<compile_context>
chip_gen: v5e
topology: v5e:2x2
jax: 0.10.0
libtpu: 0.0.40
codegen_flags: <defaults>
</compile_context>

<pallas_src>
import numpy as np
import jax
import jax.numpy as jnp
from jax import lax
from jax.experimental import pallas as pl
from jax.experimental.pallas import tpu as pltpu

LANE = 128
SUBLANE = 8


def _round_up(n, m):
    return ((n + m - 1) // m) * m


# ---------------------------------------------------------------------------
# One-time parameter packing (host / init time, NOT per forward call)
# ---------------------------------------------------------------------------
def pack_decoder_params(raw):
    """Pack PyTorch-layout LSTM/Linear params into lane-aligned TPU layout.

    Gate column order becomes (i, f, o, g); each gate block occupies `p`
    lanes (zero padded).  Padded-lane invariant: padded W columns and padded
    bias lanes are exactly 0 and h0/c0 are 0, so padded h/c lanes stay 0 and
    the final Linear's padded rows are 0 -> exact match to the reference.
    """
    lstm_raw = raw["lstm"]
    w_out, b_out = raw["w_out"], raw["b_out"]

    hidden_sizes = [whh.shape[1] for (_, whh, _, _) in lstm_raw]
    p = _round_up(max(hidden_sizes), LANE)          # uniform padded hidden width
    order = (0, 1, 3, 2)                            # i,f,g,o -> i,f,o,g

    def pack_w_block(w, rows_out):
        # w: (4H, Din)  ->  (rows_out, 4p), transposed + gate-reordered + padded
        h = w.shape[0] // 4
        rows_in = w.shape[1]
        out = jnp.zeros((rows_out, 4 * p), jnp.float32)
        for k, g in enumerate(order):
            out = out.at[:rows_in, k * p:k * p + h].set(
                w[g * h:(g + 1) * h, :].T.astype(jnp.float32))
        return out

    def pack_b(bih, bhh, h):
        b = (bih + bhh).astype(jnp.float32)
        bp = jnp.zeros((1, 4 * p), jnp.float32)
        for k, g in enumerate(order):
            bp = bp.at[0, k * p:k * p + h].set(b[g * h:(g + 1) * h])
        return bp

    # Layer 0: keep W_ih separate (whole-sequence hoisted projection) and
    # W_hh separate (recurrence).
    wih0, whh0, bih0, bhh0 = lstm_raw[0]
    h0 = whh0.shape[1]
    packed = {
        "wih0": pack_w_block(wih0, wih0.shape[1]),   # (Din, 4P), input unpadded
        "whh0": pack_w_block(whh0, p),               # (P, 4P)
        "b0": pack_b(bih0, bhh0, h0),                # (1, 4P)
    }

    # Layers > 0: fuse [W_ih ; W_hh] vertically -> one matmul per wavefront step.
    upper = []
    for l in range(1, len(lstm_raw)):
        wih, whh, bih, bhh = lstm_raw[l]
        h = whh.shape[1]
        wih_p = pack_w_block(wih, p)                 # input = previous layer's h
        whh_p = pack_w_block(whh, p)
        wcat = jnp.concatenate([wih_p, whh_p], axis=0)   # (2P, 4P)
        upper.append((wcat, pack_b(bih, bhh, h)))
    packed["upper"] = upper

    o, h_last = w_out.shape
    opad = _round_up(o, LANE)
    packed["w_out"] = jnp.zeros((p, opad), jnp.float32).at[:h_last, :o].set(w_out.T)
    packed["b_out"] = jnp.zeros((1, opad), jnp.float32).at[0, :o].set(b_out)
    packed["out_features"] = int(o)
    packed["hidden_pad"] = int(p)
    packed["num_lstm"] = len(lstm_raw)
    return packed


# ---------------------------------------------------------------------------
# Fused kernel: all LSTM layers (wavefronted) + final Linear.
#   x_ref        : (T*Bp, Din)   time-major, batch padded to 8 sublanes
#   layer 0      : wih0 (Din, 4P), whh0 (P, 4P), b0 (1, 4P)
#   layer l>0    : wcat_l (2P, 4P) = [W_ih ; W_hh], b_l (1, 4P)
#   w_out, b_out : (P, Opad), (1, Opad)
#   out_ref      : (T*Bp, Opad)  lane-dense output
#   scratch      : gx0 (T*Bp, 4P), act (T*Bp, P)  [last LSTM layer's h]
# ---------------------------------------------------------------------------
def _make_fused_kernel(T, Bp, P, num_lstm):
    def kernel(*refs):
        idx = 0
        x_ref = refs[idx]; idx += 1
        wih0_ref, whh0_ref, b0_ref = refs[idx], refs[idx + 1], refs[idx + 2]
        idx += 3
        upper_refs = []
        for _ in range(num_lstm - 1):
            upper_refs.append((refs[idx], refs[idx + 1]))
            idx += 2
        w_out_ref, b_out_ref = refs[idx], refs[idx + 1]
        idx += 2
        out_ref = refs[idx]; idx += 1
        gx0_scr, act_scr = refs[idx], refs[idx + 1]

        # Layer-0 input projection + bias for the whole sequence, hoisted out
        # of the recurrence (one MXU call with M = T*Bp rows).
        gx0_scr[...] = (jnp.dot(x_ref[...], wih0_ref[...],
                                preferred_element_type=jnp.float32)
                        + b0_ref[...])

        L = num_lstm
        # Register-resident state (h/c never round-trip through VMEM).
        h = [jnp.zeros((Bp, P), jnp.float32) for _ in range(L)]
        c = [jnp.zeros((Bp, P), jnp.float32) for _ in range(L)]

        def cell(gates, c_prev):
            # gate blocks are lane aligned: [i | f | o | g], each P lanes
            sig = jax.nn.sigmoid(gates[:, :3 * P])
            i_g = sig[:, 0:P]
            f_g = sig[:, P:2 * P]
            o_g = sig[:, 2 * P:3 * P]
            g_g = jnp.tanh(gates[:, 3 * P:])
            c_new = f_g * c_prev + i_g * g_g
            h_new = o_g * jnp.tanh(c_new)
            return h_new, c_new

        # Wavefront: at step s, layer l handles timestep t = s - l.  The L
        # active layers form independent dependency chains -> they overlap.
        # Processing l in DECREASING order lets layer l read h[l-1] before
        # layer l-1 overwrites it this step (h[l-1] holds h_{l-1}[t] exactly).
        # T is a small static constant -> fully unrolled, all slices static.
        for s in range(T + L - 1):
            for l in reversed(range(L)):
                t = s - l
                if not (0 <= t < T):
                    continue
                if l == 0:
                    r0 = t * Bp
                    gates = (gx0_scr[r0:r0 + Bp, :]
                             + jnp.dot(h[0], whh0_ref[...],
                                       preferred_element_type=jnp.float32))
                else:
                    wcat_ref, b_ref = upper_refs[l - 1]
                    zcat = jnp.concatenate([h[l - 1], h[l]], axis=1)  # (Bp, 2P)
                    gates = (jnp.dot(zcat, wcat_ref[...],
                                     preferred_element_type=jnp.float32)
                             + b_ref[...])
                h[l], c[l] = cell(gates, c[l])
                if l == L - 1:
                    # off the critical path; whole-tile (8,128) unmasked store
                    act_scr[t * Bp:(t + 1) * Bp, :] = h[l]

        # Final Linear over the whole sequence, still in VMEM; lane-dense store.
        out_ref[...] = (jnp.dot(act_scr[...], w_out_ref[...],
                                preferred_element_type=jnp.float32)
                        + b_out_ref[...]).astype(out_ref.dtype)

    return kernel


def make_decoder_forward(packed):
    P = packed["hidden_pad"]
    O = packed["out_features"]
    Opad = int(packed["w_out"].shape[1])
    num_lstm = packed["num_lstm"]

    def forward(x):
        B, T, Din = x.shape
        Bp = _round_up(B, SUBLANE)          # sublane-pad batch -> tile-aligned slices
        TB = T * Bp

        # time-major, batch padded, flattened: row index = t*Bp + b
        x_tm = (jnp.zeros((T, Bp, Din), jnp.float32)
                .at[:, :B, :].set(jnp.transpose(x, (1, 0, 2)).astype(jnp.float32))
                .reshape(TB, Din))

        args = [x_tm, packed["wih0"], packed["whh0"], packed["b0"]]
        in_specs = [pl.BlockSpec((TB, Din), lambda i: (0, 0)),
                    pl.BlockSpec(packed["wih0"].shape, lambda i: (0, 0)),
                    pl.BlockSpec(packed["whh0"].shape, lambda i: (0, 0)),
                    pl.BlockSpec(packed["b0"].shape, lambda i: (0, 0))]
        for (wcat, b) in packed["upper"]:
            args += [wcat, b]
            in_specs += [pl.BlockSpec(wcat.shape, lambda i: (0, 0)),
                         pl.BlockSpec(b.shape, lambda i: (0, 0))]
        args += [packed["w_out"], packed["b_out"]]
        in_specs += [pl.BlockSpec(packed["w_out"].shape, lambda i: (0, 0)),
                     pl.BlockSpec(packed["b_out"].shape, lambda i: (0, 0))]

        out_flat = pl.pallas_call(
            _make_fused_kernel(T, Bp, P, num_lstm),
            out_shape=jax.ShapeDtypeStruct((TB, Opad), jnp.float32),
            grid_spec=pltpu.PrefetchScalarGridSpec(
                num_scalar_prefetch=0,
                grid=(1,),
                in_specs=in_specs,
                out_specs=pl.BlockSpec((TB, Opad), lambda i: (0, 0)),
                scratch_shapes=[
                    pltpu.VMEM((TB, 4 * P), jnp.float32),   # layer-0 gates_x
                    pltpu.VMEM((TB, P), jnp.float32),       # last-layer activations
                ],
            ),
            compiler_params=pltpu.CompilerParams(
                dimension_semantics=("arbitrary",)),
        )(*args)

        out = jnp.transpose(out_flat.reshape(T, Bp, Opad), (1, 0, 2))
        return out[:B, :, :O]

    return jax.jit(forward)


# ---------------------------------------------------------------------------
# Parameter init (deterministic, PyTorch-style U(-1/sqrt(H), 1/sqrt(H)))
# ---------------------------------------------------------------------------
def init_lstm_decoder_params(key, output_size, last_layer_size,
                             encoding_size, num_layers):
    layer_sizes = np.linspace(encoding_size, last_layer_size,
                              num_layers, dtype=int)
    lstm_params = []
    for i in range(num_layers - 1):
        din = int(layer_sizes[i])
        h = int(layer_sizes[i + 1])
        key, k1, k2, k3, k4 = jax.random.split(key, 5)
        bound = 1.0 / np.sqrt(h)
        wih = jax.random.uniform(k1, (4 * h, din), jnp.float32, -bound, bound)
        whh = jax.random.uniform(k2, (4 * h, h), jnp.float32, -bound, bound)
        bih = jax.random.uniform(k3, (4 * h,), jnp.float32, -bound, bound)
        bhh = jax.random.uniform(k4, (4 * h,), jnp.float32, -bound, bound)
        lstm_params.append((wih, whh, bih, bhh))

    key, kw, kb = jax.random.split(key, 3)
    bound = 1.0 / np.sqrt(last_layer_size)
    w_out = jax.random.uniform(kw, (output_size, last_layer_size),
                               jnp.float32, -bound, bound)
    b_out = jax.random.uniform(kb, (output_size,), jnp.float32, -bound, bound)
    return {"lstm": lstm_params, "w_out": w_out, "b_out": b_out}


# ---------------------------------------------------------------------------
# Pure-JAX reference (PyTorch semantics) for correctness check.
# ---------------------------------------------------------------------------
def _ref_lstm_layer(x, wih, whh, bih, bhh):
    B, T, _ = x.shape
    H = whh.shape[1]
    b = bih + bhh

    def step(carry, x_t):
        h, c = carry
        gates = x_t @ wih.T + h @ whh.T + b
        i = jax.nn.sigmoid(gates[:, 0 * H:1 * H])
        f = jax.nn.sigmoid(gates[:, 1 * H:2 * H])
        g = jnp.tanh(gates[:, 2 * H:3 * H])
        o = jax.nn.sigmoid(gates[:, 3 * H:4 * H])
        c_new = f * c + i * g
        h_new = o * jnp.tanh(c_new)
        return (h_new, c_new), h_new

    init = (jnp.zeros((B, H), jnp.float32), jnp.zeros((B, H), jnp.float32))
    _, hs = lax.scan(step, init, jnp.transpose(x, (1, 0, 2)))
    return jnp.transpose(hs, (1, 0, 2))


def _ref_forward(params, x):
    for (wih, whh, bih, bhh) in params["lstm"]:
        x = _ref_lstm_layer(x, wih, whh, bih, bhh)
    return x @ params["w_out"].T + params["b_out"]


if __name__ == "__main__":
    # LSTMDecoder config: layer_sizes = linspace(32, 64, 3) = [32, 48, 64]
    #   -> LSTM(32->48), LSTM(48->64), Linear(64->16)
    output_size = 16
    last_layer_size = 64
    encoding_size = 32
    num_layers = 3
    batch, seq = 2, 8

    key = jax.random.PRNGKey(0)
    key, kx, kp = jax.random.split(key, 3)
    x = jax.random.normal(kx, (batch, seq, encoding_size), jnp.float32)
    raw = init_lstm_decoder_params(kp, output_size, last_layer_size,
                                   encoding_size, num_layers)

    packed = pack_decoder_params(raw)        # one-time weight packing
    forward = make_decoder_forward(packed)   # fused single-kernel forward

    out = jax.block_until_ready(forward(x))
    ref = jax.block_until_ready(_ref_forward(raw, x))

    assert out.shape == (batch, seq, output_size)
    np.testing.assert_allclose(np.asarray(out), np.asarray(ref),
                               rtol=1e-5, atol=1e-5)
    print("KERNEL_OK")
</pallas_src>

<mosaic_0001>
module attributes {stable_mosaic.version = 11 : i64} {
  func.func @kernel(%arg0: i32, %arg1: memref<64x32xf32, #tpu.memory_space<vmem>>, %arg2: memref<32x512xf32, #tpu.memory_space<vmem>>, %arg3: memref<128x512xf32, #tpu.memory_space<vmem>>, %arg4: memref<1x512xf32, #tpu.memory_space<vmem>>, %arg5: memref<256x512xf32, #tpu.memory_space<vmem>>, %arg6: memref<1x512xf32, #tpu.memory_space<vmem>>, %arg7: memref<128x128xf32, #tpu.memory_space<vmem>>, %arg8: memref<1x128xf32, #tpu.memory_space<vmem>>, %arg9: memref<64x128xf32, #tpu.memory_space<vmem>>, %arg10: memref<64x512xf32, #tpu.memory_space<vmem>>, %arg11: memref<64x128xf32, #tpu.memory_space<vmem>>) attributes {dimension_semantics = [#tpu.dimension_semantics<arbitrary>], iteration_bounds = array<i64: 1>, scalar_prefetch = 0 : i64, scratch_operands = 2 : i64, tpu.core_type = #tpu.core_type<tc>, window_params = [{pipeline_mode = #tpu.pipeline_mode<synchronous>, transform_indices = @transform_0, window_bounds = array<i64: 64, 32>}, {pipeline_mode = #tpu.pipeline_mode<synchronous>, transform_indices = @transform_1, window_bounds = array<i64: 32, 512>}, {pipeline_mode = #tpu.pipeline_mode<synchronous>, transform_indices = @transform_2, window_bounds = array<i64: 128, 512>}, {pipeline_mode = #tpu.pipeline_mode<synchronous>, transform_indices = @transform_3, window_bounds = array<i64: 1, 512>}, {pipeline_mode = #tpu.pipeline_mode<synchronous>, transform_indices = @transform_4, window_bounds = array<i64: 256, 512>}, {pipeline_mode = #tpu.pipeline_mode<synchronous>, transform_indices = @transform_5, window_bounds = array<i64: 1, 512>}, {pipeline_mode = #tpu.pipeline_mode<synchronous>, transform_indices = @transform_6, window_bounds = array<i64: 128, 128>}, {pipeline_mode = #tpu.pipeline_mode<synchronous>, transform_indices = @transform_7, window_bounds = array<i64: 1, 128>}, {pipeline_mode = #tpu.pipeline_mode<synchronous>, transform_indices = @transform_8, window_bounds = array<i64: 64, 128>}]} {
    %c0 = arith.constant 0 : index
    %c0_0 = arith.constant 0 : index
    %0 = vector.load %arg1[%c0, %c0_0] : memref<64x32xf32, #tpu.memory_space<vmem>>, vector<64x32xf32>
    %c0_1 = arith.constant 0 : index
    %c0_2 = arith.constant 0 : index
    %1 = vector.load %arg2[%c0_1, %c0_2] : memref<32x512xf32, #tpu.memory_space<vmem>>, vector<32x512xf32>
    %cst = arith.constant dense<0.000000e+00> : vector<64x512xf32>
    %2 = tpu.matmul %0, %1, %cst {dimension_numbers = #tpu.dot_dimension_numbers<[1], [0], [0], [1], [0, 0, 1, 1], [], []>} : vector<64x32xf32>, vector<32x512xf32>, vector<64x512xf32> -> vector<64x512xf32>
    %c0_3 = arith.constant 0 : index
    %c0_4 = arith.constant 0 : index
    %3 = vector.load %arg4[%c0_3, %c0_4] : memref<1x512xf32, #tpu.memory_space<vmem>>, vector<1x512xf32>
    %4 = vector.broadcast %3 : vector<1x512xf32> to vector<64x512xf32>
    %5 = arith.addf %2, %4 : vector<64x512xf32>
    %c0_5 = arith.constant 0 : index
    %c0_6 = arith.constant 0 : index
    %6 = vector.load %arg10[%c0_5, %c0_6] : memref<64x512xf32, #tpu.memory_space<vmem>>, vector<64x512xf32>
    tpu.vector_store %arg10[%c0_5, %c0_6], %5 {strides = array<i32>} : memref<64x512xf32, #tpu.memory_space<vmem>>, vector<64x512xf32>,
    %cst_7 = arith.constant 0.000000e+00 : f32
    %7 = vector.broadcast %cst_7 : f32 to vector<8x128xf32>
    %cst_8 = arith.constant 0.000000e+00 : f32
    %8 = vector.broadcast %cst_8 : f32 to vector<8x128xf32>
    %cst_9 = arith.constant 0.000000e+00 : f32
    %9 = vector.broadcast %cst_9 : f32 to vector<8x128xf32>
    %cst_10 = arith.constant 0.000000e+00 : f32
    %10 = vector.broadcast %cst_10 : f32 to vector<8x128xf32>
    %c0_11 = arith.constant 0 : index
    %c0_12 = arith.constant 0 : index
    %11 = vector.load %arg10[%c0_11, %c0_12] : memref<64x512xf32, #tpu.memory_space<vmem>>, vector<8x512xf32>
    %c0_13 = arith.constant 0 : index
    %c0_14 = arith.constant 0 : index
    %12 = vector.load %arg3[%c0_13, %c0_14] : memref<128x512xf32, #tpu.memory_space<vmem>>, vector<128x512xf32>
    %cst_15 = arith.constant dense<0.000000e+00> : vector<8x512xf32>
    %13 = tpu.matmul %7, %12, %cst_15 {dimension_numbers = #tpu.dot_dimension_numbers<[1], [0], [0], [1], [0, 0, 1, 1], [], []>} : vector<8x128xf32>, vector<128x512xf32>, vector<8x512xf32> -> vector<8x512xf32>
    %14 = arith.addf %11, %13 : vector<8x512xf32>
    %15 = vector.extract_strided_slice %14 {offsets = [0, 0], sizes = [8, 384], strides = [1, 1]} : vector<8x512xf32> to vector<8x384xf32>
    %16 = arith.negf %15 : vector<8x384xf32>
    %17 = math.exp %16 : vector<8x384xf32>
    %cst_16 = arith.constant 1.000000e+00 : f32
    %18 = vector.broadcast %cst_16 : f32 to vector<8x384xf32>
    %19 = arith.addf %18, %17 : vector<8x384xf32>
    %20 = arith.divf %18, %19 : vector<8x384xf32>
    %21 = vector.extract_strided_slice %20 {offsets = [0, 0], sizes = [8, 128], strides = [1, 1]} : vector<8x384xf32> to vector<8x128xf32>
    %22 = vector.extract_strided_slice %20 {offsets = [0, 128], sizes = [8, 128], strides = [1, 1]} : vector<8x384xf32> to vector<8x128xf32>
    %23 = vector.extract_strided_slice %20 {offsets = [0, 256], sizes = [8, 128], strides = [1, 1]} : vector<8x384xf32> to vector<8x128xf32>
    %24 = vector.extract_strided_slice %14 {offsets = [0, 384], sizes = [8, 128], strides = [1, 1]} : vector<8x512xf32> to vector<8x128xf32>
    %25 = math.tanh %24 : vector<8x128xf32>
    %26 = arith.mulf %22, %9 : vector<8x128xf32>
    %27 = arith.mulf %21, %25 : vector<8x128xf32>
    %28 = arith.addf %26, %27 : vector<8x128xf32>
    %29 = math.tanh %28 : vector<8x128xf32>
    %30 = arith.mulf %23, %29 : vector<8x128xf32>
    %31 = tpu.concatenate %30, %8 in 1 : vector<8x128xf32>, vector<8x128xf32> -> vector<8x256xf32>
    %c0_17 = arith.constant 0 : index
    %c0_18 = arith.constant 0 : index
    %32 = vector.load %arg5[%c0_17, %c0_18] : memref<256x512xf32, #tpu.memory_space<vmem>>, vector<256x512xf32>
    %cst_19 = arith.constant dense<0.000000e+00> : vector<8x512xf32>
    %33 = tpu.matmul %31, %32, %cst_19 {dimension_numbers = #tpu.dot_dimension_numbers<[1], [0], [0], [1], [0, 0, 1, 1], [], []>} : vector<8x256xf32>, vector<256x512xf32>, vector<8x512xf32> -> vector<8x512xf32>
    %c0_20 = arith.constant 0 : index
    %c0_21 = arith.constant 0 : index
    %34 = vector.load %arg6[%c0_20, %c0_21] : memref<1x512xf32, #tpu.memory_space<vmem>>, vector<1x512xf32>
    %35 = vector.broadcast %34 : vector<1x512xf32> to vector<8x512xf32>
    %36 = arith.addf %33, %35 : vector<8x512xf32>
    %37 = vector.extract_strided_slice %36 {offsets = [0, 0], sizes = [8, 384], strides = [1, 1]} : vector<8x512xf32> to vector<8x384xf32>
    %38 = arith.negf %37 : vector<8x384xf32>
    %39 = math.exp %38 : vector<8x384xf32>
    %cst_22 = arith.constant 1.000000e+00 : f32
    %40 = vector.broadcast %cst_22 : f32 to vector<8x384xf32>
    %41 = arith.addf %40, %39 : vector<8x384xf32>
    %42 = arith.divf %40, %41 : vector<8x384xf32>
    %43 = vector.extract_strided_slice %42 {offsets = [0, 0], sizes = [8, 128], strides = [1, 1]} : vector<8x384xf32> to vector<8x128xf32>
    %44 = vector.extract_strided_slice %42 {offsets = [0, 128], sizes = [8, 128], strides = [1, 1]} : vector<8x384xf32> to vector<8x128xf32>
    %45 = vector.extract_strided_slice %42 {offsets = [0, 256], sizes = [8, 128], strides = [1, 1]} : vector<8x384xf32> to vector<8x128xf32>
    %46 = vector.extract_strided_slice %36 {offsets = [0, 384], sizes = [8, 128], strides = [1, 1]} : vector<8x512xf32> to vector<8x128xf32>
    %47 = math.tanh %46 : vector<8x128xf32>
    %48 = arith.mulf %44, %10 : vector<8x128xf32>
    %49 = arith.mulf %43, %47 : vector<8x128xf32>
    %50 = arith.addf %48, %49 : vector<8x128xf32>
    %51 = math.tanh %50 : vector<8x128xf32>
    %52 = arith.mulf %45, %51 : vector<8x128xf32>
    %c0_23 = arith.constant 0 : index
    %c0_24 = arith.constant 0 : index
    %53 = vector.load %arg11[%c0_23, %c0_24] : memref<64x128xf32, #tpu.memory_space<vmem>>, vector<8x128xf32>
    tpu.vector_store %arg11[%c0_23, %c0_24], %52 {strides = array<i32>} : memref<64x128xf32, #tpu.memory_space<vmem>>, vector<8x128xf32>,
    %c8 = arith.constant 8 : index
    %c0_25 = arith.constant 0 : index
    %54 = vector.load %arg10[%c8, %c0_25] : memref<64x512xf32, #tpu.memory_space<vmem>>, vector<8x512xf32>
    %c0_26 = arith.constant 0 : index
    %c0_27 = arith.constant 0 : index
    %55 = vector.load %arg3[%c0_26, %c0_27] : memref<128x512xf32, #tpu.memory_space<vmem>>, vector<128x512xf32>
    %cst_28 = arith.constant dense<0.000000e+00> : vector<8x512xf32>
    %56 = tpu.matmul %30, %55, %cst_28 {dimension_numbers = #tpu.dot_dimension_numbers<[1], [0], [0], [1], [0, 0, 1, 1], [], []>} : vector<8x128xf32>, vector<128x512xf32>, vector<8x512xf32> -> vector<8x512xf32>
    %57 = arith.addf %54, %56 : vector<8x512xf32>
    %58 = vector.extract_strided_slice %57 {offsets = [0, 0], sizes = [8, 384], strides = [1, 1]} : vector<8x512xf32> to vector<8x384xf32>
    %59 = arith.negf %58 : vector<8x384xf32>
    %60 = math.exp %59 : vector<8x384xf32>
    %cst_29 = arith.constant 1.000000e+00 : f32
    %61 = vector.broadcast %cst_29 : f32 to vector<8x384xf32>
    %62 = arith.addf %61, %60 : vector<8x384xf32>
    %63 = arith.divf %61, %62 : vector<8x384xf32>
    %64 = vector.extract_strided_slice %63 {offsets = [0, 0], sizes = [8, 128], strides = [1, 1]} : vector<8x384xf32> to vector<8x128xf32>
    %65 = vector.extract_strided_slice %63 {offsets = [0, 128], sizes = [8, 128], strides = [1, 1]} : vector<8x384xf32> to vector<8x128xf32>
    %66 = vector.extract_strided_slice %63 {offsets = [0, 256], sizes = [8, 128], strides = [1, 1]} : vector<8x384xf32> to vector<8x128xf32>
    %67 = vector.extract_strided_slice %57 {offsets = [0, 384], sizes = [8, 128], strides = [1, 1]} : vector<8x512xf32> to vector<8x128xf32>
    %68 = math.tanh %67 : vector<8x128xf32>
    %69 = arith.mulf %65, %28 : vector<8x128xf32>
    %70 = arith.mulf %64, %68 : vector<8x128xf32>
    %71 = arith.addf %69, %70 : vector<8x128xf32>
    %72 = math.tanh %71 : vector<8x128xf32>
    %73 = arith.mulf %66, %72 : vector<8x128xf32>
    %74 = tpu.concatenate %73, %52 in 1 : vector<8x128xf32>, vector<8x128xf32> -> vector<8x256xf32>
    %c0_30 = arith.constant 0 : index
    %c0_31 = arith.constant 0 : index
    %75 = vector.load %arg5[%c0_30, %c0_31] : memref<256x512xf32, #tpu.memory_space<vmem>>, vector<256x512xf32>
    %cst_32 = arith.constant dense<0.000000e+00> : vector<8x512xf32>
    %76 = tpu.matmul %74, %75, %cst_32 {dimension_numbers = #tpu.dot_dimension_numbers<[1], [0], [0], [1], [0, 0, 1, 1], [], []>} : vector<8x256xf32>, vector<256x512xf32>, vector<8x512xf32> -> vector<8x512xf32>
    %c0_33 = arith.constant 0 : index
    %c0_34 = arith.constant 0 : index
    %77 = vector.load %arg6[%c0_33, %c0_34] : memref<1x512xf32, #tpu.memory_space<vmem>>, vector<1x512xf32>
    %78 = vector.broadcast %77 : vector<1x512xf32> to vector<8x512xf32>
    %79 = arith.addf %76, %78 : vector<8x512xf32>
    %80 = vector.extract_strided_slice %79 {offsets = [0, 0], sizes = [8, 384], strides = [1, 1]} : vector<8x512xf32> to vector<8x384xf32>
    %81 = arith.negf %80 : vector<8x384xf32>
    %82 = math.exp %81 : vector<8x384xf32>
    %cst_35 = arith.constant 1.000000e+00 : f32
    %83 = vector.broadcast %cst_35 : f32 to vector<8x384xf32>
    %84 = arith.addf %83, %82 : vector<8x384xf32>
    %85 = arith.divf %83, %84 : vector<8x384xf32>
    %86 = vector.extract_strided_slice %85 {offsets = [0, 0], sizes = [8, 128], strides = [1, 1]} : vector<8x384xf32> to vector<8x128xf32>
    %87 = vector.extract_strided_slice %85 {offsets = [0, 128], sizes = [8, 128], strides = [1, 1]} : vector<8x384xf32> to vector<8x128xf32>
    %88 = vector.extract_strided_slice %85 {offsets = [0, 256], sizes = [8, 128], strides = [1, 1]} : vector<8x384xf32> to vector<8x128xf32>
    %89 = vector.extract_strided_slice %79 {offsets = [0, 384], sizes = [8, 128], strides = [1, 1]} : vector<8x512xf32> to vector<8x128xf32>
    %90 = math.tanh %89 : vector<8x128xf32>
    %91 = arith.mulf %87, %50 : vector<8x128xf32>
    %92 = arith.mulf %86, %90 : vector<8x128xf32>
    %93 = arith.addf %91, %92 : vector<8x128xf32>
    %94 = math.tanh %93 : vector<8x128xf32>
    %95 = arith.mulf %88, %94 : vector<8x128xf32>
    %c8_36 = arith.constant 8 : index
    %c0_37 = arith.constant 0 : index
    %96 = vector.load %arg11[%c8_36, %c0_37] : memref<64x128xf32, #tpu.memory_space<vmem>>, vector<8x128xf32>
    tpu.vector_store %arg11[%c8_36, %c0_37], %95 {strides = array<i32>} : memref<64x128xf32, #tpu.memory_space<vmem>>, vector<8x128xf32>,
    %c16 = arith.constant 16 : index
    %c0_38 = arith.constant 0 : index
    %97 = vector.load %arg10[%c16, %c0_38] : memref<64x512xf32, #tpu.memory_space<vmem>>, vector<8x512xf32>
    %c0_39 = arith.constant 0 : index
    %c0_40 = arith.constant 0 : index
    %98 = vector.load %arg3[%c0_39, %c0_40] : memref<128x512xf32, #tpu.memory_space<vmem>>, vector<128x512xf32>
    %cst_41 = arith.constant dense<0.000000e+00> : vector<8x512xf32>
    %99 = tpu.matmul %73, %98, %cst_41 {dimension_numbers = #tpu.dot_dimension_numbers<[1], [0], [0], [1], [0, 0, 1, 1], [], []>} : vector<8x128xf32>, vector<128x512xf32>, vector<8x512xf32> -> vector<8x512xf32>
    %100 = arith.addf %97, %99 : vector<8x512xf32>
    %101 = vector.extract_strided_slice %100 {offsets = [0, 0], sizes = [8, 384], strides = [1, 1]} : vector<8x512xf32> to vector<8x384xf32>
    %102 = arith.negf %101 : vector<8x384xf32>
    %103 = math.exp %102 : vector<8x384xf32>
    %cst_42 = arith.constant 1.000000e+00 : f32
    %104 = vector.broadcast %cst_42 : f32 to vector<8x384xf32>
    %105 = arith.addf %104, %103 : vector<8x384xf32>
    %106 = arith.divf %104, %105 : vector<8x384xf32>
    %107 = vector.extract_strided_slice %106 {offsets = [0, 0], sizes = [8, 128], strides = [1, 1]} : vector<8x384xf32> to vector<8x128xf32>
    %108 = vector.extract_strided_slice %106 {offsets = [0, 128], sizes = [8, 128], strides = [1, 1]} : vector<8x384xf32> to vector<8x128xf32>
    %109 = vector.extract_strided_slice %106 {offsets = [0, 256], sizes = [8, 128], strides = [1, 1]} : vector<8x384xf32> to vector<8x128xf32>
    %110 = vector.extract_strided_slice %100 {offsets = [0, 384], sizes = [8, 128], strides = [1, 1]} : vector<8x512xf32> to vector<8x128xf32>
    %111 = math.tanh %110 : vector<8x128xf32>
    %112 = arith.mulf %108, %71 : vector<8x128xf32>
    %113 = arith.mulf %107, %111 : vector<8x128xf32>
    %114 = arith.addf %112, %113 : vector<8x128xf32>
    %115 = math.tanh %114 : vector<8x128xf32>
    %116 = arith.mulf %109, %115 : vector<8x128xf32>
    %117 = tpu.concatenate %116, %95 in 1 : vector<8x128xf32>, vector<8x128xf32> -> vector<8x256xf32>
    %c0_43 = arith.constant 0 : index
    %c0_44 = arith.constant 0 : index
    %118 = vector.load %arg5[%c0_43, %c0_44] : memref<256x512xf32, #tpu.memory_space<vmem>>, vector<256x512xf32>
    %cst_45 = arith.constant dense<0.000000e+00> : vector<8x512xf32>
    %119 = tpu.matmul %117, %118, %cst_45 {dimension_numbers = #tpu.dot_dimension_numbers<[1], [0], [0], [1], [0, 0, 1, 1], [], []>} : vector<8x256xf32>, vector<256x512xf32>, vector<8x512xf32> -> vector<8x512xf32>
    %c0_46 = arith.constant 0 : index
    %c0_47 = arith.constant 0 : index
    %120 = vector.load %arg6[%c0_46, %c0_47] : memref<1x512xf32, #tpu.memory_space<vmem>>, vector<1x512xf32>
    %121 = vector.broadcast %120 : vector<1x512xf32> to vector<8x512xf32>
    %122 = arith.addf %119, %121 : vector<8x512xf32>
    %123 = vector.extract_strided_slice %122 {offsets = [0, 0], sizes = [8, 384], strides = [1, 1]} : vector<8x512xf32> to vector<8x384xf32>
    %124 = arith.negf %123 : vector<8x384xf32>
    %125 = math.exp %124 : vector<8x384xf32>
    %cst_48 = arith.constant 1.000000e+00 : f32
    %126 = vector.broadcast %cst_48 : f32 to vector<8x384xf32>
    %127 = arith.addf %126, %125 : vector<8x384xf32>
    %128 = arith.divf %126, %127 : vector<8x384xf32>
    %129 = vector.extract_strided_slice %128 {offsets = [0, 0], sizes = [8, 128], strides = [1, 1]} : vector<8x384xf32> to vector<8x128xf32>
    %130 = vector.extract_strided_slice %128 {offsets = [0, 128], sizes = [8, 128], strides = [1, 1]} : vector<8x384xf32> to vector<8x128xf32>
    %131 = vector.extract_strided_slice %128 {offsets = [0, 256], sizes = [8, 128], strides = [1, 1]} : vector<8x384xf32> to vector<8x128xf32>
    %132 = vector.extract_strided_slice %122 {offsets = [0, 384], sizes = [8, 128], strides = [1, 1]} : vector<8x512xf32> to vector<8x128xf32>
    %133 = math.tanh %132 : vector<8x128xf32>
    %134 = arith.mulf %130, %93 : vector<8x128xf32>
    %135 = arith.mulf %129, %133 : vector<8x128xf32>
    %136 = arith.addf %134, %135 : vector<8x128xf32>
    %137 = math.tanh %136 : vector<8x128xf32>
    %138 = arith.mulf %131, %137 : vector<8x128xf32>
    %c16_49 = arith.constant 16 : index
    %c0_50 = arith.constant 0 : index
    %139 = vector.load %arg11[%c16_49, %c0_50] : memref<64x128xf32, #tpu.memory_space<vmem>>, vector<8x128xf32>
    tpu.vector_store %arg11[%c16_49, %c0_50], %138 {strides = array<i32>} : memref<64x128xf32, #tpu.memory_space<vmem>>, vector<8x128xf32>,
    %c24 = arith.constant 24 : index
    %c0_51 = arith.constant 0 : index
    %140 = vector.load %arg10[%c24, %c0_51] : memref<64x512xf32, #tpu.memory_space<vmem>>, vector<8x512xf32>
    %c0_52 = arith.constant 0 : index
    %c0_53 = arith.constant 0 : index
    %141 = vector.load %arg3[%c0_52, %c0_53] : memref<128x512xf32, #tpu.memory_space<vmem>>, vector<128x512xf32>
    %cst_54 = arith.constant dense<0.000000e+00> : vector<8x512xf32>
    %142 = tpu.matmul %116, %141, %cst_54 {dimension_numbers = #tpu.dot_dimension_numbers<[1], [0], [0], [1], [0, 0, 1, 1], [], []>} : vector<8x128xf32>, vector<128x512xf32>, vector<8x512xf32> -> vector<8x512xf32>
    %143 = arith.addf %140, %142 : vector<8x512xf32>
    %144 = vector.extract_strided_slice %143 {offsets = [0, 0], sizes = [8, 384], strides = [1, 1]} : vector<8x512xf32> to vector<8x384xf32>
    %145 = arith.negf %144 : vector<8x384xf32>
    %146 = math.exp %145 : vector<8x384xf32>
    %cst_55 = arith.constant 1.000000e+00 : f32
    %147 = vector.broadcast %cst_55 : f32 to vector<8x384xf32>
    %148 = arith.addf %147, %146 : vector<8x384xf32>
    %149 = arith.divf %147, %148 : vector<8x384xf32>
    %150 = vector.extract_strided_slice %149 {offsets = [0, 0], sizes = [8, 128], strides = [1, 1]} : vector<8x384xf32> to vector<8x128xf32>
    %151 = vector.extract_strided_slice %149 {offsets = [0, 128], sizes = [8, 128], strides = [1, 1]} : vector<8x384xf32> to vector<8x128xf32>
    %152 = vector.extract_strided_slice %149 {offsets = [0, 256], sizes = [8, 128], strides = [1, 1]} : vector<8x384xf32> to vector<8x128xf32>
    %153 = vector.extract_strided_slice %143 {offsets = [0, 384], sizes = [8, 128], strides = [1, 1]} : vector<8x512xf32> to vector<8x128xf32>
    %154 = math.tanh %153 : vector<8x128xf32>
    %155 = arith.mulf %151, %114 : vector<8x128xf32>
    %156 = arith.mulf %150, %154 : vector<8x128xf32>
    %157 = arith.addf %155, %156 : vector<8x128xf32>
    %158 = math.tanh %157 : vector<8x128xf32>
    %159 = arith.mulf %152, %158 : vector<8x128xf32>
    %160 = tpu.concatenate %159, %138 in 1 : vector<8x128xf32>, vector<8x128xf32> -> vector<8x256xf32>
    %c0_56 = arith.constant 0 : index
    %c0_57 = arith.constant 0 : index
    %161 = vector.load %arg5[%c0_56, %c0_57] : memref<256x512xf32, #tpu.memory_space<vmem>>, vector<256x512xf32>
    %cst_58 = arith.constant dense<0.000000e+00> : vector<8x512xf32>
    %162 = tpu.matmul %160, %161, %cst_58 {dimension_numbers = #tpu.dot_dimension_numbers<[1], [0], [0], [1], [0, 0, 1, 1], [], []>} : vector<8x256xf32>, vector<256x512xf32>, vector<8x512xf32> -> vector<8x512xf32>
    %c0_59 = arith.constant 0 : index
    %c0_60 = arith.constant 0 : index
    %163 = vector.load %arg6[%c0_59, %c0_60] : memref<1x512xf32, #tpu.memory_space<vmem>>, vector<1x512xf32>
    %164 = vector.broadcast %163 : vector<1x512xf32> to vector<8x512xf32>
    %165 = arith.addf %162, %164 : vector<8x512xf32>
    %166 = vector.extract_strided_slice %165 {offsets = [0, 0], sizes = [8, 384], strides = [1, 1]} : vector<8x512xf32> to vector<8x384xf32>
    %167 = arith.negf %166 : vector<8x384xf32>
    %168 = math.exp %167 : vector<8x384xf32>
    %cst_61 = arith.constant 1.000000e+00 : f32
    %169 = vector.broadcast %cst_61 : f32 to vector<8x384xf32>
    %170 = arith.addf %169, %168 : vector<8x384xf32>
    %171 = arith.divf %169, %170 : vector<8x384xf32>
    %172 = vector.extract_strided_slice %171 {offsets = [0, 0], sizes = [8, 128], strides = [1, 1]} : vector<8x384xf32> to vector<8x128xf32>
    %173 = vector.extract_strided_slice %171 {offsets = [0, 128], sizes = [8, 128], strides = [1, 1]} : vector<8x384xf32> to vector<8x128xf32>
    %174 = vector.extract_strided_slice %171 {offsets = [0, 256], sizes = [8, 128], strides = [1, 1]} : vector<8x384xf32> to vector<8x128xf32>
    %175 = vector.extract_strided_slice %165 {offsets = [0, 384], sizes = [8, 128], strides = [1, 1]} : vector<8x512xf32> to vector<8x128xf32>
    %176 = math.tanh %175 : vector<8x128xf32>
    %177 = arith.mulf %173, %136 : vector<8x128xf32>
    %178 = arith.mulf %172, %176 : vector<8x128xf32>
    %179 = arith.addf %177, %178 : vector<8x128xf32>
    %180 = math.tanh %179 : vector<8x128xf32>
    %181 = arith.mulf %174, %180 : vector<8x128xf32>
    %c24_62 = arith.constant 24 : index
    %c0_63 = arith.constant 0 : index
    %182 = vector.load %arg11[%c24_62, %c0_63] : memref<64x128xf32, #tpu.memory_space<vmem>>, vector<8x128xf32>
    tpu.vector_store %arg11[%c24_62, %c0_63], %181 {strides = array<i32>} : memref<64x128xf32, #tpu.memory_space<vmem>>, vector<8x128xf32>,
    %c32 = arith.constant 32 : index
    %c0_64 = arith.constant 0 : index
    %183 = vector.load %arg10[%c32, %c0_64] : memref<64x512xf32, #tpu.memory_space<vmem>>, vector<8x512xf32>
    %c0_65 = arith.constant 0 : index
    %c0_66 = arith.constant 0 : index
    %184 = vector.load %arg3[%c0_65, %c0_66] : memref<128x512xf32, #tpu.memory_space<vmem>>, vector<128x512xf32>
    %cst_67 = arith.constant dense<0.000000e+00> : vector<8x512xf32>
    %185 = tpu.matmul %159, %184, %cst_67 {dimension_numbers = #tpu.dot_dimension_numbers<[1], [0], [0], [1], [0, 0, 1, 1], [], []>} : vector<8x128xf32>, vector<128x512xf32>, vector<8x512xf32> -> vector<8x512xf32>
    %186 = arith.addf %183, %185 : vector<8x512xf32>
    %187 = vector.extract_strided_slice %186 {offsets = [0, 0], sizes = [8, 384], strides = [1, 1]} : vector<8x512xf32> to vector<8x384xf32>
    %188 = arith.negf %187 : vector<8x384xf32>
    %189 = math.exp %188 : vector<8x384xf32>
    %cst_68 = arith.constant 1.000000e+00 : f32
    %190 = vector.broadcast %cst_68 : f32 to vector<8x384xf32>
    %191 = arith.addf %190, %189 : vector<8x384xf32>
    %192 = arith.divf %190, %191 : vector<8x384xf32>
    %193 = vector.extract_strided_slice %192 {offsets = [0, 0], sizes = [8, 128], strides = [1, 1]} : vector<8x384xf32> to vector<8x128xf32>
    %194 = vector.extract_strided_slice %192 {offsets = [0, 128], sizes = [8, 128], strides = [1, 1]} : vector<8x384xf32> to vector<8x128xf32>
    %195 = vector.extract_strided_slice %192 {offsets = [0, 256], sizes = [8, 128], strides = [1, 1]} : vector<8x384xf32> to vector<8x128xf32>
    %196 = vector.extract_strided_slice %186 {offsets = [0, 384], sizes = [8, 128], strides = [1, 1]} : vector<8x512xf32> to vector<8x128xf32>
    %197 = math.tanh %196 : vector<8x128xf32>
    %198 = arith.mulf %194, %157 : vector<8x128xf32>
    %199 = arith.mulf %193, %197 : vector<8x128xf32>
    %200 = arith.addf %198, %199 : vector<8x128xf32>
    %201 = math.tanh %200 : vector<8x128xf32>
    %202 = arith.mulf %195, %201 : vector<8x128xf32>
    %203 = tpu.concatenate %202, %181 in 1 : vector<8x128xf32>, vector<8x128xf32> -> vector<8x256xf32>
    %c0_69 = arith.constant 0 : index
    %c0_70 = arith.constant 0 : index
    %204 = vector.load %arg5[%c0_69, %c0_70] : memref<256x512xf32, #tpu.memory_space<vmem>>, vector<256x512xf32>
    %cst_71 = arith.constant dense<0.000000e+00> : vector<8x512xf32>
    %205 = tpu.matmul %203, %204, %cst_71 {dimension_numbers = #tpu.dot_dimension_numbers<[1], [0], [0], [1], [0, 0, 1, 1], [], []>} : vector<8x256xf32>, vector<256x512xf32>, vector<8x512xf32> -> vector<8x512xf32>
    %c0_72 = arith.constant 0 : index
    %c0_73 = arith.constant 0 : index
    %206 = vector.load %arg6[%c0_72, %c0_73] : memref<1x512xf32, #tpu.memory_space<vmem>>, vector<1x512xf32>
    %207 = vector.broadcast %206 : vector<1x512xf32> to vector<8x512xf32>
    %208 = arith.addf %205, %207 : vector<8x512xf32>
    %209 = vector.extract_strided_slice %208 {offsets = [0, 0], sizes = [8, 384], strides = [1, 1]} : vector<8x512xf32> to vector<8x384xf32>
    %210 = arith.negf %209 : vector<8x384xf32>
    %211 = math.exp %210 : vector<8x384xf32>
    %cst_74 = arith.constant 1.000000e+00 : f32
    %212 = vector.broadcast %cst_74 : f32 to vector<8x384xf32>
    %213 = arith.addf %212, %211 : vector<8x384xf32>
    %214 = arith.divf %212, %213 : vector<8x384xf32>
    %215 = vector.extract_strided_slice %214 {offsets = [0, 0], sizes = [8, 128], strides = [1, 1]} : vector<8x384xf32> to vector<8x128xf32>
    %216 = vector.extract_strided_slice %214 {offsets = [0, 128], sizes = [8, 128], strides = [1, 1]} : vector<8x384xf32> to vector<8x128xf32>
    %217 = vector.extract_strided_slice %214 {offsets = [0, 256], sizes = [8, 128], strides = [1, 1]} : vector<8x384xf32> to vector<8x128xf32>
    %218 = vector.extract_strided_slice %208 {offsets = [0, 384], sizes = [8, 128], strides = [1, 1]} : vector<8x512xf32> to vector<8x128xf32>
    %219 = math.tanh %218 : vector<8x128xf32>
    %220 = arith.mulf %216, %179 : vector<8x128xf32>
    %221 = arith.mulf %215, %219 : vector<8x128xf32>
    %222 = arith.addf %220, %221 : vector<8x128xf32>
    %223 = math.tanh %222 : vector<8x128xf32>
    %224 = arith.mulf %217, %223 : vector<8x128xf32>
    %c32_75 = arith.constant 32 : index
    %c0_76 = arith.constant 0 : index
    %225 = vector.load %arg11[%c32_75, %c0_76] : memref<64x128xf32, #tpu.memory_space<vmem>>, vector<8x128xf32>
    tpu.vector_store %arg11[%c32_75, %c0_76], %224 {strides = array<i32>} : memref<64x128xf32, #tpu.memory_space<vmem>>, vector<8x128xf32>,
    %c40 = arith.constant 40 : index
    %c0_77 = arith.constant 0 : index
    %226 = vector.load %arg10[%c40, %c0_77] : memref<64x512xf32, #tpu.memory_space<vmem>>, vector<8x512xf32>
    %c0_78 = arith.constant 0 : index
    %c0_79 = arith.constant 0 : index
    %227 = vector.load %arg3[%c0_78, %c0_79] : memref<128x512xf32, #tpu.memory_space<vmem>>, vector<128x512xf32>
    %cst_80 = arith.constant dense<0.000000e+00> : vector<8x512xf32>
    %228 = tpu.matmul %202, %227, %cst_80 {dimension_numbers = #tpu.dot_dimension_numbers<[1], [0], [0], [1], [0, 0, 1, 1], [], []>} : vector<8x128xf32>, vector<128x512xf32>, vector<8x512xf32> -> vector<8x512xf32>
    %229 = arith.addf %226, %228 : vector<8x512xf32>
    %230 = vector.extract_strided_slice %229 {offsets = [0, 0], sizes = [8, 384], strides = [1, 1]} : vector<8x512xf32> to vector<8x384xf32>
    %231 = arith.negf %230 : vector<8x384xf32>
    %232 = math.exp %231 : vector<8x384xf32>
    %cst_81 = arith.constant 1.000000e+00 : f32
    %233 = vector.broadcast %cst_81 : f32 to vector<8x384xf32>
    %234 = arith.addf %233, %232 : vector<8x384xf32>
    %235 = arith.divf %233, %234 : vector<8x384xf32>
    %236 = vector.extract_strided_slice %235 {offsets = [0, 0], sizes = [8, 128], strides = [1, 1]} : vector<8x384xf32> to vector<8x128xf32>
    %237 = vector.extract_strided_slice %235 {offsets = [0, 128], sizes = [8, 128], strides = [1, 1]} : vector<8x384xf32> to vector<8x128xf32>
    %238 = vector.extract_strided_slice %235 {offsets = [0, 256], sizes = [8, 128], strides = [1, 1]} : vector<8x384xf32> to vector<8x128xf32>
    %239 = vector.extract_strided_slice %229 {offsets = [0, 384], sizes = [8, 128], strides = [1, 1]} : vector<8x512xf32> to vector<8x128xf32>
    %240 = math.tanh %239 : vector<8x128xf32>
    %241 = arith.mulf %237, %200 : vector<8x128xf32>
    %242 = arith.mulf %236, %240 : vector<8x128xf32>
    %243 = arith.addf %241, %242 : vector<8x128xf32>
    %244 = math.tanh %243 : vector<8x128xf32>
    %245 = arith.mulf %238, %244 : vector<8x128xf32>
    %246 = tpu.concatenate %245, %224 in 1 : vector<8x128xf32>, vector<8x128xf32> -> vector<8x256xf32>
    %c0_82 = arith.constant 0 : index
    %c0_83 = arith.constant 0 : index
    %247 = vector.load %arg5[%c0_82, %c0_83] : memref<256x512xf32, #tpu.memory_space<vmem>>, vector<256x512xf32>
    %cst_84 = arith.constant dense<0.000000e+00> : vector<8x512xf32>
    %248 = tpu.matmul %246, %247, %cst_84 {dimension_numbers = #tpu.dot_dimension_numbers<[1], [0], [0], [1], [0, 0, 1, 1], [], []>} : vector<8x256xf32>, vector<256x512xf32>, vector<8x512xf32> -> vector<8x512xf32>
    %c0_85 = arith.constant 0 : index
    %c0_86 = arith.constant 0 : index
    %249 = vector.load %arg6[%c0_85, %c0_86] : memref<1x512xf32, #tpu.memory_space<vmem>>, vector<1x512xf32>
    %250 = vector.broadcast %249 : vector<1x512xf32> to vector<8x512xf32>
    %251 = arith.addf %248, %250 : vector<8x512xf32>
    %252 = vector.extract_strided_slice %251 {offsets = [0, 0], sizes = [8, 384], strides = [1, 1]} : vector<8x512xf32> to vector<8x384xf32>
    %253 = arith.negf %252 : vector<8x384xf32>
    %254 = math.exp %253 : vector<8x384xf32>
    %cst_87 = arith.constant 1.000000e+00 : f32
    %255 = vector.broadcast %cst_87 : f32 to vector<8x384xf32>
    %256 = arith.addf %255, %254 : vector<8x384xf32>
    %257 = arith.divf %255, %256 : vector<8x384xf32>
    %258 = vector.extract_strided_slice %257 {offsets = [0, 0], sizes = [8, 128], strides = [1, 1]} : vector<8x384xf32> to vector<8x128xf32>
    %259 = vector.extract_strided_slice %257 {offsets = [0, 128], sizes = [8, 128], strides = [1, 1]} : vector<8x384xf32> to vector<8x128xf32>
    %260 = vector.extract_strided_slice %257 {offsets = [0, 256], sizes = [8, 128], strides = [1, 1]} : vector<8x384xf32> to vector<8x128xf32>
    %261 = vector.extract_strided_slice %251 {offsets = [0, 384], sizes = [8, 128], strides = [1, 1]} : vector<8x512xf32> to vector<8x128xf32>
    %262 = math.tanh %261 : vector<8x128xf32>
    %263 = arith.mulf %259, %222 : vector<8x128xf32>
    %264 = arith.mulf %258, %262 : vector<8x128xf32>
    %265 = arith.addf %263, %264 : vector<8x128xf32>
    %266 = math.tanh %265 : vector<8x128xf32>
    %267 = arith.mulf %260, %266 : vector<8x128xf32>
    %c40_88 = arith.constant 40 : index
    %c0_89 = arith.constant 0 : index
    %268 = vector.load %arg11[%c40_88, %c0_89] : memref<64x128xf32, #tpu.memory_space<vmem>>, vector<8x128xf32>
    tpu.vector_store %arg11[%c40_88, %c0_89], %267 {strides = array<i32>} : memref<64x128xf32, #tpu.memory_space<vmem>>, vector<8x128xf32>,
    %c48 = arith.constant 48 : index
    %c0_90 = arith.constant 0 : index
    %269 = vector.load %arg10[%c48, %c0_90] : memref<64x512xf32, #tpu.memory_space<vmem>>, vector<8x512xf32>
    %c0_91 = arith.constant 0 : index
    %c0_92 = arith.constant 0 : index
    %270 = vector.load %arg3[%c0_91, %c0_92] : memref<128x512xf32, #tpu.memory_space<vmem>>, vector<128x512xf32>
    %cst_93 = arith.constant dense<0.000000e+00> : vector<8x512xf32>
    %271 = tpu.matmul %245, %270, %cst_93 {dimension_numbers = #tpu.dot_dimension_numbers<[1], [0], [0], [1], [0, 0, 1, 1], [], []>} : vector<8x128xf32>, vector<128x512xf32>, vector<8x512xf32> -> vector<8x512xf32>
    %272 = arith.addf %269, %271 : vector<8x512xf32>
    %273 = vector.extract_strided_slice %272 {offsets = [0, 0], sizes = [8, 384], strides = [1, 1]} : vector<8x512xf32> to vector<8x384xf32>
    %274 = arith.negf %273 : vector<8x384xf32>
    %275 = math.exp %274 : vector<8x384xf32>
    %cst_94 = arith.constant 1.000000e+00 : f32
    %276 = vector.broadcast %cst_94 : f32 to vector<8x384xf32>
    %277 = arith.addf %276, %275 : vector<8x384xf32>
    %278 = arith.divf %276, %277 : vector<8x384xf32>
    %279 = vector.extract_strided_slice %278 {offsets = [0, 0], sizes = [8, 128], strides = [1, 1]} : vector<8x384xf32> to vector<8x128xf32>
    %280 = vector.extract_strided_slice %278 {offsets = [0, 128], sizes = [8, 128], strides = [1, 1]} : vector<8x384xf32> to vector<8x128xf32>
    %281 = vector.extract_strided_slice %278 {offsets = [0, 256], sizes = [8, 128], strides = [1, 1]} : vector<8x384xf32> to vector<8x128xf32>
    %282 = vector.extract_strided_slice %272 {offsets = [0, 384], sizes = [8, 128], strides = [1, 1]} : vector<8x512xf32> to vector<8x128xf32>
    %283 = math.tanh %282 : vector<8x128xf32>
    %284 = arith.mulf %280, %243 : vector<8x128xf32>
    %285 = arith.mulf %279, %283 : vector<8x128xf32>
    %286 = arith.addf %284, %285 : vector<8x128xf32>
    %287 = math.tanh %286 : vector<8x128xf32>
    %288 = arith.mulf %281, %287 : vector<8x128xf32>
    %289 = tpu.concatenate %288, %267 in 1 : vector<8x128xf32>, vector<8x128xf32> -> vector<8x256xf32>
    %c0_95 = arith.constant 0 : index
    %c0_96 = arith.constant 0 : index
    %290 = vector.load %arg5[%c0_95, %c0_96] : memref<256x512xf32, #tpu.memory_space<vmem>>, vector<256x512xf32>
    %cst_97 = arith.constant dense<0.000000e+00> : vector<8x512xf32>
    %291 = tpu.matmul %289, %290, %cst_97 {dimension_numbers = #tpu.dot_dimension_numbers<[1], [0], [0], [1], [0, 0, 1, 1], [], []>} : vector<8x256xf32>, vector<256x512xf32>, vector<8x512xf32> -> vector<8x512xf32>
    %c0_98 = arith.constant 0 : index
    %c0_99 = arith.constant 0 : index
    %292 = vector.load %arg6[%c0_98, %c0_99] : memref<1x512xf32, #tpu.memory_space<vmem>>, vector<1x512xf32>
    %293 = vector.broadcast %292 : vector<1x512xf32> to vector<8x512xf32>
    %294 = arith.addf %291, %293 : vector<8x512xf32>
    %295 = vector.extract_strided_slice %294 {offsets = [0, 0], sizes = [8, 384], strides = [1, 1]} : vector<8x512xf32> to vector<8x384xf32>
    %296 = arith.negf %295 : vector<8x384xf32>
    %297 = math.exp %296 : vector<8x384xf32>
    %cst_100 = arith.constant 1.000000e+00 : f32
    %298 = vector.broadcast %cst_100 : f32 to vector<8x384xf32>
    %299 = arith.addf %298, %297 : vector<8x384xf32>
    %300 = arith.divf %298, %299 : vector<8x384xf32>
    %301 = vector.extract_strided_slice %300 {offsets = [0, 0], sizes = [8, 128], strides = [1, 1]} : vector<8x384xf32> to vector<8x128xf32>
    %302 = vector.extract_strided_slice %300 {offsets = [0, 128], sizes = [8, 128], strides = [1, 1]} : vector<8x384xf32> to vector<8x128xf32>
    %303 = vector.extract_strided_slice %300 {offsets = [0, 256], sizes = [8, 128], strides = [1, 1]} : vector<8x384xf32> to vector<8x128xf32>
    %304 = vector.extract_strided_slice %294 {offsets = [0, 384], sizes = [8, 128], strides = [1, 1]} : vector<8x512xf32> to vector<8x128xf32>
    %305 = math.tanh %304 : vector<8x128xf32>
    %306 = arith.mulf %302, %265 : vector<8x128xf32>
    %307 = arith.mulf %301, %305 : vector<8x128xf32>
    %308 = arith.addf %306, %307 : vector<8x128xf32>
    %309 = math.tanh %308 : vector<8x128xf32>
    %310 = arith.mulf %303, %309 : vector<8x128xf32>
    %c48_101 = arith.constant 48 : index
    %c0_102 = arith.constant 0 : index
    %311 = vector.load %arg11[%c48_101, %c0_102] : memref<64x128xf32, #tpu.memory_space<vmem>>, vector<8x128xf32>
    tpu.vector_store %arg11[%c48_101, %c0_102], %310 {strides = array<i32>} : memref<64x128xf32, #tpu.memory_space<vmem>>, vector<8x128xf32>,
    %c56 = arith.constant 56 : index
    %c0_103 = arith.constant 0 : index
    %312 = vector.load %arg10[%c56, %c0_103] : memref<64x512xf32, #tpu.memory_space<vmem>>, vector<8x512xf32>
    %c0_104 = arith.constant 0 : index
    %c0_105 = arith.constant 0 : index
    %313 = vector.load %arg3[%c0_104, %c0_105] : memref<128x512xf32, #tpu.memory_space<vmem>>, vector<128x512xf32>
    %cst_106 = arith.constant dense<0.000000e+00> : vector<8x512xf32>
    %314 = tpu.matmul %288, %313, %cst_106 {dimension_numbers = #tpu.dot_dimension_numbers<[1], [0], [0], [1], [0, 0, 1, 1], [], []>} : vector<8x128xf32>, vector<128x512xf32>, vector<8x512xf32> -> vector<8x512xf32>
    %315 = arith.addf %312, %314 : vector<8x512xf32>
    %316 = vector.extract_strided_slice %315 {offsets = [0, 0], sizes = [8, 384], strides = [1, 1]} : vector<8x512xf32> to vector<8x384xf32>
    %317 = arith.negf %316 : vector<8x384xf32>
    %318 = math.exp %317 : vector<8x384xf32>
    %cst_107 = arith.constant 1.000000e+00 : f32
    %319 = vector.broadcast %cst_107 : f32 to vector<8x384xf32>
    %320 = arith.addf %319, %318 : vector<8x384xf32>
    %321 = arith.divf %319, %320 : vector<8x384xf32>
    %322 = vector.extract_strided_slice %321 {offsets = [0, 0], sizes = [8, 128], strides = [1, 1]} : vector<8x384xf32> to vector<8x128xf32>
    %323 = vector.extract_strided_slice %321 {offsets = [0, 128], sizes = [8, 128], strides = [1, 1]} : vector<8x384xf32> to vector<8x128xf32>
    %324 = vector.extract_strided_slice %321 {offsets = [0, 256], sizes = [8, 128], strides = [1, 1]} : vector<8x384xf32> to vector<8x128xf32>
    %325 = vector.extract_strided_slice %315 {offsets = [0, 384], sizes = [8, 128], strides = [1, 1]} : vector<8x512xf32> to vector<8x128xf32>
    %326 = math.tanh %325 : vector<8x128xf32>
    %327 = arith.mulf %323, %286 : vector<8x128xf32>
    %328 = arith.mulf %322, %326 : vector<8x128xf32>
    %329 = arith.addf %327, %328 : vector<8x128xf32>
    %330 = math.tanh %329 : vector<8x128xf32>
    %331 = arith.mulf %324, %330 : vector<8x128xf32>
    %332 = tpu.concatenate %331, %310 in 1 : vector<8x128xf32>, vector<8x128xf32> -> vector<8x256xf32>
    %c0_108 = arith.constant 0 : index
    %c0_109 = arith.constant 0 : index
    %333 = vector.load %arg5[%c0_108, %c0_109] : memref<256x512xf32, #tpu.memory_space<vmem>>, vector<256x512xf32>
    %cst_110 = arith.constant dense<0.000000e+00> : vector<8x512xf32>
    %334 = tpu.matmul %332, %333, %cst_110 {dimension_numbers = #tpu.dot_dimension_numbers<[1], [0], [0], [1], [0, 0, 1, 1], [], []>} : vector<8x256xf32>, vector<256x512xf32>, vector<8x512xf32> -> vector<8x512xf32>
    %c0_111 = arith.constant 0 : index
    %c0_112 = arith.constant 0 : index
    %335 = vector.load %arg6[%c0_111, %c0_112] : memref<1x512xf32, #tpu.memory_space<vmem>>, vector<1x512xf32>
    %336 = vector.broadcast %335 : vector<1x512xf32> to vector<8x512xf32>
    %337 = arith.addf %334, %336 : vector<8x512xf32>
    %338 = vector.extract_strided_slice %337 {offsets = [0, 0], sizes = [8, 384], strides = [1, 1]} : vector<8x512xf32> to vector<8x384xf32>
    %339 = arith.negf %338 : vector<8x384xf32>
    %340 = math.exp %339 : vector<8x384xf32>
    %cst_113 = arith.constant 1.000000e+00 : f32
    %341 = vector.broadcast %cst_113 : f32 to vector<8x384xf32>
    %342 = arith.addf %341, %340 : vector<8x384xf32>
    %343 = arith.divf %341, %342 : vector<8x384xf32>
    %344 = vector.extract_strided_slice %343 {offsets = [0, 0], sizes = [8, 128], strides = [1, 1]} : vector<8x384xf32> to vector<8x128xf32>
    %345 = vector.extract_strided_slice %343 {offsets = [0, 128], sizes = [8, 128], strides = [1, 1]} : vector<8x384xf32> to vector<8x128xf32>
    %346 = vector.extract_strided_slice %343 {offsets = [0, 256], sizes = [8, 128], strides = [1, 1]} : vector<8x384xf32> to vector<8x128xf32>
    %347 = vector.extract_strided_slice %337 {offsets = [0, 384], sizes = [8, 128], strides = [1, 1]} : vector<8x512xf32> to vector<8x128xf32>
    %348 = math.tanh %347 : vector<8x128xf32>
    %349 = arith.mulf %345, %308 : vector<8x128xf32>
    %350 = arith.mulf %344, %348 : vector<8x128xf32>
    %351 = arith.addf %349, %350 : vector<8x128xf32>
    %352 = math.tanh %351 : vector<8x128xf32>
    %353 = arith.mulf %346, %352 : vector<8x128xf32>
    %c56_114 = arith.constant 56 : index
    %c0_115 = arith.constant 0 : index
    %354 = vector.load %arg11[%c56_114, %c0_115] : memref<64x128xf32, #tpu.memory_space<vmem>>, vector<8x128xf32>
    tpu.vector_store %arg11[%c56_114, %c0_115], %353 {strides = array<i32>} : memref<64x128xf32, #tpu.memory_space<vmem>>, vector<8x128xf32>,
    %c0_116 = arith.constant 0 : index
    %c0_117 = arith.constant 0 : index
    %355 = vector.load %arg11[%c0_116, %c0_117] : memref<64x128xf32, #tpu.memory_space<vmem>>, vector<64x128xf32>
    %c0_118 = arith.constant 0 : index
    %c0_119 = arith.constant 0 : index
    %356 = vector.load %arg7[%c0_118, %c0_119] : memref<128x128xf32, #tpu.memory_space<vmem>>, vector<128x128xf32>
    %cst_120 = arith.constant dense<0.000000e+00> : vector<64x128xf32>
    %357 = tpu.matmul %355, %356, %cst_120 {dimension_numbers = #tpu.dot_dimension_numbers<[1], [0], [0], [1], [0, 0, 1, 1], [], []>} : vector<64x128xf32>, vector<128x128xf32>, vector<64x128xf32> -> vector<64x128xf32>
    %c0_121 = arith.constant 0 : index
    %c0_122 = arith.constant 0 : index
    %358 = vector.load %arg8[%c0_121, %c0_122] : memref<1x128xf32, #tpu.memory_space<vmem>>, vector<1x128xf32>
    %359 = vector.broadcast %358 : vector<1x128xf32> to vector<64x128xf32>
    %360 = arith.addf %357, %359 : vector<64x128xf32>
    %c0_123 = arith.constant 0 : index
    %c0_124 = arith.constant 0 : index
    %361 = vector.load %arg9[%c0_123, %c0_124] : memref<64x128xf32, #tpu.memory_space<vmem>>, vector<64x128xf32>
    tpu.vector_store %arg9[%c0_123, %c0_124], %360 {strides = array<i32>} : memref<64x128xf32, #tpu.memory_space<vmem>>, vector<64x128xf32>,
    return
  }
  func.func @transform_0(%arg0: i32) -> (i32, i32) {
    %c0_i32 = arith.constant 0 : i32
    %c0_i32_0 = arith.constant 0 : i32
    %c0_i32_1 = arith.constant 0 : i32
    return %c0_i32, %c0_i32_0 : i32, i32
  }
  func.func @transform_1(%arg0: i32) -> (i32, i32) {
    %c0_i32 = arith.constant 0 : i32
    %c0_i32_0 = arith.constant 0 : i32
    %c0_i32_1 = arith.constant 0 : i32
    return %c0_i32, %c0_i32_0 : i32, i32
  }
  func.func @transform_2(%arg0: i32) -> (i32, i32) {
    %c0_i32 = arith.constant 0 : i32
    %c0_i32_0 = arith.constant 0 : i32
    %c0_i32_1 = arith.constant 0 : i32
    return %c0_i32, %c0_i32_0 : i32, i32
  }
  func.func @transform_3(%arg0: i32) -> (i32, i32) {
    %c0_i32 = arith.constant 0 : i32
    %c0_i32_0 = arith.constant 0 : i32
    %c0_i32_1 = arith.constant 0 : i32
    return %c0_i32, %c0_i32_0 : i32, i32
  }
  func.func @transform_4(%arg0: i32) -> (i32, i32) {
    %c0_i32 = arith.constant 0 : i32
    %c0_i32_0 = arith.constant 0 : i32
    %c0_i32_1 = arith.constant 0 : i32
    return %c0_i32, %c0_i32_0 : i32, i32
  }
  func.func @transform_5(%arg0: i32) -> (i32, i32) {
    %c0_i32 = arith.constant 0 : i32
    %c0_i32_0 = arith.constant 0 : i32
    %c0_i32_1 = arith.constant 0 : i32
    return %c0_i32, %c0_i32_0 : i32, i32
  }
  func.func @transform_6(%arg0: i32) -> (i32, i32) {
    %c0_i32 = arith.constant 0 : i32
    %c0_i32_0 = arith.constant 0 : i32
    %c0_i32_1 = arith.constant 0 : i32
    return %c0_i32, %c0_i32_0 : i32, i32
  }
  func.func @transform_7(%arg0: i32) -> (i32, i32) {
    %c0_i32 = arith.constant 0 : i32
    %c0_i32_0 = arith.constant 0 : i32
    %c0_i32_1 = arith.constant 0 : i32
    return %c0_i32, %c0_i32_0 : i32, i32
  }
  func.func @transform_8(%arg0: i32) -> (i32, i32) {
    %c0_i32 = arith.constant 0 : i32
    %c0_i32_0 = arith.constant 0 : i32
    %c0_i32_1 = arith.constant 0 : i32
    return %c0_i32, %c0_i32_0 : i32, i32
  }
}

</mosaic_0001>

<bundles_post_ra>
// kernel: forward.1
= control target key start
LH: loop header
LB: loop body
LE: loop exit
PB: predicated region body
PF: predicated region fallthrough
CT: control target
= control target key end

     0   :  { %13 = vsyncpa [#allocation5], 0  ;;  %s6886_s0 = inlined_call_operand.vmem [shape: f32[64,32], index: 0, kind: input, shape index: {}]   ;;  %s6887_s1 = inlined_call_operand.hbm [shape: f32[32,512], index: 1, kind: input, shape index: {}]   ;;  %s6888_s2 = inlined_call_operand.hbm [shape: f32[128,512], index: 2, kind: input, shape index: {}]   ;;  %s6889_s3 = inlined_call_operand.vmem [shape: f32[1,512], index: 3, kind: input, shape index: {}]   ;;  %s6890_s4 = inlined_call_operand.hbm [shape: f32[256,512], index: 4, kind: input, shape index: {}]   ;;  %s6891_s5 = inlined_call_operand.vmem [shape: f32[1,512], index: 5, kind: input, shape index: {}]   ;;  %s6892_s6 = inlined_call_operand.hbm [shape: f32[128,128], index: 6, kind: input, shape index: {}]   ;;  %s6893_s7 = inlined_call_operand.vmem [shape: f32[1,128], index: 7, kind: input, shape index: {}]   ;;  %s6894_s8 = inlined_call_operand.vmem [shape: f32[64,128], index: 8, kind: output, shape index: {}]  }
   0x1   :  { %14 = vsyncpa [#allocation7], 0 }
   0x2   :  { %15 = vsyncpa [#allocation10], 0  ;;  %s35_s29 = sshll.u32 %s6888_s2, 4  ;;  %s5526_s30 = smov [#allocation6]   ;;  %s36_s29 = int_to_ptr.hbm [resolvable:$true] %s35_s29 }
   0x3   :  { %s37_s9 = sshll.u32 %s5526_s30, 4  ;;  %s22_s12 = sshll.u32 %s6887_s1, 4  ;;  %s38_s9 = int_to_ptr.vmem [resolvable:$true] %s37_s9  ;;  %s23_s12 = int_to_ptr.hbm [resolvable:$true] %s22_s12 }
   0x4   :  { %s5527_s13 = smov 512   ;;  %s5528_s14 = smov 32  }
   0x5   :  { %43 = dma.hbm_to_vmem [thread:$0]  %s36_s29, 8192, %s38_s9, [#allocation7], %s5527_s13, %s5527_s13, %s5528_s14  }
   0x6   :  { %s5529_s15 = smov [#allocation4]   ;;  %s50_s19 = sshll.u32 %s6890_s4, 4  ;;  %s51_s19 = int_to_ptr.hbm [resolvable:$true] %s50_s19 }
   0x7   :  { %s24_s16 = sshll.u32 %s5529_s15, 4  ;;  %s65_s21 = sshll.u32 %s6892_s6, 4  ;;  %s25_s16 = int_to_ptr.vmem [resolvable:$true] %s24_s16  ;;  %s66_s21 = int_to_ptr.hbm [resolvable:$true] %s65_s21 }
   0x8   :  { %30 = dma.hbm_to_vmem [thread:$0]  %s23_s12, 2048, %s25_s16, [#allocation5], %s5527_s13, %s5527_s13, %s5528_s14  }
   0x9   :  { %s5530_s22 = smov [#allocation8]   ;;  %s5531_s1 = smov [#allocation9]  }
   0xa   :  { %s52_s23 = sshll.u32 %s5530_s22, 4  ;;  %s67_s24 = sshll.u32 %s5531_s1, 4  ;;  %s53_s23 = int_to_ptr.vmem [resolvable:$true] %s52_s23  ;;  %s68_s24 = int_to_ptr.vmem [resolvable:$true] %s67_s24 }
   0xb   :  { %58 = dma.hbm_to_vmem [thread:$0]  %s51_s19, 16384, %s53_s23, [#allocation7], %s5527_s13, %s5527_s13, %s5528_s14  }
   0xc   :  { %s5532_s25 = smov 128   ;;  %s5533_s26 = smov 8  }
   0xd   :  { %73 = dma.hbm_to_vmem [thread:$0]  %s66_s21, 2048, %s68_s24, [#allocation10], %s5532_s25, %s5532_s25, %s5533_s26  }
   0xe   :  { %5520 = dma.done.wait [#allocation5], 2048  }
   0xf   :  { %5521 = vsyncadd [#allocation5], 4294965248 }
  0x10   :  { %5522 = dma.done.wait [#allocation7], 24576  }
  0x11   :  { %5523 = vsyncadd [#allocation7], 4294942720 }
  0x12   :  { %5524 = dma.done.wait [#allocation10], 2048  }
  0x13   :  { %5525 = vsyncadd [#allocation10], 4294965248  ;;  %v112_v0 = vld [vmem:[#allocation4 + $0x60] sm:$0xff]  ;;  %v114_v1 = vld [vmem:[#allocation4 + $0x70] sm:$0xff]  ;;  %vm126_vm0 = vcmask 261120  }
  0x14   :  { %v108_v2 = vld [vmem:[#allocation4 + $0x40] sm:$0xff]  ;;  %5127 = vmatpush.msra.mxu1 %v112_v0  ;;  %5128 = vmatpush.msra.mxu3 %v112_v0  ;;  %v110_v3 = vld [vmem:[#allocation4 + $0x50] sm:$0xff]  ;;  %v5600_v9 = vld [vmem:[%s6886_s0 + $0x28] sm:$0xff] }
  0x15   :  { %245 = vmatpush.msra.mxu2 %v114_v1  ;;  %v104_v4 = vld [vmem:[#allocation4 + $0x20] sm:$0xff]  ;;  %163 = vmatpush.msra.mxu0 %v112_v0  ;;  %v106_v5 = vld [vmem:[#allocation4 + $0x30] sm:$0xff]  ;;  %v115_v11 = vld [vmem:[#allocation4 + $0x78] sm:$0xff] }
  0x16   :  { %5129 = vmatpush.msra.mxu1 %v108_v2  ;;  %5130 = vmatpush.msra.mxu3 %v108_v2  ;;  %v100_v6 = vld [vmem:[#allocation4] sm:$0xff]  ;;  %v102_v7 = vld [vmem:[#allocation4 + $0x10] sm:$0xff]  ;;  %v113_v12 = vld [vmem:[#allocation4 + $0x68] sm:$0xff] }
  0x17   :  { %246 = vmatpush.msra.mxu2 %v110_v3  ;;  %164 = vmatpush.msra.mxu0 %v108_v2  ;;  %v5595_v8 = vld [vmem:[%s6886_s0 + $0x20] sm:$0xff]  ;;  %v109_v14 = vld [vmem:[#allocation4 + $0x48] sm:$0xff]  ;;  %v111_v15 = vld [vmem:[#allocation4 + $0x58] sm:$0xff] }
  0x18   :  { %5131 = vmatpush.msra.mxu1 %v104_v4  ;;  %5132 = vmatpush.msra.mxu3 %v104_v4  ;;  %v5605_v10 = vld [vmem:[%s6886_s0] sm:$0xff]  ;;  %v105_v17 = vld [vmem:[#allocation4 + $0x28] sm:$0xff]  ;;  %v107_v18 = vld [vmem:[#allocation4 + $0x38] sm:$0xff] }
  0x19   :  { %247 = vmatpush.msra.mxu2 %v106_v5  ;;  %165 = vmatpush.msra.mxu0 %v104_v4  ;;  %v411_v13 = vld [vmem:[#allocation6 + $0x1e0] sm:$0xff]  ;;  %v101_v20 = vld [vmem:[#allocation4 + $0x8] sm:$0xff]  ;;  %v103_v21 = vld [vmem:[#allocation4 + $0x18] sm:$0xff] }
  0x1a   :  { %5133 = vmatpush.msra.mxu1 %v100_v6  ;;  %5134 = vmatpush.msra.mxu3 %v100_v6  ;;  %v407_v16 = vld [vmem:[#allocation6 + $0x1c0] sm:$0xff]  ;;  %v5618_v22 = vld [vmem:[%s6886_s0 + $0x30] sm:$0xff]  ;;  %v5623_v23 = vld [vmem:[%s6886_s0 + $0x8] sm:$0xff] }
  0x1b   :  { %248 = vmatpush.msra.mxu2 %v102_v7  ;;  %5051 = vmatmul.msk.f32.vlgmr.msra.gmra.mxu1 %vm126_vm0, %v5595_v8  ;;  %v403_v19 = vld [vmem:[#allocation6 + $0x1a0] sm:$0xff]  ;;  %v5625_v24 = vld [vmem:[#allocation6 + $0x1e8] sm:$0xff]  ;;  %v5627_v26 = vld [vmem:[#allocation6 + $0x1f8] sm:$0xff] }
  0x1c   :  { %5052 = vmatmul.msk.f32.vlgmr.msra.gmra.mxu3 %vm126_vm0, %v5600_v9  ;;  %5063 = vmatmul.msk.f32.vlgmr.msra.gmra.mxu2 %vm126_vm0, %v5605_v10  ;;  %v399_v25 = vld [vmem:[#allocation6 + $0x180] sm:$0xff]  ;;  %v5633_v27 = vld [vmem:[#allocation6 + $0x1c8] sm:$0xff]  ;;  %v5638_v29 = vld [vmem:[#allocation6 + $0x1d8] sm:$0xff] }
  0x1d   :  { %286 = vmatpush.msrb.mxu3 %v115_v11  ;;  %204 = vmatpush.msrb.mxu1 %v113_v12  ;;  %v395_v28 = vld [vmem:[#allocation6 + $0x160] sm:$0xff]  ;;  %v5640_v30 = vld [vmem:[#allocation6 + $0x1a8] sm:$0xff]  ;;  %v5644_v32 = vld [vmem:[#allocation6 + $0x1b8] sm:$0xff] }
  0x1e   :  { %415 = vmatpush.msrb.mxu2 %v411_v13  ;;  %166 = vmatpush.msra.mxu0 %v100_v6  ;;  %v391_v31 = vld [vmem:[#allocation6 + $0x140] sm:$0xff]  ;;  %v5646_v33 = vld [vmem:[#allocation6 + $0x188] sm:$0xff]  ;;  %v5652_v34 = vld [vmem:[%s6886_s0 + $0x38] sm:$0xff] }
  0x1f   :  { %205 = vmatpush.msrb.mxu1 %v109_v14  ;;  %287 = vmatpush.msrb.mxu3 %v111_v15  ;;  %v5660_v35 = vld [vmem:[%s6886_s0 + $0x10] sm:$0xff]  ;;  %v5662_v36 = vld [vmem:[#allocation6 + $0x168] sm:$0xff]  ;;  %v387_v37 = vld [vmem:[#allocation6 + $0x120] sm:$0xff] }
  0x20   :  { %416 = vmatpush.msrb.mxu2 %v407_v16  ;;  %5047 = vmatmul.msk.f32.vlgmr.msra.gmra.mxu0 %vm126_vm0, %v5605_v10  ;;  %v5666_v38 = vld [vmem:[#allocation6 + $0x198] sm:$0xff]  ;;  %v5672_v39 = vld [vmem:[#allocation6 + $0x148] sm:$0xff]  ;;  %v383_v40 = vld [vmem:[#allocation6 + $0x100] sm:$0xff] }
  0x21   :  { %206 = vmatpush.msrb.mxu1 %v105_v17  ;;  %288 = vmatpush.msrb.mxu3 %v107_v18  ;;  %v5677_v41 = vld [vmem:[#allocation6 + $0x178] sm:$0xff]  ;;  %v5679_v42 = vld [vmem:[#allocation6 + $0x128] sm:$0xff]  ;;  %v379_v43 = vld [vmem:[#allocation6 + $0xe0] sm:$0xff] }
  0x22   :  { %417 = vmatpush.msrb.mxu2 %v403_v19  ;;  %v5683_v44 = vld [vmem:[#allocation6 + $0x158] sm:$0xff]  ;;  %v5685_v45 = vld [vmem:[#allocation6 + $0x108] sm:$0xff]  ;;  %v375_v48 = vld [vmem:[#allocation6 + $0xc0] sm:$0xff] }
  0x23   :  { %207 = vmatpush.msrb.mxu1 %v101_v20  ;;  %289 = vmatpush.msrb.mxu3 %v103_v21  ;;  %v5694_v46 = vld [vmem:[%s6886_s0 + $0x18] sm:$0xff]  ;;  %v5696_v47 = vld [vmem:[#allocation6 + $0xe8] sm:$0xff]  ;;  %v371_v51 = vld [vmem:[#allocation6 + $0xa0] sm:$0xff] }
  0x24   :  { %5053 = vmatmul.msk.f32.gmra.mxu3 %vm126_vm0, %v5618_v22  ;;  %5055 = vmatmul.msk.f32.vlgmr.msrb.gmra.mxu1 %vm126_vm0, %v5605_v10  ;;  %v5700_v49 = vld [vmem:[#allocation6 + $0x138] sm:$0xff]  ;;  %v5706_v50 = vld [vmem:[#allocation6 + $0xc8] sm:$0xff]  ;;  %v367_v54 = vld [vmem:[#allocation6 + $0x80] sm:$0xff] }
  0x25   :  { %5064 = vmatmul.msk.f32.gmra.mxu2 %vm126_vm0, %v5623_v23  ;;  %435 = vmatpush.msra.mxu1 %v5625_v24  ;;  %v5711_v52 = vld [vmem:[#allocation6 + $0x118] sm:$0xff]  ;;  %v5714_v53 = vld [vmem:[#allocation6 + $0xa8] sm:$0xff]  ;;  %v363_v58 = vld [vmem:[#allocation6 + $0x60] sm:$0xff] }
  0x26   :  { %418 = vmatpush.msrb.mxu2 %v399_v25  ;;  %475 = vmatpush.msra.mxu3 %v5627_v26  ;;  %v5717_v55 = vld [vmem:[#allocation6 + $0xf8] sm:$0xff]  ;;  %v5720_v56 = vld [vmem:[#allocation6 + $0x88] sm:$0xff]  ;;  %v359_v61 = vld [vmem:[#allocation6 + $0x40] sm:$0xff] }
  0x27   :  { %436 = vmatpush.msra.mxu1 %v5633_v27  ;;  %v5726_v57 = vld [vmem:[#allocation6 + $0x68] sm:$0xff]  ;;  %v5729_v59 = vld [vmem:[#allocation6 + $0xd8] sm:$0xff]  ;;  %v355_v0 = vld [vmem:[#allocation6 + $0x20] sm:$0xff] }
  0x28   :  { %419 = vmatpush.msrb.mxu2 %v395_v28  ;;  %476 = vmatpush.msra.mxu3 %v5638_v29  ;;  %v5735_v60 = vld [vmem:[#allocation6 + $0x48] sm:$0xff]  ;;  %v5741_v62 = vld [vmem:[#allocation6 + $0xb8] sm:$0xff]  ;;  %v351_v3 = vld [vmem:[#allocation6] sm:$0xff] }
  0x29   :  { %437 = vmatpush.msra.mxu1 %v5640_v30  ;;  %5048 = vmatmul.msk.f32.gmra.mxu0 %vm126_vm0, %v5623_v23  ;;  %v5743_v63 = vld [vmem:[#allocation6 + $0x28] sm:$0xff]  ;;  %v5748_v1 = vld [vmem:[#allocation6 + $0x98] sm:$0xff]  ;;  %v413_v4 = vld [vmem:[#allocation6 + $0x1f0] sm:$0xff] }
  0x2a   :  { %420 = vmatpush.msrb.mxu2 %v391_v31  ;;  %477 = vmatpush.msra.mxu3 %v5644_v32  ;;  %v5750_v2 = vld [vmem:[#allocation6 + $0x8] sm:$0xff]  ;;  %v409_v5 = vld [vmem:[#allocation6 + $0x1d0] sm:$0xff]  ;;  %v5760_v6 = vld [vmem:[#allocation6 + $0x78] sm:$0xff] }
  0x2b   :  { %438 = vmatpush.msra.mxu1 %v5646_v33  ;;  %v5762_v7 = vld [vmem:[#allocation6 + $0x58] sm:$0xff]  ;;  %v401_v11 = vld [vmem:[#allocation6 + $0x190] sm:$0xff] }
  0x2c   :  { %5054 = vmatmul.msk.f32.gmra.mxu3 %vm126_vm0, %v5652_v34  ;;  %5056 = vmatmul.msk.f32.gmra.mxu1 %vm126_vm0, %v5623_v23  ;;  %v397_v12 = vld [vmem:[#allocation6 + $0x170] sm:$0xff]  ;;  %v5770_v13 = vld [vmem:[#allocation6 + $0x38] sm:$0xff] }
  0x2d   :  { %5065 = vmatmul.msk.f32.gmra.mxu2 %vm126_vm0, %v5660_v35  ;;  %439 = vmatpush.msra.mxu1 %v5662_v36  ;;  %v5772_v14 = vld [vmem:[#allocation6 + $0x18] sm:$0xff]  ;;  %v393_v15 = vld [vmem:[#allocation6 + $0x150] sm:$0xff] }
  0x2e   :  { %421 = vmatpush.msrb.mxu2 %v387_v37  ;;  %478 = vmatpush.msra.mxu3 %v5666_v38  ;;  %v389_v16 = vld [vmem:[#allocation6 + $0x130] sm:$0xff]  ;;  %v5800_v37 = vld [vmem:[#allocation8 + $0x3c0] sm:$0xff] }
  0x2f   :  { %440 = vmatpush.msra.mxu1 %v5672_v39  ;;  %v385_v17 = vld [vmem:[#allocation6 + $0x110] sm:$0xff] }
  0x30   :  { %422 = vmatpush.msrb.mxu2 %v383_v40  ;;  %479 = vmatpush.msra.mxu3 %v5677_v41  ;;  %v381_v18 = vld [vmem:[#allocation6 + $0xf0] sm:$0xff]  ;;  %v5806_v40 = vld [vmem:[#allocation8 + $0x3a0] sm:$0xff] }
  0x31   :  { %441 = vmatpush.msra.mxu1 %v5679_v42  ;;  %5049 = vmatmul.msk.f32.gmra.mxu0 %vm126_vm0, %v5660_v35  ;;  %v377_v19 = vld [vmem:[#allocation6 + $0xd0] sm:$0xff] }
  0x32   :  { %423 = vmatpush.msrb.mxu2 %v379_v43  ;;  %480 = vmatpush.msra.mxu3 %v5683_v44  ;;  %v373_v20 = vld [vmem:[#allocation6 + $0xb0] sm:$0xff]  ;;  %v5808_v43 = vld [vmem:[#allocation8 + $0x3a8] sm:$0xff] }
  0x33   :  { %442 = vmatpush.msra.mxu1 %v5685_v45  ;;  %v369_v21 = vld [vmem:[#allocation6 + $0x90] sm:$0xff] }
  0x34   :  { %5057 = vmatmul.msk.f32.gmra.mxu1 %vm126_vm0, %v5660_v35  ;;  %5071 = vmatmul.msk.f32.vlgmr.msrb.gmra.mxu3 %vm126_vm0, %v5605_v10  ;;  %v405_v10 = vld [vmem:[#allocation6 + $0x1b0] sm:$0xff] }
  0x35   :  { %5066 = vmatmul.msk.f32.gmra.mxu2 %vm126_vm0, %v5694_v46  ;;  %443 = vmatpush.msra.mxu1 %v5696_v47  ;;  %v361_v25 = vld [vmem:[#allocation6 + $0x50] sm:$0xff] }
  0x36   :  { %424 = vmatpush.msrb.mxu2 %v375_v48  ;;  %481 = vmatpush.msra.mxu3 %v5700_v49  ;;  %v357_v28 = vld [vmem:[#allocation6 + $0x30] sm:$0xff]  ;;  %v5818_v48 = vld [vmem:[#allocation8 + $0x388] sm:$0xff] }
  0x37   :  { %444 = vmatpush.msra.mxu1 %v5706_v50  ;;  %v353_v31 = vld [vmem:[#allocation6 + $0x10] sm:$0xff] }
  0x38   :  { %425 = vmatpush.msrb.mxu2 %v371_v51  ;;  %482 = vmatpush.msra.mxu3 %v5711_v52  ;;  %v5822_v51 = vld [vmem:[#allocation8 + $0x360] sm:$0xff] }
  0x39   :  { %445 = vmatpush.msra.mxu1 %v5714_v53  ;;  %5050 = vmatmul.msk.f32.gmra.mxu0 %vm126_vm0, %v5694_v46 }
  0x3a   :  { %426 = vmatpush.msrb.mxu2 %v367_v54  ;;  %483 = vmatpush.msra.mxu3 %v5717_v55  ;;  %v5824_v54 = vld [vmem:[#allocation8 + $0x368] sm:$0xff] }
  0x3b   :  { %446 = vmatpush.msra.mxu1 %v5720_v56 }
  0x3c   :  { %5058 = vmatmul.msk.f32.gmra.mxu1 %vm126_vm0, %v5694_v46  ;;  %5072 = vmatmul.msk.f32.gmra.mxu3 %vm126_vm0, %v5623_v23  ;;  %v365_v23 = vld [vmem:[#allocation6 + $0x70] sm:$0xff] }
  0x3d   :  { %5067 = vmatmul.msk.f32.gmra.mxu2 %vm126_vm0, %v5595_v8  ;;  %447 = vmatpush.msra.mxu1 %v5726_v57 }
  0x3e   :  { %427 = vmatpush.msrb.mxu2 %v363_v58  ;;  %484 = vmatpush.msra.mxu3 %v5729_v59  ;;  %v666_v58 = vld [vmem:[#allocation8 + $0x340] sm:$0xff] }
  0x3f   :  { %448 = vmatpush.msra.mxu1 %v5735_v60 }
  0x40   :  { %428 = vmatpush.msrb.mxu2 %v359_v61  ;;  %485 = vmatpush.msra.mxu3 %v5741_v62  ;;  %v667_v61 = vld [vmem:[#allocation8 + $0x348] sm:$0xff] }
  0x41   :  { %449 = vmatpush.msra.mxu1 %v5743_v63 }
  0x42   :  { %429 = vmatpush.msrb.mxu2 %v355_v0  ;;  %486 = vmatpush.msra.mxu3 %v5748_v1  ;;  %v662_v0 = vld [vmem:[#allocation8 + $0x320] sm:$0xff] }
  0x43   :  { %450 = vmatpush.msra.mxu1 %v5750_v2 }
  0x44   :  { %5059 = vmatmul.msk.f32.gmra.mxu1 %vm126_vm0, %v5595_v8  ;;  %5073 = vmatmul.msk.f32.gmra.mxu3 %vm126_vm0, %v5660_v35  ;;  %v5798_v35 = vld [vmem:[#allocation8 + $0x3e8] sm:$0xff] }
  0x45   :  { %5068 = vmatmul.msk.f32.gmra.mxu2 %vm126_vm0, %v5600_v9  ;;  %487 = vmatpush.msra.mxu3 %v5760_v6 }
  0x46   :  { %430 = vmatpush.msrb.mxu2 %v351_v3  ;;  %v663_v3 = vld [vmem:[#allocation8 + $0x328] sm:$0xff] }
  0x47   :  { %488 = vmatpush.msra.mxu3 %v5762_v7 }
  0x48   :  { %455 = vmatpush.msra.mxu2 %v413_v4 }
  0x49   :  { %489 = vmatpush.msra.mxu3 %v5770_v13 }
  0x4a   :  { %456 = vmatpush.msra.mxu2 %v409_v5 }
  0x4b   :  { %490 = vmatpush.msra.mxu3 %v5772_v14 }
  0x4c   :  { %457 = vmatpush.msra.mxu2 %v405_v10  ;;  %5060 = vmatmul.msk.f32.gmra.mxu1 %vm126_vm0, %v5600_v9  ;;  %v658_v10 = vld [vmem:[#allocation8 + $0x300] sm:$0xff] }
  0x4d   :  { %5074 = vmatmul.msk.f32.gmra.mxu3 %vm126_vm0, %v5694_v46  ;;  %5069 = vmatmul.msk.f32.gmra.mxu2 %vm126_vm0, %v5618_v22  ;;  %v5816_v46 = vld [vmem:[#allocation8 + $0x380] sm:$0xff] }
  0x4e   :  { %458 = vmatpush.msra.mxu2 %v401_v11  ;;  %760 = vmatpush.msrb.mxu3 %v5798_v35  ;;  %v659_v11 = vld [vmem:[#allocation8 + $0x308] sm:$0xff] }
  0x50   :  { %459 = vmatpush.msra.mxu2 %v397_v12 }
  0x52   :  { %460 = vmatpush.msra.mxu2 %v393_v15  ;;  %v654_v15 = vld [vmem:[#allocation8 + $0x2e0] sm:$0xff] }
  0x54   :  { %461 = vmatpush.msra.mxu2 %v389_v16  ;;  %5061 = vmatmul.msk.f32.gmra.mxu1 %vm126_vm0, %v5618_v22  ;;  %v655_v16 = vld [vmem:[#allocation8 + $0x2e8] sm:$0xff] }
  0x55   :  { %5075 = vmatmul.msk.f32.gmra.mxu3 %vm126_vm0, %v5595_v8  ;;  %5070 = vmatmul.msk.f32.gmra.mxu2 %vm126_vm0, %v5652_v34  ;;  %v6895_v8 = vmov 0.0  }
  0x56   :  { %462 = vmatpush.msra.mxu2 %v385_v17  ;;  %v650_v17 = vld [vmem:[#allocation8 + $0x2c0] sm:$0xff] }
  0x58   :  { %463 = vmatpush.msra.mxu2 %v381_v18  ;;  %v651_v18 = vld [vmem:[#allocation8 + $0x2c8] sm:$0xff] }
  0x5a   :  { %464 = vmatpush.msra.mxu2 %v377_v19  ;;  %v646_v19 = vld [vmem:[#allocation8 + $0x2a0] sm:$0xff] }
  0x5c   :  { %465 = vmatpush.msra.mxu2 %v373_v20  ;;  %5062 = vmatmul.msk.f32.gmra.mxu1 %vm126_vm0, %v5652_v34  ;;  %v647_v20 = vld [vmem:[#allocation8 + $0x2a8] sm:$0xff] }
  0x5d   :  { %5076 = vmatmul.msk.f32.gmra.mxu3 %vm126_vm0, %v5600_v9  ;;  %431 = vmatmul.f32.vlgmr.msrb.gmra.mxu2 %v6895_v8  ;;  %v5796_v9 = vld [vmem:[#allocation8 + $0x3e0] sm:$0xff] }
  0x5e   :  { %466 = vmatpush.msra.mxu2 %v369_v21  ;;  %720 = vmatpush.msrb.mxu1 %v5796_v9 }
  0x60   :  { %467 = vmatpush.msra.mxu2 %v365_v23  ;;  %721 = vmatpush.msrb.mxu1 %v5800_v37 }
  0x62   :  { %468 = vmatpush.msra.mxu2 %v361_v25  ;;  %722 = vmatpush.msrb.mxu1 %v5806_v40  ;;  %v642_v25 = vld [vmem:[#allocation8 + $0x280] sm:$0xff] }
  0x64   :  { %469 = vmatpush.msra.mxu2 %v357_v28  ;;  %451 = vmatmul.f32.vlgmr.msra.gmra.mxu1 %v6895_v8  ;;  %v643_v28 = vld [vmem:[#allocation8 + $0x288] sm:$0xff] }
  0x65   :  { %5077 = vmatmul.msk.f32.gmra.mxu3 %vm126_vm0, %v5618_v22  ;;  %v5804_v22 = vld [vmem:[#allocation8 + $0x3c8] sm:$0xff]  ;;  %723 = vmatpush.msrb.mxu1 %v5816_v46 }
  0x66   :  { %470 = vmatpush.msra.mxu2 %v353_v31  ;;  %761 = vmatpush.msrb.mxu3 %v5804_v22 }
  0x67   :  { %471 = vmatmul.f32.vlgmr.msra.gmra.mxu2 %v6895_v8  ;;  %724 = vmatpush.msrb.mxu1 %v5822_v51 }
  0x68   :  { %762 = vmatpush.msrb.mxu3 %v5808_v43 }
  0x69   :  { %725 = vmatpush.msrb.mxu1 %v666_v58  ;;  %v638_v58 = vld [vmem:[#allocation8 + $0x260] sm:$0xff] }
  0x6a   :  { %763 = vmatpush.msrb.mxu3 %v5818_v48 }
  0x6b   :  { %726 = vmatpush.msrb.mxu1 %v662_v0  ;;  %v634_v0 = vld [vmem:[#allocation8 + $0x240] sm:$0xff] }
  0x6c   :  { %764 = vmatpush.msrb.mxu3 %v5824_v54 }
  0x6d   :  { %5078 = vmatmul.msk.f32.gmra.mxu3 %vm126_vm0, %v5652_v34  ;;  %727 = vmatpush.msrb.mxu1 %v658_v10  ;;  %v630_v10 = vld [vmem:[#allocation8 + $0x220] sm:$0xff] }
  0x6e   :  { %765 = vmatpush.msrb.mxu3 %v667_v61  ;;  %v639_v61 = vld [vmem:[#allocation8 + $0x268] sm:$0xff] }
  0x6f   :  { %728 = vmatpush.msrb.mxu1 %v654_v15 }
  0x70   :  { %766 = vmatpush.msrb.mxu3 %v663_v3  ;;  %v635_v3 = vld [vmem:[#allocation8 + $0x248] sm:$0xff] }
  0x71   :  { %729 = vmatpush.msrb.mxu1 %v650_v17  ;;  %v626_v17 = vld [vmem:[#allocation8 + $0x200] sm:$0xff] }
  0x72   :  { %767 = vmatpush.msrb.mxu3 %v659_v11  ;;  %v631_v11 = vld [vmem:[#allocation8 + $0x228] sm:$0xff] }
  0x73   :  { %730 = vmatpush.msrb.mxu1 %v646_v19 }
  0x74   :  { %768 = vmatpush.msrb.mxu3 %v655_v16 }
  0x75   :  { %491 = vmatmul.f32.vlgmr.msra.gmra.mxu3 %v6895_v8  ;;  %731 = vmatpush.msrb.mxu1 %v642_v25  ;;  %v623_v25 = vld [vmem:[#allocation8 + $0x1e8] sm:$0xff] }
  0x76   :  { %769 = vmatpush.msrb.mxu3 %v651_v18  ;;  %v627_v18 = vld [vmem:[#allocation8 + $0x208] sm:$0xff]  ;;  %740 = vmatpush.msrb.mxu2 %v623_v25  ;;  %v677_v25 = vld [vmem:[#allocation8 + $0x398] sm:$0xff] }
  0x77   :  { %732 = vmatpush.msrb.mxu1 %v638_v58  ;;  %v689_v58 = vld [vmem:[#allocation8 + $0x3f8] sm:$0xff]  ;;  %v615_v8 = vld [vmem:[#allocation8 + $0x1a8] sm:$0xff] }
  0x78   :  { %770 = vmatpush.msrb.mxu3 %v647_v20  ;;  %v622_v20 = vld [vmem:[#allocation8 + $0x1e0] sm:$0xff] }
  0x79   :  { %733 = vmatpush.msrb.mxu1 %v634_v0  ;;  %700 = vmatpush.msrb.mxu0 %v622_v20  ;;  %v619_v0 = vld [vmem:[#allocation8 + $0x1c8] sm:$0xff]  ;;  %v676_v20 = vld [vmem:[#allocation8 + $0x390] sm:$0xff] }
  0x7a   :  { %771 = vmatpush.msrb.mxu3 %v643_v28  ;;  %v688_v28 = vld [vmem:[#allocation8 + $0x3f0] sm:$0xff]  ;;  %741 = vmatpush.msrb.mxu2 %v619_v0  ;;  %v607_v0 = vld [vmem:[#allocation8 + $0x168] sm:$0xff] }
  0x7b   :  { %734 = vmatpush.msrb.mxu1 %v630_v10  ;;  %v685_v10 = vld [vmem:[#allocation8 + $0x3d8] sm:$0xff] }
  0x7c   :  { %772 = vmatpush.msrb.mxu3 %v639_v61  ;;  %v618_v61 = vld [vmem:[#allocation8 + $0x1c0] sm:$0xff]  ;;  %742 = vmatpush.msrb.mxu2 %v615_v8  ;;  %v673_v8 = vld [vmem:[#allocation8 + $0x378] sm:$0xff] }
  0x7d   :  { %735 = vmatpush.msrb.mxu1 %v626_v17  ;;  %701 = vmatpush.msrb.mxu0 %v618_v61  ;;  %v610_v17 = vld [vmem:[#allocation8 + $0x180] sm:$0xff] }
  0x7e   :  { %773 = vmatpush.msrb.mxu3 %v635_v3  ;;  %v684_v3 = vld [vmem:[#allocation8 + $0x3d0] sm:$0xff]  ;;  %v606_v61 = vld [vmem:[#allocation8 + $0x160] sm:$0xff] }
  0x7f   :  { %800 = vmatpush.msra.mxu1 %v688_v28 }
  0x80   :  { %774 = vmatpush.msrb.mxu3 %v631_v11  ;;  %v614_v11 = vld [vmem:[#allocation8 + $0x1a0] sm:$0xff] }
  0x81   :  { %801 = vmatpush.msra.mxu1 %v684_v3  ;;  %702 = vmatpush.msrb.mxu0 %v614_v11  ;;  %v672_v3 = vld [vmem:[#allocation8 + $0x370] sm:$0xff]  ;;  %v603_v11 = vld [vmem:[#allocation8 + $0x148] sm:$0xff] }
  0x82   :  { %775 = vmatpush.msrb.mxu3 %v627_v18  ;;  %v611_v18 = vld [vmem:[#allocation8 + $0x188] sm:$0xff] }
  0x83   :  { %703 = vmatpush.msrb.mxu0 %v610_v17  ;;  %743 = vmatpush.msrb.mxu2 %v611_v18  ;;  %v599_v17 = vld [vmem:[#allocation8 + $0x128] sm:$0xff]  ;;  %v664_v18 = vld [vmem:[#allocation8 + $0x330] sm:$0xff] }
  0x84   :  { %840 = vmatpush.msra.mxu3 %v689_v58 }
  0x85   :  { %704 = vmatpush.msrb.mxu0 %v606_v61  ;;  %744 = vmatpush.msrb.mxu2 %v607_v0  ;;  %v660_v61 = vld [vmem:[#allocation8 + $0x310] sm:$0xff]  ;;  %v661_v0 = vld [vmem:[#allocation8 + $0x318] sm:$0xff] }
  0x86   :  { %841 = vmatpush.msra.mxu3 %v685_v10  ;;  %v602_v10 = vld [vmem:[#allocation8 + $0x140] sm:$0xff] }
  0x87   :  { %705 = vmatpush.msrb.mxu0 %v602_v10  ;;  %745 = vmatpush.msrb.mxu2 %v603_v11  ;;  %v590_v10 = vld [vmem:[#allocation8 + $0xe0] sm:$0xff]  ;;  %v591_v11 = vld [vmem:[#allocation8 + $0xe8] sm:$0xff] }
  0x89   :  { %746 = vmatpush.msrb.mxu2 %v599_v17  ;;  %v587_v17 = vld [vmem:[#allocation8 + $0xc8] sm:$0xff] }
  0x98   :  { %v5814_v34 = vpop.f32.mrf.mxu1 }
  0x99   :  { %6897 = vst [vmem:[#allocation14_spill] sm:$0xff] %v5814_v34  ;;  %v598_v34 = vld [vmem:[#allocation8 + $0x120] sm:$0xff] }
  0x9a   :  { %706 = vmatpush.msrb.mxu0 %v598_v34  ;;  %v657_v34 = vld [vmem:[#allocation8 + $0x2f8] sm:$0xff] }
  0x9f   :  { %v5828_v4 = vpop.f32.mrf.mxu3  ;;  %v5830_v5 = vpop.f32.mrf.mxu2 }
  0xa0   :  { %6898 = vst [vmem:[#allocation15_spill] sm:$0xff] %v5828_v4 }
  0xa1   :  { %v5832_v12 = vpop.f32.mrf.mxu1 }
  0xa7   :  { %v5834_v21 = vpop.f32.mrf.mxu3 }
  0xa8   :  { %6899 = vst [vmem:[#allocation16_spill] sm:$0xff] %v5834_v21  ;;  %v5836_v23 = vpop.f32.mrf.mxu2  ;;  %v681_v21 = vld [vmem:[#allocation8 + $0x3b8] sm:$0xff] }
  0xa9   :  { %v5838_v31 = vpop.f32.mrf.mxu1  ;;  %842 = vmatpush.msra.mxu3 %v681_v21  ;;  %v669_v21 = vld [vmem:[#allocation8 + $0x358] sm:$0xff] }
  0xab   :  { %843 = vmatpush.msra.mxu3 %v677_v25  ;;  %v595_v25 = vld [vmem:[#allocation8 + $0x108] sm:$0xff] }
  0xac   :  { %747 = vmatpush.msrb.mxu2 %v595_v25  ;;  %v583_v25 = vld [vmem:[#allocation8 + $0xa8] sm:$0xff] }
  0xad   :  { %844 = vmatpush.msra.mxu3 %v673_v8 }
  0xae   :  { %748 = vmatpush.msrb.mxu2 %v591_v11  ;;  %v579_v11 = vld [vmem:[#allocation8 + $0x88] sm:$0xff] }
  0xaf   :  { %v5840_v15 = vpop.f32.mrf.mxu3  ;;  %845 = vmatpush.msra.mxu3 %v669_v21  ;;  %v586_v21 = vld [vmem:[#allocation8 + $0xc0] sm:$0xff] }
  0xb0   :  { %6900 = vst [vmem:[#allocation17_spill] sm:$0xff] %v5840_v15  ;;  %v5842_v16 = vpop.f32.mrf.mxu2  ;;  %v680_v15 = vld [vmem:[#allocation8 + $0x3b0] sm:$0xff]  ;;  %749 = vmatpush.msrb.mxu2 %v587_v17 }
  0xb1   :  { %v5844_v19 = vpop.f32.mrf.mxu1  ;;  %802 = vmatpush.msra.mxu1 %v680_v15  ;;  %v668_v15 = vld [vmem:[#allocation8 + $0x350] sm:$0xff] }
  0xb2   :  { %750 = vmatpush.msrb.mxu2 %v583_v25  ;;  %v6908_v25 = vmov 0.0  }
  0xb3   :  { %803 = vmatpush.msra.mxu1 %v676_v20  ;;  %v594_v20 = vld [vmem:[#allocation8 + $0x100] sm:$0xff]  ;;  %776 = vmatmul.f32.vlgmr.msrb.gmra.mxu3 %v6908_v25 }
  0xb4   :  { %707 = vmatpush.msrb.mxu0 %v594_v20  ;;  %v582_v20 = vld [vmem:[#allocation8 + $0xa0] sm:$0xff]  ;;  %751 = vmatpush.msrb.mxu2 %v579_v11  ;;  %v636_v11 = vld [vmem:[#allocation8 + $0x250] sm:$0xff] }
  0xb5   :  { %804 = vmatpush.msra.mxu1 %v672_v3 }
  0xb6   :  { %708 = vmatpush.msrb.mxu0 %v590_v10  ;;  %v578_v10 = vld [vmem:[#allocation8 + $0x80] sm:$0xff]  ;;  %736 = vmatmul.f32.vlgmr.msrb.gmra.mxu1 %v6908_v25 }
  0xb7   :  { %v5846_v4 = vpop.f32.mrf.mxu3  ;;  %805 = vmatpush.msra.mxu1 %v668_v15  ;;  %v656_v15 = vld [vmem:[#allocation8 + $0x2f0] sm:$0xff] }
  0xb8   :  { %v5848_v28 = vpop.f32.mrf.mxu2  ;;  %709 = vmatpush.msrb.mxu0 %v586_v21  ;;  %v645_v21 = vld [vmem:[#allocation8 + $0x298] sm:$0xff] }
  0xb9   :  { %6901 = vst [vmem:[#allocation18_spill] sm:$0xff] %v5848_v28  ;;  %v5850_v58 = vpop.f32.mrf.mxu1  ;;  %v665_v28 = vld [vmem:[#allocation8 + $0x338] sm:$0xff]  ;;  %806 = vmatpush.msra.mxu1 %v664_v18  ;;  %v652_v18 = vld [vmem:[#allocation8 + $0x2d0] sm:$0xff] }
  0xba   :  { %6902 = vst [vmem:[#allocation19_spill] sm:$0xff] %v5850_v58  ;;  %846 = vmatpush.msra.mxu3 %v665_v28  ;;  %v653_v28 = vld [vmem:[#allocation8 + $0x2d8] sm:$0xff]  ;;  %710 = vmatpush.msrb.mxu0 %v582_v20  ;;  %v640_v20 = vld [vmem:[#allocation8 + $0x270] sm:$0xff] }
  0xbb   :  { %807 = vmatpush.msra.mxu1 %v660_v61  ;;  %v648_v61 = vld [vmem:[#allocation8 + $0x2b0] sm:$0xff] }
  0xbc   :  { %847 = vmatpush.msra.mxu3 %v661_v0  ;;  %v649_v0 = vld [vmem:[#allocation8 + $0x2b8] sm:$0xff]  ;;  %711 = vmatpush.msrb.mxu0 %v578_v10  ;;  %v571_v10 = vld [vmem:[#allocation8 + $0x48] sm:$0xff] }
  0xbd   :  { %808 = vmatpush.msra.mxu1 %v656_v15  ;;  %v644_v15 = vld [vmem:[#allocation8 + $0x290] sm:$0xff] }
  0xbe   :  { %848 = vmatpush.msra.mxu3 %v657_v34 }
  0xbf   :  { %v5852_v58 = vpop.f32.mrf.mxu3  ;;  %809 = vmatpush.msra.mxu1 %v652_v18  ;;  %v574_v18 = vld [vmem:[#allocation8 + $0x60] sm:$0xff] }
  0xc0   :  { %v5854_v3 = vpop.f32.mrf.mxu2  ;;  %849 = vmatpush.msra.mxu3 %v653_v28  ;;  %v575_v28 = vld [vmem:[#allocation8 + $0x68] sm:$0xff]  ;;  %712 = vmatpush.msrb.mxu0 %v574_v18  ;;  %v633_v18 = vld [vmem:[#allocation8 + $0x238] sm:$0xff] }
  0xc1   :  { %6903 = vst [vmem:[#allocation20_spill] sm:$0xff] %v5854_v3  ;;  %v5856_v8 = vpop.f32.mrf.mxu1  ;;  %810 = vmatpush.msra.mxu1 %v648_v61  ;;  %752 = vmatpush.msrb.mxu2 %v575_v28  ;;  %v641_v61 = vld [vmem:[#allocation8 + $0x278] sm:$0xff]  ;;  %v562_v28 = vld [vmem:[#allocation8] sm:$0xff] }
  0xc2   :  { %6904 = vst [vmem:[#allocation21_spill] sm:$0xff] %v5856_v8  ;;  %850 = vmatpush.msra.mxu3 %v649_v0  ;;  %v570_v0 = vld [vmem:[#allocation8 + $0x40] sm:$0xff] }
  0xc3   :  { %811 = vmatpush.msra.mxu1 %v644_v15  ;;  %713 = vmatpush.msrb.mxu0 %v570_v0  ;;  %v566_v15 = vld [vmem:[#allocation8 + $0x20] sm:$0xff] }
  0xc4   :  { %851 = vmatpush.msra.mxu3 %v645_v21  ;;  %753 = vmatpush.msrb.mxu2 %v571_v10  ;;  %v567_v21 = vld [vmem:[#allocation8 + $0x28] sm:$0xff]  ;;  %v624_v10 = vld [vmem:[#allocation8 + $0x1f0] sm:$0xff] }
  0xc5   :  { %812 = vmatpush.msra.mxu1 %v640_v20  ;;  %714 = vmatpush.msrb.mxu0 %v566_v15  ;;  %v563_v20 = vld [vmem:[#allocation8 + $0x8] sm:$0xff]  ;;  %v620_v15 = vld [vmem:[#allocation8 + $0x1d0] sm:$0xff] }
  0xc6   :  { %852 = vmatpush.msra.mxu3 %v641_v61  ;;  %754 = vmatpush.msrb.mxu2 %v567_v21  ;;  %v628_v61 = vld [vmem:[#allocation8 + $0x210] sm:$0xff]  ;;  %v621_v21 = vld [vmem:[#allocation8 + $0x1d8] sm:$0xff] }
  0xc7   :  { %v5858_v3 = vpop.f32.mrf.mxu3  ;;  %813 = vmatpush.msra.mxu1 %v636_v11  ;;  %715 = vmatpush.msrb.mxu0 %v562_v28  ;;  %v625_v11 = vld [vmem:[#allocation8 + $0x1f8] sm:$0xff] }
  0xc8   :  { %6905 = vst [vmem:[#allocation22_spill] sm:$0xff] %v5858_v3  ;;  %v5860_v34 = vpop.f32.mrf.mxu2  ;;  %755 = vmatpush.msrb.mxu2 %v563_v20  ;;  %v612_v20 = vld [vmem:[#allocation8 + $0x190] sm:$0xff] }
  0xc9   :  { %6906 = vst [vmem:[#allocation23_spill] sm:$0xff] %v5860_v34  ;;  %v5862_v17 = vpop.f32.mrf.mxu1  ;;  %v637_v34 = vld [vmem:[#allocation8 + $0x258] sm:$0xff]  ;;  %780 = vmatpush.msra.mxu0 %v624_v10 }
  0xca   :  { %6907 = vst [vmem:[#allocation24_spill] sm:$0xff] %v5862_v17  ;;  %853 = vmatpush.msra.mxu3 %v637_v34  ;;  %v632_v17 = vld [vmem:[#allocation8 + $0x230] sm:$0xff]  ;;  %v629_v34 = vld [vmem:[#allocation8 + $0x218] sm:$0xff]  ;;  %820 = vmatpush.msra.mxu2 %v625_v11 }
  0xcb   :  { %814 = vmatpush.msra.mxu1 %v632_v17  ;;  %781 = vmatpush.msra.mxu0 %v620_v15  ;;  %v616_v17 = vld [vmem:[#allocation8 + $0x1b0] sm:$0xff]  ;;  %v605_v10 = vld [vmem:[#allocation8 + $0x158] sm:$0xff] }
  0xcc   :  { %854 = vmatpush.msra.mxu3 %v633_v18  ;;  %821 = vmatpush.msra.mxu2 %v621_v21  ;;  %v617_v18 = vld [vmem:[#allocation8 + $0x1b8] sm:$0xff] }
  0xcd   :  { %815 = vmatpush.msra.mxu1 %v628_v61  ;;  %782 = vmatpush.msra.mxu0 %v616_v17  ;;  %v613_v61 = vld [vmem:[#allocation8 + $0x198] sm:$0xff] }
  0xce   :  { %855 = vmatpush.msra.mxu3 %v629_v34  ;;  %822 = vmatpush.msra.mxu2 %v617_v18  ;;  %v609_v34 = vld [vmem:[#allocation8 + $0x178] sm:$0xff]  ;;  %v596_v18 = vld [vmem:[#allocation8 + $0x110] sm:$0xff] }
  0xcf   :  { %1012 = vmatpush.msrb.mxu1 %v5625_v24  ;;  %v5883_v24 = vld [vmem:[%s6889_s3] sm:$0xf]  ;;  %783 = vmatpush.msra.mxu0 %v612_v20  ;;  %v601_v21 = vld [vmem:[#allocation8 + $0x138] sm:$0xff] }
  0xd0   :  { %v5866_v8 = vpop.f32.mrf.mxu3  ;;  %v5868_v3 = vpop.f32.mrf.mxu2  ;;  %1052 = vmatpush.msrb.mxu3 %v5627_v26  ;;  %823 = vmatpush.msra.mxu2 %v613_v61  ;;  %v5892_v11 = vperm.slane %v5883_v24, 0  ;;  %v5895_v15 = vperm.slane %v5883_v24, 1  ;;  %v597_v20 = vld [vmem:[#allocation8 + $0x118] sm:$0xff] }
  0xd1   :  { %v5870_v0 = vpop.f32.mrf.mxu1  ;;  %1013 = vmatpush.msrb.mxu1 %v5633_v27  ;;  %856 = vmatmul.f32.vlgmr.msra.gmra.mxu3 %v6908_v25 }
  0xd2   :  { %1053 = vmatpush.msrb.mxu3 %v5638_v29  ;;  %v608_v29 = vld [vmem:[#allocation8 + $0x170] sm:$0xff]  ;;  %824 = vmatpush.msra.mxu2 %v609_v34 }
  0xd3   :  { %1014 = vmatpush.msrb.mxu1 %v5640_v30  ;;  %v168_v30 = vpop.f32.mrf.mxu0  ;;  %784 = vmatpush.msra.mxu0 %v608_v29  ;;  %v593_v29 = vld [vmem:[#allocation8 + $0xf8] sm:$0xff] }
  0xd4   :  { %1054 = vmatpush.msrb.mxu3 %v5644_v32  ;;  %v604_v32 = vld [vmem:[#allocation8 + $0x150] sm:$0xff]  ;;  %825 = vmatpush.msra.mxu2 %v605_v10 }
  0xd5   :  { %1015 = vmatpush.msrb.mxu1 %v5646_v33  ;;  %785 = vmatpush.msra.mxu0 %v604_v32  ;;  %v600_v33 = vld [vmem:[#allocation8 + $0x130] sm:$0xff] }
  0xd6   :  { %1055 = vmatpush.msrb.mxu3 %v5666_v38  ;;  %v169_v38 = vadd.f32 %v168_v30, %v5892_v11  ;;  %826 = vmatpush.msra.mxu2 %v601_v21  ;;  %v588_v30 = vld [vmem:[#allocation8 + $0xd0] sm:$0xff]  ;;  %v581_v21 = vld [vmem:[#allocation8 + $0x98] sm:$0xff] }
  0xd7   :  { %1016 = vmatpush.msrb.mxu1 %v5662_v36  ;;  %786 = vmatpush.msra.mxu0 %v600_v33  ;;  %v210_v36 = vadd.f32 %v5832_v12, %v5895_v15  ;;  %v589_v12 = vld [vmem:[#allocation8 + $0xd8] sm:$0xff]  ;;  %v584_v10 = vld [vmem:[#allocation8 + $0xb0] sm:$0xff] }
  0xd8   :  { %v5876_v28 = vpop.f32.mrf.mxu3  ;;  %v5885_v26 = vpop.f32.mrf.mxu2  ;;  %1056 = vmatpush.msrb.mxu3 %v5677_v41  ;;  %827 = vmatpush.msra.mxu2 %v597_v20  ;;  %v585_v33 = vld [vmem:[#allocation8 + $0xb8] sm:$0xff] }
  0xd9   :  { %v5887_v27 = vpop.f32.mrf.mxu1  ;;  %1017 = vmatpush.msrb.mxu1 %v5672_v39  ;;  %787 = vmatpush.msra.mxu0 %v596_v18  ;;  %v592_v39 = vld [vmem:[#allocation8 + $0xf0] sm:$0xff] }
  0xda   :  { %1057 = vmatpush.msrb.mxu3 %v5683_v44  ;;  %828 = vmatpush.msra.mxu2 %v593_v29  ;;  %v572_v18 = vld [vmem:[#allocation8 + $0x50] sm:$0xff] }
  0xdb   :  { %1018 = vmatpush.msrb.mxu1 %v5679_v42  ;;  %788 = vmatpush.msra.mxu0 %v592_v39  ;;  %v5911_v42 = vperm.slane %v5883_v24, 2  ;;  %v565_v39 = vld [vmem:[#allocation8 + $0x18] sm:$0xff] }
  0xdc   :  { %1058 = vmatpush.msrb.mxu3 %v5700_v49  ;;  %829 = vmatpush.msra.mxu2 %v589_v12 }
  0xdd   :  { %1019 = vmatpush.msrb.mxu1 %v5685_v45  ;;  %789 = vmatpush.msra.mxu0 %v588_v30 }
  0xde   :  { %1059 = vmatpush.msrb.mxu3 %v5711_v52  ;;  %830 = vmatpush.msra.mxu2 %v585_v33  ;;  %v580_v52 = vld [vmem:[#allocation8 + $0x90] sm:$0xff] }
  0xdf   :  { %1020 = vmatpush.msrb.mxu1 %v5696_v47  ;;  %790 = vmatpush.msra.mxu0 %v584_v10  ;;  %v251_v47 = vadd.f32 %v5830_v5, %v5911_v42  ;;  %v573_v5 = vld [vmem:[#allocation8 + $0x58] sm:$0xff] }
  0xe0   :  { %v5902_v17 = vpop.f32.mrf.mxu3  ;;  %v432_v41 = vpop.f32.mrf.mxu2  ;;  %1060 = vmatpush.msrb.mxu3 %v5717_v55  ;;  %831 = vmatpush.msra.mxu2 %v581_v21 }
  0xe1   :  { %v452_v61 = vpop.f32.mrf.mxu1  ;;  %v495_v44 = vadd.f32 %v432_v41, %v169_v38  ;;  %1021 = vmatpush.msrb.mxu1 %v5706_v50  ;;  %791 = vmatpush.msra.mxu0 %v580_v52  ;;  %v576_v50 = vld [vmem:[#allocation8 + $0x70] sm:$0xff]  ;;  %v577_v38 = vld [vmem:[#allocation8 + $0x78] sm:$0xff] }
  0xe2   :  { %v496_v34 = vadd.f32 %v452_v61, %v210_v36  ;;  %1061 = vmatpush.msrb.mxu3 %v5729_v59  ;;  %816 = vmatmul.f32.vlgmr.msra.gmra.mxu1 %v6908_v25  ;;  %v569_v41 = vld [vmem:[#allocation8 + $0x38] sm:$0xff]  ;;  %v564_v61 = vld [vmem:[#allocation8 + $0x10] sm:$0xff] }
  0xe3   :  { %v5079_v49 = vmul.f32 -1.442695, %v495_v44  ;;  %1022 = vmatpush.msrb.mxu1 %v5714_v53  ;;  %792 = vmatpush.msra.mxu0 %v576_v50 }
  0xe4   :  { %v5080_v32 = vmul.f32 -1.442695, %v496_v34  ;;  %1062 = vmatpush.msrb.mxu3 %v5741_v62  ;;  %832 = vmatpush.msra.mxu2 %v577_v38 }
  0xe5   :  { %5145 = vpow2.f32 %v5079_v49  ;;  %1023 = vmatpush.msrb.mxu1 %v5720_v56  ;;  %v568_v56 = vld [vmem:[#allocation8 + $0x30] sm:$0xff]  ;;  %793 = vmatpush.msra.mxu0 %v572_v18 }
  0xe6   :  { %5147 = vpow2.f32 %v5080_v32  ;;  %1063 = vmatpush.msrb.mxu3 %v5748_v1  ;;  %833 = vmatpush.msra.mxu2 %v573_v5 }
  0xe7   :  { %1024 = vmatpush.msrb.mxu1 %v5726_v57  ;;  %794 = vmatpush.msra.mxu0 %v568_v56  ;;  %v5942_v57 = vperm.slane %v5883_v24, 3  ;;  %v988_v56 = vld [vmem:[#allocation6 + $0x1e0] sm:$0xff] }
  0xe8   :  { %v5917_v45 = vpop.f32.mrf.mxu3  ;;  %1064 = vmatpush.msrb.mxu3 %v5760_v6  ;;  %834 = vmatpush.msra.mxu2 %v569_v41  ;;  %v990_v41 = vld [vmem:[#allocation6 + $0x1f0] sm:$0xff] }
  0xe9   :  { %1025 = vmatpush.msrb.mxu1 %v5735_v60  ;;  %795 = vmatpush.msra.mxu0 %v564_v61  ;;  %v986_v61 = vld [vmem:[#allocation6 + $0x1d0] sm:$0xff] }
  0xea   :  { %v472_v55 = vpop.f32.mrf.mxu2  ;;  %1065 = vmatpush.msrb.mxu3 %v5762_v7  ;;  %835 = vmatpush.msra.mxu2 %v565_v39  ;;  %v980_v39 = vld [vmem:[#allocation6 + $0x1a0] sm:$0xff] }
  0xeb   :  { %v497_v59 = vadd.f32 %v472_v55, %v251_v47  ;;  %v5146_v20 = vpop.eup %5145  ;;  %1026 = vmatpush.msrb.mxu1 %v5743_v63  ;;  %v292_v63 = vadd.f32 %v5846_v4, %v5942_v57 }
  0xec   :  { %v5148_v62 = vpop.eup %5147  ;;  %v5927_v36 = vadd.f32 1.0, %v5146_v20  ;;  %1066 = vmatpush.msrb.mxu3 %v5770_v13 }
  0xed   :  { %v5081_v53 = vmul.f32 -1.442695, %v497_v59  ;;  %v5931_v1 = vadd.f32 1.0, %v5148_v62  ;;  %1027 = vmatpush.msrb.mxu1 %v5750_v2 }
  0xee   :  { %1067 = vmatpush.msrb.mxu3 %v5772_v14  ;;  %v522_v44 = vand.u32 2147483648, %v5927_v36  ;;  %vm516_vm3 = vweird.f32 %v5927_v36 }
  0xef   :  { %5149 = vpow2.f32 %v5081_v53  ;;  %1297 = vmatpush.msra.mxu1 %v5796_v9  ;;  %v537_v4 = vand.u32 2147483648, %v5931_v1  ;;  %vm531_vm4 = vweird.f32 %v5931_v1 }
  0xf0   :  { %5151 = vrcp.f32 %v5927_v36  ;;  %v5934_v25 = vpop.f32.mrf.mxu3  ;;  %1337 = vmatpush.msra.mxu3 %v5798_v35  ;;  %v523_v32 = vor.u32 1.1754944e-38, %v522_v44  ;;  %v956_v44 = vld [vmem:[#allocation6 + $0xe0] sm:$0xff] }
  0xf1   :  { %5153 = vrcp.f32 %v5931_v1  ;;  %1298 = vmatpush.msra.mxu1 %v5800_v37  ;;  %v538_v12 = vor.u32 1.1754944e-38, %v537_v4  ;;  %v958_v4 = vld [vmem:[#allocation6 + $0xf0] sm:$0xff] }
  0xf2   :  { %1338 = vmatpush.msra.mxu3 %v5804_v22  ;;  %v520_v22 = vand.u32 2147483647, %v5927_v36 }
  0xf3   :  { %1299 = vmatpush.msra.mxu1 %v5806_v40  ;;  %v535_v40 = vand.u32 2147483647, %v5931_v1 }
  0xf4   :  { %1339 = vmatpush.msra.mxu3 %v5808_v43  ;;  %vm521_vm7 = vcmp.eq.f32.partialorder %v520_v22, 8.507059e+37  ;;  %v948_v22 = vld [vmem:[#allocation6 + $0xa0] sm:$0xff] }
  0xf5   :  { %v5150_v60 = vpop.eup %5149  ;;  %1300 = vmatpush.msra.mxu1 %v5816_v46  ;;  %vm536_vm8 = vcmp.eq.f32.partialorder %v535_v40, 8.507059e+37  ;;  %v950_v40 = vld [vmem:[#allocation6 + $0xb0] sm:$0xff] }
  0xf6   :  { %v5152_v6 = vpop.eup %5151  ;;  %v510_v7 = vadd.f32 1.0, %v5150_v60  ;;  %1340 = vmatpush.msra.mxu3 %v5818_v48  ;;  %v982_v60 = vld [vmem:[#allocation6 + $0x1b0] sm:$0xff] }
  0xf7   :  { %v5154_v29 = vpop.eup %5153  ;;  %v512_v13 = vmul.f32 %v5152_v6, %v5927_v36  ;;  %vm517_vm1 = vweird.f32 %v5152_v6  ;;  %1301 = vmatpush.msra.mxu1 %v5822_v51 }
  0xf8   :  { %v527_v2 = vmul.f32 %v5154_v29, %v5931_v1  ;;  %5155 = vrcp.f32 %v510_v7  ;;  %v492_v14 = vpop.f32.mrf.mxu3  ;;  %vm532_vm2 = vweird.f32 %v5154_v29  ;;  %1341 = vmatpush.msra.mxu3 %v5824_v54  ;;  %vm518_vm5 = vmor %vm516_vm3, %vm517_vm1  ;;  %v552_v59 = vand.u32 2147483648, %v510_v7  ;;  %v984_v1 = vld [vmem:[#allocation6 + $0x1c0] sm:$0xff] }
  0xf9   :  { %v513_v24 = vsub.f32 1.0, %v512_v13  ;;  %v498_v9 = vadd.f32 %v492_v14, %v292_v63  ;;  %vm533_vm6 = vmor %vm531_vm4, %vm532_vm2  ;;  %vm546_vm10 = vweird.f32 %v510_v7  ;;  %v550_v18 = vand.u32 2147483647, %v510_v7  ;;  %v974_v63 = vld [vmem:[#allocation6 + $0x170] sm:$0xff]  ;;  %v968_v13 = vld [vmem:[#allocation6 + $0x140] sm:$0xff] }
  0xfa   :  { %v528_v35 = vsub.f32 1.0, %v527_v2  ;;  %v553_v20 = vor.u32 1.1754944e-38, %v552_v59  ;;  %v970_v2 = vld [vmem:[#allocation6 + $0x150] sm:$0xff]  ;;  %v964_v14 = vld [vmem:[#allocation6 + $0x120] sm:$0xff]  ;;  %v1236_v59 = vld [vmem:[#allocation8 + $0x308] sm:$0xff] }
  0xfb   :  { %v514_v34 = vmul.f32 %v5152_v6, %v513_v24  ;;  %5157 = vtanh.f32 %v498_v9  ;;  %vm551_vm12 = vcmp.eq.f32.partialorder %v550_v18, 8.507059e+37  ;;  %v966_v24 = vld [vmem:[#allocation6 + $0x130] sm:$0xff]  ;;  %v960_v9 = vld [vmem:[#allocation6 + $0x100] sm:$0xff] }
  0xfc   :  { %v529_v37 = vmul.f32 %v5154_v29, %v528_v35  ;;  %v962_v35 = vld [vmem:[#allocation6 + $0x110] sm:$0xff]  ;;  %v1231_v18 = vld [vmem:[#allocation8 + $0x2e0] sm:$0xff] }
  0xfd   :  { %v515_v30 = vadd.f32 %v5152_v6, %v514_v34  ;;  %v952_v34 = vld [vmem:[#allocation6 + $0xc0] sm:$0xff] }
  0xfe   :  { %v5156_v43 = vpop.eup %5155  ;;  %v530_v46 = vadd.f32 %v5154_v29, %v529_v37  ;;  %v954_v37 = vld [vmem:[#allocation6 + $0xd0] sm:$0xff] }
  0xff   :  { %v542_v48 = vmul.f32 %v5156_v43, %v510_v7  ;;  %v519_v49 = vsel %vm518_vm5, %v5152_v6, %v515_v30  ;;  %vm547_vm9 = vweird.f32 %v5156_v43  ;;  %v976_v6 = vld [vmem:[#allocation6 + $0x180] sm:$0xff]  ;;  %v978_v7 = vld [vmem:[#allocation6 + $0x190] sm:$0xff] }
 0x100   :  { %v534_v10 = vsel %vm533_vm6, %v5154_v29, %v530_v46  ;;  %v524_v21 = vsel %vm521_vm7, %v523_v32, %v519_v49  ;;  %vm548_vm11 = vmor %vm546_vm10, %vm547_vm9  ;;  %v972_v29 = vld [vmem:[#allocation6 + $0x160] sm:$0xff]  ;;  %v938_v49 = vld [vmem:[#allocation6 + $0x50] sm:$0xff] }
 0x101   :  { %v5158_v33 = vpop.eup %5157  ;;  %v543_v52 = vsub.f32 1.0, %v542_v48  ;;  %v539_v47 = vsel %vm536_vm8, %v538_v12, %v534_v10  ;;  %v944_v30 = vld [vmem:[#allocation6 + $0x80] sm:$0xff]  ;;  %v942_v12 = vld [vmem:[#allocation6 + $0x70] sm:$0xff] }
 0x102   :  { %v557_v51 = vmul.f32 0.0, %v539_v47  ;;  %v558_v55 = vmul.f32 %v5158_v33, %v524_v21  ;;  %v940_v46 = vld [vmem:[#allocation6 + $0x60] sm:$0xff]  ;;  %v934_v10 = vld [vmem:[#allocation6 + $0x30] sm:$0xff]  ;;  %v5979_v21 = vpop.f32.mrf.mxu0 }
 0x103   :  { %v544_v54 = vmul.f32 %v5156_v43, %v543_v52  ;;  %v936_v48 = vld [vmem:[#allocation6 + $0x40] sm:$0xff]  ;;  %v930_v52 = vld [vmem:[#allocation6 + $0x10] sm:$0xff] }
 0x104   :  { %v5966_v50 = vadd.f32 %v558_v55, %v557_v51  ;;  %v932_v32 = vld [vmem:[#allocation6 + $0x20] sm:$0xff]  ;;  %v1244_v51 = vld [vmem:[#allocation8 + $0x348] sm:$0xff] }
 0x105   :  { %v545_v38 = vadd.f32 %v5156_v43, %v544_v54  ;;  %v928_v33 = vld [vmem:[#allocation6] sm:$0xff]  ;;  %1342 = vmatpush.msra.mxu3 %v1244_v51  ;;  %v1240_v54 = vld [vmem:[#allocation8 + $0x328] sm:$0xff]  ;;  %v1258_v51 = vld [vmem:[#allocation8 + $0x3b8] sm:$0xff] }
 0x106   :  { %5159 = vtanh.f32 %v5966_v50  ;;  %v1243_v47 = vld [vmem:[#allocation8 + $0x340] sm:$0xff] }
 0x107   :  { %v549_v5 = vsel %vm548_vm11, %v5156_v43, %v545_v38  ;;  %v946_v43 = vld [vmem:[#allocation6 + $0x90] sm:$0xff]  ;;  %1302 = vmatpush.msra.mxu1 %v1243_v47  ;;  %v1239_v55 = vld [vmem:[#allocation8 + $0x320] sm:$0xff]  ;;  %1343 = vmatpush.msra.mxu3 %v1240_v54 }
 0x108   :  { %v554_v62 = vsel %vm551_vm12, %v553_v20, %v549_v5  ;;  %v1235_v38 = vld [vmem:[#allocation8 + $0x300] sm:$0xff]  ;;  %v1232_v5 = vld [vmem:[#allocation8 + $0x2e8] sm:$0xff]  ;;  %v1257_v47 = vld [vmem:[#allocation8 + $0x3b0] sm:$0xff] }
 0x109   :  { %1303 = vmatpush.msra.mxu1 %v1239_v55  ;;  %1344 = vmatpush.msra.mxu3 %v1236_v59  ;;  %v1227_v20 = vld [vmem:[#allocation8 + $0x2c0] sm:$0xff]  ;;  %v1172_v59 = vld [vmem:[#allocation8 + $0x108] sm:$0xff] }
 0x10b   :  { %1304 = vmatpush.msra.mxu1 %v1235_v38  ;;  %1345 = vmatpush.msra.mxu3 %v1232_v5  ;;  %v1171_v38 = vld [vmem:[#allocation8 + $0x100] sm:$0xff]  ;;  %v1254_v5 = vld [vmem:[#allocation8 + $0x398] sm:$0xff] }
 0x10c   :  { %v5160_v53 = vpop.eup %5159 }
 0x10d   :  { %v5969_v36 = vmul.f32 %v5160_v53, %v554_v62  ;;  %1305 = vmatpush.msra.mxu1 %v1231_v18  ;;  %v1228_v53 = vld [vmem:[#allocation8 + $0x2c8] sm:$0xff]  ;;  %v5981_v62 = vpop.f32.mrf.mxu0  ;;  %v1253_v18 = vld [vmem:[#allocation8 + $0x390] sm:$0xff] }
 0x10e   :  { %1346 = vmatpush.msra.mxu3 %v1228_v53  ;;  %v1168_v53 = vld [vmem:[#allocation8 + $0xe8] sm:$0xff] }
 0x10f   :  { %716 = vmatmul.f32.vlgmr.msrb.gmra.mxu0 %v5969_v36  ;;  %756 = vmatmul.f32.vlgmr.msrb.gmra.mxu2 %v5969_v36 }
 0x110   :  { %992 = vmatpush.msrb.mxu0 %v988_v56  ;;  %1028 = vmatmul.f32.vlgmr.msrb.gmra.mxu1 %v5969_v36  ;;  %v1224_v56 = vld [vmem:[#allocation8 + $0x2a8] sm:$0xff] }
 0x111   :  { %1032 = vmatpush.msrb.mxu2 %v990_v41  ;;  %1068 = vmatmul.f32.vlgmr.msrb.gmra.mxu3 %v5969_v36  ;;  %v1219_v41 = vld [vmem:[#allocation8 + $0x280] sm:$0xff] }
 0x112   :  { %993 = vmatpush.msrb.mxu0 %v984_v1  ;;  %1306 = vmatpush.msra.mxu1 %v1227_v20  ;;  %v1220_v1 = vld [vmem:[#allocation8 + $0x288] sm:$0xff]  ;;  %v1167_v20 = vld [vmem:[#allocation8 + $0xe0] sm:$0xff] }
 0x113   :  { %1033 = vmatpush.msrb.mxu2 %v986_v61  ;;  %1347 = vmatpush.msra.mxu3 %v1224_v56  ;;  %v1199_v61 = vld [vmem:[#allocation8 + $0x1e0] sm:$0xff] }
 0x114   :  { %994 = vmatpush.msrb.mxu0 %v980_v39  ;;  %v1200_v39 = vld [vmem:[#allocation8 + $0x1e8] sm:$0xff] }
 0x115   :  { %1034 = vmatpush.msrb.mxu2 %v982_v60  ;;  %1348 = vmatpush.msra.mxu3 %v1220_v1  ;;  %v1215_v60 = vld [vmem:[#allocation8 + $0x260] sm:$0xff] }
 0x116   :  { %995 = vmatpush.msrb.mxu0 %v976_v6  ;;  %v1216_v6 = vld [vmem:[#allocation8 + $0x268] sm:$0xff] }
 0x117   :  { %1035 = vmatpush.msrb.mxu2 %v978_v7  ;;  %796 = vmatmul.f32.vlgmr.msra.gmra.mxu0 %v5969_v36  ;;  %v1195_v7 = vld [vmem:[#allocation8 + $0x1c0] sm:$0xff] }
 0x118   :  { %836 = vmatmul.f32.vlgmr.msra.gmra.mxu2 %v5969_v36  ;;  %996 = vmatpush.msrb.mxu0 %v972_v29  ;;  %v1196_v29 = vld [vmem:[#allocation8 + $0x1c8] sm:$0xff] }
 0x119   :  { %1036 = vmatpush.msrb.mxu2 %v974_v63  ;;  %1349 = vmatpush.msra.mxu3 %v1216_v6  ;;  %v1211_v63 = vld [vmem:[#allocation8 + $0x240] sm:$0xff]  ;;  %v1246_v6 = vld [vmem:[#allocation8 + $0x358] sm:$0xff] }
 0x11a   :  { %997 = vmatpush.msrb.mxu0 %v968_v13  ;;  %v1212_v13 = vld [vmem:[#allocation8 + $0x248] sm:$0xff] }
 0x11b   :  { %1037 = vmatpush.msrb.mxu2 %v970_v2  ;;  %1350 = vmatpush.msra.mxu3 %v1212_v13  ;;  %v1160_v13 = vld [vmem:[#allocation8 + $0xa8] sm:$0xff] }
 0x11c   :  { %998 = vmatpush.msrb.mxu0 %v964_v14  ;;  %v1191_v14 = vld [vmem:[#allocation8 + $0x1a0] sm:$0xff] }
 0x11d   :  { %1038 = vmatpush.msrb.mxu2 %v966_v24  ;;  %v1192_v24 = vld [vmem:[#allocation8 + $0x1a8] sm:$0xff] }
 0x11e   :  { %999 = vmatpush.msrb.mxu0 %v960_v9  ;;  %v1207_v9 = vld [vmem:[#allocation8 + $0x220] sm:$0xff] }
 0x11f   :  { %1039 = vmatpush.msrb.mxu2 %v962_v35  ;;  %v1208_v35 = vld [vmem:[#allocation8 + $0x228] sm:$0xff] }
 0x120   :  { %1000 = vmatpush.msrb.mxu0 %v956_v44  ;;  %1351 = vmatpush.msra.mxu3 %v1208_v35  ;;  %v1187_v44 = vld [vmem:[#allocation8 + $0x180] sm:$0xff] }
 0x121   :  { %1040 = vmatpush.msrb.mxu2 %v958_v4  ;;  %v1188_v4 = vld [vmem:[#allocation8 + $0x188] sm:$0xff] }
 0x122   :  { %1001 = vmatpush.msrb.mxu0 %v952_v34  ;;  %v5985_v34 = vpop.f32.mrf.mxu0 }
 0x123   :  { %1041 = vmatpush.msrb.mxu2 %v954_v37  ;;  %v1203_v37 = vld [vmem:[#allocation8 + $0x200] sm:$0xff] }
 0x124   :  { %1002 = vmatpush.msrb.mxu0 %v948_v22  ;;  %v1204_v22 = vld [vmem:[#allocation8 + $0x208] sm:$0xff] }
 0x125   :  { %1042 = vmatpush.msrb.mxu2 %v950_v40  ;;  %1352 = vmatpush.msra.mxu3 %v1204_v22  ;;  %v1183_v40 = vld [vmem:[#allocation8 + $0x160] sm:$0xff] }
 0x126   :  { %1003 = vmatpush.msrb.mxu0 %v944_v30  ;;  %v1184_v30 = vld [vmem:[#allocation8 + $0x168] sm:$0xff] }
 0x127   :  { %1043 = vmatpush.msrb.mxu2 %v946_v43  ;;  %v1265_v43 = vld [vmem:[#allocation8 + $0x3f0] sm:$0xff] }
 0x128   :  { %1004 = vmatpush.msrb.mxu0 %v940_v46  ;;  %v1266_v46 = vld [vmem:[#allocation8 + $0x3f8] sm:$0xff] }
 0x129   :  { %1044 = vmatpush.msrb.mxu2 %v942_v12  ;;  %1417 = vmatpush.msrb.mxu3 %v1266_v46  ;;  %v1179_v12 = vld [vmem:[#allocation8 + $0x140] sm:$0xff]  ;;  %v1152_v46 = vld [vmem:[#allocation8 + $0x68] sm:$0xff] }
 0x12a   :  { %1005 = vmatpush.msrb.mxu0 %v936_v48  ;;  %v1180_v48 = vld [vmem:[#allocation8 + $0x148] sm:$0xff] }
 0x12b   :  { %1045 = vmatpush.msrb.mxu2 %v938_v49  ;;  %v1261_v49 = vld [vmem:[#allocation8 + $0x3d0] sm:$0xff] }
 0x12c   :  { %1006 = vmatpush.msrb.mxu0 %v932_v32  ;;  %v5990_v32 = vld [vmem:[%s6891_s5] sm:$0xf] }
 0x12d   :  { %1046 = vmatpush.msrb.mxu2 %v934_v10  ;;  %v1262_v10 = vld [vmem:[#allocation8 + $0x3d8] sm:$0xff]  ;;  %v692_v54 = vperm.slane %v5990_v32, 0  ;;  %v694_v35 = vperm.slane %v5990_v32, 2 }
 0x12e   :  { %1007 = vmatpush.msrb.mxu0 %v928_v33  ;;  %1418 = vmatpush.msrb.mxu3 %v1262_v10  ;;  %v1175_v33 = vld [vmem:[#allocation8 + $0x120] sm:$0xff] }
 0x12f   :  { %1047 = vmatpush.msrb.mxu2 %v930_v52  ;;  %1008 = vmatmul.f32.vlgmr.msrb.gmra.mxu0 %v5969_v36  ;;  %v1176_v52 = vld [vmem:[#allocation8 + $0x128] sm:$0xff] }
 0x130   :  { %1048 = vmatmul.f32.vlgmr.msrb.gmra.mxu2 %v5969_v36  ;;  %v1223_v36 = vld [vmem:[#allocation8 + $0x2a0] sm:$0xff]  ;;  %1277 = vmatpush.msra.mxu0 %v1199_v61 }
 0x131   :  { %1307 = vmatpush.msra.mxu1 %v1223_v36  ;;  %1317 = vmatpush.msra.mxu2 %v1200_v39  ;;  %v1249_v36 = vld [vmem:[#allocation8 + $0x370] sm:$0xff]  ;;  %v1163_v61 = vld [vmem:[#allocation8 + $0xc0] sm:$0xff]  ;;  %v1164_v39 = vld [vmem:[#allocation8 + $0xc8] sm:$0xff] }
 0x132   :  { %1278 = vmatpush.msra.mxu0 %v1195_v7  ;;  %1419 = vmatpush.msrb.mxu3 %v1258_v51  ;;  %v1147_v51 = vld [vmem:[#allocation8 + $0x40] sm:$0xff] }
 0x133   :  { %1308 = vmatpush.msra.mxu1 %v1219_v41  ;;  %1318 = vmatpush.msra.mxu2 %v1196_v29  ;;  %v5983_v2 = vpop.f32.mrf.mxu1  ;;  %v1250_v41 = vld [vmem:[#allocation8 + $0x378] sm:$0xff]  ;;  %v693_v29 = vperm.slane %v5990_v32, 1 }
 0x134   :  { %1279 = vmatpush.msra.mxu0 %v1191_v14  ;;  %1420 = vmatpush.msrb.mxu3 %v1254_v5  ;;  %v1241_v14 = vld [vmem:[#allocation8 + $0x330] sm:$0xff] }
 0x135   :  { %1309 = vmatpush.msra.mxu1 %v1215_v60  ;;  %1319 = vmatpush.msra.mxu2 %v1192_v24  ;;  %v1245_v60 = vld [vmem:[#allocation8 + $0x350] sm:$0xff]  ;;  %v1242_v24 = vld [vmem:[#allocation8 + $0x338] sm:$0xff] }
 0x136   :  { %1280 = vmatpush.msra.mxu0 %v1187_v44  ;;  %1421 = vmatpush.msrb.mxu3 %v1250_v41  ;;  %v1155_v44 = vld [vmem:[#allocation8 + $0x80] sm:$0xff] }
 0x137   :  { %1310 = vmatpush.msra.mxu1 %v1211_v63  ;;  %1320 = vmatpush.msra.mxu2 %v1188_v4  ;;  %v1159_v63 = vld [vmem:[#allocation8 + $0xa0] sm:$0xff]  ;;  %v1156_v4 = vld [vmem:[#allocation8 + $0x88] sm:$0xff] }
 0x138   :  { %1281 = vmatpush.msra.mxu0 %v1183_v40  ;;  %1422 = vmatpush.msrb.mxu3 %v1246_v6 }
 0x139   :  { %1311 = vmatpush.msra.mxu1 %v1207_v9  ;;  %1321 = vmatpush.msra.mxu2 %v1184_v30 }
 0x13a   :  { %1282 = vmatpush.msra.mxu0 %v1179_v12  ;;  %1423 = vmatpush.msrb.mxu3 %v1242_v24  ;;  %v1233_v12 = vld [vmem:[#allocation8 + $0x2f0] sm:$0xff] }
 0x13b   :  { %1312 = vmatpush.msra.mxu1 %v1203_v37  ;;  %1322 = vmatpush.msra.mxu2 %v1180_v48  ;;  %v1237_v37 = vld [vmem:[#allocation8 + $0x310] sm:$0xff]  ;;  %v213_v48 = vadd.f32 %v5838_v31, %v5895_v15  ;;  %v1143_v31 = vld [vmem:[#allocation8 + $0x20] sm:$0xff] }
 0x13c   :  { %1283 = vmatpush.msra.mxu0 %v1175_v33  ;;  %v1234_v33 = vld [vmem:[#allocation8 + $0x2f8] sm:$0xff]  ;;  %v1197_v24 = vld [vmem:[#allocation8 + $0x1d0] sm:$0xff] }
 0x13d   :  { %1377 = vmatpush.msrb.mxu1 %v1265_v43  ;;  %1323 = vmatpush.msra.mxu2 %v1176_v52  ;;  %v1151_v43 = vld [vmem:[#allocation8 + $0x60] sm:$0xff] }
 0x13e   :  { %1284 = vmatpush.msra.mxu0 %v1171_v38  ;;  %v1229_v38 = vld [vmem:[#allocation8 + $0x2d0] sm:$0xff] }
 0x13f   :  { %1378 = vmatpush.msrb.mxu1 %v1261_v49  ;;  %1324 = vmatpush.msra.mxu2 %v1172_v59  ;;  %v777_v49 = vpop.f32.mrf.mxu3 }
 0x140   :  { %1285 = vmatpush.msra.mxu0 %v1167_v20 }
 0x141   :  { %1379 = vmatpush.msrb.mxu1 %v1257_v47  ;;  %1325 = vmatpush.msra.mxu2 %v1168_v53  ;;  %v1144_v53 = vld [vmem:[#allocation8 + $0x28] sm:$0xff] }
 0x142   :  { %1286 = vmatpush.msra.mxu0 %v1163_v61  ;;  %v1139_v61 = vld [vmem:[#allocation8] sm:$0xff] }
 0x143   :  { %1380 = vmatpush.msrb.mxu1 %v1253_v18  ;;  %1326 = vmatpush.msra.mxu2 %v1164_v39  ;;  %v1230_v18 = vld [vmem:[#allocation8 + $0x2d8] sm:$0xff]  ;;  %v1140_v39 = vld [vmem:[#allocation8 + $0x8] sm:$0xff] }
 0x144   :  { %1287 = vmatpush.msra.mxu0 %v1159_v63  ;;  %v1202_v63 = vld [vmem:[#allocation8 + $0x1f8] sm:$0xff] }
 0x145   :  { %1381 = vmatpush.msrb.mxu1 %v1249_v36  ;;  %1327 = vmatpush.msra.mxu2 %v1160_v13  ;;  %v1225_v36 = vld [vmem:[#allocation8 + $0x2b0] sm:$0xff] }
 0x146   :  { %1288 = vmatpush.msra.mxu0 %v1155_v44  ;;  %v1217_v13 = vld [vmem:[#allocation8 + $0x270] sm:$0xff]  ;;  %v1214_v44 = vld [vmem:[#allocation8 + $0x258] sm:$0xff] }
 0x147   :  { %1382 = vmatpush.msrb.mxu1 %v1245_v60  ;;  %1328 = vmatpush.msra.mxu2 %v1156_v4  ;;  %v1221_v60 = vld [vmem:[#allocation8 + $0x290] sm:$0xff] }
 0x148   :  { %1289 = vmatpush.msra.mxu0 %v1151_v43  ;;  %v1193_v4 = vld [vmem:[#allocation8 + $0x1b0] sm:$0xff]  ;;  %v695_v43 = vperm.slane %v5990_v32, 3 }
 0x149   :  { %1383 = vmatpush.msrb.mxu1 %v1241_v14  ;;  %1329 = vmatpush.msra.mxu2 %v1152_v46  ;;  %v1218_v14 = vld [vmem:[#allocation8 + $0x278] sm:$0xff]  ;;  %v1189_v46 = vld [vmem:[#allocation8 + $0x190] sm:$0xff] }
 0x14a   :  { %1290 = vmatpush.msra.mxu0 %v1147_v51 }
 0x14b   :  { %1384 = vmatpush.msrb.mxu1 %v1237_v37  ;;  %v1194_v37 = vld [vmem:[#allocation8 + $0x1b8] sm:$0xff] }
 0x14c   :  { %1291 = vmatpush.msra.mxu0 %v1143_v31  ;;  %v1177_v31 = vld [vmem:[#allocation8 + $0x130] sm:$0xff] }
 0x14d   :  { %1385 = vmatpush.msrb.mxu1 %v1233_v12  ;;  %v1190_v12 = vld [vmem:[#allocation8 + $0x198] sm:$0xff] }
 0x14e   :  { %1292 = vmatpush.msra.mxu0 %v1139_v61 }
 0x14f   :  { %1386 = vmatpush.msrb.mxu1 %v1229_v38 }
 0x151   :  { %1387 = vmatpush.msrb.mxu1 %v1225_v36 }
 0x153   :  { %1388 = vmatpush.msrb.mxu1 %v1221_v60  ;;  %v1174_v60 = vld [vmem:[#allocation8 + $0x118] sm:$0xff] }
 0x154   :  { %v857_v36 = vpop.f32.mrf.mxu3 }
 0x155   :  { %1389 = vmatpush.msrb.mxu1 %v1217_v13  ;;  %v1169_v13 = vld [vmem:[#allocation8 + $0xf0] sm:$0xff] }
 0x15f   :  { %v5992_v55 = vpop.f32.mrf.mxu1 }
 0x18c   :  { %v717_v56 = vpop.f32.mrf.mxu0 }
 0x18d   :  { %v718_v1 = vadd.f32 %v717_v56, %v692_v54  ;;  %v1029_v40 = vpop.f32.mrf.mxu1  ;;  %v1148_v54 = vld [vmem:[#allocation8 + $0x48] sm:$0xff]  ;;  %v1226_v56 = vld [vmem:[#allocation8 + $0x2b8] sm:$0xff] }
 0x18e   :  { %v1073_v59 = vadd.f32 %v1029_v40, %v213_v48  ;;  %1330 = vmatpush.msra.mxu2 %v1148_v54  ;;  %v1210_v40 = vld [vmem:[#allocation8 + $0x238] sm:$0xff] }
 0x18f   :  { %v738_v7 = vadd.f32 %v5983_v2, %v718_v1  ;;  %v1238_v2 = vld [vmem:[#allocation8 + $0x318] sm:$0xff] }
 0x190   :  { %1424 = vmatpush.msrb.mxu3 %v1238_v2  ;;  %1331 = vmatpush.msra.mxu2 %v1144_v53  ;;  %v1209_v2 = vld [vmem:[#allocation8 + $0x230] sm:$0xff]  ;;  %v1178_v53 = vld [vmem:[#allocation8 + $0x138] sm:$0xff] }
 0x191   :  { %v5082_v9 = vmul.f32 -1.442695, %v738_v7  ;;  %v5086_v7 = vmul.f32 -1.442695, %v1073_v59 }
 0x192   :  { %v757_v22 = vpop.f32.mrf.mxu2  ;;  %1425 = vmatpush.msrb.mxu3 %v1234_v33  ;;  %1332 = vmatpush.msra.mxu2 %v1140_v39  ;;  %v1173_v39 = vld [vmem:[#allocation8 + $0x110] sm:$0xff] }
 0x193   :  { %5161 = vpow2.f32 %v5082_v9  ;;  %v758_v30 = vadd.f32 %v757_v22, %v693_v29  ;;  %v1201_v29 = vld [vmem:[#allocation8 + $0x1f0] sm:$0xff]  ;;  %v1198_v9 = vld [vmem:[#allocation8 + $0x1d8] sm:$0xff] }
 0x194   :  { %v797_v10 = vpop.f32.mrf.mxu0  ;;  %1426 = vmatpush.msrb.mxu3 %v1230_v18  ;;  %1357 = vmatpush.msrb.mxu0 %v1201_v29  ;;  %v1181_v18 = vld [vmem:[#allocation8 + $0x150] sm:$0xff] }
 0x195   :  { %v778_v52 = vadd.f32 %v777_v49, %v758_v30  ;;  %v798_v47 = vadd.f32 %v797_v10, %v694_v35  ;;  %1397 = vmatpush.msrb.mxu2 %v1202_v63  ;;  %v1213_v35 = vld [vmem:[#allocation8 + $0x250] sm:$0xff]  ;;  %v1206_v10 = vld [vmem:[#allocation8 + $0x218] sm:$0xff] }
 0x196   :  { %1427 = vmatpush.msrb.mxu3 %v1226_v56  ;;  %1358 = vmatpush.msrb.mxu0 %v1197_v24  ;;  %v1205_v49 = vld [vmem:[#allocation8 + $0x210] sm:$0xff]  ;;  %v172_v24 = vadd.f32 %v5979_v21, %v5892_v11 }
 0x197   :  { %v5083_v5 = vmul.f32 -1.442695, %v778_v52  ;;  %v818_v20 = vadd.f32 %v5992_v55, %v798_v47  ;;  %v1222_v55 = vld [vmem:[#allocation8 + $0x298] sm:$0xff]  ;;  %1398 = vmatpush.msrb.mxu2 %v1198_v9  ;;  %1390 = vmatpush.msrb.mxu1 %v1213_v35  ;;  %v1185_v52 = vld [vmem:[#allocation8 + $0x170] sm:$0xff] }
 0x198   :  { %1428 = vmatpush.msrb.mxu3 %v1222_v55  ;;  %1359 = vmatpush.msrb.mxu0 %v1193_v4  ;;  %v1186_v47 = vld [vmem:[#allocation8 + $0x178] sm:$0xff]  ;;  %v1165_v21 = vld [vmem:[#allocation8 + $0xd0] sm:$0xff] }
 0x199   :  { %v5162_v41 = vpop.eup %5161  ;;  %5163 = vpow2.f32 %v5083_v5  ;;  %v5084_v1 = vmul.f32 -1.442695, %v818_v20  ;;  %1399 = vmatpush.msrb.mxu2 %v1194_v37  ;;  %1391 = vmatpush.msrb.mxu1 %v1209_v2  ;;  %v1182_v5 = vld [vmem:[#allocation8 + $0x158] sm:$0xff] }
 0x19a   :  { %v6001_v6 = vadd.f32 1.0, %v5162_v41  ;;  %1429 = vmatpush.msrb.mxu3 %v1218_v14  ;;  %1360 = vmatpush.msrb.mxu0 %v1189_v46  ;;  %v1170_v14 = vld [vmem:[#allocation8 + $0xf8] sm:$0xff] }
 0x19b   :  { %v837_v48 = vpop.f32.mrf.mxu2  ;;  %1400 = vmatpush.msrb.mxu2 %v1190_v12  ;;  %1392 = vmatpush.msrb.mxu1 %v1205_v49  ;;  %v1166_v2 = vld [vmem:[#allocation8 + $0xd8] sm:$0xff] }
 0x19c   :  { %5165 = vrcp.f32 %v6001_v6  ;;  %1430 = vmatpush.msrb.mxu3 %v1214_v44  ;;  %v838_v59 = vadd.f32 %v837_v48, %v695_v43  ;;  %1361 = vmatpush.msrb.mxu0 %v1185_v52  ;;  %v881_v29 = vand.u32 2147483647, %v6001_v6  ;;  %v883_v63 = vand.u32 2147483648, %v6001_v6  ;;  %v1161_v48 = vld [vmem:[#allocation8 + $0xb0] sm:$0xff]  ;;  %v1162_v49 = vld [vmem:[#allocation8 + $0xb8] sm:$0xff] }
 0x19d   :  { %5167 = vpow2.f32 %v5084_v1  ;;  %1401 = vmatpush.msrb.mxu2 %v1186_v47  ;;  %vm877_vm14 = vweird.f32 %v6001_v6  ;;  %v1142_v4 = vld [vmem:[#allocation8 + $0x18] sm:$0xff] }
 0x19e   :  { %5169 = vpow2.f32 %v5086_v7  ;;  %1431 = vmatpush.msrb.mxu3 %v1210_v40  ;;  %1362 = vmatpush.msrb.mxu0 %v1181_v18  ;;  %v858_v61 = vadd.f32 %v857_v36, %v838_v59  ;;  %vm882_vm1 = vcmp.eq.f32.partialorder %v881_v29, 8.507059e+37  ;;  %v884_v12 = vor.u32 1.1754944e-38, %v883_v63  ;;  %v1154_v36 = vld [vmem:[#allocation8 + $0x78] sm:$0xff] }
 0x19f   :  { %v5164_v22 = vpop.eup %5163  ;;  %1402 = vmatpush.msrb.mxu2 %v1182_v5 }
 0x1a0   :  { %v6004_v30 = vadd.f32 1.0, %v5164_v22  ;;  %1432 = vmatpush.msrb.mxu3 %v1206_v10  ;;  %1363 = vmatpush.msrb.mxu0 %v1177_v31 }
 0x1a1   :  { %1403 = vmatpush.msrb.mxu2 %v1178_v53  ;;  %v1153_v53 = vld [vmem:[#allocation8 + $0x70] sm:$0xff] }
 0x1a2   :  { %v6007_v33 = vpop.eup %5165  ;;  %5171 = vrcp.f32 %v6004_v30  ;;  %1364 = vmatpush.msrb.mxu0 %v1173_v39  ;;  %v898_v44 = vand.u32 2147483648, %v6004_v30  ;;  %v896_v37 = vand.u32 2147483647, %v6004_v30  ;;  %vm892_vm2 = vweird.f32 %v6004_v30 }
 0x1a3   :  { %v5168_v51 = vpop.eup %5167  ;;  %v873_v32 = vmul.f32 %v6007_v33, %v6001_v6  ;;  %vm878_vm13 = vweird.f32 %v6007_v33  ;;  %1404 = vmatpush.msrb.mxu2 %v1174_v60 }
 0x1a4   :  { %v5170_v54 = vpop.eup %5169  ;;  %v6012_v38 = vadd.f32 1.0, %v5168_v51  ;;  %vm6030_vm15 = vmor %vm877_vm14, %vm878_vm13  ;;  %1365 = vmatpush.msrb.mxu0 %v1169_v13  ;;  %v899_v51 = vor.u32 1.1754944e-38, %v898_v44  ;;  %vm897_vm4 = vcmp.eq.f32.partialorder %v896_v37, 8.507059e+37  ;;  %v1145_v13 = vld [vmem:[#allocation8 + $0x30] sm:$0xff] }
 0x1a5   :  { %v874_v20 = vsub.f32 1.0, %v873_v32  ;;  %v6015_v56 = vadd.f32 1.0, %v5170_v54  ;;  %1405 = vmatpush.msrb.mxu2 %v1170_v14  ;;  %v1157_v54 = vld [vmem:[#allocation8 + $0x90] sm:$0xff]  ;;  %v1146_v14 = vld [vmem:[#allocation8 + $0x38] sm:$0xff] }
 0x1a6   :  { %5173 = vrcp.f32 %v6012_v38  ;;  %1366 = vmatpush.msrb.mxu0 %v1165_v21  ;;  %v1141_v44 = vld [vmem:[#allocation8 + $0x10] sm:$0xff]  ;;  %vm907_vm6 = vweird.f32 %v6012_v38 }
 0x1a7   :  { %v875_v41 = vmul.f32 %v6007_v33, %v874_v20  ;;  %5175 = vrcp.f32 %v6015_v56  ;;  %1406 = vmatpush.msrb.mxu2 %v1166_v2  ;;  %vm1108_vm10 = vweird.f32 %v6015_v56 }
 0x1a8   :  { %v5172_v1 = vpop.eup %5171  ;;  %5177 = vtanh.f32 %v858_v61  ;;  %1367 = vmatpush.msrb.mxu0 %v1161_v48  ;;  %v295_v48 = vadd.f32 %v5852_v58, %v5942_v57 }
 0x1a9   :  { %v888_v7 = vmul.f32 %v5172_v1, %v6004_v30  ;;  %v876_v55 = vadd.f32 %v6007_v33, %v875_v41  ;;  %vm893_vm0 = vweird.f32 %v5172_v1  ;;  %1407 = vmatpush.msrb.mxu2 %v1162_v49  ;;  %v254_v30 = vadd.f32 %v5836_v23, %v5911_v42 }
 0x1aa   :  { %vm894_vm3 = vmor %vm892_vm2, %vm893_vm0  ;;  %1368 = vmatpush.msrb.mxu0 %v1157_v54  ;;  %v1564_v54 = vld [vmem:[#allocation6 + $0x1d8] sm:$0xff] }
 0x1ab   :  { %v889_v9 = vsub.f32 1.0, %v888_v7  ;;  %v880_v43 = vsel %vm6030_vm15, %v6007_v33, %v876_v55  ;;  %v1158_v33 = vld [vmem:[#allocation8 + $0x98] sm:$0xff] }
 0x1ac   :  { %v6027_v35 = vpop.eup %5173  ;;  %v1009_v22 = vpop.f32.mrf.mxu0  ;;  %v885_v32 = vsel %vm882_vm1, %v884_v12, %v880_v43  ;;  %1408 = vmatpush.msrb.mxu2 %v1158_v33  ;;  %1369 = vmatpush.msrb.mxu0 %v1153_v53  ;;  %v1150_v7 = vld [vmem:[#allocation8 + $0x58] sm:$0xff] }
 0x1ad   :  { %v890_v40 = vmul.f32 %v5172_v1, %v889_v9  ;;  %v903_v6 = vmul.f32 %v6027_v35, %v6012_v38  ;;  %v1072_v46 = vadd.f32 %v1009_v22, %v172_v24  ;;  %v6042_v59 = vpop.eup %5175  ;;  %vm908_vm5 = vweird.f32 %v6027_v35 }
 0x1ae   :  { %v5178_v5 = vpop.eup %5177  ;;  %1409 = vmatpush.msrb.mxu2 %v1154_v36  ;;  %v1104_v55 = vmul.f32 %v6042_v59, %v6015_v56  ;;  %v913_v9 = vand.u32 2147483648, %v6012_v38  ;;  %v911_v22 = vand.u32 2147483647, %v6012_v38  ;;  %vm909_vm7 = vmor %vm907_vm6, %vm908_vm5  ;;  %vm1109_vm9 = vweird.f32 %v6042_v59 }
 0x1af   :  { %v904_v10 = vsub.f32 1.0, %v903_v6  ;;  %v891_v52 = vadd.f32 %v5172_v1, %v890_v40  ;;  %v5085_v47 = vmul.f32 -1.442695, %v1072_v46  ;;  %v919_v61 = vmul.f32 %v5178_v5, %v885_v32  ;;  %v1069_v46 = vpop.f32.mrf.mxu3  ;;  %v1562_v32 = vld [vmem:[#allocation6 + $0x1c8] sm:$0xff]  ;;  %vm6079_vm11 = vmor %vm1108_vm10, %vm1109_vm9 }
 0x1b0   :  { %1410 = vmatpush.msrb.mxu2 %v1150_v7  ;;  %v1105_v21 = vsub.f32 1.0, %v1104_v55  ;;  %v914_v40 = vor.u32 1.1754944e-38, %v913_v9  ;;  %vm912_vm8 = vcmp.eq.f32.partialorder %v911_v22, 8.507059e+37  ;;  %v1558_v5 = vld [vmem:[#allocation6 + $0x1a8] sm:$0xff]  ;;  %v1552_v55 = vld [vmem:[#allocation6 + $0x178] sm:$0xff] }
 0x1b1   :  { %v895_v18 = vsel %vm894_vm3, %v5172_v1, %v891_v52  ;;  %5179 = vpow2.f32 %v5085_v47  ;;  %v905_v20 = vmul.f32 %v6027_v35, %v904_v10  ;;  %v1149_v1 = vld [vmem:[#allocation8 + $0x50] sm:$0xff]  ;;  %v1566_v10 = vld [vmem:[#allocation6 + $0x1e8] sm:$0xff]  ;;  %v1568_v52 = vld [vmem:[#allocation6 + $0x1f8] sm:$0xff] }
 0x1b2   :  { %v900_v31 = vsel %vm897_vm4, %v899_v51, %v895_v18  ;;  %1370 = vmatpush.msrb.mxu0 %v1149_v1  ;;  %1411 = vmatpush.msrb.mxu2 %v1146_v14  ;;  %v1106_v43 = vmul.f32 %v6042_v59, %v1105_v21  ;;  %v1075_v51 = vadd.f32 %v1069_v46, %v295_v48  ;;  %v1114_v18 = vand.u32 2147483648, %v6015_v56  ;;  %v1550_v7 = vld [vmem:[#allocation6 + $0x168] sm:$0xff]  ;;  %v1548_v9 = vld [vmem:[#allocation6 + $0x158] sm:$0xff] }
 0x1b3   :  { %v918_v41 = vmul.f32 0.0, %v900_v31  ;;  %v1049_v39 = vpop.f32.mrf.mxu2  ;;  %v906_v63 = vadd.f32 %v6027_v35, %v905_v20  ;;  %v1112_v20 = vand.u32 2147483647, %v6015_v56  ;;  %v1542_v21 = vld [vmem:[#allocation6 + $0x128] sm:$0xff] }
 0x1b4   :  { %v1074_v60 = vadd.f32 %v1049_v39, %v254_v30  ;;  %1371 = vmatpush.msrb.mxu0 %v1145_v13  ;;  %1412 = vmatpush.msrb.mxu2 %v1142_v4  ;;  %v1107_v33 = vadd.f32 %v6042_v59, %v1106_v43  ;;  %v1560_v30 = vld [vmem:[#allocation6 + $0x1b8] sm:$0xff]  ;;  %v1115_v1 = vor.u32 1.1754944e-38, %v1114_v18  ;;  %v1538_v46 = vld [vmem:[#allocation6 + $0x108] sm:$0xff] }
 0x1b5   :  { %v6049_v29 = vadd.f32 %v919_v61, %v918_v41  ;;  %v910_v2 = vsel %vm909_vm7, %v6027_v35, %v906_v63  ;;  %v1554_v41 = vld [vmem:[#allocation6 + $0x188] sm:$0xff]  ;;  %v1556_v61 = vld [vmem:[#allocation6 + $0x198] sm:$0xff]  ;;  %vm1113_vm13 = vcmp.eq.f32.partialorder %v1112_v20, 8.507059e+37 }
 0x1b6   :  { %v5087_v23 = vmul.f32 -1.442695, %v1074_v60  ;;  %1372 = vmatpush.msrb.mxu0 %v1141_v44  ;;  %v915_v12 = vsel %vm912_vm8, %v914_v40, %v910_v2  ;;  %v1111_v39 = vsel %vm6079_vm11, %v6042_v59, %v1107_v33  ;;  %v1544_v2 = vld [vmem:[#allocation6 + $0x138] sm:$0xff]  ;;  %v1526_v33 = vld [vmem:[#allocation6 + $0xa8] sm:$0xff] }
 0x1b7   :  { %v5180_v24 = vpop.eup %5179  ;;  %5181 = vtanh.f32 %v6049_v29  ;;  %v1116_v13 = vsel %vm1113_vm13, %v1115_v1, %v1111_v39  ;;  %v1561_v39 = vld [vmem:[#allocation6 + $0x1c0] sm:$0xff]  ;;  %v1516_v1 = vld [vmem:[#allocation6 + $0x58] sm:$0xff] }
 0x1b8   :  { %v6055_v37 = vadd.f32 1.0, %v5180_v24  ;;  %5183 = vpow2.f32 %v5087_v23  ;;  %v1546_v24 = vld [vmem:[#allocation6 + $0x148] sm:$0xff]  ;;  %v1134_v40 = vmul.f32 %v1116_v13, %v5966_v50  ;;  %v1553_v13 = vld [vmem:[#allocation6 + $0x180] sm:$0xff] }
 0x1ba   :  { %5185 = vrcp.f32 %v6055_v37  ;;  %v1099_v36 = vand.u32 2147483648, %v6055_v37  ;;  %v1097_v56 = vand.u32 2147483647, %v6055_v37  ;;  %vm1093_vm14 = vweird.f32 %v6055_v37 }
 0x1bc   :  { %v1100_v14 = vor.u32 1.1754944e-38, %v1099_v36  ;;  %vm1098_vm0 = vcmp.eq.f32.partialorder %v1097_v56, 8.507059e+37  ;;  %v1567_v36 = vld [vmem:[#allocation6 + $0x1f0] sm:$0xff]  ;;  %v1514_v56 = vld [vmem:[#allocation6 + $0x48] sm:$0xff] }
 0x1bd   :  { %v5182_v6 = vpop.eup %5181 }
 0x1be   :  { %v5184_v38 = vpop.eup %5183  ;;  %v6066_v49 = vmul.f32 %v5182_v6, %v915_v12  ;;  %v1540_v12 = vld [vmem:[#allocation6 + $0x118] sm:$0xff] }
 0x1bf   :  { %v6068_v47 = vadd.f32 1.0, %v5184_v38 }
 0x1c0   :  { %v5186_v35 = vpop.eup %5185  ;;  %1313 = vmatmul.f32.vlgmr.msra.gmra.mxu1 %v6066_v49  ;;  %1353 = vmatmul.f32.vlgmr.msra.gmra.mxu3 %v6066_v49 }
 0x1c1   :  { %v1089_v58 = vmul.f32 %v5186_v35, %v6055_v37  ;;  %5187 = vrcp.f32 %v6068_v47  ;;  %1589 = vmatpush.msra.mxu1 %v1566_v10  ;;  %1629 = vmatpush.msra.mxu3 %v1568_v52  ;;  %vm1094_vm12 = vweird.f32 %v5186_v35  ;;  %v1534_v10 = vld [vmem:[#allocation6 + $0xe8] sm:$0xff]  ;;  %v1536_v52 = vld [vmem:[#allocation6 + $0xf8] sm:$0xff]  ;;  %vm1123_vm2 = vweird.f32 %v6068_v47 }
 0x1c2   :  { %5189 = vtanh.f32 %v1075_v51  ;;  %vm1095_vm15 = vmor %vm1093_vm14, %vm1094_vm12  ;;  %v1127_v50 = vand.u32 2147483647, %v6068_v47  ;;  %v1530_v51 = vld [vmem:[#allocation6 + $0xc8] sm:$0xff] }
 0x1c3   :  { %v1090_v31 = vsub.f32 1.0, %v1089_v58  ;;  %1590 = vmatpush.msra.mxu1 %v1562_v32  ;;  %1630 = vmatpush.msra.mxu3 %v1564_v54  ;;  %v1532_v32 = vld [vmem:[#allocation6 + $0xd8] sm:$0xff] }
 0x1c4   :  { %v1528_v58 = vld [vmem:[#allocation6 + $0xb8] sm:$0xff]  ;;  %vm1128_vm4 = vcmp.eq.f32.partialorder %v1127_v50, 8.507059e+37  ;;  %v1517_v50 = vld [vmem:[#allocation6 + $0x60] sm:$0xff] }
 0x1c5   :  { %v1091_v60 = vmul.f32 %v5186_v35, %v1090_v31  ;;  %1591 = vmatpush.msra.mxu1 %v1558_v5  ;;  %1631 = vmatpush.msra.mxu3 %v1560_v30  ;;  %v1522_v5 = vld [vmem:[#allocation6 + $0x88] sm:$0xff]  ;;  %v1524_v30 = vld [vmem:[#allocation6 + $0x98] sm:$0xff] }
 0x1c7   :  { %v5188_v23 = vpop.eup %5187  ;;  %v1092_v63 = vadd.f32 %v5186_v35, %v1091_v60  ;;  %1592 = vmatpush.msra.mxu1 %v1554_v41  ;;  %1632 = vmatpush.msra.mxu3 %v1556_v61  ;;  %v1518_v41 = vld [vmem:[#allocation6 + $0x68] sm:$0xff]  ;;  %v1520_v61 = vld [vmem:[#allocation6 + $0x78] sm:$0xff]  ;;  %v1563_v60 = vld [vmem:[#allocation6 + $0x1d0] sm:$0xff] }
 0x1c8   :  { %v1119_v59 = vmul.f32 %v5188_v23, %v6068_v47  ;;  %1393 = vmatmul.f32.vlgmr.msrb.gmra.mxu1 %v6066_v49  ;;  %1433 = vmatmul.f32.vlgmr.msrb.gmra.mxu3 %v6066_v49  ;;  %v5190_v4 = vpop.eup %5189  ;;  %vm1124_vm1 = vweird.f32 %v5188_v23 }
 0x1c9   :  { %v1096_v44 = vsel %vm1095_vm15, %v5186_v35, %v1092_v63  ;;  %1593 = vmatpush.msra.mxu1 %v1550_v7  ;;  %1633 = vmatpush.msra.mxu3 %v1552_v55  ;;  %v1129_v35 = vand.u32 2147483648, %v6068_v47  ;;  %vm1125_vm3 = vmor %vm1123_vm2, %vm1124_vm1  ;;  %v1565_v47 = vld [vmem:[#allocation6 + $0x1e0] sm:$0xff]  ;;  %v1559_v55 = vld [vmem:[#allocation6 + $0x1b0] sm:$0xff] }
 0x1ca   :  { %v1101_v22 = vsel %vm1098_vm0, %v1100_v14, %v1096_v44  ;;  %v1120_v37 = vsub.f32 1.0, %v1119_v59  ;;  %v1557_v7 = vld [vmem:[#allocation6 + $0x1a0] sm:$0xff]  ;;  %v1512_v63 = vld [vmem:[#allocation6 + $0x38] sm:$0xff]  ;;  %v1555_v14 = vld [vmem:[#allocation6 + $0x190] sm:$0xff] }
 0x1cb   :  { %v1135_v6 = vmul.f32 %v5190_v4, %v1101_v22  ;;  %1594 = vmatpush.msra.mxu1 %v1546_v24  ;;  %1634 = vmatpush.msra.mxu3 %v1548_v9  ;;  %v1130_v18 = vor.u32 1.1754944e-38, %v1129_v35  ;;  %v1506_v59 = vld [vmem:[#allocation6 + $0x8] sm:$0xff]  ;;  %v1508_v24 = vld [vmem:[#allocation6 + $0x18] sm:$0xff]  ;;  %v1549_v9 = vld [vmem:[#allocation6 + $0x160] sm:$0xff] }
 0x1cc   :  { %v1121_v43 = vmul.f32 %v5188_v23, %v1120_v37  ;;  %v1551_v44 = vld [vmem:[#allocation6 + $0x170] sm:$0xff]  ;;  %v1545_v4 = vld [vmem:[#allocation6 + $0x140] sm:$0xff] }
 0x1cd   :  { %v6093_v38 = vadd.f32 %v1135_v6, %v1134_v40  ;;  %1595 = vmatpush.msra.mxu1 %v1542_v21  ;;  %1635 = vmatpush.msra.mxu3 %v1544_v2  ;;  %v1547_v22 = vld [vmem:[#allocation6 + $0x150] sm:$0xff]  ;;  %v1541_v37 = vld [vmem:[#allocation6 + $0x120] sm:$0xff] }
 0x1ce   :  { %v1122_v48 = vadd.f32 %v5188_v23, %v1121_v43  ;;  %v1543_v21 = vld [vmem:[#allocation6 + $0x130] sm:$0xff]  ;;  %v1537_v2 = vld [vmem:[#allocation6 + $0x100] sm:$0xff] }
 0x1cf   :  { %5191 = vtanh.f32 %v6093_v38  ;;  %1596 = vmatpush.msra.mxu1 %v1538_v46  ;;  %1636 = vmatpush.msra.mxu3 %v1540_v12  ;;  %v1539_v40 = vld [vmem:[#allocation6 + $0x110] sm:$0xff]  ;;  %v1533_v6 = vld [vmem:[#allocation6 + $0xe0] sm:$0xff] }
 0x1d0   :  { %v1126_v54 = vsel %vm1125_vm3, %v5188_v23, %v1122_v48  ;;  %v1510_v23 = vld [vmem:[#allocation6 + $0x28] sm:$0xff]  ;;  %v1535_v43 = vld [vmem:[#allocation6 + $0xf0] sm:$0xff]  ;;  %v1529_v46 = vld [vmem:[#allocation6 + $0xc0] sm:$0xff] }
 0x1d1   :  { %1597 = vmatpush.msra.mxu1 %v1534_v10  ;;  %1637 = vmatpush.msra.mxu3 %v1536_v52  ;;  %v1131_v31 = vsel %vm1128_vm4, %v1130_v18, %v1126_v54  ;;  %v1531_v12 = vld [vmem:[#allocation6 + $0xd0] sm:$0xff]  ;;  %v1525_v48 = vld [vmem:[#allocation6 + $0xa0] sm:$0xff] }
 0x1d2   :  { %v1527_v10 = vld [vmem:[#allocation6 + $0xb0] sm:$0xff]  ;;  %v1521_v52 = vld [vmem:[#allocation6 + $0x80] sm:$0xff] }
 0x1d3   :  { %1598 = vmatpush.msra.mxu1 %v1530_v51  ;;  %1638 = vmatpush.msra.mxu3 %v1532_v32  ;;  %v1523_v35 = vld [vmem:[#allocation6 + $0x90] sm:$0xff]  ;;  %v1513_v32 = vld [vmem:[#allocation6 + $0x40] sm:$0xff] }
 0x1d4   :  { %v1519_v51 = vld [vmem:[#allocation6 + $0x70] sm:$0xff]  ;;  %v1505_v18 = vld [vmem:[#allocation6] sm:$0xff] }
 0x1d5   :  { %v5192_v20 = vpop.eup %5191  ;;  %1599 = vmatpush.msra.mxu1 %v1526_v33  ;;  %1639 = vmatpush.msra.mxu3 %v1528_v58  ;;  %v1515_v54 = vld [vmem:[#allocation6 + $0x50] sm:$0xff]  ;;  %v1509_v33 = vld [vmem:[#allocation6 + $0x20] sm:$0xff] }
 0x1d6   :  { %v6099_v53 = vmul.f32 %v5192_v20, %v1131_v31  ;;  %v1511_v58 = vld [vmem:[#allocation6 + $0x30] sm:$0xff]  ;;  %v1841_v20 = vld [vmem:[#allocation8 + $0x3e8] sm:$0xff]  ;;  %v1836_v31 = vld [vmem:[#allocation8 + $0x3c0] sm:$0xff] }
 0x1d7   :  { %1600 = vmatpush.msra.mxu1 %v1522_v5  ;;  %1640 = vmatpush.msra.mxu3 %v1524_v30  ;;  %v1507_v5 = vld [vmem:[#allocation6 + $0x10] sm:$0xff]  ;;  %v1840_v30 = vld [vmem:[#allocation8 + $0x3e0] sm:$0xff] }
 0x1d8   :  { %1293 = vmatmul.f32.vlgmr.msra.gmra.mxu0 %v6099_v53  ;;  %1333 = vmatmul.f32.vlgmr.msra.gmra.mxu2 %v6099_v53 }
 0x1d9   :  { %1569 = vmatpush.msra.mxu0 %v1565_v47  ;;  %1609 = vmatpush.msra.mxu2 %v1567_v36  ;;  %v1837_v47 = vld [vmem:[#allocation8 + $0x3c8] sm:$0xff]  ;;  %v1832_v36 = vld [vmem:[#allocation8 + $0x3a0] sm:$0xff] }
 0x1da   :  { %1601 = vmatpush.msra.mxu1 %v1518_v41  ;;  %1641 = vmatpush.msra.mxu3 %v1520_v61  ;;  %v1833_v41 = vld [vmem:[#allocation8 + $0x3a8] sm:$0xff]  ;;  %v1828_v61 = vld [vmem:[#allocation8 + $0x380] sm:$0xff] }
 0x1db   :  { %1570 = vmatpush.msra.mxu0 %v1561_v39  ;;  %1610 = vmatpush.msra.mxu2 %v1563_v60  ;;  %v1829_v39 = vld [vmem:[#allocation8 + $0x388] sm:$0xff]  ;;  %v1824_v60 = vld [vmem:[#allocation8 + $0x360] sm:$0xff] }
 0x1dc   :  { %1602 = vmatpush.msra.mxu1 %v1514_v56  ;;  %1642 = vmatpush.msra.mxu3 %v1516_v1  ;;  %v1825_v56 = vld [vmem:[#allocation8 + $0x368] sm:$0xff] }
 0x1dd   :  { %1571 = vmatpush.msra.mxu0 %v1557_v7  ;;  %1611 = vmatpush.msra.mxu2 %v1559_v55  ;;  %v1821_v1 = vld [vmem:[#allocation8 + $0x348] sm:$0xff]  ;;  %v1816_v7 = vld [vmem:[#allocation8 + $0x320] sm:$0xff] }
 0x1de   :  { %1603 = vmatpush.msra.mxu1 %v1510_v23  ;;  %1643 = vmatpush.msra.mxu3 %v1512_v63  ;;  %v1817_v55 = vld [vmem:[#allocation8 + $0x328] sm:$0xff]  ;;  %v1812_v23 = vld [vmem:[#allocation8 + $0x300] sm:$0xff] }
 0x1df   :  { %1572 = vmatpush.msra.mxu0 %v1553_v13  ;;  %1612 = vmatpush.msra.mxu2 %v1555_v14  ;;  %v1813_v63 = vld [vmem:[#allocation8 + $0x308] sm:$0xff]  ;;  %v1808_v13 = vld [vmem:[#allocation8 + $0x2e0] sm:$0xff] }
 0x1e0   :  { %1604 = vmatpush.msra.mxu1 %v1506_v59  ;;  %1644 = vmatpush.msra.mxu3 %v1508_v24  ;;  %v1809_v14 = vld [vmem:[#allocation8 + $0x2e8] sm:$0xff]  ;;  %v1804_v59 = vld [vmem:[#allocation8 + $0x2c0] sm:$0xff] }
 0x1e1   :  { %1373 = vmatmul.f32.vlgmr.msrb.gmra.mxu0 %v6099_v53  ;;  %1413 = vmatmul.f32.vlgmr.msrb.gmra.mxu2 %v6099_v53  ;;  %v1805_v24 = vld [vmem:[#allocation8 + $0x2c8] sm:$0xff] }
 0x1e2   :  { %1573 = vmatpush.msra.mxu0 %v1549_v9  ;;  %1605 = vmatmul.f32.vlgmr.msra.gmra.mxu1 %v6099_v53  ;;  %v1800_v9 = vld [vmem:[#allocation8 + $0x2a0] sm:$0xff] }
 0x1e3   :  { %1613 = vmatpush.msra.mxu2 %v1551_v44  ;;  %1645 = vmatmul.f32.vlgmr.msra.gmra.mxu3 %v6099_v53  ;;  %v1801_v44 = vld [vmem:[#allocation8 + $0x2a8] sm:$0xff] }
 0x1e4   :  { %1574 = vmatpush.msra.mxu0 %v1545_v4  ;;  %1874 = vmatpush.msrb.mxu1 %v1840_v30  ;;  %v1796_v4 = vld [vmem:[#allocation8 + $0x280] sm:$0xff] }
 0x1e5   :  { %1614 = vmatpush.msra.mxu2 %v1547_v22  ;;  %1914 = vmatpush.msrb.mxu3 %v1841_v20  ;;  %v1797_v22 = vld [vmem:[#allocation8 + $0x288] sm:$0xff]  ;;  %v6112_v30 = vld [vmem:[%s6891_s5] sm:$0xf]  ;;  %v1843_v20 = vld [vmem:[#allocation8 + $0x3f8] sm:$0xff] }
 0x1e6   :  { %1575 = vmatpush.msra.mxu0 %v1541_v37  ;;  %1875 = vmatpush.msrb.mxu1 %v1836_v31  ;;  %v1776_v37 = vld [vmem:[#allocation8 + $0x1e0] sm:$0xff] }
 0x1e7   :  { %1615 = vmatpush.msra.mxu2 %v1543_v21  ;;  %1915 = vmatpush.msrb.mxu3 %v1837_v47  ;;  %v1777_v21 = vld [vmem:[#allocation8 + $0x1e8] sm:$0xff]  ;;  %v1756_v31 = vld [vmem:[#allocation8 + $0x140] sm:$0xff] }
 0x1e8   :  { %1576 = vmatpush.msra.mxu0 %v1537_v2  ;;  %1876 = vmatpush.msrb.mxu1 %v1832_v36  ;;  %v1792_v2 = vld [vmem:[#allocation8 + $0x260] sm:$0xff]  ;;  %v1757_v47 = vld [vmem:[#allocation8 + $0x148] sm:$0xff]  ;;  %v1838_v36 = vld [vmem:[#allocation8 + $0x3d0] sm:$0xff] }
 0x1e9   :  { %1616 = vmatpush.msra.mxu2 %v1539_v40  ;;  %1916 = vmatpush.msrb.mxu3 %v1833_v41  ;;  %v1793_v40 = vld [vmem:[#allocation8 + $0x268] sm:$0xff]  ;;  %v1839_v41 = vld [vmem:[#allocation8 + $0x3d8] sm:$0xff] }
 0x1ea   :  { %1577 = vmatpush.msra.mxu0 %v1533_v6  ;;  %1877 = vmatpush.msrb.mxu1 %v1828_v61  ;;  %v1772_v6 = vld [vmem:[#allocation8 + $0x1c0] sm:$0xff] }
 0x1eb   :  { %1617 = vmatpush.msra.mxu2 %v1535_v43  ;;  %1917 = vmatpush.msrb.mxu3 %v1829_v39  ;;  %v1773_v43 = vld [vmem:[#allocation8 + $0x1c8] sm:$0xff]  ;;  %v1752_v61 = vld [vmem:[#allocation8 + $0x120] sm:$0xff] }
 0x1ec   :  { %1578 = vmatpush.msra.mxu0 %v1529_v46  ;;  %1878 = vmatpush.msrb.mxu1 %v1824_v60  ;;  %v1788_v46 = vld [vmem:[#allocation8 + $0x240] sm:$0xff]  ;;  %v1753_v39 = vld [vmem:[#allocation8 + $0x128] sm:$0xff]  ;;  %v1834_v60 = vld [vmem:[#allocation8 + $0x3b0] sm:$0xff] }
 0x1ed   :  { %1618 = vmatpush.msra.mxu2 %v1531_v12  ;;  %1918 = vmatpush.msrb.mxu3 %v1825_v56  ;;  %v1789_v12 = vld [vmem:[#allocation8 + $0x248] sm:$0xff]  ;;  %v1269_v56 = vperm.slane %v6112_v30, 0 }
 0x1ee   :  { %1579 = vmatpush.msra.mxu0 %v1525_v48  ;;  %v1768_v48 = vld [vmem:[#allocation8 + $0x1a0] sm:$0xff] }
 0x1ef   :  { %1619 = vmatpush.msra.mxu2 %v1527_v10  ;;  %1919 = vmatpush.msrb.mxu3 %v1821_v1  ;;  %v1769_v10 = vld [vmem:[#allocation8 + $0x1a8] sm:$0xff]  ;;  %v1748_v1 = vld [vmem:[#allocation8 + $0x100] sm:$0xff] }
 0x1f0   :  { %1580 = vmatpush.msra.mxu0 %v1521_v52  ;;  %v1784_v52 = vld [vmem:[#allocation8 + $0x220] sm:$0xff] }
 0x1f1   :  { %1620 = vmatpush.msra.mxu2 %v1523_v35  ;;  %1920 = vmatpush.msrb.mxu3 %v1817_v55  ;;  %v1785_v35 = vld [vmem:[#allocation8 + $0x228] sm:$0xff]  ;;  %v1830_v55 = vld [vmem:[#allocation8 + $0x390] sm:$0xff] }
 0x1f2   :  { %1581 = vmatpush.msra.mxu0 %v1517_v50  ;;  %v1764_v50 = vld [vmem:[#allocation8 + $0x180] sm:$0xff] }
 0x1f3   :  { %1621 = vmatpush.msra.mxu2 %v1519_v51  ;;  %1921 = vmatpush.msrb.mxu3 %v1813_v63  ;;  %v1765_v51 = vld [vmem:[#allocation8 + $0x188] sm:$0xff] }
 0x1f4   :  { %1582 = vmatpush.msra.mxu0 %v1513_v32  ;;  %v1780_v32 = vld [vmem:[#allocation8 + $0x200] sm:$0xff] }
 0x1f5   :  { %1622 = vmatpush.msra.mxu2 %v1515_v54  ;;  %1922 = vmatpush.msrb.mxu3 %v1809_v14  ;;  %v1781_v54 = vld [vmem:[#allocation8 + $0x208] sm:$0xff] }
 0x1f6   :  { %1583 = vmatpush.msra.mxu0 %v1509_v33  ;;  %v1745_v14 = vld [vmem:[#allocation8 + $0xe8] sm:$0xff] }
 0x1f7   :  { %1623 = vmatpush.msra.mxu2 %v1511_v58  ;;  %1923 = vmatpush.msrb.mxu3 %v1805_v24  ;;  %v1760_v58 = vld [vmem:[#allocation8 + $0x160] sm:$0xff] }
 0x1f8   :  { %1584 = vmatpush.msra.mxu0 %v1505_v18  ;;  %v1761_v18 = vld [vmem:[#allocation8 + $0x168] sm:$0xff] }
 0x1f9   :  { %1624 = vmatpush.msra.mxu2 %v1507_v5  ;;  %1585 = vmatmul.f32.vlgmr.msra.gmra.mxu0 %v6099_v53  ;;  %v1842_v5 = vld [vmem:[#allocation8 + $0x3f0] sm:$0xff] }
 0x1fa   :  { %1625 = vmatmul.f32.vlgmr.msra.gmra.mxu2 %v6099_v53  ;;  %v1820_v53 = vld [vmem:[#allocation8 + $0x340] sm:$0xff]  ;;  %1924 = vmatpush.msrb.mxu3 %v1801_v44 }
 0x1fb   :  { %1879 = vmatpush.msrb.mxu1 %v1820_v53  ;;  %1854 = vmatpush.msrb.mxu0 %v1776_v37  ;;  %v1835_v53 = vld [vmem:[#allocation8 + $0x3b8] sm:$0xff]  ;;  %v1822_v37 = vld [vmem:[#allocation8 + $0x350] sm:$0xff] }
 0x1fc   :  { %1925 = vmatpush.msrb.mxu3 %v1797_v22  ;;  %1894 = vmatpush.msrb.mxu2 %v1777_v21  ;;  %v1741_v22 = vld [vmem:[#allocation8 + $0xc8] sm:$0xff] }
 0x1fd   :  { %1880 = vmatpush.msrb.mxu1 %v1816_v7  ;;  %1855 = vmatpush.msrb.mxu0 %v1772_v6  ;;  %v1749_v7 = vld [vmem:[#allocation8 + $0x108] sm:$0xff]  ;;  %v1736_v6 = vld [vmem:[#allocation8 + $0xa0] sm:$0xff] }
 0x1fe   :  { %1926 = vmatpush.msrb.mxu3 %v1793_v40  ;;  %1895 = vmatpush.msrb.mxu2 %v1773_v43  ;;  %v1823_v40 = vld [vmem:[#allocation8 + $0x358] sm:$0xff]  ;;  %v1737_v43 = vld [vmem:[#allocation8 + $0xa8] sm:$0xff] }
 0x1ff   :  { %1881 = vmatpush.msrb.mxu1 %v1812_v23  ;;  %1856 = vmatpush.msrb.mxu0 %v1768_v48  ;;  %v1831_v23 = vld [vmem:[#allocation8 + $0x398] sm:$0xff] }
 0x200   :  { %1927 = vmatpush.msrb.mxu3 %v1789_v12  ;;  %1896 = vmatpush.msrb.mxu2 %v1769_v10  ;;  %v1819_v48 = vld [vmem:[#allocation8 + $0x338] sm:$0xff] }
 0x201   :  { %1882 = vmatpush.msrb.mxu1 %v1808_v13  ;;  %1857 = vmatpush.msrb.mxu0 %v1764_v50  ;;  %v1744_v13 = vld [vmem:[#allocation8 + $0xe0] sm:$0xff]  ;;  %v1733_v50 = vld [vmem:[#allocation8 + $0x88] sm:$0xff] }
 0x202   :  { %1928 = vmatpush.msrb.mxu3 %v1785_v35  ;;  %1897 = vmatpush.msrb.mxu2 %v1765_v51  ;;  %v1732_v35 = vld [vmem:[#allocation8 + $0x80] sm:$0xff]  ;;  %v1814_v51 = vld [vmem:[#allocation8 + $0x310] sm:$0xff] }
 0x203   :  { %1883 = vmatpush.msrb.mxu1 %v1804_v59  ;;  %1858 = vmatpush.msrb.mxu0 %v1760_v58  ;;  %v1826_v59 = vld [vmem:[#allocation8 + $0x370] sm:$0xff]  ;;  %v1728_v58 = vld [vmem:[#allocation8 + $0x60] sm:$0xff] }
 0x204   :  { %1929 = vmatpush.msrb.mxu3 %v1781_v54  ;;  %1898 = vmatpush.msrb.mxu2 %v1761_v18  ;;  %v1815_v54 = vld [vmem:[#allocation8 + $0x318] sm:$0xff]  ;;  %v1729_v18 = vld [vmem:[#allocation8 + $0x68] sm:$0xff] }
 0x205   :  { %1884 = vmatpush.msrb.mxu1 %v1800_v9  ;;  %1859 = vmatpush.msrb.mxu0 %v1756_v31  ;;  %v1827_v9 = vld [vmem:[#allocation8 + $0x378] sm:$0xff] }
 0x206   :  { %1994 = vmatpush.msra.mxu3 %v1843_v20  ;;  %1899 = vmatpush.msrb.mxu2 %v1757_v47  ;;  %v216_v20 = vadd.f32 %v5844_v19, %v5895_v15  ;;  %v1720_v19 = vld [vmem:[#allocation8 + $0x20] sm:$0xff] }
 0x207   :  { %1885 = vmatpush.msrb.mxu1 %v1796_v4  ;;  %1860 = vmatpush.msrb.mxu0 %v1752_v61  ;;  %v1740_v4 = vld [vmem:[#allocation8 + $0xc0] sm:$0xff] }
 0x208   :  { %1995 = vmatpush.msra.mxu3 %v1839_v41  ;;  %1900 = vmatpush.msrb.mxu2 %v1753_v39  ;;  %v1724_v39 = vld [vmem:[#allocation8 + $0x40] sm:$0xff] }
 0x209   :  { %1886 = vmatpush.msrb.mxu1 %v1792_v2  ;;  %1861 = vmatpush.msrb.mxu0 %v1748_v1  ;;  %v1270_v2 = vperm.slane %v6112_v30, 1 }
 0x20a   :  { %1996 = vmatpush.msra.mxu3 %v1835_v53  ;;  %1901 = vmatpush.msrb.mxu2 %v1749_v7  ;;  %v1807_v7 = vld [vmem:[#allocation8 + $0x2d8] sm:$0xff] }
 0x20b   :  { %1887 = vmatpush.msrb.mxu1 %v1788_v46  ;;  %1862 = vmatpush.msrb.mxu0 %v1744_v13  ;;  %v1818_v46 = vld [vmem:[#allocation8 + $0x330] sm:$0xff] }
 0x20c   :  { %1997 = vmatpush.msra.mxu3 %v1831_v23  ;;  %1902 = vmatpush.msrb.mxu2 %v1745_v14  ;;  %v1721_v23 = vld [vmem:[#allocation8 + $0x28] sm:$0xff]  ;;  %v1803_v14 = vld [vmem:[#allocation8 + $0x2b8] sm:$0xff] }
 0x20d   :  { %1888 = vmatpush.msrb.mxu1 %v1784_v52  ;;  %1863 = vmatpush.msrb.mxu0 %v1740_v4  ;;  %v1271_v52 = vperm.slane %v6112_v30, 2  ;;  %v1717_v4 = vld [vmem:[#allocation8 + $0x8] sm:$0xff] }
 0x20e   :  { %1998 = vmatpush.msra.mxu3 %v1827_v9  ;;  %1903 = vmatpush.msrb.mxu2 %v1741_v22  ;;  %v1716_v9 = vld [vmem:[#allocation8] sm:$0xff]  ;;  %v1798_v22 = vld [vmem:[#allocation8 + $0x290] sm:$0xff] }
 0x20f   :  { %1889 = vmatpush.msrb.mxu1 %v1780_v32  ;;  %1864 = vmatpush.msrb.mxu0 %v1736_v6  ;;  %v1795_v6 = vld [vmem:[#allocation8 + $0x278] sm:$0xff] }
 0x210   :  { %1999 = vmatpush.msra.mxu3 %v1823_v40  ;;  %1904 = vmatpush.msrb.mxu2 %v1737_v43  ;;  %v1794_v40 = vld [vmem:[#allocation8 + $0x270] sm:$0xff] }
 0x211   :  { %1954 = vmatpush.msra.mxu1 %v1842_v5  ;;  %1865 = vmatpush.msrb.mxu0 %v1732_v35  ;;  %v1810_v5 = vld [vmem:[#allocation8 + $0x2f0] sm:$0xff] }
 0x212   :  { %2000 = vmatpush.msra.mxu3 %v1819_v48  ;;  %1905 = vmatpush.msrb.mxu2 %v1733_v50  ;;  %v1774_v43 = vld [vmem:[#allocation8 + $0x1d0] sm:$0xff]  ;;  %v1791_v48 = vld [vmem:[#allocation8 + $0x258] sm:$0xff] }
 0x213   :  { %1955 = vmatpush.msra.mxu1 %v1838_v36  ;;  %1866 = vmatpush.msrb.mxu0 %v1728_v58  ;;  %v1811_v36 = vld [vmem:[#allocation8 + $0x2f8] sm:$0xff]  ;;  %v1770_v35 = vld [vmem:[#allocation8 + $0x1b0] sm:$0xff] }
 0x214   :  { %2001 = vmatpush.msra.mxu3 %v1815_v54  ;;  %1906 = vmatpush.msrb.mxu2 %v1729_v18  ;;  %v1771_v50 = vld [vmem:[#allocation8 + $0x1b8] sm:$0xff]  ;;  %v1786_v54 = vld [vmem:[#allocation8 + $0x230] sm:$0xff] }
 0x215   :  { %1956 = vmatpush.msra.mxu1 %v1834_v60  ;;  %v1725_v60 = vld [vmem:[#allocation8 + $0x48] sm:$0xff]  ;;  %1867 = vmatpush.msrb.mxu0 %v1724_v39  ;;  %v1766_v58 = vld [vmem:[#allocation8 + $0x190] sm:$0xff]  ;;  %v1767_v18 = vld [vmem:[#allocation8 + $0x198] sm:$0xff] }
 0x216   :  { %2002 = vmatpush.msra.mxu3 %v1811_v36  ;;  %1907 = vmatpush.msrb.mxu2 %v1725_v60 }
 0x217   :  { %1957 = vmatpush.msra.mxu1 %v1830_v55  ;;  %1868 = vmatpush.msrb.mxu0 %v1720_v19 }
 0x218   :  { %2003 = vmatpush.msra.mxu3 %v1807_v7  ;;  %1908 = vmatpush.msrb.mxu2 %v1721_v23  ;;  %v1759_v7 = vld [vmem:[#allocation8 + $0x158] sm:$0xff]  ;;  %v1754_v23 = vld [vmem:[#allocation8 + $0x130] sm:$0xff] }
 0x219   :  { %1958 = vmatpush.msra.mxu1 %v1826_v59  ;;  %1869 = vmatpush.msrb.mxu0 %v1716_v9 }
 0x21a   :  { %2004 = vmatpush.msra.mxu3 %v1803_v14  ;;  %1909 = vmatpush.msrb.mxu2 %v1717_v4  ;;  %v1750_v4 = vld [vmem:[#allocation8 + $0x110] sm:$0xff] }
 0x21b   :  { %1959 = vmatpush.msra.mxu1 %v1822_v37 }
 0x21d   :  { %1960 = vmatpush.msra.mxu1 %v1818_v46  ;;  %v1775_v46 = vld [vmem:[#allocation8 + $0x1d8] sm:$0xff] }
 0x21f   :  { %1961 = vmatpush.msra.mxu1 %v1814_v51 }
 0x221   :  { %1962 = vmatpush.msra.mxu1 %v1810_v5 }
 0x23d   :  { %v1314_v33 = vpop.f32.mrf.mxu1 }
 0x245   :  { %v1394_v44 = vpop.f32.mrf.mxu1 }
 0x255   :  { %v1294_v63 = vpop.f32.mrf.mxu0 }
 0x256   :  { %v1295_v24 = vadd.f32 %v1294_v63, %v1269_v56  ;;  %v1806_v56 = vld [vmem:[#allocation8 + $0x2d0] sm:$0xff] }
 0x257   :  { %1963 = vmatpush.msra.mxu1 %v1806_v56  ;;  %v1802_v63 = vld [vmem:[#allocation8 + $0x2b0] sm:$0xff] }
 0x258   :  { %v1315_v21 = vadd.f32 %v1314_v33, %v1295_v24  ;;  %v1354_v33 = vpop.f32.mrf.mxu3 }
 0x259   :  { %1964 = vmatpush.msra.mxu1 %v1802_v63  ;;  %v1755_v63 = vld [vmem:[#allocation8 + $0x138] sm:$0xff] }
 0x25a   :  { %v5088_v12 = vmul.f32 -1.442695, %v1315_v21  ;;  %v1778_v21 = vld [vmem:[#allocation8 + $0x1f0] sm:$0xff] }
 0x25b   :  { %v1334_v10 = vpop.f32.mrf.mxu2  ;;  %1965 = vmatpush.msra.mxu1 %v1798_v22  ;;  %1934 = vmatpush.msra.mxu0 %v1778_v21  ;;  %v1751_v22 = vld [vmem:[#allocation8 + $0x118] sm:$0xff] }
 0x25c   :  { %5193 = vpow2.f32 %v5088_v12  ;;  %v1335_v32 = vadd.f32 %v1334_v10, %v1270_v2  ;;  %v1779_v2 = vld [vmem:[#allocation8 + $0x1f8] sm:$0xff]  ;;  %v1790_v12 = vld [vmem:[#allocation8 + $0x250] sm:$0xff] }
 0x25d   :  { %1974 = vmatpush.msra.mxu2 %v1779_v2  ;;  %1966 = vmatpush.msra.mxu1 %v1794_v40  ;;  %v1746_v2 = vld [vmem:[#allocation8 + $0xf0] sm:$0xff]  ;;  %v1747_v40 = vld [vmem:[#allocation8 + $0xf8] sm:$0xff] }
 0x25e   :  { %v1355_v31 = vadd.f32 %v1354_v33, %v1335_v32  ;;  %v1374_v47 = vpop.f32.mrf.mxu0  ;;  %1935 = vmatpush.msra.mxu0 %v1774_v43  ;;  %v1787_v33 = vld [vmem:[#allocation8 + $0x238] sm:$0xff]  ;;  %v175_v43 = vadd.f32 %v5981_v62, %v5892_v11 }
 0x25f   :  { %v1375_v41 = vadd.f32 %v1374_v47, %v1271_v52  ;;  %v1606_v61 = vpop.f32.mrf.mxu1  ;;  %v1272_v52 = vperm.slane %v6112_v30, 3  ;;  %1975 = vmatpush.msra.mxu2 %v1775_v46  ;;  %1967 = vmatpush.msra.mxu1 %v1790_v12  ;;  %v1782_v30 = vld [vmem:[#allocation8 + $0x210] sm:$0xff] }
 0x260   :  { %v5089_v53 = vmul.f32 -1.442695, %v1355_v31  ;;  %v1650_v1 = vadd.f32 %v1606_v61, %v216_v20  ;;  %1936 = vmatpush.msra.mxu0 %v1770_v35  ;;  %v1783_v20 = vld [vmem:[#allocation8 + $0x218] sm:$0xff]  ;;  %v1742_v35 = vld [vmem:[#allocation8 + $0xd0] sm:$0xff] }
 0x261   :  { %v1395_v55 = vadd.f32 %v1394_v44, %v1375_v41  ;;  %v1799_v44 = vld [vmem:[#allocation8 + $0x298] sm:$0xff]  ;;  %1976 = vmatpush.msra.mxu2 %v1771_v50  ;;  %1968 = vmatpush.msra.mxu1 %v1786_v54  ;;  %v1762_v41 = vld [vmem:[#allocation8 + $0x170] sm:$0xff] }
 0x262   :  { %v5194_v13 = vpop.eup %5193  ;;  %5195 = vpow2.f32 %v5089_v53  ;;  %v5092_v37 = vmul.f32 -1.442695, %v1650_v1  ;;  %2005 = vmatpush.msra.mxu3 %v1799_v44  ;;  %1937 = vmatpush.msra.mxu0 %v1766_v58  ;;  %v1763_v61 = vld [vmem:[#allocation8 + $0x178] sm:$0xff]  ;;  %v1758_v53 = vld [vmem:[#allocation8 + $0x150] sm:$0xff]  ;;  %v1434_v1 = vpop.f32.mrf.mxu3 }
 0x263   :  { %v6119_v59 = vadd.f32 1.0, %v5194_v13  ;;  %v5090_v24 = vmul.f32 -1.442695, %v1395_v55  ;;  %1977 = vmatpush.msra.mxu2 %v1767_v18  ;;  %1969 = vmatpush.msra.mxu1 %v1782_v30  ;;  %v1743_v50 = vld [vmem:[#allocation8 + $0xd8] sm:$0xff]  ;;  %v1738_v18 = vld [vmem:[#allocation8 + $0xb0] sm:$0xff] }
 0x264   :  { %2006 = vmatpush.msra.mxu3 %v1795_v6  ;;  %v1414_v32 = vpop.f32.mrf.mxu2  ;;  %1938 = vmatpush.msra.mxu0 %v1762_v41  ;;  %v1739_v30 = vld [vmem:[#allocation8 + $0xb8] sm:$0xff]  ;;  %v1734_v41 = vld [vmem:[#allocation8 + $0x90] sm:$0xff] }
 0x265   :  { %5197 = vrcp.f32 %v6119_v59  ;;  %v1415_v36 = vadd.f32 %v1414_v32, %v1272_v52  ;;  %1978 = vmatpush.msra.mxu2 %v1763_v61  ;;  %vm1454_vm6 = vweird.f32 %v6119_v59  ;;  %v1458_v21 = vand.u32 2147483647, %v6119_v59  ;;  %v1735_v61 = vld [vmem:[#allocation8 + $0x98] sm:$0xff] }
 0x266   :  { %5199 = vpow2.f32 %v5090_v24  ;;  %2007 = vmatpush.msra.mxu3 %v1791_v48  ;;  %1939 = vmatpush.msra.mxu0 %v1758_v53  ;;  %v257_v53 = vadd.f32 %v5842_v16, %v5911_v42 }
 0x267   :  { %5201 = vpow2.f32 %v5092_v37  ;;  %v1435_v55 = vadd.f32 %v1434_v1, %v1415_v36  ;;  %1979 = vmatpush.msra.mxu2 %v1759_v7  ;;  %v1460_v37 = vand.u32 2147483648, %v6119_v59  ;;  %vm1459_vm10 = vcmp.eq.f32.partialorder %v1458_v21, 8.507059e+37 }
 0x268   :  { %v5196_v10 = vpop.eup %5195  ;;  %2008 = vmatpush.msra.mxu3 %v1787_v33  ;;  %1940 = vmatpush.msra.mxu0 %v1754_v23 }
 0x269   :  { %v6123_v51 = vadd.f32 1.0, %v5196_v10  ;;  %1980 = vmatpush.msra.mxu2 %v1755_v63  ;;  %v1461_v32 = vor.u32 1.1754944e-38, %v1460_v37  ;;  %v1722_v37 = vld [vmem:[#allocation8 + $0x30] sm:$0xff] }
 0x26a   :  { %2009 = vmatpush.msra.mxu3 %v1783_v20  ;;  %1941 = vmatpush.msra.mxu0 %v1750_v4 }
 0x26b   :  { %v6125_v5 = vpop.eup %5197  ;;  %5203 = vrcp.f32 %v6123_v51  ;;  %1981 = vmatpush.msra.mxu2 %v1751_v22  ;;  %v1475_v46 = vand.u32 2147483648, %v6123_v51  ;;  %vm1469_vm9 = vweird.f32 %v6123_v51 }
 0x26c   :  { %v5200_v31 = vpop.eup %5199  ;;  %v1450_v47 = vmul.f32 %v6125_v5, %v6119_v59  ;;  %vm1455_vm5 = vweird.f32 %v6125_v5  ;;  %v1473_v59 = vand.u32 2147483647, %v6123_v51  ;;  %1942 = vmatpush.msra.mxu0 %v1746_v2 }
 0x26d   :  { %v6130_v39 = vadd.f32 1.0, %v5200_v31  ;;  %v5202_v60 = vpop.eup %5201  ;;  %vm6150_vm7 = vmor %vm1454_vm6, %vm1455_vm5  ;;  %1982 = vmatpush.msra.mxu2 %v1747_v40  ;;  %v1476_v20 = vor.u32 1.1754944e-38, %v1475_v46  ;;  %v1718_v40 = vld [vmem:[#allocation8 + $0x10] sm:$0xff]  ;;  %v1719_v46 = vld [vmem:[#allocation8 + $0x18] sm:$0xff] }
 0x26e   :  { %v1451_v56 = vsub.f32 1.0, %v1450_v47  ;;  %v6134_v14 = vadd.f32 1.0, %v5202_v60  ;;  %1943 = vmatpush.msra.mxu0 %v1742_v35  ;;  %vm1474_vm12 = vcmp.eq.f32.partialorder %v1473_v59, 8.507059e+37 }
 0x26f   :  { %5205 = vrcp.f32 %v6130_v39  ;;  %1983 = vmatpush.msra.mxu2 %v1743_v50  ;;  %vm1484_vm14 = vweird.f32 %v6130_v39  ;;  %v1488_v2 = vand.u32 2147483647, %v6130_v39  ;;  %v2143_v50 = vld [vmem:[#allocation6 + $0x1e8] sm:$0xff] }
 0x270   :  { %v1452_v19 = vmul.f32 %v6125_v5, %v1451_v56  ;;  %5207 = vtanh.f32 %v1435_v55  ;;  %1944 = vmatpush.msra.mxu0 %v1738_v18  ;;  %v1730_v55 = vld [vmem:[#allocation8 + $0x70] sm:$0xff]  ;;  %v2139_v18 = vld [vmem:[#allocation6 + $0x1c8] sm:$0xff]  ;;  %vm1685_vm2 = vweird.f32 %v6134_v14 }
 0x271   :  { %v5204_v13 = vpop.eup %5203  ;;  %5209 = vrcp.f32 %v6134_v14  ;;  %1984 = vmatpush.msra.mxu2 %v1739_v30  ;;  %vm1489_vm0 = vcmp.eq.f32.partialorder %v1488_v2, 8.507059e+37  ;;  %v2141_v30 = vld [vmem:[#allocation6 + $0x1d8] sm:$0xff]  ;;  %v2119_v2 = vld [vmem:[#allocation6 + $0x128] sm:$0xff] }
 0x272   :  { %v1465_v24 = vmul.f32 %v5204_v13, %v6123_v51  ;;  %v1453_v9 = vadd.f32 %v6125_v5, %v1452_v19  ;;  %vm1470_vm8 = vweird.f32 %v5204_v13  ;;  %1945 = vmatpush.msra.mxu0 %v1734_v41  ;;  %v1731_v19 = vld [vmem:[#allocation8 + $0x78] sm:$0xff] }
 0x273   :  { %vm1471_vm11 = vmor %vm1469_vm9, %vm1470_vm8  ;;  %1985 = vmatpush.msra.mxu2 %v1735_v61  ;;  %v2137_v41 = vld [vmem:[#allocation6 + $0x1b8] sm:$0xff]  ;;  %v1691_v61 = vand.u32 2147483648, %v6134_v14 }
 0x274   :  { %v1466_v44 = vsub.f32 1.0, %v1465_v24  ;;  %v1457_v62 = vsel %vm6150_vm7, %v6125_v5, %v1453_v9  ;;  %1946 = vmatpush.msra.mxu0 %v1730_v55  ;;  %v1726_v24 = vld [vmem:[#allocation8 + $0x50] sm:$0xff]  ;;  %v1727_v9 = vld [vmem:[#allocation8 + $0x58] sm:$0xff] }
 0x275   :  { %v6142_v6 = vpop.eup %5205  ;;  %v1462_v5 = vsel %vm1459_vm10, %v1461_v32, %v1457_v62  ;;  %1986 = vmatpush.msra.mxu2 %v1731_v19  ;;  %v2145_v32 = vld [vmem:[#allocation6 + $0x1f8] sm:$0xff] }
 0x276   :  { %v1467_v48 = vmul.f32 %v5204_v13, %v1466_v44  ;;  %v1480_v10 = vmul.f32 %v6142_v6, %v6130_v39  ;;  %v1586_v52 = vpop.f32.mrf.mxu0  ;;  %v5208_v47 = vpop.eup %5207  ;;  %vm1485_vm13 = vweird.f32 %v6142_v6  ;;  %1947 = vmatpush.msra.mxu0 %v1726_v24  ;;  %v1723_v44 = vld [vmem:[#allocation8 + $0x38] sm:$0xff] }
 0x277   :  { %v1649_v54 = vadd.f32 %v1586_v52, %v175_v43  ;;  %v6162_v51 = vpop.eup %5209  ;;  %v1496_v7 = vmul.f32 %v5208_v47, %v1462_v5  ;;  %1987 = vmatpush.msra.mxu2 %v1727_v9  ;;  %vm1486_vm15 = vmor %vm1484_vm14, %vm1485_vm13  ;;  %v1646_v52 = vpop.f32.mrf.mxu3  ;;  %v2129_v24 = vld [vmem:[#allocation6 + $0x178] sm:$0xff]  ;;  %v1692_v9 = vor.u32 1.1754944e-38, %v1691_v61 }
 0x278   :  { %v1481_v33 = vsub.f32 1.0, %v1480_v10  ;;  %v1468_v58 = vadd.f32 %v5204_v13, %v1467_v48  ;;  %v1681_v4 = vmul.f32 %v6162_v51, %v6134_v14  ;;  %1948 = vmatpush.msra.mxu0 %v1722_v37  ;;  %vm1686_vm1 = vweird.f32 %v6162_v51 }
 0x279   :  { %v5091_v31 = vmul.f32 -1.442695, %v1649_v54  ;;  %1988 = vmatpush.msra.mxu2 %v1723_v44  ;;  %vm6200_vm3 = vmor %vm1685_vm2, %vm1686_vm1 }
 0x27a   :  { %v1472_v36 = vsel %vm1471_vm11, %v5204_v13, %v1468_v58  ;;  %v1482_v60 = vmul.f32 %v6142_v6, %v1481_v33  ;;  %v1682_v12 = vsub.f32 1.0, %v1681_v4  ;;  %1949 = vmatpush.msra.mxu0 %v1718_v40  ;;  %v6915_v33 = vld [vmem:[#allocation22_spill] sm:$0xff]  ;;  %v2121_v40 = vld [vmem:[#allocation6 + $0x138] sm:$0xff] }
 0x27b   :  { %v1477_v56 = vsel %vm1474_vm12, %v1476_v20, %v1472_v36  ;;  %5211 = vpow2.f32 %v5091_v31  ;;  %1989 = vmatpush.msra.mxu2 %v1719_v46  ;;  %v2135_v36 = vld [vmem:[#allocation6 + $0x1a8] sm:$0xff] }
 0x27c   :  { %v1495_v1 = vmul.f32 %v1477_v56, %v6049_v29  ;;  %v1483_v22 = vadd.f32 %v6142_v6, %v1482_v60  ;;  %v1490_v29 = vand.u32 2147483648, %v6130_v39  ;;  %v1683_v62 = vmul.f32 %v6162_v51, %v1682_v12 }
 0x27d   :  { %v1626_v23 = vpop.f32.mrf.mxu2  ;;  %v1689_v60 = vand.u32 2147483647, %v6134_v14 }
 0x27e   :  { %v6168_v63 = vadd.f32 %v1496_v7, %v1495_v1  ;;  %v1651_v13 = vadd.f32 %v1626_v23, %v257_v53  ;;  %v1487_v59 = vsel %vm1486_vm15, %v6142_v6, %v1483_v22  ;;  %v1491_v48 = vor.u32 1.1754944e-38, %v1490_v29  ;;  %v2131_v53 = vld [vmem:[#allocation6 + $0x188] sm:$0xff]  ;;  %v2133_v1 = vld [vmem:[#allocation6 + $0x198] sm:$0xff]  ;;  %v2138_v7 = vld [vmem:[#allocation6 + $0x1c0] sm:$0xff] }
 0x27f   :  { %v298_v6 = vadd.f32 %v6915_v33, %v5942_v57  ;;  %v1684_v31 = vadd.f32 %v6162_v51, %v1683_v62  ;;  %vm1690_vm5 = vcmp.eq.f32.partialorder %v1689_v60, 8.507059e+37 }
 0x280   :  { %5213 = vtanh.f32 %v6168_v63  ;;  %v5093_v16 = vmul.f32 -1.442695, %v1651_v13  ;;  %v1492_v10 = vsel %vm1489_vm0, %v1491_v48, %v1487_v59  ;;  %v2127_v13 = vld [vmem:[#allocation6 + $0x168] sm:$0xff] }
 0x281   :  { %v5212_v21 = vpop.eup %5211  ;;  %v1652_v5 = vadd.f32 %v1646_v52, %v298_v6  ;;  %v1688_v19 = vsel %vm6200_vm3, %v6162_v51, %v1684_v31  ;;  %v2125_v51 = vld [vmem:[#allocation6 + $0x158] sm:$0xff]  ;;  %v2107_v6 = vld [vmem:[#allocation6 + $0xc8] sm:$0xff] }
 0x282   :  { %v6178_v43 = vadd.f32 1.0, %v5212_v21  ;;  %5215 = vpow2.f32 %v5093_v16  ;;  %v2123_v16 = vld [vmem:[#allocation6 + $0x148] sm:$0xff]  ;;  %v1693_v29 = vsel %vm1690_vm5, %v1692_v9, %v1688_v19  ;;  %v2089_v9 = vld [vmem:[#allocation6 + $0x38] sm:$0xff] }
 0x283   :  { %v1711_v59 = vmul.f32 %v1693_v29, %v6093_v38  ;;  %v2109_v38 = vld [vmem:[#allocation6 + $0xd8] sm:$0xff]  ;;  %v2091_v19 = vld [vmem:[#allocation6 + $0x48] sm:$0xff]  ;;  %v2126_v29 = vld [vmem:[#allocation6 + $0x160] sm:$0xff] }
 0x284   :  { %5217 = vrcp.f32 %v6178_v43  ;;  %v1676_v55 = vand.u32 2147483648, %v6178_v43  ;;  %v1674_v14 = vand.u32 2147483647, %v6178_v43  ;;  %vm1670_vm6 = vweird.f32 %v6178_v43 }
 0x286   :  { %v5214_v39 = vpop.eup %5213  ;;  %v1677_v37 = vor.u32 1.1754944e-38, %v1676_v55  ;;  %vm1675_vm8 = vcmp.eq.f32.partialorder %v1674_v14, 8.507059e+37  ;;  %v2140_v55 = vld [vmem:[#allocation6 + $0x1d0] sm:$0xff]  ;;  %v2134_v14 = vld [vmem:[#allocation6 + $0x1a0] sm:$0xff] }
 0x287   :  { %v6185_v35 = vmul.f32 %v5214_v39, %v1492_v10  ;;  %v2115_v39 = vld [vmem:[#allocation6 + $0x108] sm:$0xff]  ;;  %v2117_v10 = vld [vmem:[#allocation6 + $0x118] sm:$0xff] }
 0x288   :  { %v5216_v54 = vpop.eup %5215 }
 0x289   :  { %v6189_v58 = vadd.f32 1.0, %v5216_v54  ;;  %1890 = vmatmul.f32.vlgmr.msrb.gmra.mxu1 %v6185_v35  ;;  %1930 = vmatmul.f32.vlgmr.msrb.gmra.mxu3 %v6185_v35 }
 0x28a   :  { %v5218_v20 = vpop.eup %5217  ;;  %2166 = vmatpush.msrb.mxu1 %v2143_v50  ;;  %2206 = vmatpush.msrb.mxu3 %v2145_v32  ;;  %v2111_v50 = vld [vmem:[#allocation6 + $0xe8] sm:$0xff]  ;;  %v2113_v32 = vld [vmem:[#allocation6 + $0xf8] sm:$0xff] }
 0x28b   :  { %v1666_v47 = vmul.f32 %v5218_v20, %v6178_v43  ;;  %5219 = vrcp.f32 %v6189_v58  ;;  %vm1671_vm4 = vweird.f32 %v5218_v20  ;;  %v1706_v33 = vand.u32 2147483648, %v6189_v58 }
 0x28c   :  { %2167 = vmatpush.msrb.mxu1 %v2139_v18  ;;  %2207 = vmatpush.msrb.mxu3 %v2141_v30  ;;  %5221 = vtanh.f32 %v1652_v5  ;;  %vm1672_vm7 = vmor %vm1670_vm6, %vm1671_vm4  ;;  %vm1700_vm10 = vweird.f32 %v6189_v58  ;;  %v1704_v18 = vand.u32 2147483647, %v6189_v58  ;;  %v2103_v30 = vld [vmem:[#allocation6 + $0xa8] sm:$0xff] }
 0x28d   :  { %v1667_v56 = vsub.f32 1.0, %v1666_v47  ;;  %v1707_v31 = vor.u32 1.1754944e-38, %v1706_v33  ;;  %v2099_v47 = vld [vmem:[#allocation6 + $0x88] sm:$0xff]  ;;  %v2096_v33 = vld [vmem:[#allocation6 + $0x70] sm:$0xff] }
 0x28e   :  { %2168 = vmatpush.msrb.mxu1 %v2135_v36  ;;  %2208 = vmatpush.msrb.mxu3 %v2137_v41  ;;  %v2101_v36 = vld [vmem:[#allocation6 + $0x98] sm:$0xff]  ;;  %vm1705_vm12 = vcmp.eq.f32.partialorder %v1704_v18, 8.507059e+37  ;;  %v2086_v18 = vld [vmem:[#allocation6 + $0x20] sm:$0xff] }
 0x28f   :  { %v1668_v23 = vmul.f32 %v5218_v20, %v1667_v56  ;;  %v2144_v56 = vld [vmem:[#allocation6 + $0x1f0] sm:$0xff] }
 0x290   :  { %2169 = vmatpush.msrb.mxu1 %v2131_v53  ;;  %2209 = vmatpush.msrb.mxu3 %v2133_v1  ;;  %v2095_v53 = vld [vmem:[#allocation6 + $0x68] sm:$0xff]  ;;  %v2097_v1 = vld [vmem:[#allocation6 + $0x78] sm:$0xff] }
 0x291   :  { %v5220_v4 = vpop.eup %5219  ;;  %v1669_v22 = vadd.f32 %v5218_v20, %v1668_v23  ;;  %1970 = vmatmul.f32.vlgmr.msra.gmra.mxu1 %v6185_v35  ;;  %2010 = vmatmul.f32.vlgmr.msra.gmra.mxu3 %v6185_v35  ;;  %v2093_v23 = vld [vmem:[#allocation6 + $0x58] sm:$0xff] }
 0x292   :  { %v1696_v44 = vmul.f32 %v5220_v4, %v6189_v58  ;;  %2170 = vmatpush.msrb.mxu1 %v2127_v13  ;;  %2210 = vmatpush.msrb.mxu3 %v2129_v24  ;;  %v5222_v46 = vpop.eup %5221  ;;  %vm1701_vm9 = vweird.f32 %v5220_v4  ;;  %v2142_v58 = vld [vmem:[#allocation6 + $0x1e0] sm:$0xff]  ;;  %v2136_v13 = vld [vmem:[#allocation6 + $0x1b0] sm:$0xff]  ;;  %v2087_v24 = vld [vmem:[#allocation6 + $0x28] sm:$0xff] }
 0x293   :  { %v1673_v21 = vsel %vm1672_vm7, %v5218_v20, %v1669_v22  ;;  %vm1702_vm11 = vmor %vm1700_vm10, %vm1701_vm9  ;;  %v2105_v20 = vld [vmem:[#allocation6 + $0xb8] sm:$0xff]  ;;  %v2132_v22 = vld [vmem:[#allocation6 + $0x190] sm:$0xff] }
 0x294   :  { %v1678_v43 = vsel %vm1675_vm8, %v1677_v37, %v1673_v21  ;;  %v1697_v12 = vsub.f32 1.0, %v1696_v44  ;;  %2171 = vmatpush.msrb.mxu1 %v2123_v16  ;;  %2211 = vmatpush.msrb.mxu3 %v2125_v51  ;;  %v2083_v16 = vld [vmem:[#allocation6 + $0x8] sm:$0xff]  ;;  %v2085_v51 = vld [vmem:[#allocation6 + $0x18] sm:$0xff]  ;;  %v2128_v37 = vld [vmem:[#allocation6 + $0x170] sm:$0xff] }
 0x295   :  { %v1712_v48 = vmul.f32 %v5222_v46, %v1678_v43  ;;  %v2122_v44 = vld [vmem:[#allocation6 + $0x140] sm:$0xff]  ;;  %v2124_v21 = vld [vmem:[#allocation6 + $0x150] sm:$0xff] }
 0x296   :  { %v1698_v62 = vmul.f32 %v5220_v4, %v1697_v12  ;;  %2172 = vmatpush.msrb.mxu1 %v2119_v2  ;;  %2212 = vmatpush.msrb.mxu3 %v2121_v40  ;;  %v2118_v2 = vld [vmem:[#allocation6 + $0x120] sm:$0xff]  ;;  %v2120_v40 = vld [vmem:[#allocation6 + $0x130] sm:$0xff] }
 0x297   :  { %v6215_v52 = vadd.f32 %v1712_v48, %v1711_v59  ;;  %v2114_v46 = vld [vmem:[#allocation6 + $0x100] sm:$0xff]  ;;  %v2116_v43 = vld [vmem:[#allocation6 + $0x110] sm:$0xff] }
 0x298   :  { %v1699_v54 = vadd.f32 %v5220_v4, %v1698_v62  ;;  %2173 = vmatpush.msrb.mxu1 %v2115_v39  ;;  %2213 = vmatpush.msrb.mxu3 %v2117_v10  ;;  %v2110_v12 = vld [vmem:[#allocation6 + $0xe0] sm:$0xff]  ;;  %v2112_v59 = vld [vmem:[#allocation6 + $0xf0] sm:$0xff] }
 0x299   :  { %5223 = vtanh.f32 %v6215_v52  ;;  %v2106_v48 = vld [vmem:[#allocation6 + $0xc0] sm:$0xff]  ;;  %v2108_v39 = vld [vmem:[#allocation6 + $0xd0] sm:$0xff] }
 0x29a   :  { %2174 = vmatpush.msrb.mxu1 %v2111_v50  ;;  %2214 = vmatpush.msrb.mxu3 %v2113_v32  ;;  %v1703_v5 = vsel %vm1702_vm11, %v5220_v4, %v1699_v54  ;;  %v2130_v4 = vld [vmem:[#allocation6 + $0x180] sm:$0xff]  ;;  %v2104_v62 = vld [vmem:[#allocation6 + $0xb0] sm:$0xff] }
 0x29b   :  { %v1708_v61 = vsel %vm1705_vm12, %v1707_v31, %v1703_v5  ;;  %v2102_v10 = vld [vmem:[#allocation6 + $0xa0] sm:$0xff]  ;;  %v2100_v32 = vld [vmem:[#allocation6 + $0x90] sm:$0xff] }
 0x29c   :  { %2175 = vmatpush.msrb.mxu1 %v2107_v6  ;;  %2215 = vmatpush.msrb.mxu3 %v2109_v38  ;;  %v2098_v50 = vld [vmem:[#allocation6 + $0x80] sm:$0xff]  ;;  %v2092_v38 = vld [vmem:[#allocation6 + $0x50] sm:$0xff] }
 0x29d   :  { %v2094_v54 = vld [vmem:[#allocation6 + $0x60] sm:$0xff]  ;;  %v2084_v5 = vld [vmem:[#allocation6 + $0x10] sm:$0xff] }
 0x29e   :  { %2176 = vmatpush.msrb.mxu1 %v2103_v30  ;;  %2216 = vmatpush.msrb.mxu3 %v2105_v20  ;;  %v2090_v6 = vld [vmem:[#allocation6 + $0x40] sm:$0xff]  ;;  %v2088_v30 = vld [vmem:[#allocation6 + $0x30] sm:$0xff] }
 0x29f   :  { %v5224_v41 = vpop.eup %5223  ;;  %v2082_v20 = vld [vmem:[#allocation6] sm:$0xff] }
 0x2a0   :  { %v6221_v60 = vmul.f32 %v5224_v41, %v1708_v61  ;;  %2177 = vmatpush.msrb.mxu1 %v2099_v47  ;;  %2217 = vmatpush.msrb.mxu3 %v2101_v36  ;;  %v2417_v31 = vld [vmem:[#allocation8 + $0x3e0] sm:$0xff]  ;;  %v2418_v47 = vld [vmem:[#allocation8 + $0x3e8] sm:$0xff] }
 0x2a1   :  { %v2413_v36 = vld [vmem:[#allocation8 + $0x3c0] sm:$0xff]  ;;  %v2414_v41 = vld [vmem:[#allocation8 + $0x3c8] sm:$0xff] }
 0x2a2   :  { %1870 = vmatmul.f32.vlgmr.msrb.gmra.mxu0 %v6221_v60  ;;  %1910 = vmatmul.f32.vlgmr.msrb.gmra.mxu2 %v6221_v60  ;;  %v2409_v61 = vld [vmem:[#allocation8 + $0x3a0] sm:$0xff] }
 0x2a3   :  { %2146 = vmatpush.msrb.mxu0 %v2142_v58  ;;  %2186 = vmatpush.msrb.mxu2 %v2144_v56  ;;  %v2410_v58 = vld [vmem:[#allocation8 + $0x3a8] sm:$0xff]  ;;  %v2405_v56 = vld [vmem:[#allocation8 + $0x380] sm:$0xff] }
 0x2a4   :  { %2178 = vmatpush.msrb.mxu1 %v2095_v53  ;;  %2218 = vmatpush.msrb.mxu3 %v2097_v1  ;;  %v2406_v53 = vld [vmem:[#allocation8 + $0x388] sm:$0xff]  ;;  %v2401_v1 = vld [vmem:[#allocation8 + $0x360] sm:$0xff] }
 0x2a5   :  { %2147 = vmatpush.msrb.mxu0 %v2138_v7  ;;  %2187 = vmatpush.msrb.mxu2 %v2140_v55  ;;  %v2402_v7 = vld [vmem:[#allocation8 + $0x368] sm:$0xff] }
 0x2a6   :  { %2179 = vmatpush.msrb.mxu1 %v2091_v19  ;;  %2219 = vmatpush.msrb.mxu3 %v2093_v23  ;;  %v2398_v55 = vld [vmem:[#allocation8 + $0x348] sm:$0xff]  ;;  %v2393_v19 = vld [vmem:[#allocation8 + $0x320] sm:$0xff] }
 0x2a7   :  { %2148 = vmatpush.msrb.mxu0 %v2134_v14  ;;  %2188 = vmatpush.msrb.mxu2 %v2136_v13  ;;  %v2394_v23 = vld [vmem:[#allocation8 + $0x328] sm:$0xff]  ;;  %v2389_v14 = vld [vmem:[#allocation8 + $0x300] sm:$0xff] }
 0x2a8   :  { %2180 = vmatpush.msrb.mxu1 %v2087_v24  ;;  %2220 = vmatpush.msrb.mxu3 %v2089_v9  ;;  %v2390_v13 = vld [vmem:[#allocation8 + $0x308] sm:$0xff]  ;;  %v2385_v24 = vld [vmem:[#allocation8 + $0x2e0] sm:$0xff] }
 0x2a9   :  { %2149 = vmatpush.msrb.mxu0 %v2130_v4  ;;  %2189 = vmatpush.msrb.mxu2 %v2132_v22  ;;  %v2386_v9 = vld [vmem:[#allocation8 + $0x2e8] sm:$0xff]  ;;  %v2381_v4 = vld [vmem:[#allocation8 + $0x2c0] sm:$0xff] }
 0x2aa   :  { %2181 = vmatpush.msrb.mxu1 %v2083_v16  ;;  %2221 = vmatpush.msrb.mxu3 %v2085_v51  ;;  %v2382_v22 = vld [vmem:[#allocation8 + $0x2c8] sm:$0xff]  ;;  %v2377_v16 = vld [vmem:[#allocation8 + $0x2a0] sm:$0xff] }
 0x2ab   :  { %1950 = vmatmul.f32.vlgmr.msra.gmra.mxu0 %v6221_v60  ;;  %1990 = vmatmul.f32.vlgmr.msra.gmra.mxu2 %v6221_v60  ;;  %v2378_v51 = vld [vmem:[#allocation8 + $0x2a8] sm:$0xff] }
 0x2ac   :  { %2150 = vmatpush.msrb.mxu0 %v2126_v29  ;;  %2182 = vmatmul.f32.vlgmr.msrb.gmra.mxu1 %v6221_v60  ;;  %v2373_v29 = vld [vmem:[#allocation8 + $0x280] sm:$0xff] }
 0x2ad   :  { %2190 = vmatpush.msrb.mxu2 %v2128_v37  ;;  %2222 = vmatmul.f32.vlgmr.msrb.gmra.mxu3 %v6221_v60  ;;  %v2374_v37 = vld [vmem:[#allocation8 + $0x288] sm:$0xff] }
 0x2ae   :  { %2151 = vmatpush.msrb.mxu0 %v2122_v44  ;;  %2451 = vmatpush.msra.mxu1 %v2417_v31  ;;  %v2353_v44 = vld [vmem:[#allocation8 + $0x1e0] sm:$0xff] }
 0x2af   :  { %2191 = vmatpush.msrb.mxu2 %v2124_v21  ;;  %2491 = vmatpush.msra.mxu3 %v2418_v47  ;;  %v2354_v21 = vld [vmem:[#allocation8 + $0x1e8] sm:$0xff]  ;;  %v2333_v31 = vld [vmem:[#allocation8 + $0x140] sm:$0xff] }
 0x2b0   :  { %2152 = vmatpush.msrb.mxu0 %v2118_v2  ;;  %2452 = vmatpush.msra.mxu1 %v2413_v36  ;;  %v2369_v2 = vld [vmem:[#allocation8 + $0x260] sm:$0xff]  ;;  %v2334_v47 = vld [vmem:[#allocation8 + $0x148] sm:$0xff]  ;;  %v2415_v36 = vld [vmem:[#allocation8 + $0x3d0] sm:$0xff] }
 0x2b1   :  { %2192 = vmatpush.msrb.mxu2 %v2120_v40  ;;  %2492 = vmatpush.msra.mxu3 %v2414_v41  ;;  %v2370_v40 = vld [vmem:[#allocation8 + $0x268] sm:$0xff]  ;;  %v2416_v41 = vld [vmem:[#allocation8 + $0x3d8] sm:$0xff] }
 0x2b2   :  { %2153 = vmatpush.msrb.mxu0 %v2114_v46  ;;  %2453 = vmatpush.msra.mxu1 %v2409_v61  ;;  %v2349_v46 = vld [vmem:[#allocation8 + $0x1c0] sm:$0xff] }
 0x2b3   :  { %2193 = vmatpush.msrb.mxu2 %v2116_v43  ;;  %2493 = vmatpush.msra.mxu3 %v2410_v58  ;;  %v2350_v43 = vld [vmem:[#allocation8 + $0x1c8] sm:$0xff]  ;;  %v2329_v61 = vld [vmem:[#allocation8 + $0x120] sm:$0xff] }
 0x2b4   :  { %2154 = vmatpush.msrb.mxu0 %v2110_v12  ;;  %2454 = vmatpush.msra.mxu1 %v2405_v56  ;;  %v2365_v12 = vld [vmem:[#allocation8 + $0x240] sm:$0xff]  ;;  %v2330_v58 = vld [vmem:[#allocation8 + $0x128] sm:$0xff]  ;;  %v2411_v56 = vld [vmem:[#allocation8 + $0x3b0] sm:$0xff] }
 0x2b5   :  { %2194 = vmatpush.msrb.mxu2 %v2112_v59  ;;  %2494 = vmatpush.msra.mxu3 %v2406_v53  ;;  %v2366_v59 = vld [vmem:[#allocation8 + $0x248] sm:$0xff] }
 0x2b6   :  { %2155 = vmatpush.msrb.mxu0 %v2106_v48  ;;  %2455 = vmatpush.msra.mxu1 %v2401_v1  ;;  %v2345_v48 = vld [vmem:[#allocation8 + $0x1a0] sm:$0xff]  ;;  %v2412_v1 = vld [vmem:[#allocation8 + $0x3b8] sm:$0xff] }
 0x2b7   :  { %2195 = vmatpush.msrb.mxu2 %v2108_v39  ;;  %2495 = vmatpush.msra.mxu3 %v2402_v7  ;;  %v2346_v39 = vld [vmem:[#allocation8 + $0x1a8] sm:$0xff]  ;;  %v2325_v7 = vld [vmem:[#allocation8 + $0x100] sm:$0xff] }
 0x2b8   :  { %2156 = vmatpush.msrb.mxu0 %v2102_v10  ;;  %v2361_v10 = vld [vmem:[#allocation8 + $0x220] sm:$0xff] }
 0x2b9   :  { %2196 = vmatpush.msrb.mxu2 %v2104_v62  ;;  %2496 = vmatpush.msra.mxu3 %v2398_v55  ;;  %v2362_v62 = vld [vmem:[#allocation8 + $0x228] sm:$0xff]  ;;  %v2407_v55 = vld [vmem:[#allocation8 + $0x390] sm:$0xff] }
 0x2ba   :  { %2157 = vmatpush.msrb.mxu0 %v2098_v50  ;;  %v2341_v50 = vld [vmem:[#allocation8 + $0x180] sm:$0xff] }
 0x2bb   :  { %2197 = vmatpush.msrb.mxu2 %v2100_v32  ;;  %2497 = vmatpush.msra.mxu3 %v2394_v23  ;;  %v2342_v32 = vld [vmem:[#allocation8 + $0x188] sm:$0xff] }
 0x2bc   :  { %2158 = vmatpush.msrb.mxu0 %v2094_v54  ;;  %v2357_v54 = vld [vmem:[#allocation8 + $0x200] sm:$0xff] }
 0x2bd   :  { %2198 = vmatpush.msrb.mxu2 %v2096_v33  ;;  %2498 = vmatpush.msra.mxu3 %v2390_v13  ;;  %v2358_v33 = vld [vmem:[#allocation8 + $0x208] sm:$0xff] }
 0x2be   :  { %2159 = vmatpush.msrb.mxu0 %v2090_v6  ;;  %v2322_v13 = vld [vmem:[#allocation8 + $0xe8] sm:$0xff] }
 0x2bf   :  { %2199 = vmatpush.msrb.mxu2 %v2092_v38  ;;  %2499 = vmatpush.msra.mxu3 %v2386_v9  ;;  %v2337_v38 = vld [vmem:[#allocation8 + $0x160] sm:$0xff] }
 0x2c0   :  { %2160 = vmatpush.msrb.mxu0 %v2086_v18  ;;  %v2338_v18 = vld [vmem:[#allocation8 + $0x168] sm:$0xff] }
 0x2c1   :  { %2200 = vmatpush.msrb.mxu2 %v2088_v30  ;;  %2500 = vmatpush.msra.mxu3 %v2382_v22  ;;  %v2419_v30 = vld [vmem:[#allocation8 + $0x3f0] sm:$0xff] }
 0x2c2   :  { %2161 = vmatpush.msrb.mxu0 %v2082_v20  ;;  %v6234_v20 = vld [vmem:[%s6891_s5] sm:$0xf] }
 0x2c3   :  { %2201 = vmatpush.msrb.mxu2 %v2084_v5  ;;  %2162 = vmatmul.f32.vlgmr.msrb.gmra.mxu0 %v6221_v60  ;;  %v2420_v5 = vld [vmem:[#allocation8 + $0x3f8] sm:$0xff]  ;;  %v1846_v53 = vperm.slane %v6234_v20, 0 }
 0x2c4   :  { %2202 = vmatmul.f32.vlgmr.msrb.gmra.mxu2 %v6221_v60  ;;  %v2397_v60 = vld [vmem:[#allocation8 + $0x340] sm:$0xff]  ;;  %2501 = vmatpush.msra.mxu3 %v2378_v51  ;;  %v2318_v51 = vld [vmem:[#allocation8 + $0xc8] sm:$0xff] }
 0x2c5   :  { %2456 = vmatpush.msra.mxu1 %v2397_v60  ;;  %2431 = vmatpush.msra.mxu0 %v2353_v44  ;;  %v2326_v60 = vld [vmem:[#allocation8 + $0x108] sm:$0xff]  ;;  %v1847_v44 = vperm.slane %v6234_v20, 1 }
 0x2c6   :  { %2502 = vmatpush.msra.mxu3 %v2374_v37  ;;  %2471 = vmatpush.msra.mxu2 %v2354_v21  ;;  %v2400_v21 = vld [vmem:[#allocation8 + $0x358] sm:$0xff] }
 0x2c7   :  { %2457 = vmatpush.msra.mxu1 %v2393_v19  ;;  %2432 = vmatpush.msra.mxu0 %v2349_v46  ;;  %v2408_v19 = vld [vmem:[#allocation8 + $0x398] sm:$0xff]  ;;  %v2395_v46 = vld [vmem:[#allocation8 + $0x330] sm:$0xff] }
 0x2c8   :  { %2503 = vmatpush.msra.mxu3 %v2370_v40  ;;  %2472 = vmatpush.msra.mxu2 %v2350_v43  ;;  %v2314_v40 = vld [vmem:[#allocation8 + $0xa8] sm:$0xff] }
 0x2c9   :  { %2458 = vmatpush.msra.mxu1 %v2389_v14  ;;  %2433 = vmatpush.msra.mxu0 %v2345_v48  ;;  %v2321_v14 = vld [vmem:[#allocation8 + $0xe0] sm:$0xff]  ;;  %v1848_v48 = vperm.slane %v6234_v20, 2 }
 0x2ca   :  { %2504 = vmatpush.msra.mxu3 %v2366_v59  ;;  %2473 = vmatpush.msra.mxu2 %v2346_v39  ;;  %v2309_v39 = vld [vmem:[#allocation8 + $0x80] sm:$0xff] }
 0x2cb   :  { %2459 = vmatpush.msra.mxu1 %v2385_v24  ;;  %2434 = vmatpush.msra.mxu0 %v2341_v50  ;;  %v2403_v24 = vld [vmem:[#allocation8 + $0x370] sm:$0xff] }
 0x2cc   :  { %2505 = vmatpush.msra.mxu3 %v2362_v62  ;;  %2474 = vmatpush.msra.mxu2 %v2342_v32  ;;  %v2391_v62 = vld [vmem:[#allocation8 + $0x310] sm:$0xff]  ;;  %v2392_v32 = vld [vmem:[#allocation8 + $0x318] sm:$0xff] }
 0x2cd   :  { %2460 = vmatpush.msra.mxu1 %v2381_v4  ;;  %2435 = vmatpush.msra.mxu0 %v2337_v38  ;;  %v2404_v4 = vld [vmem:[#allocation8 + $0x378] sm:$0xff]  ;;  %v2387_v38 = vld [vmem:[#allocation8 + $0x2f0] sm:$0xff] }
 0x2ce   :  { %2506 = vmatpush.msra.mxu3 %v2358_v33  ;;  %2475 = vmatpush.msra.mxu2 %v2338_v18  ;;  %v2305_v33 = vld [vmem:[#allocation8 + $0x60] sm:$0xff]  ;;  %v6918_v18 = vld [vmem:[#allocation19_spill] sm:$0xff] }
 0x2cf   :  { %2461 = vmatpush.msra.mxu1 %v2377_v16  ;;  %2436 = vmatpush.msra.mxu0 %v2333_v31  ;;  %v2317_v16 = vld [vmem:[#allocation8 + $0xc0] sm:$0xff] }
 0x2d0   :  { %2571 = vmatpush.msrb.mxu3 %v2420_v5  ;;  %2476 = vmatpush.msra.mxu2 %v2334_v47  ;;  %v2388_v47 = vld [vmem:[#allocation8 + $0x2f8] sm:$0xff] }
 0x2d1   :  { %2462 = vmatpush.msra.mxu1 %v2373_v29  ;;  %2437 = vmatpush.msra.mxu0 %v2329_v61  ;;  %v2399_v29 = vld [vmem:[#allocation8 + $0x350] sm:$0xff]  ;;  %v2301_v61 = vld [vmem:[#allocation8 + $0x40] sm:$0xff] }
 0x2d2   :  { %2572 = vmatpush.msrb.mxu3 %v2416_v41  ;;  %2477 = vmatpush.msra.mxu2 %v2330_v58  ;;  %v2302_v58 = vld [vmem:[#allocation8 + $0x48] sm:$0xff] }
 0x2d3   :  { %2463 = vmatpush.msra.mxu1 %v2369_v2  ;;  %2438 = vmatpush.msra.mxu0 %v2325_v7  ;;  %v2313_v2 = vld [vmem:[#allocation8 + $0xa0] sm:$0xff]  ;;  %v2384_v7 = vld [vmem:[#allocation8 + $0x2d8] sm:$0xff] }
 0x2d4   :  { %2573 = vmatpush.msrb.mxu3 %v2412_v1  ;;  %2478 = vmatpush.msra.mxu2 %v2326_v60 }
 0x2d5   :  { %2464 = vmatpush.msra.mxu1 %v2365_v12  ;;  %2439 = vmatpush.msra.mxu0 %v2321_v14  ;;  %v2396_v12 = vld [vmem:[#allocation8 + $0x338] sm:$0xff] }
 0x2d6   :  { %2574 = vmatpush.msrb.mxu3 %v2408_v19  ;;  %2479 = vmatpush.msra.mxu2 %v2322_v13  ;;  %v2298_v19 = vld [vmem:[#allocation8 + $0x28] sm:$0xff]  ;;  %v2380_v13 = vld [vmem:[#allocation8 + $0x2b8] sm:$0xff] }
 0x2d7   :  { %2465 = vmatpush.msra.mxu1 %v2361_v10  ;;  %2440 = vmatpush.msra.mxu0 %v2317_v16  ;;  %v2310_v10 = vld [vmem:[#allocation8 + $0x88] sm:$0xff] }
 0x2d8   :  { %2575 = vmatpush.msrb.mxu3 %v2404_v4  ;;  %2480 = vmatpush.msra.mxu2 %v2318_v51  ;;  %v2293_v4 = vld [vmem:[#allocation8] sm:$0xff]  ;;  %v2294_v16 = vld [vmem:[#allocation8 + $0x8] sm:$0xff]  ;;  %v2375_v51 = vld [vmem:[#allocation8 + $0x290] sm:$0xff] }
 0x2d9   :  { %2466 = vmatpush.msra.mxu1 %v2357_v54  ;;  %2441 = vmatpush.msra.mxu0 %v2313_v2  ;;  %v2372_v2 = vld [vmem:[#allocation8 + $0x278] sm:$0xff] }
 0x2da   :  { %2576 = vmatpush.msrb.mxu3 %v2400_v21  ;;  %2481 = vmatpush.msra.mxu2 %v2314_v40  ;;  %v2371_v21 = vld [vmem:[#allocation8 + $0x270] sm:$0xff] }
 0x2db   :  { %2531 = vmatpush.msrb.mxu1 %v2419_v30  ;;  %2442 = vmatpush.msra.mxu0 %v2309_v39  ;;  %v219_v30 = vadd.f32 %v6918_v18, %v5895_v15  ;;  %v2351_v40 = vld [vmem:[#allocation8 + $0x1d0] sm:$0xff]  ;;  %v2360_v18 = vld [vmem:[#allocation8 + $0x218] sm:$0xff] }
 0x2dc   :  { %2577 = vmatpush.msrb.mxu3 %v2396_v12  ;;  %2482 = vmatpush.msra.mxu2 %v2310_v10  ;;  %v2368_v12 = vld [vmem:[#allocation8 + $0x258] sm:$0xff]  ;;  %v2347_v39 = vld [vmem:[#allocation8 + $0x1b0] sm:$0xff] }
 0x2dd   :  { %2532 = vmatpush.msrb.mxu1 %v2415_v36  ;;  %2443 = vmatpush.msra.mxu0 %v2305_v33  ;;  %v2348_v10 = vld [vmem:[#allocation8 + $0x1b8] sm:$0xff]  ;;  %v2343_v33 = vld [vmem:[#allocation8 + $0x190] sm:$0xff] }
 0x2de   :  { %2578 = vmatpush.msrb.mxu3 %v2392_v32  ;;  %v2363_v32 = vld [vmem:[#allocation8 + $0x230] sm:$0xff] }
 0x2df   :  { %2533 = vmatpush.msrb.mxu1 %v2411_v56  ;;  %v2383_v56 = vld [vmem:[#allocation8 + $0x2d0] sm:$0xff]  ;;  %2444 = vmatpush.msra.mxu0 %v2301_v61 }
 0x2e0   :  { %2579 = vmatpush.msrb.mxu3 %v2388_v47  ;;  %v2339_v47 = vld [vmem:[#allocation8 + $0x170] sm:$0xff] }
 0x2e1   :  { %2534 = vmatpush.msrb.mxu1 %v2407_v55  ;;  %v2297_v55 = vld [vmem:[#allocation8 + $0x20] sm:$0xff] }
 0x2e2   :  { %2580 = vmatpush.msrb.mxu3 %v2384_v7  ;;  %2445 = vmatpush.msra.mxu0 %v2297_v55  ;;  %v2331_v55 = vld [vmem:[#allocation8 + $0x130] sm:$0xff] }
 0x2e3   :  { %2535 = vmatpush.msrb.mxu1 %v2403_v24 }
 0x2e4   :  { %2581 = vmatpush.msrb.mxu3 %v2380_v13  ;;  %2446 = vmatpush.msra.mxu0 %v2293_v4  ;;  %v2327_v4 = vld [vmem:[#allocation8 + $0x110] sm:$0xff] }
 0x2e5   :  { %2536 = vmatpush.msrb.mxu1 %v2399_v29 }
 0x2e7   :  { %2537 = vmatpush.msrb.mxu1 %v2395_v46  ;;  %v2352_v46 = vld [vmem:[#allocation8 + $0x1d8] sm:$0xff] }
 0x2e9   :  { %2538 = vmatpush.msrb.mxu1 %v2391_v62 }
 0x2eb   :  { %2539 = vmatpush.msrb.mxu1 %v2387_v38 }
 0x2ed   :  { %2540 = vmatpush.msrb.mxu1 %v2383_v56  ;;  %v2335_v56 = vld [vmem:[#allocation8 + $0x150] sm:$0xff] }
 0x306   :  { %v1891_v6 = vpop.f32.mrf.mxu1 }
 0x30c   :  { %v1931_v54 = vpop.f32.mrf.mxu3 }
 0x30e   :  { %v1971_v22 = vpop.f32.mrf.mxu1 }
 0x31f   :  { %v1871_v23 = vpop.f32.mrf.mxu0 }
 0x320   :  { %v1872_v9 = vadd.f32 %v1871_v23, %v1846_v53  ;;  %v2379_v23 = vld [vmem:[#allocation8 + $0x2b0] sm:$0xff] }
 0x321   :  { %2541 = vmatpush.msrb.mxu1 %v2379_v23 }
 0x322   :  { %v1892_v37 = vadd.f32 %v1891_v6, %v1872_v9  ;;  %v2306_v6 = vld [vmem:[#allocation8 + $0x68] sm:$0xff] }
 0x323   :  { %2483 = vmatpush.msra.mxu2 %v2306_v6  ;;  %2542 = vmatpush.msrb.mxu1 %v2375_v51  ;;  %v2344_v6 = vld [vmem:[#allocation8 + $0x198] sm:$0xff] }
 0x324   :  { %v5094_v43 = vmul.f32 -1.442695, %v1892_v37  ;;  %v2355_v37 = vld [vmem:[#allocation8 + $0x1f0] sm:$0xff] }
 0x325   :  { %v1911_v59 = vpop.f32.mrf.mxu2  ;;  %2484 = vmatpush.msra.mxu2 %v2302_v58  ;;  %2511 = vmatpush.msrb.mxu0 %v2355_v37  ;;  %v2323_v37 = vld [vmem:[#allocation8 + $0xf0] sm:$0xff] }
 0x326   :  { %5225 = vpow2.f32 %v5094_v43  ;;  %v1912_v50 = vadd.f32 %v1911_v59, %v1847_v44  ;;  %v2356_v44 = vld [vmem:[#allocation8 + $0x1f8] sm:$0xff]  ;;  %2543 = vmatpush.msrb.mxu1 %v2371_v21  ;;  %v2367_v43 = vld [vmem:[#allocation8 + $0x250] sm:$0xff] }
 0x327   :  { %2485 = vmatpush.msra.mxu2 %v2298_v19  ;;  %2512 = vmatpush.msrb.mxu0 %v2351_v40  ;;  %v2332_v19 = vld [vmem:[#allocation8 + $0x138] sm:$0xff] }
 0x328   :  { %v1932_v5 = vadd.f32 %v1931_v54, %v1912_v50  ;;  %v1951_v31 = vpop.f32.mrf.mxu0  ;;  %2544 = vmatpush.msrb.mxu1 %v2367_v43  ;;  %v2364_v54 = vld [vmem:[#allocation8 + $0x238] sm:$0xff] }
 0x329   :  { %v1952_v36 = vadd.f32 %v1951_v31, %v1848_v48  ;;  %v2183_v41 = vpop.f32.mrf.mxu1  ;;  %2486 = vmatpush.msra.mxu2 %v2294_v16  ;;  %v1849_v48 = vperm.slane %v6234_v20, 3  ;;  %2513 = vmatpush.msrb.mxu0 %v2347_v39  ;;  %v2359_v20 = vld [vmem:[#allocation8 + $0x210] sm:$0xff]  ;;  %v2328_v16 = vld [vmem:[#allocation8 + $0x118] sm:$0xff] }
 0x32a   :  { %v5095_v53 = vmul.f32 -1.442695, %v1932_v5  ;;  %v2227_v1 = vadd.f32 %v2183_v41, %v219_v30  ;;  %2545 = vmatpush.msrb.mxu1 %v2363_v32  ;;  %v2320_v39 = vld [vmem:[#allocation8 + $0xd8] sm:$0xff] }
 0x32b   :  { %v1972_v60 = vadd.f32 %v1971_v22, %v1952_v36  ;;  %v2376_v22 = vld [vmem:[#allocation8 + $0x298] sm:$0xff]  ;;  %2551 = vmatpush.msrb.mxu2 %v2356_v44  ;;  %2514 = vmatpush.msrb.mxu0 %v2343_v33  ;;  %v2315_v33 = vld [vmem:[#allocation8 + $0xb0] sm:$0xff] }
 0x32c   :  { %v5226_v14 = vpop.eup %5225  ;;  %5227 = vpow2.f32 %v5095_v53  ;;  %v5098_v29 = vmul.f32 -1.442695, %v2227_v1  ;;  %2582 = vmatpush.msrb.mxu3 %v2376_v22  ;;  %v2340_v36 = vld [vmem:[#allocation8 + $0x178] sm:$0xff]  ;;  %2546 = vmatpush.msrb.mxu1 %v2359_v20  ;;  %v2011_v53 = vpop.f32.mrf.mxu3 }
 0x32d   :  { %v6241_v24 = vadd.f32 1.0, %v5226_v14  ;;  %v5096_v9 = vmul.f32 -1.442695, %v1972_v60  ;;  %2552 = vmatpush.msrb.mxu2 %v2352_v46  ;;  %2515 = vmatpush.msrb.mxu0 %v2339_v47  ;;  %v2336_v1 = vld [vmem:[#allocation8 + $0x158] sm:$0xff] }
 0x32e   :  { %2583 = vmatpush.msrb.mxu3 %v2372_v2  ;;  %v1991_v50 = vpop.f32.mrf.mxu2  ;;  %v2324_v44 = vld [vmem:[#allocation8 + $0xf8] sm:$0xff]  ;;  %v178_v2 = vadd.f32 %v5985_v34, %v5892_v11 }
 0x32f   :  { %5229 = vrcp.f32 %v6241_v24  ;;  %2553 = vmatpush.msrb.mxu2 %v2348_v10  ;;  %v1992_v31 = vadd.f32 %v1991_v50, %v1849_v48  ;;  %2516 = vmatpush.msrb.mxu0 %v2335_v56  ;;  %v2037_v51 = vand.u32 2147483648, %v6241_v24  ;;  %vm2031_vm14 = vweird.f32 %v6241_v24  ;;  %v2319_v48 = vld [vmem:[#allocation8 + $0xd0] sm:$0xff]  ;;  %v2312_v47 = vld [vmem:[#allocation8 + $0x98] sm:$0xff] }
 0x330   :  { %5231 = vpow2.f32 %v5096_v9  ;;  %2584 = vmatpush.msrb.mxu3 %v2368_v12  ;;  %v2035_v22 = vand.u32 2147483647, %v6241_v24  ;;  %v2296_v46 = vld [vmem:[#allocation8 + $0x18] sm:$0xff] }
 0x331   :  { %5233 = vpow2.f32 %v5098_v29  ;;  %2554 = vmatpush.msrb.mxu2 %v2344_v6  ;;  %v2012_v7 = vadd.f32 %v2011_v53, %v1992_v31  ;;  %2517 = vmatpush.msrb.mxu0 %v2331_v55  ;;  %v2038_v10 = vor.u32 1.1754944e-38, %v2037_v51  ;;  %v2316_v6 = vld [vmem:[#allocation8 + $0xb8] sm:$0xff]  ;;  %v2311_v31 = vld [vmem:[#allocation8 + $0x90] sm:$0xff] }
 0x332   :  { %v5228_v59 = vpop.eup %5227  ;;  %2585 = vmatpush.msrb.mxu3 %v2364_v54  ;;  %vm2036_vm2 = vcmp.eq.f32.partialorder %v2035_v22, 8.507059e+37  ;;  %v2300_v22 = vld [vmem:[#allocation8 + $0x38] sm:$0xff] }
 0x333   :  { %v6245_v62 = vadd.f32 1.0, %v5228_v59  ;;  %2555 = vmatpush.msrb.mxu2 %v2340_v36  ;;  %2518 = vmatpush.msrb.mxu0 %v2327_v4 }
 0x334   :  { %2586 = vmatpush.msrb.mxu3 %v2360_v18 }
 0x335   :  { %v6247_v38 = vpop.eup %5229  ;;  %5235 = vrcp.f32 %v6245_v62  ;;  %2556 = vmatpush.msrb.mxu2 %v2336_v1  ;;  %v2052_v40 = vand.u32 2147483648, %v6245_v62  ;;  %2519 = vmatpush.msrb.mxu0 %v2323_v37  ;;  %vm2046_vm1 = vweird.f32 %v6245_v62 }
 0x336   :  { %v5232_v30 = vpop.eup %5231  ;;  %v2027_v5 = vmul.f32 %v6247_v38, %v6241_v24  ;;  %vm2032_vm13 = vweird.f32 %v6247_v38  ;;  %v2050_v24 = vand.u32 2147483647, %v6245_v62 }
 0x337   :  { %v6252_v41 = vadd.f32 1.0, %v5232_v30  ;;  %v5234_v61 = vpop.eup %5233  ;;  %2557 = vmatpush.msrb.mxu2 %v2332_v19  ;;  %vm6272_vm15 = vmor %vm2031_vm14, %vm2032_vm13  ;;  %2520 = vmatpush.msrb.mxu0 %v2319_v48  ;;  %v2053_v20 = vor.u32 1.1754944e-38, %v2052_v40  ;;  %v2223_v48 = vpop.f32.mrf.mxu3 }
 0x338   :  { %v2028_v58 = vsub.f32 1.0, %v2027_v5  ;;  %v6256_v14 = vadd.f32 1.0, %v5234_v61  ;;  %vm2051_vm4 = vcmp.eq.f32.partialorder %v2050_v24, 8.507059e+37 }
 0x339   :  { %5237 = vrcp.f32 %v6252_v41  ;;  %2558 = vmatpush.msrb.mxu2 %v2328_v16  ;;  %2521 = vmatpush.msrb.mxu0 %v2315_v33  ;;  %vm2061_vm6 = vweird.f32 %v6252_v41  ;;  %v2716_v33 = vld [vmem:[#allocation6 + $0x1c8] sm:$0xff] }
 0x33a   :  { %v2029_v60 = vmul.f32 %v6247_v38, %v2028_v58  ;;  %5239 = vtanh.f32 %v2012_v7  ;;  %v6921_v58 = vld [vmem:[#allocation18_spill] sm:$0xff]  ;;  %v2307_v7 = vld [vmem:[#allocation8 + $0x70] sm:$0xff]  ;;  %vm2262_vm10 = vweird.f32 %v6256_v14 }
 0x33b   :  { %v5236_v23 = vpop.eup %5235  ;;  %5241 = vrcp.f32 %v6256_v14  ;;  %2559 = vmatpush.msrb.mxu2 %v2324_v44  ;;  %v260_v56 = vadd.f32 %v6921_v58, %v5911_v42  ;;  %2522 = vmatpush.msrb.mxu0 %v2311_v31  ;;  %v2065_v44 = vand.u32 2147483647, %v6252_v41  ;;  %v2268_v31 = vand.u32 2147483648, %v6256_v14  ;;  %v2710_v58 = vld [vmem:[#allocation6 + $0x198] sm:$0xff] }
 0x33c   :  { %v2042_v13 = vmul.f32 %v5236_v23, %v6245_v62  ;;  %v2030_v9 = vadd.f32 %v6247_v38, %v2029_v60  ;;  %vm2047_vm0 = vweird.f32 %v5236_v23  ;;  %v2308_v60 = vld [vmem:[#allocation8 + $0x78] sm:$0xff] }
 0x33d   :  { %2560 = vmatpush.msrb.mxu2 %v2320_v39  ;;  %vm2048_vm3 = vmor %vm2046_vm1, %vm2047_vm0  ;;  %2523 = vmatpush.msrb.mxu0 %v2307_v7  ;;  %vm2066_vm8 = vcmp.eq.f32.partialorder %v2065_v44, 8.507059e+37 }
 0x33e   :  { %v2043_v29 = vsub.f32 1.0, %v2042_v13  ;;  %v2034_v34 = vsel %vm6272_vm15, %v6247_v38, %v2030_v9  ;;  %v2303_v13 = vld [vmem:[#allocation8 + $0x50] sm:$0xff]  ;;  %v2304_v9 = vld [vmem:[#allocation8 + $0x58] sm:$0xff] }
 0x33f   :  { %v6264_v21 = vpop.eup %5237  ;;  %v2039_v38 = vsel %vm2036_vm2, %v2038_v10, %v2034_v34  ;;  %2561 = vmatpush.msrb.mxu2 %v2316_v6  ;;  %2524 = vmatpush.msrb.mxu0 %v2303_v13  ;;  %v2720_v10 = vld [vmem:[#allocation6 + $0x1e8] sm:$0xff]  ;;  %v2718_v6 = vld [vmem:[#allocation6 + $0x1d8] sm:$0xff] }
 0x340   :  { %v2044_v43 = vmul.f32 %v5236_v23, %v2043_v29  ;;  %v2057_v12 = vmul.f32 %v6264_v21, %v6252_v41  ;;  %v2163_v59 = vpop.f32.mrf.mxu0  ;;  %v5240_v30 = vpop.eup %5239  ;;  %vm2062_vm5 = vweird.f32 %v6264_v21  ;;  %v2299_v29 = vld [vmem:[#allocation8 + $0x30] sm:$0xff] }
 0x341   :  { %v2226_v50 = vadd.f32 %v2163_v59, %v178_v2  ;;  %v6284_v62 = vpop.eup %5241  ;;  %v2073_v1 = vmul.f32 %v5240_v30, %v2039_v38  ;;  %2562 = vmatpush.msrb.mxu2 %v2312_v47  ;;  %v2295_v2 = vld [vmem:[#allocation8 + $0x10] sm:$0xff]  ;;  %vm2063_vm7 = vmor %vm2061_vm6, %vm2062_vm5  ;;  %2525 = vmatpush.msrb.mxu0 %v2299_v29  ;;  %v2266_v47 = vand.u32 2147483647, %v6256_v14 }
 0x342   :  { %v2058_v32 = vsub.f32 1.0, %v2057_v12  ;;  %v2045_v54 = vadd.f32 %v5236_v23, %v2044_v43  ;;  %v2258_v4 = vmul.f32 %v6284_v62, %v6256_v14  ;;  %vm2263_vm9 = vweird.f32 %v6284_v62 }
 0x343   :  { %v5097_v18 = vmul.f32 -1.442695, %v2226_v50  ;;  %2563 = vmatpush.msrb.mxu2 %v2308_v60  ;;  %2526 = vmatpush.msrb.mxu0 %v2295_v2  ;;  %v2722_v50 = vld [vmem:[#allocation6 + $0x1f8] sm:$0xff]  ;;  %vm6322_vm11 = vmor %vm2262_vm10, %vm2263_vm9  ;;  %v2704_v60 = vld [vmem:[#allocation6 + $0x168] sm:$0xff]  ;;  %vm2267_vm13 = vcmp.eq.f32.partialorder %v2266_v47, 8.507059e+37 }
 0x344   :  { %v2049_v5 = vsel %vm2048_vm3, %v5236_v23, %v2045_v54  ;;  %v2059_v36 = vmul.f32 %v6264_v21, %v2058_v32  ;;  %v2259_v24 = vsub.f32 1.0, %v2258_v4  ;;  %v2700_v4 = vld [vmem:[#allocation6 + $0x148] sm:$0xff]  ;;  %v2721_v47 = vld [vmem:[#allocation6 + $0x1f0] sm:$0xff] }
 0x345   :  { %v2054_v61 = vsel %vm2051_vm4, %v2053_v20, %v2049_v5  ;;  %5243 = vpow2.f32 %v5097_v18  ;;  %2564 = vmatpush.msrb.mxu2 %v2304_v9  ;;  %v2714_v5 = vld [vmem:[#allocation6 + $0x1b8] sm:$0xff] }
 0x346   :  { %v2072_v53 = vmul.f32 %v2054_v61, %v6168_v63  ;;  %v2060_v16 = vadd.f32 %v6264_v21, %v2059_v36  ;;  %v2067_v63 = vand.u32 2147483648, %v6252_v41  ;;  %v2260_v59 = vmul.f32 %v6284_v62, %v2259_v24  ;;  %v2708_v61 = vld [vmem:[#allocation6 + $0x188] sm:$0xff] }
 0x347   :  { %v2203_v55 = vpop.f32.mrf.mxu2  ;;  %2565 = vmatpush.msrb.mxu2 %v2300_v22  ;;  %v2696_v22 = vld [vmem:[#allocation6 + $0x128] sm:$0xff] }
 0x348   :  { %v6290_v19 = vadd.f32 %v2073_v1, %v2072_v53  ;;  %v2228_v23 = vadd.f32 %v2203_v55, %v260_v56  ;;  %v2064_v43 = vsel %vm2063_vm7, %v6264_v21, %v2060_v16  ;;  %v2068_v12 = vor.u32 1.1754944e-38, %v2067_v63  ;;  %v2706_v55 = vld [vmem:[#allocation6 + $0x178] sm:$0xff]  ;;  %v2717_v56 = vld [vmem:[#allocation6 + $0x1d0] sm:$0xff] }
 0x349   :  { %2566 = vmatpush.msrb.mxu2 %v2296_v46  ;;  %v301_v21 = vadd.f32 %v5866_v8, %v5942_v57  ;;  %v2261_v18 = vadd.f32 %v6284_v62, %v2260_v59  ;;  %v2712_v8 = vld [vmem:[#allocation6 + $0x1a8] sm:$0xff] }
 0x34a   :  { %5245 = vtanh.f32 %v6290_v19  ;;  %v5099_v51 = vmul.f32 -1.442695, %v2228_v23  ;;  %v2069_v34 = vsel %vm2066_vm8, %v2068_v12, %v2064_v43  ;;  %v2269_v23 = vor.u32 1.1754944e-38, %v2268_v31  ;;  %v2692_v43 = vld [vmem:[#allocation6 + $0x108] sm:$0xff]  ;;  %v2694_v12 = vld [vmem:[#allocation6 + $0x118] sm:$0xff] }
 0x34b   :  { %v5244_v37 = vpop.eup %5243  ;;  %v2229_v38 = vadd.f32 %v2223_v48, %v301_v21  ;;  %v2265_v1 = vsel %vm6322_vm11, %v6284_v62, %v2261_v18  ;;  %v2702_v62 = vld [vmem:[#allocation6 + $0x158] sm:$0xff]  ;;  %v2688_v59 = vld [vmem:[#allocation6 + $0xe8] sm:$0xff] }
 0x34c   :  { %v6300_v40 = vadd.f32 1.0, %v5244_v37  ;;  %5247 = vpow2.f32 %v5099_v51  ;;  %v2270_v16 = vsel %vm2267_vm13, %v2269_v23, %v2265_v1  ;;  %v2698_v37 = vld [vmem:[#allocation6 + $0x138] sm:$0xff]  ;;  %v2676_v18 = vld [vmem:[#allocation6 + $0x88] sm:$0xff]  ;;  %v2707_v23 = vld [vmem:[#allocation6 + $0x180] sm:$0xff] }
 0x34d   :  { %v2288_v46 = vmul.f32 %v2270_v16, %v6215_v52  ;;  %v2690_v48 = vld [vmem:[#allocation6 + $0xf8] sm:$0xff]  ;;  %v2705_v16 = vld [vmem:[#allocation6 + $0x170] sm:$0xff] }
 0x34e   :  { %5249 = vrcp.f32 %v6300_v40  ;;  %v2253_v53 = vand.u32 2147483648, %v6300_v40  ;;  %v2251_v14 = vand.u32 2147483647, %v6300_v40  ;;  %vm2247_vm14 = vweird.f32 %v6300_v40  ;;  %v2686_v52 = vld [vmem:[#allocation6 + $0xd8] sm:$0xff] }
 0x34f   :  { %v2670_v1 = vld [vmem:[#allocation6 + $0x58] sm:$0xff] }
 0x350   :  { %v5246_v41 = vpop.eup %5245  ;;  %v2254_v63 = vor.u32 1.1754944e-38, %v2253_v53  ;;  %vm2252_vm0 = vcmp.eq.f32.partialorder %v2251_v14, 8.507059e+37  ;;  %v2668_v53 = vld [vmem:[#allocation6 + $0x48] sm:$0xff]  ;;  %v2713_v14 = vld [vmem:[#allocation6 + $0x1b0] sm:$0xff] }
 0x351   :  { %v6307_v39 = vmul.f32 %v5246_v41, %v2069_v34 }
 0x352   :  { %v5248_v32 = vpop.eup %5247 }
 0x353   :  { %v6311_v54 = vadd.f32 1.0, %v5248_v32  ;;  %2467 = vmatmul.f32.vlgmr.msra.gmra.mxu1 %v6307_v39  ;;  %2507 = vmatmul.f32.vlgmr.msra.gmra.mxu3 %v6307_v39  ;;  %v2684_v32 = vld [vmem:[#allocation6 + $0xc8] sm:$0xff] }
 0x354   :  { %v5250_v20 = vpop.eup %5249  ;;  %2743 = vmatpush.msra.mxu1 %v2720_v10  ;;  %2783 = vmatpush.msra.mxu3 %v2722_v50 }
 0x355   :  { %v2243_v30 = vmul.f32 %v5250_v20, %v6300_v40  ;;  %5251 = vrcp.f32 %v6311_v54  ;;  %vm2248_vm12 = vweird.f32 %v5250_v20  ;;  %v2283_v50 = vand.u32 2147483648, %v6311_v54 }
 0x356   :  { %2744 = vmatpush.msra.mxu1 %v2716_v33  ;;  %2784 = vmatpush.msra.mxu3 %v2718_v6  ;;  %5253 = vtanh.f32 %v2229_v38  ;;  %vm2249_vm15 = vmor %vm2247_vm14, %vm2248_vm12  ;;  %vm2277_vm2 = vweird.f32 %v6311_v54  ;;  %v2281_v21 = vand.u32 2147483647, %v6311_v54  ;;  %v2680_v33 = vld [vmem:[#allocation6 + $0xa8] sm:$0xff]  ;;  %v2682_v6 = vld [vmem:[#allocation6 + $0xb8] sm:$0xff] }
 0x357   :  { %v2244_v36 = vsub.f32 1.0, %v2243_v30  ;;  %v2284_v38 = vor.u32 1.1754944e-38, %v2283_v50  ;;  %v2678_v30 = vld [vmem:[#allocation6 + $0x98] sm:$0xff]  ;;  %v2667_v50 = vld [vmem:[#allocation6 + $0x40] sm:$0xff] }
 0x358   :  { %2745 = vmatpush.msra.mxu1 %v2712_v8  ;;  %2785 = vmatpush.msra.mxu3 %v2714_v5  ;;  %vm2282_vm4 = vcmp.eq.f32.partialorder %v2281_v21, 8.507059e+37  ;;  %v2665_v21 = vld [vmem:[#allocation6 + $0x30] sm:$0xff] }
 0x359   :  { %v2245_v7 = vmul.f32 %v5250_v20, %v2244_v36  ;;  %v2672_v36 = vld [vmem:[#allocation6 + $0x68] sm:$0xff] }
 0x35a   :  { %2746 = vmatpush.msra.mxu1 %v2708_v61  ;;  %2786 = vmatpush.msra.mxu3 %v2710_v58  ;;  %v2674_v61 = vld [vmem:[#allocation6 + $0x78] sm:$0xff]  ;;  %v2715_v58 = vld [vmem:[#allocation6 + $0x1c0] sm:$0xff] }
 0x35b   :  { %v5252_v13 = vpop.eup %5251  ;;  %v2246_v9 = vadd.f32 %v5250_v20, %v2245_v7  ;;  %2547 = vmatmul.f32.vlgmr.msrb.gmra.mxu1 %v6307_v39  ;;  %2587 = vmatmul.f32.vlgmr.msrb.gmra.mxu3 %v6307_v39  ;;  %v2711_v7 = vld [vmem:[#allocation6 + $0x1a0] sm:$0xff] }
 0x35c   :  { %v2273_v51 = vmul.f32 %v5252_v13, %v6311_v54  ;;  %2747 = vmatpush.msra.mxu1 %v2704_v60  ;;  %2787 = vmatpush.msra.mxu3 %v2706_v55  ;;  %v5254_v44 = vpop.eup %5253  ;;  %vm2278_vm1 = vweird.f32 %v5252_v13  ;;  %v2719_v54 = vld [vmem:[#allocation6 + $0x1e0] sm:$0xff]  ;;  %v2664_v60 = vld [vmem:[#allocation6 + $0x28] sm:$0xff]  ;;  %v2666_v55 = vld [vmem:[#allocation6 + $0x38] sm:$0xff] }
 0x35d   :  { %v2250_v29 = vsel %vm2249_vm15, %v5250_v20, %v2246_v9  ;;  %vm2279_vm3 = vmor %vm2277_vm2, %vm2278_vm1  ;;  %v2660_v9 = vld [vmem:[#allocation6 + $0x8] sm:$0xff] }
 0x35e   :  { %v2255_v2 = vsel %vm2252_vm0, %v2254_v63, %v2250_v29  ;;  %v2274_v40 = vsub.f32 1.0, %v2273_v51  ;;  %2748 = vmatpush.msra.mxu1 %v2700_v4  ;;  %2788 = vmatpush.msra.mxu3 %v2702_v62  ;;  %v2662_v4 = vld [vmem:[#allocation6 + $0x18] sm:$0xff]  ;;  %v2703_v62 = vld [vmem:[#allocation6 + $0x160] sm:$0xff]  ;;  %v2701_v51 = vld [vmem:[#allocation6 + $0x150] sm:$0xff] }
 0x35f   :  { %v2289_v24 = vmul.f32 %v5254_v44, %v2255_v2  ;;  %v2699_v63 = vld [vmem:[#allocation6 + $0x140] sm:$0xff]  ;;  %v2693_v44 = vld [vmem:[#allocation6 + $0x110] sm:$0xff] }
 0x360   :  { %v2275_v41 = vmul.f32 %v5252_v13, %v2274_v40  ;;  %2749 = vmatpush.msra.mxu1 %v2696_v22  ;;  %2789 = vmatpush.msra.mxu3 %v2698_v37  ;;  %v2695_v29 = vld [vmem:[#allocation6 + $0x120] sm:$0xff]  ;;  %v2697_v22 = vld [vmem:[#allocation6 + $0x130] sm:$0xff] }
 0x361   :  { %v6337_v34 = vadd.f32 %v2289_v24, %v2288_v46  ;;  %v2691_v37 = vld [vmem:[#allocation6 + $0x100] sm:$0xff]  ;;  %v2689_v40 = vld [vmem:[#allocation6 + $0xf0] sm:$0xff] }
 0x362   :  { %v2276_v10 = vadd.f32 %v5252_v13, %v2275_v41  ;;  %2750 = vmatpush.msra.mxu1 %v2692_v43  ;;  %2790 = vmatpush.msra.mxu3 %v2694_v12  ;;  %v2687_v2 = vld [vmem:[#allocation6 + $0xe0] sm:$0xff]  ;;  %v2685_v24 = vld [vmem:[#allocation6 + $0xd0] sm:$0xff] }
 0x363   :  { %5255 = vtanh.f32 %v6337_v34  ;;  %v2683_v46 = vld [vmem:[#allocation6 + $0xc0] sm:$0xff]  ;;  %v2681_v12 = vld [vmem:[#allocation6 + $0xb0] sm:$0xff] }
 0x364   :  { %2751 = vmatpush.msra.mxu1 %v2688_v59  ;;  %2791 = vmatpush.msra.mxu3 %v2690_v48  ;;  %v2280_v20 = vsel %vm2279_vm3, %v5252_v13, %v2276_v10  ;;  %v2709_v13 = vld [vmem:[#allocation6 + $0x190] sm:$0xff]  ;;  %v2679_v43 = vld [vmem:[#allocation6 + $0xa0] sm:$0xff] }
 0x365   :  { %v2285_v5 = vsel %vm2282_vm4, %v2284_v38, %v2280_v20  ;;  %v2675_v41 = vld [vmem:[#allocation6 + $0x80] sm:$0xff]  ;;  %v2677_v59 = vld [vmem:[#allocation6 + $0x90] sm:$0xff]  ;;  %v2995_v38 = vld [vmem:[#allocation8 + $0x3e8] sm:$0xff] }
 0x366   :  { %2752 = vmatpush.msra.mxu1 %v2684_v32  ;;  %2792 = vmatpush.msra.mxu3 %v2686_v52  ;;  %v2671_v48 = vld [vmem:[#allocation6 + $0x60] sm:$0xff]  ;;  %v2673_v10 = vld [vmem:[#allocation6 + $0x70] sm:$0xff] }
 0x367   :  { %v2669_v32 = vld [vmem:[#allocation6 + $0x50] sm:$0xff]  ;;  %v2663_v52 = vld [vmem:[#allocation6 + $0x20] sm:$0xff] }
 0x368   :  { %2753 = vmatpush.msra.mxu1 %v2680_v33  ;;  %2793 = vmatpush.msra.mxu3 %v2682_v6  ;;  %v2659_v33 = vld [vmem:[#allocation6] sm:$0xff]  ;;  %v2661_v6 = vld [vmem:[#allocation6 + $0x10] sm:$0xff] }
 0x369   :  { %v5256_v8 = vpop.eup %5255  ;;  %v2994_v20 = vld [vmem:[#allocation8 + $0x3e0] sm:$0xff] }
 0x36a   :  { %v6343_v31 = vmul.f32 %v5256_v8, %v2285_v5  ;;  %2754 = vmatpush.msra.mxu1 %v2676_v18  ;;  %2794 = vmatpush.msra.mxu3 %v2678_v30  ;;  %v2990_v18 = vld [vmem:[#allocation8 + $0x3c0] sm:$0xff]  ;;  %v2991_v30 = vld [vmem:[#allocation8 + $0x3c8] sm:$0xff] }
 0x36b   :  { %v2986_v8 = vld [vmem:[#allocation8 + $0x3a0] sm:$0xff]  ;;  %v2987_v5 = vld [vmem:[#allocation8 + $0x3a8] sm:$0xff] }
 0x36c   :  { %2447 = vmatmul.f32.vlgmr.msra.gmra.mxu0 %v6343_v31  ;;  %2487 = vmatmul.f32.vlgmr.msra.gmra.mxu2 %v6343_v31 }
 0x36d   :  { %2723 = vmatpush.msra.mxu0 %v2719_v54  ;;  %2763 = vmatpush.msra.mxu2 %v2721_v47  ;;  %v2982_v54 = vld [vmem:[#allocation8 + $0x380] sm:$0xff]  ;;  %v2983_v47 = vld [vmem:[#allocation8 + $0x388] sm:$0xff] }
 0x36e   :  { %2755 = vmatpush.msra.mxu1 %v2672_v36  ;;  %2795 = vmatpush.msra.mxu3 %v2674_v61  ;;  %v2978_v36 = vld [vmem:[#allocation8 + $0x360] sm:$0xff]  ;;  %v2979_v61 = vld [vmem:[#allocation8 + $0x368] sm:$0xff] }
 0x36f   :  { %2724 = vmatpush.msra.mxu0 %v2715_v58  ;;  %2764 = vmatpush.msra.mxu2 %v2717_v56  ;;  %v2975_v58 = vld [vmem:[#allocation8 + $0x348] sm:$0xff]  ;;  %v2970_v56 = vld [vmem:[#allocation8 + $0x320] sm:$0xff] }
 0x370   :  { %2756 = vmatpush.msra.mxu1 %v2668_v53  ;;  %2796 = vmatpush.msra.mxu3 %v2670_v1  ;;  %v2971_v53 = vld [vmem:[#allocation8 + $0x328] sm:$0xff]  ;;  %v2966_v1 = vld [vmem:[#allocation8 + $0x300] sm:$0xff] }
 0x371   :  { %2725 = vmatpush.msra.mxu0 %v2711_v7  ;;  %2765 = vmatpush.msra.mxu2 %v2713_v14  ;;  %v2967_v7 = vld [vmem:[#allocation8 + $0x308] sm:$0xff]  ;;  %v2962_v14 = vld [vmem:[#allocation8 + $0x2e0] sm:$0xff] }
 0x372   :  { %2757 = vmatpush.msra.mxu1 %v2664_v60  ;;  %2797 = vmatpush.msra.mxu3 %v2666_v55  ;;  %v2963_v60 = vld [vmem:[#allocation8 + $0x2e8] sm:$0xff]  ;;  %v2958_v55 = vld [vmem:[#allocation8 + $0x2c0] sm:$0xff] }
 0x373   :  { %2726 = vmatpush.msra.mxu0 %v2707_v23  ;;  %2766 = vmatpush.msra.mxu2 %v2709_v13  ;;  %v2959_v23 = vld [vmem:[#allocation8 + $0x2c8] sm:$0xff]  ;;  %v2954_v13 = vld [vmem:[#allocation8 + $0x2a0] sm:$0xff] }
 0x374   :  { %2758 = vmatpush.msra.mxu1 %v2660_v9  ;;  %2798 = vmatpush.msra.mxu3 %v2662_v4  ;;  %v2955_v9 = vld [vmem:[#allocation8 + $0x2a8] sm:$0xff]  ;;  %v2950_v4 = vld [vmem:[#allocation8 + $0x280] sm:$0xff] }
 0x375   :  { %2527 = vmatmul.f32.vlgmr.msrb.gmra.mxu0 %v6343_v31  ;;  %2567 = vmatmul.f32.vlgmr.msrb.gmra.mxu2 %v6343_v31 }
 0x376   :  { %2727 = vmatpush.msra.mxu0 %v2703_v62  ;;  %2759 = vmatmul.f32.vlgmr.msra.gmra.mxu1 %v6343_v31  ;;  %v2951_v62 = vld [vmem:[#allocation8 + $0x288] sm:$0xff] }
 0x377   :  { %2767 = vmatpush.msra.mxu2 %v2705_v16  ;;  %2799 = vmatmul.f32.vlgmr.msra.gmra.mxu3 %v6343_v31  ;;  %v2930_v16 = vld [vmem:[#allocation8 + $0x1e0] sm:$0xff] }
 0x378   :  { %2728 = vmatpush.msra.mxu0 %v2699_v63  ;;  %3028 = vmatpush.msrb.mxu1 %v2994_v20  ;;  %v2931_v63 = vld [vmem:[#allocation8 + $0x1e8] sm:$0xff] }
 0x379   :  { %2768 = vmatpush.msra.mxu2 %v2701_v51  ;;  %3068 = vmatpush.msrb.mxu3 %v2995_v38  ;;  %v2946_v51 = vld [vmem:[#allocation8 + $0x260] sm:$0xff]  ;;  %v2911_v20 = vld [vmem:[#allocation8 + $0x148] sm:$0xff]  ;;  %v2992_v38 = vld [vmem:[#allocation8 + $0x3d0] sm:$0xff] }
 0x37a   :  { %2729 = vmatpush.msra.mxu0 %v2695_v29  ;;  %3029 = vmatpush.msrb.mxu1 %v2990_v18  ;;  %v2947_v29 = vld [vmem:[#allocation8 + $0x268] sm:$0xff]  ;;  %v2993_v18 = vld [vmem:[#allocation8 + $0x3d8] sm:$0xff] }
 0x37b   :  { %2769 = vmatpush.msra.mxu2 %v2697_v22  ;;  %3069 = vmatpush.msrb.mxu3 %v2991_v30  ;;  %v2926_v22 = vld [vmem:[#allocation8 + $0x1c0] sm:$0xff] }
 0x37c   :  { %2730 = vmatpush.msra.mxu0 %v2691_v37  ;;  %3030 = vmatpush.msrb.mxu1 %v2986_v8  ;;  %v2927_v37 = vld [vmem:[#allocation8 + $0x1c8] sm:$0xff]  ;;  %v2906_v30 = vld [vmem:[#allocation8 + $0x120] sm:$0xff] }
 0x37d   :  { %2770 = vmatpush.msra.mxu2 %v2693_v44  ;;  %3070 = vmatpush.msrb.mxu3 %v2987_v5  ;;  %v2942_v44 = vld [vmem:[#allocation8 + $0x240] sm:$0xff]  ;;  %v2907_v8 = vld [vmem:[#allocation8 + $0x128] sm:$0xff]  ;;  %v2988_v5 = vld [vmem:[#allocation8 + $0x3b0] sm:$0xff] }
 0x37e   :  { %2731 = vmatpush.msra.mxu0 %v2687_v2  ;;  %3031 = vmatpush.msrb.mxu1 %v2982_v54  ;;  %v2943_v2 = vld [vmem:[#allocation8 + $0x248] sm:$0xff] }
 0x37f   :  { %2771 = vmatpush.msra.mxu2 %v2689_v40  ;;  %3071 = vmatpush.msrb.mxu3 %v2983_v47  ;;  %v2922_v40 = vld [vmem:[#allocation8 + $0x1a0] sm:$0xff]  ;;  %v2989_v47 = vld [vmem:[#allocation8 + $0x3b8] sm:$0xff] }
 0x380   :  { %2732 = vmatpush.msra.mxu0 %v2683_v46  ;;  %3032 = vmatpush.msrb.mxu1 %v2978_v36  ;;  %v2923_v46 = vld [vmem:[#allocation8 + $0x1a8] sm:$0xff]  ;;  %v2902_v36 = vld [vmem:[#allocation8 + $0x100] sm:$0xff] }
 0x381   :  { %2772 = vmatpush.msra.mxu2 %v2685_v24  ;;  %3072 = vmatpush.msrb.mxu3 %v2979_v61  ;;  %v2938_v24 = vld [vmem:[#allocation8 + $0x220] sm:$0xff]  ;;  %v2903_v61 = vld [vmem:[#allocation8 + $0x108] sm:$0xff] }
 0x382   :  { %2733 = vmatpush.msra.mxu0 %v2679_v43  ;;  %v2939_v43 = vld [vmem:[#allocation8 + $0x228] sm:$0xff] }
 0x383   :  { %2773 = vmatpush.msra.mxu2 %v2681_v12  ;;  %3073 = vmatpush.msrb.mxu3 %v2975_v58  ;;  %v2918_v12 = vld [vmem:[#allocation8 + $0x180] sm:$0xff]  ;;  %v2985_v58 = vld [vmem:[#allocation8 + $0x398] sm:$0xff] }
 0x384   :  { %2734 = vmatpush.msra.mxu0 %v2675_v41  ;;  %v2919_v41 = vld [vmem:[#allocation8 + $0x188] sm:$0xff] }
 0x385   :  { %2774 = vmatpush.msra.mxu2 %v2677_v59  ;;  %3074 = vmatpush.msrb.mxu3 %v2971_v53  ;;  %v2934_v59 = vld [vmem:[#allocation8 + $0x200] sm:$0xff] }
 0x386   :  { %2735 = vmatpush.msra.mxu0 %v2671_v48  ;;  %v2935_v48 = vld [vmem:[#allocation8 + $0x208] sm:$0xff]  ;;  %v2898_v53 = vld [vmem:[#allocation8 + $0xe0] sm:$0xff] }
 0x387   :  { %2775 = vmatpush.msra.mxu2 %v2673_v10  ;;  %3075 = vmatpush.msrb.mxu3 %v2967_v7  ;;  %v2980_v7 = vld [vmem:[#allocation8 + $0x370] sm:$0xff] }
 0x388   :  { %2736 = vmatpush.msra.mxu0 %v2667_v50  ;;  %v2914_v50 = vld [vmem:[#allocation8 + $0x160] sm:$0xff] }
 0x389   :  { %2776 = vmatpush.msra.mxu2 %v2669_v32  ;;  %3076 = vmatpush.msrb.mxu3 %v2963_v60  ;;  %v2915_v32 = vld [vmem:[#allocation8 + $0x168] sm:$0xff]  ;;  %v2981_v60 = vld [vmem:[#allocation8 + $0x378] sm:$0xff] }
 0x38a   :  { %2737 = vmatpush.msra.mxu0 %v2663_v52  ;;  %v2996_v52 = vld [vmem:[#allocation8 + $0x3f0] sm:$0xff] }
 0x38b   :  { %2777 = vmatpush.msra.mxu2 %v2665_v21  ;;  %3077 = vmatpush.msrb.mxu3 %v2959_v23  ;;  %v6356_v21 = vld [vmem:[%s6891_s5] sm:$0xf] }
 0x38c   :  { %2738 = vmatpush.msra.mxu0 %v2659_v33  ;;  %v2997_v33 = vld [vmem:[#allocation8 + $0x3f8] sm:$0xff]  ;;  %v2423_v54 = vperm.slane %v6356_v21, 0  ;;  %v2894_v23 = vld [vmem:[#allocation8 + $0xc0] sm:$0xff] }
 0x38d   :  { %2778 = vmatpush.msra.mxu2 %v2661_v6  ;;  %2739 = vmatmul.f32.vlgmr.msra.gmra.mxu0 %v6343_v31  ;;  %v2910_v6 = vld [vmem:[#allocation8 + $0x140] sm:$0xff] }
 0x38e   :  { %2779 = vmatmul.f32.vlgmr.msra.gmra.mxu2 %v6343_v31  ;;  %v2974_v31 = vld [vmem:[#allocation8 + $0x340] sm:$0xff]  ;;  %3078 = vmatpush.msrb.mxu3 %v2955_v9  ;;  %v2976_v9 = vld [vmem:[#allocation8 + $0x350] sm:$0xff] }
 0x38f   :  { %3033 = vmatpush.msrb.mxu1 %v2974_v31  ;;  %3008 = vmatpush.msrb.mxu0 %v2930_v16  ;;  %v2984_v31 = vld [vmem:[#allocation8 + $0x390] sm:$0xff]  ;;  %v2977_v16 = vld [vmem:[#allocation8 + $0x358] sm:$0xff] }
 0x390   :  { %3079 = vmatpush.msrb.mxu3 %v2951_v62  ;;  %3048 = vmatpush.msrb.mxu2 %v2931_v63  ;;  %v2424_v62 = vperm.slane %v6356_v21, 1  ;;  %v2890_v63 = vld [vmem:[#allocation8 + $0xa0] sm:$0xff] }
 0x391   :  { %3034 = vmatpush.msrb.mxu1 %v2970_v56  ;;  %3009 = vmatpush.msrb.mxu0 %v2926_v22 }
 0x392   :  { %3080 = vmatpush.msrb.mxu3 %v2947_v29  ;;  %3049 = vmatpush.msrb.mxu2 %v2927_v37  ;;  %v2972_v29 = vld [vmem:[#allocation8 + $0x330] sm:$0xff]  ;;  %v2973_v37 = vld [vmem:[#allocation8 + $0x338] sm:$0xff] }
 0x393   :  { %3035 = vmatpush.msrb.mxu1 %v2966_v1  ;;  %3010 = vmatpush.msrb.mxu0 %v2922_v40  ;;  %v2899_v1 = vld [vmem:[#allocation8 + $0xe8] sm:$0xff]  ;;  %v2886_v40 = vld [vmem:[#allocation8 + $0x80] sm:$0xff] }
 0x394   :  { %3081 = vmatpush.msrb.mxu3 %v2943_v2  ;;  %3050 = vmatpush.msrb.mxu2 %v2923_v46  ;;  %v2425_v2 = vperm.slane %v6356_v21, 2  ;;  %v2887_v46 = vld [vmem:[#allocation8 + $0x88] sm:$0xff] }
 0x395   :  { %3036 = vmatpush.msrb.mxu1 %v2962_v14  ;;  %3011 = vmatpush.msrb.mxu0 %v2918_v12  ;;  %v2969_v12 = vld [vmem:[#allocation8 + $0x318] sm:$0xff] }
 0x396   :  { %3082 = vmatpush.msrb.mxu3 %v2939_v43  ;;  %3051 = vmatpush.msrb.mxu2 %v2919_v41 }
 0x397   :  { %3037 = vmatpush.msrb.mxu1 %v2958_v55  ;;  %3012 = vmatpush.msrb.mxu0 %v2914_v50  ;;  %v6924_v50 = vld [vmem:[#allocation21_spill] sm:$0xff] }
 0x398   :  { %3083 = vmatpush.msrb.mxu3 %v2935_v48  ;;  %3052 = vmatpush.msrb.mxu2 %v2915_v32  ;;  %v2883_v48 = vld [vmem:[#allocation8 + $0x68] sm:$0xff]  ;;  %v222_v32 = vadd.f32 %v6924_v50, %v5895_v15 }
 0x399   :  { %3038 = vmatpush.msrb.mxu1 %v2954_v13  ;;  %3013 = vmatpush.msrb.mxu0 %v2910_v6  ;;  %v2895_v13 = vld [vmem:[#allocation8 + $0xc8] sm:$0xff]  ;;  %v2965_v6 = vld [vmem:[#allocation8 + $0x2f8] sm:$0xff] }
 0x39a   :  { %3148 = vmatpush.msra.mxu3 %v2997_v33  ;;  %3053 = vmatpush.msrb.mxu2 %v2911_v20 }
 0x39b   :  { %3039 = vmatpush.msrb.mxu1 %v2950_v4  ;;  %3014 = vmatpush.msrb.mxu0 %v2906_v30  ;;  %v2879_v30 = vld [vmem:[#allocation8 + $0x48] sm:$0xff] }
 0x39c   :  { %3149 = vmatpush.msra.mxu3 %v2993_v18  ;;  %3054 = vmatpush.msrb.mxu2 %v2907_v8  ;;  %v2878_v18 = vld [vmem:[#allocation8 + $0x40] sm:$0xff]  ;;  %v2960_v8 = vld [vmem:[#allocation8 + $0x2d0] sm:$0xff] }
 0x39d   :  { %3040 = vmatpush.msrb.mxu1 %v2946_v51  ;;  %3015 = vmatpush.msrb.mxu0 %v2902_v36  ;;  %v2891_v51 = vld [vmem:[#allocation8 + $0xa8] sm:$0xff] }
 0x39e   :  { %3150 = vmatpush.msra.mxu3 %v2989_v47  ;;  %3055 = vmatpush.msrb.mxu2 %v2903_v61  ;;  %v2961_v47 = vld [vmem:[#allocation8 + $0x2d8] sm:$0xff]  ;;  %v2874_v61 = vld [vmem:[#allocation8 + $0x20] sm:$0xff] }
 0x39f   :  { %3041 = vmatpush.msrb.mxu1 %v2942_v44  ;;  %3016 = vmatpush.msrb.mxu0 %v2898_v53  ;;  %v2957_v53 = vld [vmem:[#allocation8 + $0x2b8] sm:$0xff] }
 0x3a0   :  { %3151 = vmatpush.msra.mxu3 %v2985_v58  ;;  %3056 = vmatpush.msrb.mxu2 %v2899_v1  ;;  %v2956_v58 = vld [vmem:[#allocation8 + $0x2b0] sm:$0xff] }
 0x3a1   :  { %3042 = vmatpush.msrb.mxu1 %v2938_v24  ;;  %3017 = vmatpush.msrb.mxu0 %v2894_v23  ;;  %v2968_v24 = vld [vmem:[#allocation8 + $0x310] sm:$0xff] }
 0x3a2   :  { %3152 = vmatpush.msra.mxu3 %v2981_v60  ;;  %3057 = vmatpush.msrb.mxu2 %v2895_v13  ;;  %v2871_v60 = vld [vmem:[#allocation8 + $0x8] sm:$0xff]  ;;  %v2952_v23 = vld [vmem:[#allocation8 + $0x290] sm:$0xff] }
 0x3a3   :  { %3043 = vmatpush.msrb.mxu1 %v2934_v59  ;;  %3018 = vmatpush.msrb.mxu0 %v2890_v63  ;;  %v2882_v59 = vld [vmem:[#allocation8 + $0x60] sm:$0xff]  ;;  %v2928_v63 = vld [vmem:[#allocation8 + $0x1d0] sm:$0xff] }
 0x3a4   :  { %3153 = vmatpush.msra.mxu3 %v2977_v16  ;;  %3058 = vmatpush.msrb.mxu2 %v2891_v51  ;;  %v2949_v16 = vld [vmem:[#allocation8 + $0x278] sm:$0xff] }
 0x3a5   :  { %3108 = vmatpush.msra.mxu1 %v2996_v52  ;;  %3019 = vmatpush.msrb.mxu0 %v2886_v40  ;;  %v2929_v51 = vld [vmem:[#allocation8 + $0x1d8] sm:$0xff] }
 0x3a6   :  { %3154 = vmatpush.msra.mxu3 %v2973_v37  ;;  %3059 = vmatpush.msrb.mxu2 %v2887_v46  ;;  %v2925_v40 = vld [vmem:[#allocation8 + $0x1b8] sm:$0xff] }
 0x3a7   :  { %3109 = vmatpush.msra.mxu1 %v2992_v38  ;;  %3020 = vmatpush.msrb.mxu0 %v2882_v59  ;;  %v2921_v59 = vld [vmem:[#allocation8 + $0x198] sm:$0xff] }
 0x3a8   :  { %3155 = vmatpush.msra.mxu3 %v2969_v12  ;;  %3060 = vmatpush.msrb.mxu2 %v2883_v48  ;;  %v2941_v12 = vld [vmem:[#allocation8 + $0x238] sm:$0xff] }
 0x3a9   :  { %3110 = vmatpush.msra.mxu1 %v2988_v5  ;;  %3021 = vmatpush.msrb.mxu0 %v2878_v18 }
 0x3aa   :  { %3156 = vmatpush.msra.mxu3 %v2965_v6  ;;  %3061 = vmatpush.msrb.mxu2 %v2879_v30  ;;  %v2917_v6 = vld [vmem:[#allocation8 + $0x178] sm:$0xff]  ;;  %v2912_v30 = vld [vmem:[#allocation8 + $0x150] sm:$0xff] }
 0x3ab   :  { %3111 = vmatpush.msra.mxu1 %v2984_v31  ;;  %v2875_v31 = vld [vmem:[#allocation8 + $0x28] sm:$0xff]  ;;  %3022 = vmatpush.msrb.mxu0 %v2874_v61  ;;  %v2909_v61 = vld [vmem:[#allocation8 + $0x138] sm:$0xff] }
 0x3ac   :  { %3157 = vmatpush.msra.mxu3 %v2961_v47  ;;  %3062 = vmatpush.msrb.mxu2 %v2875_v31 }
 0x3ad   :  { %3112 = vmatpush.msra.mxu1 %v2980_v7 }
 0x3ae   :  { %3158 = vmatpush.msra.mxu3 %v2957_v53  ;;  %3063 = vmatpush.msrb.mxu2 %v2871_v60 }
 0x3af   :  { %3113 = vmatpush.msra.mxu1 %v2976_v9  ;;  %v2932_v9 = vld [vmem:[#allocation8 + $0x1f0] sm:$0xff] }
 0x3b1   :  { %3114 = vmatpush.msra.mxu1 %v2972_v29  ;;  %v2944_v29 = vld [vmem:[#allocation8 + $0x250] sm:$0xff] }
 0x3b3   :  { %3115 = vmatpush.msra.mxu1 %v2968_v24 }
 0x3d0   :  { %v2468_v10 = vpop.f32.mrf.mxu1 }
 0x3d6   :  { %v2508_v41 = vpop.f32.mrf.mxu3 }
 0x3d8   :  { %v2548_v55 = vpop.f32.mrf.mxu1 }
 0x3e9   :  { %v2448_v56 = vpop.f32.mrf.mxu0 }
 0x3ea   :  { %v2449_v14 = vadd.f32 %v2448_v56, %v2423_v54 }
 0x3ec   :  { %v2469_v4 = vadd.f32 %v2468_v10, %v2449_v14  ;;  %v2964_v10 = vld [vmem:[#allocation8 + $0x2f0] sm:$0xff]  ;;  %v2870_v14 = vld [vmem:[#allocation8] sm:$0xff] }
 0x3ed   :  { %3116 = vmatpush.msra.mxu1 %v2964_v10  ;;  %3023 = vmatpush.msrb.mxu0 %v2870_v14  ;;  %v2937_v10 = vld [vmem:[#allocation8 + $0x218] sm:$0xff] }
 0x3ee   :  { %v5100_v22 = vmul.f32 -1.442695, %v2469_v4  ;;  %v2933_v4 = vld [vmem:[#allocation8 + $0x1f8] sm:$0xff] }
 0x3ef   :  { %v2488_v44 = vpop.f32.mrf.mxu2  ;;  %3117 = vmatpush.msra.mxu1 %v2960_v8  ;;  %3088 = vmatpush.msra.mxu0 %v2932_v9  ;;  %v2588_v8 = vpop.f32.mrf.mxu3  ;;  %v2905_v14 = vld [vmem:[#allocation8 + $0x118] sm:$0xff] }
 0x3f0   :  { %5257 = vpow2.f32 %v5100_v22  ;;  %v2489_v43 = vadd.f32 %v2488_v44, %v2424_v62  ;;  %v2948_v62 = vld [vmem:[#allocation8 + $0x270] sm:$0xff]  ;;  %3128 = vmatpush.msra.mxu2 %v2933_v4  ;;  %v2945_v22 = vld [vmem:[#allocation8 + $0x258] sm:$0xff]  ;;  %v2426_v44 = vperm.slane %v6356_v21, 3 }
 0x3f1   :  { %3118 = vmatpush.msra.mxu1 %v2956_v58  ;;  %3089 = vmatpush.msra.mxu0 %v2928_v63  ;;  %v2936_v21 = vld [vmem:[#allocation8 + $0x210] sm:$0xff]  ;;  %v2901_v9 = vld [vmem:[#allocation8 + $0xf8] sm:$0xff] }
 0x3f2   :  { %v2509_v52 = vadd.f32 %v2508_v41, %v2489_v43  ;;  %v2528_v33 = vpop.f32.mrf.mxu0  ;;  %3129 = vmatpush.msra.mxu2 %v2929_v51  ;;  %v2940_v43 = vld [vmem:[#allocation8 + $0x230] sm:$0xff]  ;;  %v2873_v51 = vld [vmem:[#allocation8 + $0x18] sm:$0xff] }
 0x3f3   :  { %v2529_v20 = vadd.f32 %v2528_v33, %v2425_v2  ;;  %v2760_v38 = vpop.f32.mrf.mxu1  ;;  %3119 = vmatpush.msra.mxu1 %v2952_v23  ;;  %v2924_v2 = vld [vmem:[#allocation8 + $0x1b0] sm:$0xff] }
 0x3f4   :  { %v5101_v5 = vmul.f32 -1.442695, %v2509_v52  ;;  %v2804_v54 = vadd.f32 %v2760_v38, %v222_v32  ;;  %3090 = vmatpush.msra.mxu0 %v2924_v2  ;;  %3130 = vmatpush.msra.mxu2 %v2925_v40  ;;  %v2920_v41 = vld [vmem:[#allocation8 + $0x190] sm:$0xff]  ;;  %v2897_v40 = vld [vmem:[#allocation8 + $0xd8] sm:$0xff] }
 0x3f5   :  { %v2549_v36 = vadd.f32 %v2548_v55, %v2529_v20  ;;  %v2953_v55 = vld [vmem:[#allocation8 + $0x298] sm:$0xff]  ;;  %3120 = vmatpush.msra.mxu1 %v2948_v62  ;;  %v2916_v33 = vld [vmem:[#allocation8 + $0x170] sm:$0xff]  ;;  %v6925_v62 = vld [vmem:[#allocation14_spill] sm:$0xff] }
 0x3f6   :  { %v5258_v56 = vpop.eup %5257  ;;  %5259 = vpow2.f32 %v5101_v5  ;;  %v5104_v13 = vmul.f32 -1.442695, %v2804_v54  ;;  %3159 = vmatpush.msra.mxu3 %v2953_v55  ;;  %3091 = vmatpush.msra.mxu0 %v2920_v41  ;;  %v2913_v5 = vld [vmem:[#allocation8 + $0x158] sm:$0xff]  ;;  %v2900_v55 = vld [vmem:[#allocation8 + $0xf0] sm:$0xff] }
 0x3f7   :  { %v6363_v1 = vadd.f32 1.0, %v5258_v56  ;;  %v5102_v7 = vmul.f32 -1.442695, %v2549_v36  ;;  %3121 = vmatpush.msra.mxu1 %v2944_v29  ;;  %3131 = vmatpush.msra.mxu2 %v2921_v59  ;;  %v2908_v36 = vld [vmem:[#allocation8 + $0x130] sm:$0xff] }
 0x3f8   :  { %3160 = vmatpush.msra.mxu3 %v2949_v16  ;;  %v2568_v24 = vpop.f32.mrf.mxu2  ;;  %3092 = vmatpush.msra.mxu0 %v2916_v33  ;;  %v181_v16 = vadd.f32 %v6925_v62, %v5892_v11  ;;  %v2896_v2 = vld [vmem:[#allocation8 + $0xd0] sm:$0xff] }
 0x3f9   :  { %5261 = vrcp.f32 %v6363_v1  ;;  %3122 = vmatpush.msra.mxu1 %v2940_v43  ;;  %v2569_v52 = vadd.f32 %v2568_v24, %v2426_v44  ;;  %3132 = vmatpush.msra.mxu2 %v2917_v6  ;;  %v2614_v60 = vand.u32 2147483648, %v6363_v1  ;;  %vm2608_vm6 = vweird.f32 %v6363_v1  ;;  %v2892_v59 = vld [vmem:[#allocation8 + $0xb0] sm:$0xff]  ;;  %v2889_v6 = vld [vmem:[#allocation8 + $0x98] sm:$0xff] }
 0x3fa   :  { %5263 = vpow2.f32 %v5102_v7  ;;  %3161 = vmatpush.msra.mxu3 %v2945_v22  ;;  %3093 = vmatpush.msra.mxu0 %v2912_v30  ;;  %v2904_v7 = vld [vmem:[#allocation8 + $0x110] sm:$0xff] }
 0x3fb   :  { %5265 = vpow2.f32 %v5104_v13  ;;  %3123 = vmatpush.msra.mxu1 %v2936_v21  ;;  %v2589_v54 = vadd.f32 %v2588_v8, %v2569_v52  ;;  %3133 = vmatpush.msra.mxu2 %v2913_v5  ;;  %v2612_v13 = vand.u32 2147483647, %v6363_v1  ;;  %v2615_v24 = vor.u32 1.1754944e-38, %v2614_v60  ;;  %v2893_v21 = vld [vmem:[#allocation8 + $0xb8] sm:$0xff]  ;;  %v2888_v33 = vld [vmem:[#allocation8 + $0x90] sm:$0xff] }
 0x3fc   :  { %v5260_v37 = vpop.eup %5259  ;;  %3162 = vmatpush.msra.mxu3 %v2941_v12  ;;  %3094 = vmatpush.msra.mxu0 %v2908_v36  ;;  %v6928_v30 = vld [vmem:[#allocation20_spill] sm:$0xff]  ;;  %v2885_v36 = vld [vmem:[#allocation8 + $0x78] sm:$0xff] }
 0x3fd   :  { %v6367_v46 = vadd.f32 1.0, %v5260_v37  ;;  %3134 = vmatpush.msra.mxu2 %v2909_v61  ;;  %vm2613_vm10 = vcmp.eq.f32.partialorder %v2612_v13, 8.507059e+37  ;;  %v263_v8 = vadd.f32 %v6928_v30, %v5911_v42  ;;  %v2876_v13 = vld [vmem:[#allocation8 + $0x30] sm:$0xff]  ;;  %v3287_v30 = vld [vmem:[#allocation6 + $0x198] sm:$0xff] }
 0x3fe   :  { %3163 = vmatpush.msra.mxu3 %v2937_v10  ;;  %3095 = vmatpush.msra.mxu0 %v2904_v7  ;;  %v2881_v7 = vld [vmem:[#allocation8 + $0x58] sm:$0xff] }
 0x3ff   :  { %v6369_v48 = vpop.eup %5261  ;;  %5267 = vrcp.f32 %v6367_v46  ;;  %3135 = vmatpush.msra.mxu2 %v2905_v14  ;;  %v2629_v63 = vand.u32 2147483648, %v6367_v46  ;;  %vm2623_vm9 = vweird.f32 %v6367_v46 }
 0x400   :  { %v5264_v50 = vpop.eup %5263  ;;  %v2604_v32 = vmul.f32 %v6369_v48, %v6363_v1  ;;  %vm2609_vm5 = vweird.f32 %v6369_v48  ;;  %v2627_v1 = vand.u32 2147483647, %v6367_v46  ;;  %3096 = vmatpush.msra.mxu0 %v2900_v55  ;;  %v2877_v55 = vld [vmem:[#allocation8 + $0x38] sm:$0xff] }
 0x401   :  { %v6374_v20 = vadd.f32 1.0, %v5264_v50  ;;  %v5266_v38 = vpop.eup %5265  ;;  %vm6394_vm7 = vmor %vm2608_vm6, %vm2609_vm5  ;;  %3136 = vmatpush.msra.mxu2 %v2901_v9  ;;  %v2630_v10 = vor.u32 1.1754944e-38, %v2629_v63 }
 0x402   :  { %v2605_v18 = vsub.f32 1.0, %v2604_v32  ;;  %v6378_v58 = vadd.f32 1.0, %v5266_v38  ;;  %3097 = vmatpush.msra.mxu0 %v2896_v2  ;;  %vm2628_vm12 = vcmp.eq.f32.partialorder %v2627_v1, 8.507059e+37  ;;  %v2800_v2 = vpop.f32.mrf.mxu3 }
 0x403   :  { %5269 = vrcp.f32 %v6374_v20  ;;  %3137 = vmatpush.msra.mxu2 %v2897_v40  ;;  %vm2638_vm14 = vweird.f32 %v6374_v20  ;;  %v2642_v62 = vand.u32 2147483647, %v6374_v20 }
 0x404   :  { %v2606_v47 = vmul.f32 %v6369_v48, %v2605_v18  ;;  %5271 = vtanh.f32 %v2589_v54  ;;  %3098 = vmatpush.msra.mxu0 %v2892_v59  ;;  %v3293_v59 = vld [vmem:[#allocation6 + $0x1c8] sm:$0xff]  ;;  %vm2839_vm2 = vweird.f32 %v6378_v58 }
 0x405   :  { %v5268_v31 = vpop.eup %5267  ;;  %5273 = vrcp.f32 %v6378_v58  ;;  %3138 = vmatpush.msra.mxu2 %v2893_v21  ;;  %vm2643_vm0 = vcmp.eq.f32.partialorder %v2642_v62, 8.507059e+37  ;;  %v3295_v21 = vld [vmem:[#allocation6 + $0x1d8] sm:$0xff] }
 0x406   :  { %v2619_v56 = vmul.f32 %v5268_v31, %v6367_v46  ;;  %v2607_v53 = vadd.f32 %v6369_v48, %v2606_v47  ;;  %vm2624_vm8 = vweird.f32 %v5268_v31  ;;  %3099 = vmatpush.msra.mxu0 %v2888_v33  ;;  %v2884_v47 = vld [vmem:[#allocation8 + $0x70] sm:$0xff]  ;;  %v2845_v33 = vand.u32 2147483648, %v6378_v58 }
 0x407   :  { %vm2625_vm11 = vmor %vm2623_vm9, %vm2624_vm8  ;;  %3139 = vmatpush.msra.mxu2 %v2889_v6  ;;  %v2843_v6 = vand.u32 2147483647, %v6378_v58 }
 0x408   :  { %v2620_v23 = vsub.f32 1.0, %v2619_v56  ;;  %v2611_v37 = vsel %vm6394_vm7, %v6369_v48, %v2607_v53  ;;  %3100 = vmatpush.msra.mxu0 %v2884_v47  ;;  %v2880_v53 = vld [vmem:[#allocation8 + $0x50] sm:$0xff] }
 0x409   :  { %v6386_v4 = vpop.eup %5269  ;;  %v2616_v48 = vsel %vm2613_vm10, %v2615_v24, %v2611_v37  ;;  %3140 = vmatpush.msra.mxu2 %v2885_v36  ;;  %v3297_v24 = vld [vmem:[#allocation6 + $0x1e8] sm:$0xff]  ;;  %vm2844_vm5 = vcmp.eq.f32.partialorder %v2843_v6, 8.507059e+37  ;;  %v3298_v6 = vld [vmem:[#allocation6 + $0x1f0] sm:$0xff] }
 0x40a   :  { %v2621_v29 = vmul.f32 %v5268_v31, %v2620_v23  ;;  %v2634_v22 = vmul.f32 %v6386_v4, %v6374_v20  ;;  %v2740_v44 = vpop.f32.mrf.mxu0  ;;  %v5272_v32 = vpop.eup %5271  ;;  %vm2639_vm13 = vweird.f32 %v6386_v4  ;;  %3101 = vmatpush.msra.mxu0 %v2880_v53  ;;  %v3281_v36 = vld [vmem:[#allocation6 + $0x168] sm:$0xff] }
 0x40b   :  { %v2803_v43 = vadd.f32 %v2740_v44, %v181_v16  ;;  %v6406_v46 = vpop.eup %5273  ;;  %v2650_v54 = vmul.f32 %v5272_v32, %v2616_v48  ;;  %3141 = vmatpush.msra.mxu2 %v2881_v7  ;;  %v2872_v16 = vld [vmem:[#allocation8 + $0x10] sm:$0xff]  ;;  %vm2640_vm15 = vmor %vm2638_vm14, %vm2639_vm13 }
 0x40c   :  { %v2635_v12 = vsub.f32 1.0, %v2634_v22  ;;  %v2622_v41 = vadd.f32 %v5268_v31, %v2621_v29  ;;  %v2835_v14 = vmul.f32 %v6406_v46, %v6378_v58  ;;  %3102 = vmatpush.msra.mxu0 %v2876_v13  ;;  %vm2840_vm1 = vweird.f32 %v6406_v46 }
 0x40d   :  { %v5103_v50 = vmul.f32 -1.442695, %v2803_v43  ;;  %3142 = vmatpush.msra.mxu2 %v2877_v55  ;;  %v3299_v43 = vld [vmem:[#allocation6 + $0x1f8] sm:$0xff]  ;;  %vm6444_vm3 = vmor %vm2839_vm2, %vm2840_vm1  ;;  %v3273_v55 = vld [vmem:[#allocation6 + $0x128] sm:$0xff] }
 0x40e   :  { %v2626_v52 = vsel %vm2625_vm11, %v5268_v31, %v2622_v41  ;;  %v2636_v38 = vmul.f32 %v6386_v4, %v2635_v12  ;;  %v2836_v1 = vsub.f32 1.0, %v2835_v14  ;;  %3103 = vmatpush.msra.mxu0 %v2872_v16  ;;  %v3277_v14 = vld [vmem:[#allocation6 + $0x148] sm:$0xff] }
 0x40f   :  { %v2631_v18 = vsel %vm2628_vm12, %v2630_v10, %v2626_v52  ;;  %5275 = vpow2.f32 %v5103_v50  ;;  %3143 = vmatpush.msra.mxu2 %v2873_v51  ;;  %v3291_v52 = vld [vmem:[#allocation6 + $0x1b8] sm:$0xff] }
 0x410   :  { %v2649_v5 = vmul.f32 %v2631_v18, %v6290_v19  ;;  %v2637_v60 = vadd.f32 %v6386_v4, %v2636_v38  ;;  %v2644_v19 = vand.u32 2147483648, %v6374_v20  ;;  %v2837_v44 = vmul.f32 %v6406_v46, %v2836_v1  ;;  %v3285_v18 = vld [vmem:[#allocation6 + $0x188] sm:$0xff] }
 0x411   :  { %v2780_v61 = vpop.f32.mrf.mxu2 }
 0x412   :  { %v6412_v31 = vadd.f32 %v2650_v54, %v2649_v5  ;;  %v2805_v56 = vadd.f32 %v2780_v61, %v263_v8  ;;  %v2641_v29 = vsel %vm2640_vm15, %v6386_v4, %v2637_v60  ;;  %v2645_v22 = vor.u32 1.1754944e-38, %v2644_v19  ;;  %v3283_v61 = vld [vmem:[#allocation6 + $0x178] sm:$0xff]  ;;  %v3294_v8 = vld [vmem:[#allocation6 + $0x1d0] sm:$0xff] }
 0x413   :  { %v304_v4 = vadd.f32 %v5876_v28, %v5942_v57  ;;  %v2838_v50 = vadd.f32 %v6406_v46, %v2837_v44  ;;  %v3289_v28 = vld [vmem:[#allocation6 + $0x1a8] sm:$0xff] }
 0x414   :  { %5277 = vtanh.f32 %v6412_v31  ;;  %v5105_v23 = vmul.f32 -1.442695, %v2805_v56  ;;  %v2646_v37 = vsel %vm2643_vm0, %v2645_v22, %v2641_v29  ;;  %v2846_v56 = vor.u32 1.1754944e-38, %v2845_v33  ;;  %v3269_v29 = vld [vmem:[#allocation6 + $0x108] sm:$0xff]  ;;  %v3271_v22 = vld [vmem:[#allocation6 + $0x118] sm:$0xff] }
 0x415   :  { %v5276_v9 = vpop.eup %5275  ;;  %v2806_v48 = vadd.f32 %v2800_v2, %v304_v4  ;;  %v2842_v54 = vsel %vm6444_vm3, %v6406_v46, %v2838_v50  ;;  %v3279_v46 = vld [vmem:[#allocation6 + $0x158] sm:$0xff]  ;;  %v3265_v44 = vld [vmem:[#allocation6 + $0xe8] sm:$0xff] }
 0x416   :  { %v6422_v63 = vadd.f32 1.0, %v5276_v9  ;;  %5279 = vpow2.f32 %v5105_v23  ;;  %v2847_v60 = vsel %vm2844_vm5, %v2846_v56, %v2842_v54  ;;  %v3275_v9 = vld [vmem:[#allocation6 + $0x138] sm:$0xff]  ;;  %v3253_v50 = vld [vmem:[#allocation6 + $0x88] sm:$0xff]  ;;  %v3284_v56 = vld [vmem:[#allocation6 + $0x180] sm:$0xff] }
 0x417   :  { %v2865_v51 = vmul.f32 %v2847_v60, %v6337_v34  ;;  %v3267_v2 = vld [vmem:[#allocation6 + $0xf8] sm:$0xff]  ;;  %v3282_v60 = vld [vmem:[#allocation6 + $0x170] sm:$0xff] }
 0x418   :  { %5281 = vrcp.f32 %v6422_v63  ;;  %v2830_v5 = vand.u32 2147483648, %v6422_v63  ;;  %v2828_v58 = vand.u32 2147483647, %v6422_v63  ;;  %vm2824_vm6 = vweird.f32 %v6422_v63  ;;  %v3263_v34 = vld [vmem:[#allocation6 + $0xd8] sm:$0xff] }
 0x419   :  { %v3247_v54 = vld [vmem:[#allocation6 + $0x58] sm:$0xff] }
 0x41a   :  { %v5278_v20 = vpop.eup %5277  ;;  %v2831_v19 = vor.u32 1.1754944e-38, %v2830_v5  ;;  %vm2829_vm8 = vcmp.eq.f32.partialorder %v2828_v58, 8.507059e+37  ;;  %v3245_v5 = vld [vmem:[#allocation6 + $0x48] sm:$0xff]  ;;  %v3290_v58 = vld [vmem:[#allocation6 + $0x1b0] sm:$0xff] }
 0x41b   :  { %v6429_v40 = vmul.f32 %v5278_v20, %v2646_v37 }
 0x41c   :  { %v5280_v12 = vpop.eup %5279 }
 0x41d   :  { %v6433_v41 = vadd.f32 1.0, %v5280_v12  ;;  %3044 = vmatmul.f32.vlgmr.msrb.gmra.mxu1 %v6429_v40  ;;  %3084 = vmatmul.f32.vlgmr.msrb.gmra.mxu3 %v6429_v40  ;;  %v3261_v12 = vld [vmem:[#allocation6 + $0xc8] sm:$0xff] }
 0x41e   :  { %v5282_v10 = vpop.eup %5281  ;;  %3320 = vmatpush.msrb.mxu1 %v3297_v24  ;;  %3360 = vmatpush.msrb.mxu3 %v3299_v43 }
 0x41f   :  { %v2820_v32 = vmul.f32 %v5282_v10, %v6422_v63  ;;  %5283 = vrcp.f32 %v6433_v41  ;;  %vm2825_vm4 = vweird.f32 %v5282_v10  ;;  %v2860_v43 = vand.u32 2147483648, %v6433_v41 }
 0x420   :  { %3321 = vmatpush.msrb.mxu1 %v3293_v59  ;;  %3361 = vmatpush.msrb.mxu3 %v3295_v21  ;;  %5285 = vtanh.f32 %v2806_v48  ;;  %vm2826_vm7 = vmor %vm2824_vm6, %vm2825_vm4  ;;  %vm2854_vm10 = vweird.f32 %v6433_v41  ;;  %v2858_v4 = vand.u32 2147483647, %v6433_v41  ;;  %v3257_v59 = vld [vmem:[#allocation6 + $0xa8] sm:$0xff]  ;;  %v3259_v21 = vld [vmem:[#allocation6 + $0xb8] sm:$0xff] }
 0x421   :  { %v2821_v38 = vsub.f32 1.0, %v2820_v32  ;;  %v2861_v48 = vor.u32 1.1754944e-38, %v2860_v43  ;;  %v3255_v32 = vld [vmem:[#allocation6 + $0x98] sm:$0xff]  ;;  %v3244_v43 = vld [vmem:[#allocation6 + $0x40] sm:$0xff] }
 0x422   :  { %3322 = vmatpush.msrb.mxu1 %v3289_v28  ;;  %3362 = vmatpush.msrb.mxu3 %v3291_v52  ;;  %vm2859_vm12 = vcmp.eq.f32.partialorder %v2858_v4, 8.507059e+37  ;;  %v3242_v4 = vld [vmem:[#allocation6 + $0x30] sm:$0xff] }
 0x423   :  { %v2822_v47 = vmul.f32 %v5282_v10, %v2821_v38  ;;  %v3249_v38 = vld [vmem:[#allocation6 + $0x68] sm:$0xff] }
 0x424   :  { %3323 = vmatpush.msrb.mxu1 %v3285_v18  ;;  %3363 = vmatpush.msrb.mxu3 %v3287_v30  ;;  %v3251_v18 = vld [vmem:[#allocation6 + $0x78] sm:$0xff]  ;;  %v3292_v30 = vld [vmem:[#allocation6 + $0x1c0] sm:$0xff] }
 0x425   :  { %v5284_v53 = vpop.eup %5283  ;;  %v2823_v7 = vadd.f32 %v5282_v10, %v2822_v47  ;;  %3124 = vmatmul.f32.vlgmr.msra.gmra.mxu1 %v6429_v40  ;;  %3164 = vmatmul.f32.vlgmr.msra.gmra.mxu3 %v6429_v40  ;;  %v3288_v47 = vld [vmem:[#allocation6 + $0x1a0] sm:$0xff] }
 0x426   :  { %v2850_v23 = vmul.f32 %v5284_v53, %v6433_v41  ;;  %3324 = vmatpush.msrb.mxu1 %v3281_v36  ;;  %3364 = vmatpush.msrb.mxu3 %v3283_v61  ;;  %v5286_v62 = vpop.eup %5285  ;;  %vm2855_vm9 = vweird.f32 %v5284_v53  ;;  %v3296_v41 = vld [vmem:[#allocation6 + $0x1e0] sm:$0xff]  ;;  %v3241_v36 = vld [vmem:[#allocation6 + $0x28] sm:$0xff]  ;;  %v3243_v61 = vld [vmem:[#allocation6 + $0x38] sm:$0xff] }
 0x427   :  { %v2827_v13 = vsel %vm2826_vm7, %v5282_v10, %v2823_v7  ;;  %vm2856_vm11 = vmor %vm2854_vm10, %vm2855_vm9  ;;  %v3237_v7 = vld [vmem:[#allocation6 + $0x8] sm:$0xff] }
 0x428   :  { %v2832_v16 = vsel %vm2829_vm8, %v2831_v19, %v2827_v13  ;;  %v2851_v63 = vsub.f32 1.0, %v2850_v23  ;;  %3325 = vmatpush.msrb.mxu1 %v3277_v14  ;;  %3365 = vmatpush.msrb.mxu3 %v3279_v46  ;;  %v3239_v14 = vld [vmem:[#allocation6 + $0x18] sm:$0xff]  ;;  %v3280_v46 = vld [vmem:[#allocation6 + $0x160] sm:$0xff]  ;;  %v3278_v23 = vld [vmem:[#allocation6 + $0x150] sm:$0xff] }
 0x429   :  { %v2866_v1 = vmul.f32 %v5286_v62, %v2832_v16  ;;  %v3276_v19 = vld [vmem:[#allocation6 + $0x140] sm:$0xff]  ;;  %v3270_v62 = vld [vmem:[#allocation6 + $0x110] sm:$0xff] }
 0x42a   :  { %v2852_v20 = vmul.f32 %v5284_v53, %v2851_v63  ;;  %3326 = vmatpush.msrb.mxu1 %v3273_v55  ;;  %3366 = vmatpush.msrb.mxu3 %v3275_v9  ;;  %v3272_v13 = vld [vmem:[#allocation6 + $0x120] sm:$0xff]  ;;  %v3274_v55 = vld [vmem:[#allocation6 + $0x130] sm:$0xff] }
 0x42b   :  { %v6459_v37 = vadd.f32 %v2866_v1, %v2865_v51  ;;  %v3268_v9 = vld [vmem:[#allocation6 + $0x100] sm:$0xff]  ;;  %v3266_v63 = vld [vmem:[#allocation6 + $0xf0] sm:$0xff] }
 0x42c   :  { %v2853_v24 = vadd.f32 %v5284_v53, %v2852_v20  ;;  %3327 = vmatpush.msrb.mxu1 %v3269_v29  ;;  %3367 = vmatpush.msrb.mxu3 %v3271_v22  ;;  %v3264_v16 = vld [vmem:[#allocation6 + $0xe0] sm:$0xff]  ;;  %v3262_v1 = vld [vmem:[#allocation6 + $0xd0] sm:$0xff] }
 0x42d   :  { %5287 = vtanh.f32 %v6459_v37  ;;  %v3260_v51 = vld [vmem:[#allocation6 + $0xc0] sm:$0xff]  ;;  %v3258_v22 = vld [vmem:[#allocation6 + $0xb0] sm:$0xff] }
 0x42e   :  { %3328 = vmatpush.msrb.mxu1 %v3265_v44  ;;  %3368 = vmatpush.msrb.mxu3 %v3267_v2  ;;  %v2857_v10 = vsel %vm2856_vm11, %v5284_v53, %v2853_v24  ;;  %v3286_v53 = vld [vmem:[#allocation6 + $0x190] sm:$0xff]  ;;  %v3256_v29 = vld [vmem:[#allocation6 + $0xa0] sm:$0xff] }
 0x42f   :  { %v2862_v52 = vsel %vm2859_vm12, %v2861_v48, %v2857_v10  ;;  %v3252_v20 = vld [vmem:[#allocation6 + $0x80] sm:$0xff]  ;;  %v3254_v44 = vld [vmem:[#allocation6 + $0x90] sm:$0xff]  ;;  %v3572_v48 = vld [vmem:[#allocation8 + $0x3e8] sm:$0xff] }
 0x430   :  { %3329 = vmatpush.msrb.mxu1 %v3261_v12  ;;  %3369 = vmatpush.msrb.mxu3 %v3263_v34  ;;  %v3248_v2 = vld [vmem:[#allocation6 + $0x60] sm:$0xff]  ;;  %v3250_v24 = vld [vmem:[#allocation6 + $0x70] sm:$0xff] }
 0x431   :  { %v3246_v12 = vld [vmem:[#allocation6 + $0x50] sm:$0xff]  ;;  %v3240_v34 = vld [vmem:[#allocation6 + $0x20] sm:$0xff] }
 0x432   :  { %3330 = vmatpush.msrb.mxu1 %v3257_v59  ;;  %3370 = vmatpush.msrb.mxu3 %v3259_v21  ;;  %v3236_v59 = vld [vmem:[#allocation6] sm:$0xff]  ;;  %v3238_v21 = vld [vmem:[#allocation6 + $0x10] sm:$0xff] }
 0x433   :  { %v5288_v28 = vpop.eup %5287  ;;  %v3571_v10 = vld [vmem:[#allocation8 + $0x3e0] sm:$0xff] }
 0x434   :  { %v6465_v33 = vmul.f32 %v5288_v28, %v2862_v52  ;;  %3331 = vmatpush.msrb.mxu1 %v3253_v50  ;;  %3371 = vmatpush.msrb.mxu3 %v3255_v32  ;;  %v3567_v50 = vld [vmem:[#allocation8 + $0x3c0] sm:$0xff]  ;;  %v3568_v32 = vld [vmem:[#allocation8 + $0x3c8] sm:$0xff] }
 0x435   :  { %v3563_v28 = vld [vmem:[#allocation8 + $0x3a0] sm:$0xff]  ;;  %v3564_v52 = vld [vmem:[#allocation8 + $0x3a8] sm:$0xff] }
 0x436   :  { %3024 = vmatmul.f32.vlgmr.msrb.gmra.mxu0 %v6465_v33  ;;  %3064 = vmatmul.f32.vlgmr.msrb.gmra.mxu2 %v6465_v33 }
 0x437   :  { %3300 = vmatpush.msrb.mxu0 %v3296_v41  ;;  %3340 = vmatpush.msrb.mxu2 %v3298_v6  ;;  %v3559_v41 = vld [vmem:[#allocation8 + $0x380] sm:$0xff]  ;;  %v3560_v6 = vld [vmem:[#allocation8 + $0x388] sm:$0xff] }
 0x438   :  { %3332 = vmatpush.msrb.mxu1 %v3249_v38  ;;  %3372 = vmatpush.msrb.mxu3 %v3251_v18  ;;  %v3555_v38 = vld [vmem:[#allocation8 + $0x360] sm:$0xff]  ;;  %v3556_v18 = vld [vmem:[#allocation8 + $0x368] sm:$0xff] }
 0x439   :  { %3301 = vmatpush.msrb.mxu0 %v3292_v30  ;;  %3341 = vmatpush.msrb.mxu2 %v3294_v8  ;;  %v3552_v30 = vld [vmem:[#allocation8 + $0x348] sm:$0xff]  ;;  %v3547_v8 = vld [vmem:[#allocation8 + $0x320] sm:$0xff] }
 0x43a   :  { %3333 = vmatpush.msrb.mxu1 %v3245_v5  ;;  %3373 = vmatpush.msrb.mxu3 %v3247_v54  ;;  %v3548_v5 = vld [vmem:[#allocation8 + $0x328] sm:$0xff]  ;;  %v3543_v54 = vld [vmem:[#allocation8 + $0x300] sm:$0xff] }
 0x43b   :  { %3302 = vmatpush.msrb.mxu0 %v3288_v47  ;;  %3342 = vmatpush.msrb.mxu2 %v3290_v58  ;;  %v3544_v47 = vld [vmem:[#allocation8 + $0x308] sm:$0xff]  ;;  %v3539_v58 = vld [vmem:[#allocation8 + $0x2e0] sm:$0xff] }
 0x43c   :  { %3334 = vmatpush.msrb.mxu1 %v3241_v36  ;;  %3374 = vmatpush.msrb.mxu3 %v3243_v61  ;;  %v3540_v36 = vld [vmem:[#allocation8 + $0x2e8] sm:$0xff]  ;;  %v3535_v61 = vld [vmem:[#allocation8 + $0x2c0] sm:$0xff] }
 0x43d   :  { %3303 = vmatpush.msrb.mxu0 %v3284_v56  ;;  %3343 = vmatpush.msrb.mxu2 %v3286_v53  ;;  %v3536_v56 = vld [vmem:[#allocation8 + $0x2c8] sm:$0xff]  ;;  %v3531_v53 = vld [vmem:[#allocation8 + $0x2a0] sm:$0xff] }
 0x43e   :  { %3335 = vmatpush.msrb.mxu1 %v3237_v7  ;;  %3375 = vmatpush.msrb.mxu3 %v3239_v14  ;;  %v3532_v7 = vld [vmem:[#allocation8 + $0x2a8] sm:$0xff]  ;;  %v3527_v14 = vld [vmem:[#allocation8 + $0x280] sm:$0xff] }
 0x43f   :  { %3104 = vmatmul.f32.vlgmr.msra.gmra.mxu0 %v6465_v33  ;;  %3144 = vmatmul.f32.vlgmr.msra.gmra.mxu2 %v6465_v33 }
 0x440   :  { %3304 = vmatpush.msrb.mxu0 %v3280_v46  ;;  %3336 = vmatmul.f32.vlgmr.msrb.gmra.mxu1 %v6465_v33  ;;  %v3528_v46 = vld [vmem:[#allocation8 + $0x288] sm:$0xff] }
 0x441   :  { %3344 = vmatpush.msrb.mxu2 %v3282_v60  ;;  %3376 = vmatmul.f32.vlgmr.msrb.gmra.mxu3 %v6465_v33  ;;  %v3507_v60 = vld [vmem:[#allocation8 + $0x1e0] sm:$0xff] }
 0x442   :  { %3305 = vmatpush.msrb.mxu0 %v3276_v19  ;;  %3605 = vmatpush.msra.mxu1 %v3571_v10  ;;  %v3508_v19 = vld [vmem:[#allocation8 + $0x1e8] sm:$0xff] }
 0x443   :  { %3345 = vmatpush.msrb.mxu2 %v3278_v23  ;;  %3645 = vmatpush.msra.mxu3 %v3572_v48  ;;  %v3523_v23 = vld [vmem:[#allocation8 + $0x260] sm:$0xff]  ;;  %v3488_v10 = vld [vmem:[#allocation8 + $0x148] sm:$0xff]  ;;  %v3569_v48 = vld [vmem:[#allocation8 + $0x3d0] sm:$0xff] }
 0x444   :  { %3306 = vmatpush.msrb.mxu0 %v3272_v13  ;;  %3606 = vmatpush.msra.mxu1 %v3567_v50  ;;  %v3524_v13 = vld [vmem:[#allocation8 + $0x268] sm:$0xff]  ;;  %v3570_v50 = vld [vmem:[#allocation8 + $0x3d8] sm:$0xff] }
 0x445   :  { %3346 = vmatpush.msrb.mxu2 %v3274_v55  ;;  %3646 = vmatpush.msra.mxu3 %v3568_v32  ;;  %v3503_v55 = vld [vmem:[#allocation8 + $0x1c0] sm:$0xff] }
 0x446   :  { %3307 = vmatpush.msrb.mxu0 %v3268_v9  ;;  %3607 = vmatpush.msra.mxu1 %v3563_v28  ;;  %v3504_v9 = vld [vmem:[#allocation8 + $0x1c8] sm:$0xff]  ;;  %v3483_v32 = vld [vmem:[#allocation8 + $0x120] sm:$0xff] }
 0x447   :  { %3347 = vmatpush.msrb.mxu2 %v3270_v62  ;;  %3647 = vmatpush.msra.mxu3 %v3564_v52  ;;  %v3519_v62 = vld [vmem:[#allocation8 + $0x240] sm:$0xff]  ;;  %v3484_v28 = vld [vmem:[#allocation8 + $0x128] sm:$0xff]  ;;  %v3565_v52 = vld [vmem:[#allocation8 + $0x3b0] sm:$0xff] }
 0x448   :  { %3308 = vmatpush.msrb.mxu0 %v3264_v16  ;;  %3608 = vmatpush.msra.mxu1 %v3559_v41  ;;  %v3520_v16 = vld [vmem:[#allocation8 + $0x248] sm:$0xff] }
 0x449   :  { %3348 = vmatpush.msrb.mxu2 %v3266_v63  ;;  %3648 = vmatpush.msra.mxu3 %v3560_v6  ;;  %v3499_v63 = vld [vmem:[#allocation8 + $0x1a0] sm:$0xff]  ;;  %v3566_v6 = vld [vmem:[#allocation8 + $0x3b8] sm:$0xff] }
 0x44a   :  { %3309 = vmatpush.msrb.mxu0 %v3260_v51  ;;  %3609 = vmatpush.msra.mxu1 %v3555_v38  ;;  %v3500_v51 = vld [vmem:[#allocation8 + $0x1a8] sm:$0xff]  ;;  %v3479_v38 = vld [vmem:[#allocation8 + $0x100] sm:$0xff] }
 0x44b   :  { %3349 = vmatpush.msrb.mxu2 %v3262_v1  ;;  %3649 = vmatpush.msra.mxu3 %v3556_v18  ;;  %v3515_v1 = vld [vmem:[#allocation8 + $0x220] sm:$0xff]  ;;  %v3480_v18 = vld [vmem:[#allocation8 + $0x108] sm:$0xff] }
 0x44c   :  { %3310 = vmatpush.msrb.mxu0 %v3256_v29  ;;  %v3516_v29 = vld [vmem:[#allocation8 + $0x228] sm:$0xff] }
 0x44d   :  { %3350 = vmatpush.msrb.mxu2 %v3258_v22  ;;  %3650 = vmatpush.msra.mxu3 %v3552_v30  ;;  %v3495_v22 = vld [vmem:[#allocation8 + $0x180] sm:$0xff]  ;;  %v3562_v30 = vld [vmem:[#allocation8 + $0x398] sm:$0xff] }
 0x44e   :  { %3311 = vmatpush.msrb.mxu0 %v3252_v20  ;;  %v3496_v20 = vld [vmem:[#allocation8 + $0x188] sm:$0xff] }
 0x44f   :  { %3351 = vmatpush.msrb.mxu2 %v3254_v44  ;;  %3651 = vmatpush.msra.mxu3 %v3548_v5  ;;  %v3511_v44 = vld [vmem:[#allocation8 + $0x200] sm:$0xff] }
 0x450   :  { %3312 = vmatpush.msrb.mxu0 %v3248_v2  ;;  %v3512_v2 = vld [vmem:[#allocation8 + $0x208] sm:$0xff]  ;;  %v3475_v5 = vld [vmem:[#allocation8 + $0xe0] sm:$0xff] }
 0x451   :  { %3352 = vmatpush.msrb.mxu2 %v3250_v24  ;;  %3652 = vmatpush.msra.mxu3 %v3544_v47  ;;  %v3557_v47 = vld [vmem:[#allocation8 + $0x370] sm:$0xff] }
 0x452   :  { %3313 = vmatpush.msrb.mxu0 %v3244_v43  ;;  %v3491_v43 = vld [vmem:[#allocation8 + $0x160] sm:$0xff] }
 0x453   :  { %3353 = vmatpush.msrb.mxu2 %v3246_v12  ;;  %3653 = vmatpush.msra.mxu3 %v3540_v36  ;;  %v3492_v12 = vld [vmem:[#allocation8 + $0x168] sm:$0xff]  ;;  %v3558_v36 = vld [vmem:[#allocation8 + $0x378] sm:$0xff] }
 0x454   :  { %3314 = vmatpush.msrb.mxu0 %v3240_v34  ;;  %v3573_v34 = vld [vmem:[#allocation8 + $0x3f0] sm:$0xff] }
 0x455   :  { %3354 = vmatpush.msrb.mxu2 %v3242_v4  ;;  %3654 = vmatpush.msra.mxu3 %v3536_v56  ;;  %v6478_v4 = vld [vmem:[%s6891_s5] sm:$0xf] }
 0x456   :  { %3315 = vmatpush.msrb.mxu0 %v3236_v59  ;;  %v3574_v59 = vld [vmem:[#allocation8 + $0x3f8] sm:$0xff]  ;;  %v3000_v41 = vperm.slane %v6478_v4, 0  ;;  %v3471_v56 = vld [vmem:[#allocation8 + $0xc0] sm:$0xff] }
 0x457   :  { %3355 = vmatpush.msrb.mxu2 %v3238_v21  ;;  %3316 = vmatmul.f32.vlgmr.msrb.gmra.mxu0 %v6465_v33  ;;  %v3487_v21 = vld [vmem:[#allocation8 + $0x140] sm:$0xff] }
 0x458   :  { %3356 = vmatmul.f32.vlgmr.msrb.gmra.mxu2 %v6465_v33  ;;  %v3551_v33 = vld [vmem:[#allocation8 + $0x340] sm:$0xff]  ;;  %3655 = vmatpush.msra.mxu3 %v3532_v7  ;;  %v3553_v7 = vld [vmem:[#allocation8 + $0x350] sm:$0xff] }
 0x459   :  { %3610 = vmatpush.msra.mxu1 %v3551_v33  ;;  %3585 = vmatpush.msra.mxu0 %v3507_v60  ;;  %v3561_v33 = vld [vmem:[#allocation8 + $0x390] sm:$0xff]  ;;  %v3554_v60 = vld [vmem:[#allocation8 + $0x358] sm:$0xff] }
 0x45a   :  { %3656 = vmatpush.msra.mxu3 %v3528_v46  ;;  %3625 = vmatpush.msra.mxu2 %v3508_v19  ;;  %v3001_v46 = vperm.slane %v6478_v4, 1  ;;  %v3467_v19 = vld [vmem:[#allocation8 + $0xa0] sm:$0xff] }
 0x45b   :  { %3611 = vmatpush.msra.mxu1 %v3547_v8  ;;  %3586 = vmatpush.msra.mxu0 %v3503_v55 }
 0x45c   :  { %3657 = vmatpush.msra.mxu3 %v3524_v13  ;;  %3626 = vmatpush.msra.mxu2 %v3504_v9  ;;  %v3549_v13 = vld [vmem:[#allocation8 + $0x330] sm:$0xff]  ;;  %v3550_v9 = vld [vmem:[#allocation8 + $0x338] sm:$0xff] }
 0x45d   :  { %3612 = vmatpush.msra.mxu1 %v3543_v54  ;;  %3587 = vmatpush.msra.mxu0 %v3499_v63  ;;  %v3476_v54 = vld [vmem:[#allocation8 + $0xe8] sm:$0xff]  ;;  %v3463_v63 = vld [vmem:[#allocation8 + $0x80] sm:$0xff] }
 0x45e   :  { %3658 = vmatpush.msra.mxu3 %v3520_v16  ;;  %3627 = vmatpush.msra.mxu2 %v3500_v51  ;;  %v3002_v16 = vperm.slane %v6478_v4, 2  ;;  %v3464_v51 = vld [vmem:[#allocation8 + $0x88] sm:$0xff] }
 0x45f   :  { %3613 = vmatpush.msra.mxu1 %v3539_v58  ;;  %3588 = vmatpush.msra.mxu0 %v3495_v22  ;;  %v3546_v22 = vld [vmem:[#allocation8 + $0x318] sm:$0xff] }
 0x460   :  { %3659 = vmatpush.msra.mxu3 %v3516_v29  ;;  %3628 = vmatpush.msra.mxu2 %v3496_v20 }
 0x461   :  { %3614 = vmatpush.msra.mxu1 %v3535_v61  ;;  %3589 = vmatpush.msra.mxu0 %v3491_v43  ;;  %v6931_v43 = vld [vmem:[#allocation24_spill] sm:$0xff] }
 0x462   :  { %3660 = vmatpush.msra.mxu3 %v3512_v2  ;;  %3629 = vmatpush.msra.mxu2 %v3492_v12  ;;  %v3460_v2 = vld [vmem:[#allocation8 + $0x68] sm:$0xff]  ;;  %v225_v12 = vadd.f32 %v6931_v43, %v5895_v15 }
 0x463   :  { %3615 = vmatpush.msra.mxu1 %v3531_v53  ;;  %3590 = vmatpush.msra.mxu0 %v3487_v21  ;;  %v3472_v53 = vld [vmem:[#allocation8 + $0xc8] sm:$0xff]  ;;  %v3542_v21 = vld [vmem:[#allocation8 + $0x2f8] sm:$0xff] }
 0x464   :  { %3725 = vmatpush.msrb.mxu3 %v3574_v59  ;;  %3630 = vmatpush.msra.mxu2 %v3488_v10 }
 0x465   :  { %3616 = vmatpush.msra.mxu1 %v3527_v14  ;;  %3591 = vmatpush.msra.mxu0 %v3483_v32  ;;  %v3456_v32 = vld [vmem:[#allocation8 + $0x48] sm:$0xff] }
 0x466   :  { %3726 = vmatpush.msrb.mxu3 %v3570_v50  ;;  %3631 = vmatpush.msra.mxu2 %v3484_v28  ;;  %v3455_v50 = vld [vmem:[#allocation8 + $0x40] sm:$0xff]  ;;  %v3537_v28 = vld [vmem:[#allocation8 + $0x2d0] sm:$0xff] }
 0x467   :  { %3617 = vmatpush.msra.mxu1 %v3523_v23  ;;  %3592 = vmatpush.msra.mxu0 %v3479_v38  ;;  %v3468_v23 = vld [vmem:[#allocation8 + $0xa8] sm:$0xff] }
 0x468   :  { %3727 = vmatpush.msrb.mxu3 %v3566_v6  ;;  %3632 = vmatpush.msra.mxu2 %v3480_v18  ;;  %v3538_v6 = vld [vmem:[#allocation8 + $0x2d8] sm:$0xff]  ;;  %v3451_v18 = vld [vmem:[#allocation8 + $0x20] sm:$0xff] }
 0x469   :  { %3618 = vmatpush.msra.mxu1 %v3519_v62  ;;  %3593 = vmatpush.msra.mxu0 %v3475_v5  ;;  %v3534_v5 = vld [vmem:[#allocation8 + $0x2b8] sm:$0xff] }
 0x46a   :  { %3728 = vmatpush.msrb.mxu3 %v3562_v30  ;;  %3633 = vmatpush.msra.mxu2 %v3476_v54  ;;  %v3533_v30 = vld [vmem:[#allocation8 + $0x2b0] sm:$0xff] }
 0x46b   :  { %3619 = vmatpush.msra.mxu1 %v3515_v1  ;;  %3594 = vmatpush.msra.mxu0 %v3471_v56  ;;  %v3545_v1 = vld [vmem:[#allocation8 + $0x310] sm:$0xff] }
 0x46c   :  { %3729 = vmatpush.msrb.mxu3 %v3558_v36  ;;  %3634 = vmatpush.msra.mxu2 %v3472_v53  ;;  %v3448_v36 = vld [vmem:[#allocation8 + $0x8] sm:$0xff]  ;;  %v3529_v56 = vld [vmem:[#allocation8 + $0x290] sm:$0xff] }
 0x46d   :  { %3620 = vmatpush.msra.mxu1 %v3511_v44  ;;  %3595 = vmatpush.msra.mxu0 %v3467_v19  ;;  %v3459_v44 = vld [vmem:[#allocation8 + $0x60] sm:$0xff]  ;;  %v3505_v19 = vld [vmem:[#allocation8 + $0x1d0] sm:$0xff] }
 0x46e   :  { %3730 = vmatpush.msrb.mxu3 %v3554_v60  ;;  %3635 = vmatpush.msra.mxu2 %v3468_v23  ;;  %v3526_v60 = vld [vmem:[#allocation8 + $0x278] sm:$0xff] }
 0x46f   :  { %3685 = vmatpush.msrb.mxu1 %v3573_v34  ;;  %3596 = vmatpush.msra.mxu0 %v3463_v63  ;;  %v3506_v23 = vld [vmem:[#allocation8 + $0x1d8] sm:$0xff] }
 0x470   :  { %3731 = vmatpush.msrb.mxu3 %v3550_v9  ;;  %3636 = vmatpush.msra.mxu2 %v3464_v51  ;;  %v3502_v63 = vld [vmem:[#allocation8 + $0x1b8] sm:$0xff] }
 0x471   :  { %3686 = vmatpush.msrb.mxu1 %v3569_v48  ;;  %3597 = vmatpush.msra.mxu0 %v3459_v44  ;;  %v3498_v44 = vld [vmem:[#allocation8 + $0x198] sm:$0xff] }
 0x472   :  { %3732 = vmatpush.msrb.mxu3 %v3546_v22  ;;  %3637 = vmatpush.msra.mxu2 %v3460_v2  ;;  %v3518_v22 = vld [vmem:[#allocation8 + $0x238] sm:$0xff] }
 0x473   :  { %3687 = vmatpush.msrb.mxu1 %v3565_v52  ;;  %3598 = vmatpush.msra.mxu0 %v3455_v50 }
 0x474   :  { %3733 = vmatpush.msrb.mxu3 %v3542_v21  ;;  %3638 = vmatpush.msra.mxu2 %v3456_v32  ;;  %v3494_v21 = vld [vmem:[#allocation8 + $0x178] sm:$0xff]  ;;  %v3489_v32 = vld [vmem:[#allocation8 + $0x150] sm:$0xff] }
 0x475   :  { %3688 = vmatpush.msrb.mxu1 %v3561_v33  ;;  %v3452_v33 = vld [vmem:[#allocation8 + $0x28] sm:$0xff]  ;;  %3599 = vmatpush.msra.mxu0 %v3451_v18  ;;  %v3486_v18 = vld [vmem:[#allocation8 + $0x138] sm:$0xff] }
 0x476   :  { %3734 = vmatpush.msrb.mxu3 %v3538_v6  ;;  %3639 = vmatpush.msra.mxu2 %v3452_v33 }
 0x477   :  { %3689 = vmatpush.msrb.mxu1 %v3557_v47 }
 0x478   :  { %3735 = vmatpush.msrb.mxu3 %v3534_v5  ;;  %3640 = vmatpush.msra.mxu2 %v3448_v36 }
 0x479   :  { %3690 = vmatpush.msrb.mxu1 %v3553_v7  ;;  %v3509_v7 = vld [vmem:[#allocation8 + $0x1f0] sm:$0xff] }
 0x47b   :  { %3691 = vmatpush.msrb.mxu1 %v3549_v13  ;;  %v3521_v13 = vld [vmem:[#allocation8 + $0x250] sm:$0xff] }
 0x47d   :  { %3692 = vmatpush.msrb.mxu1 %v3545_v1 }
 0x49a   :  { %v3045_v24 = vpop.f32.mrf.mxu1 }
 0x4a0   :  { %v3085_v20 = vpop.f32.mrf.mxu3 }
 0x4a2   :  { %v3125_v61 = vpop.f32.mrf.mxu1 }
 0x4b3   :  { %v3025_v8 = vpop.f32.mrf.mxu0 }
 0x4b4   :  { %v3026_v58 = vadd.f32 %v3025_v8, %v3000_v41 }
 0x4b6   :  { %v3046_v14 = vadd.f32 %v3045_v24, %v3026_v58  ;;  %v3541_v24 = vld [vmem:[#allocation8 + $0x2f0] sm:$0xff]  ;;  %v3447_v58 = vld [vmem:[#allocation8] sm:$0xff] }
 0x4b7   :  { %3693 = vmatpush.msrb.mxu1 %v3541_v24  ;;  %3600 = vmatpush.msra.mxu0 %v3447_v58  ;;  %v3514_v24 = vld [vmem:[#allocation8 + $0x218] sm:$0xff] }
 0x4b8   :  { %v5106_v55 = vmul.f32 -1.442695, %v3046_v14  ;;  %v3510_v14 = vld [vmem:[#allocation8 + $0x1f8] sm:$0xff] }
 0x4b9   :  { %v3065_v62 = vpop.f32.mrf.mxu2  ;;  %3694 = vmatpush.msrb.mxu1 %v3537_v28  ;;  %3665 = vmatpush.msrb.mxu0 %v3509_v7  ;;  %v3165_v28 = vpop.f32.mrf.mxu3  ;;  %v3482_v58 = vld [vmem:[#allocation8 + $0x118] sm:$0xff] }
 0x4ba   :  { %5289 = vpow2.f32 %v5106_v55  ;;  %v3066_v29 = vadd.f32 %v3065_v62, %v3001_v46  ;;  %v3525_v46 = vld [vmem:[#allocation8 + $0x270] sm:$0xff]  ;;  %3705 = vmatpush.msrb.mxu2 %v3510_v14  ;;  %v3522_v55 = vld [vmem:[#allocation8 + $0x258] sm:$0xff]  ;;  %v3003_v62 = vperm.slane %v6478_v4, 3 }
 0x4bb   :  { %3695 = vmatpush.msrb.mxu1 %v3533_v30  ;;  %3666 = vmatpush.msrb.mxu0 %v3505_v19  ;;  %v3513_v4 = vld [vmem:[#allocation8 + $0x210] sm:$0xff]  ;;  %v3478_v7 = vld [vmem:[#allocation8 + $0xf8] sm:$0xff] }
 0x4bc   :  { %v3086_v34 = vadd.f32 %v3085_v20, %v3066_v29  ;;  %v3105_v59 = vpop.f32.mrf.mxu0  ;;  %3706 = vmatpush.msrb.mxu2 %v3506_v23  ;;  %v3517_v29 = vld [vmem:[#allocation8 + $0x230] sm:$0xff]  ;;  %v3450_v23 = vld [vmem:[#allocation8 + $0x18] sm:$0xff] }
 0x4bd   :  { %v3106_v10 = vadd.f32 %v3105_v59, %v3002_v16  ;;  %v3337_v48 = vpop.f32.mrf.mxu1  ;;  %3696 = vmatpush.msrb.mxu1 %v3529_v56  ;;  %v3501_v16 = vld [vmem:[#allocation8 + $0x1b0] sm:$0xff] }
 0x4be   :  { %v5107_v52 = vmul.f32 -1.442695, %v3086_v34  ;;  %v3381_v41 = vadd.f32 %v3337_v48, %v225_v12  ;;  %3667 = vmatpush.msrb.mxu0 %v3501_v16  ;;  %3707 = vmatpush.msrb.mxu2 %v3502_v63  ;;  %v3497_v20 = vld [vmem:[#allocation8 + $0x190] sm:$0xff]  ;;  %v3474_v63 = vld [vmem:[#allocation8 + $0xd8] sm:$0xff] }
 0x4bf   :  { %v3126_v38 = vadd.f32 %v3125_v61, %v3106_v10  ;;  %v3530_v61 = vld [vmem:[#allocation8 + $0x298] sm:$0xff]  ;;  %3697 = vmatpush.msrb.mxu1 %v3525_v46  ;;  %v3493_v59 = vld [vmem:[#allocation8 + $0x170] sm:$0xff]  ;;  %v6932_v46 = vld [vmem:[#allocation15_spill] sm:$0xff] }
 0x4c0   :  { %v5290_v8 = vpop.eup %5289  ;;  %5291 = vpow2.f32 %v5107_v52  ;;  %v5110_v53 = vmul.f32 -1.442695, %v3381_v41  ;;  %3736 = vmatpush.msrb.mxu3 %v3530_v61  ;;  %3668 = vmatpush.msrb.mxu0 %v3497_v20  ;;  %v3490_v52 = vld [vmem:[#allocation8 + $0x158] sm:$0xff]  ;;  %v3477_v61 = vld [vmem:[#allocation8 + $0xf0] sm:$0xff] }
 0x4c1   :  { %v6485_v54 = vadd.f32 1.0, %v5290_v8  ;;  %v5108_v47 = vmul.f32 -1.442695, %v3126_v38  ;;  %3698 = vmatpush.msrb.mxu1 %v3521_v13  ;;  %3708 = vmatpush.msrb.mxu2 %v3498_v44  ;;  %v3485_v38 = vld [vmem:[#allocation8 + $0x130] sm:$0xff] }
 0x4c2   :  { %3737 = vmatpush.msrb.mxu3 %v3526_v60  ;;  %v3145_v1 = vpop.f32.mrf.mxu2  ;;  %3669 = vmatpush.msrb.mxu0 %v3493_v59  ;;  %v184_v60 = vadd.f32 %v6932_v46, %v5892_v11  ;;  %v3473_v16 = vld [vmem:[#allocation8 + $0xd0] sm:$0xff] }
 0x4c3   :  { %5293 = vrcp.f32 %v6485_v54  ;;  %3699 = vmatpush.msrb.mxu1 %v3517_v29  ;;  %v3146_v34 = vadd.f32 %v3145_v1, %v3003_v62  ;;  %3709 = vmatpush.msrb.mxu2 %v3494_v21  ;;  %v3191_v36 = vand.u32 2147483648, %v6485_v54  ;;  %vm3185_vm14 = vweird.f32 %v6485_v54  ;;  %v3469_v44 = vld [vmem:[#allocation8 + $0xb0] sm:$0xff]  ;;  %v3466_v21 = vld [vmem:[#allocation8 + $0x98] sm:$0xff] }
 0x4c4   :  { %5295 = vpow2.f32 %v5108_v47  ;;  %3738 = vmatpush.msrb.mxu3 %v3522_v55  ;;  %3670 = vmatpush.msrb.mxu0 %v3489_v32  ;;  %v3481_v47 = vld [vmem:[#allocation8 + $0x110] sm:$0xff]  ;;  %v6935_v32 = vld [vmem:[#allocation23_spill] sm:$0xff] }
 0x4c5   :  { %5297 = vpow2.f32 %v5110_v53  ;;  %3700 = vmatpush.msrb.mxu1 %v3513_v4  ;;  %v3166_v41 = vadd.f32 %v3165_v28, %v3146_v34  ;;  %3710 = vmatpush.msrb.mxu2 %v3490_v52  ;;  %v3189_v53 = vand.u32 2147483647, %v6485_v54  ;;  %v3192_v1 = vor.u32 1.1754944e-38, %v3191_v36  ;;  %v3470_v4 = vld [vmem:[#allocation8 + $0xb8] sm:$0xff]  ;;  %v3465_v59 = vld [vmem:[#allocation8 + $0x90] sm:$0xff] }
 0x4c6   :  { %v5292_v9 = vpop.eup %5291  ;;  %3739 = vmatpush.msrb.mxu3 %v3518_v22  ;;  %3671 = vmatpush.msrb.mxu0 %v3485_v38  ;;  %v266_v28 = vadd.f32 %v6935_v32, %v5911_v42  ;;  %v3462_v38 = vld [vmem:[#allocation8 + $0x78] sm:$0xff] }
 0x4c7   :  { %v6489_v51 = vadd.f32 1.0, %v5292_v9  ;;  %3711 = vmatpush.msrb.mxu2 %v3486_v18  ;;  %vm3190_vm2 = vcmp.eq.f32.partialorder %v3189_v53, 8.507059e+37  ;;  %v3453_v53 = vld [vmem:[#allocation8 + $0x30] sm:$0xff]  ;;  %v3864_v32 = vld [vmem:[#allocation6 + $0x198] sm:$0xff] }
 0x4c8   :  { %3740 = vmatpush.msrb.mxu3 %v3514_v24  ;;  %3672 = vmatpush.msrb.mxu0 %v3481_v47  ;;  %v3458_v47 = vld [vmem:[#allocation8 + $0x58] sm:$0xff] }
 0x4c9   :  { %v6491_v2 = vpop.eup %5293  ;;  %5299 = vrcp.f32 %v6489_v51  ;;  %3712 = vmatpush.msrb.mxu2 %v3482_v58  ;;  %v3206_v19 = vand.u32 2147483648, %v6489_v51  ;;  %vm3200_vm1 = vweird.f32 %v6489_v51 }
 0x4ca   :  { %v5296_v43 = vpop.eup %5295  ;;  %v3181_v12 = vmul.f32 %v6491_v2, %v6485_v54  ;;  %vm3186_vm13 = vweird.f32 %v6491_v2  ;;  %v3204_v54 = vand.u32 2147483647, %v6489_v51  ;;  %3673 = vmatpush.msrb.mxu0 %v3477_v61  ;;  %v3454_v61 = vld [vmem:[#allocation8 + $0x38] sm:$0xff] }
 0x4cb   :  { %v6496_v10 = vadd.f32 1.0, %v5296_v43  ;;  %v5298_v48 = vpop.eup %5297  ;;  %vm6516_vm15 = vmor %vm3185_vm14, %vm3186_vm13  ;;  %3713 = vmatpush.msrb.mxu2 %v3478_v7  ;;  %v3207_v24 = vor.u32 1.1754944e-38, %v3206_v19 }
 0x4cc   :  { %v3182_v50 = vsub.f32 1.0, %v3181_v12  ;;  %v6500_v30 = vadd.f32 1.0, %v5298_v48  ;;  %3674 = vmatpush.msrb.mxu0 %v3473_v16  ;;  %vm3205_vm4 = vcmp.eq.f32.partialorder %v3204_v54, 8.507059e+37  ;;  %v3377_v16 = vpop.f32.mrf.mxu3 }
 0x4cd   :  { %5301 = vrcp.f32 %v6496_v10  ;;  %3714 = vmatpush.msrb.mxu2 %v3474_v63  ;;  %vm3215_vm6 = vweird.f32 %v6496_v10  ;;  %v3219_v46 = vand.u32 2147483647, %v6496_v10 }
 0x4ce   :  { %v3183_v6 = vmul.f32 %v6491_v2, %v3182_v50  ;;  %5303 = vtanh.f32 %v3166_v41  ;;  %3675 = vmatpush.msrb.mxu0 %v3469_v44  ;;  %v3870_v44 = vld [vmem:[#allocation6 + $0x1c8] sm:$0xff]  ;;  %vm3416_vm10 = vweird.f32 %v6500_v30 }
 0x4cf   :  { %v5300_v33 = vpop.eup %5299  ;;  %5305 = vrcp.f32 %v6500_v30  ;;  %3715 = vmatpush.msrb.mxu2 %v3470_v4  ;;  %vm3220_vm8 = vcmp.eq.f32.partialorder %v3219_v46, 8.507059e+37  ;;  %v3872_v4 = vld [vmem:[#allocation6 + $0x1d8] sm:$0xff] }
 0x4d0   :  { %v3196_v8 = vmul.f32 %v5300_v33, %v6489_v51  ;;  %v3184_v5 = vadd.f32 %v6491_v2, %v3183_v6  ;;  %vm3201_vm0 = vweird.f32 %v5300_v33  ;;  %3676 = vmatpush.msrb.mxu0 %v3465_v59  ;;  %v3461_v6 = vld [vmem:[#allocation8 + $0x70] sm:$0xff]  ;;  %v3422_v59 = vand.u32 2147483648, %v6500_v30 }
 0x4d1   :  { %vm3202_vm3 = vmor %vm3200_vm1, %vm3201_vm0  ;;  %3716 = vmatpush.msrb.mxu2 %v3466_v21  ;;  %v3420_v21 = vand.u32 2147483647, %v6500_v30 }
 0x4d2   :  { %v3197_v56 = vsub.f32 1.0, %v3196_v8  ;;  %v3188_v9 = vsel %vm6516_vm15, %v6491_v2, %v3184_v5  ;;  %3677 = vmatpush.msrb.mxu0 %v3461_v6  ;;  %v3457_v5 = vld [vmem:[#allocation8 + $0x50] sm:$0xff] }
 0x4d3   :  { %v6508_v14 = vpop.eup %5301  ;;  %v3193_v2 = vsel %vm3190_vm2, %v3192_v1, %v3188_v9  ;;  %3717 = vmatpush.msrb.mxu2 %v3462_v38  ;;  %v3874_v1 = vld [vmem:[#allocation6 + $0x1e8] sm:$0xff]  ;;  %vm3421_vm13 = vcmp.eq.f32.partialorder %v3420_v21, 8.507059e+37  ;;  %v3875_v21 = vld [vmem:[#allocation6 + $0x1f0] sm:$0xff] }
 0x4d4   :  { %v3198_v13 = vmul.f32 %v5300_v33, %v3197_v56  ;;  %v3211_v55 = vmul.f32 %v6508_v14, %v6496_v10  ;;  %v3317_v62 = vpop.f32.mrf.mxu0  ;;  %v5304_v12 = vpop.eup %5303  ;;  %vm3216_vm5 = vweird.f32 %v6508_v14  ;;  %3678 = vmatpush.msrb.mxu0 %v3457_v5  ;;  %v3858_v38 = vld [vmem:[#allocation6 + $0x168] sm:$0xff] }
 0x4d5   :  { %v3380_v29 = vadd.f32 %v3317_v62, %v184_v60  ;;  %v6528_v51 = vpop.eup %5305  ;;  %v3227_v41 = vmul.f32 %v5304_v12, %v3193_v2  ;;  %3718 = vmatpush.msrb.mxu2 %v3458_v47  ;;  %v3449_v60 = vld [vmem:[#allocation8 + $0x10] sm:$0xff]  ;;  %vm3217_vm7 = vmor %vm3215_vm6, %vm3216_vm5 }
 0x4d6   :  { %v3212_v22 = vsub.f32 1.0, %v3211_v55  ;;  %v3199_v20 = vadd.f32 %v5300_v33, %v3198_v13  ;;  %v3412_v58 = vmul.f32 %v6528_v51, %v6500_v30  ;;  %3679 = vmatpush.msrb.mxu0 %v3453_v53  ;;  %vm3417_vm9 = vweird.f32 %v6528_v51 }
 0x4d7   :  { %v5109_v43 = vmul.f32 -1.442695, %v3380_v29  ;;  %3719 = vmatpush.msrb.mxu2 %v3454_v61  ;;  %v3876_v29 = vld [vmem:[#allocation6 + $0x1f8] sm:$0xff]  ;;  %vm6566_vm11 = vmor %vm3416_vm10, %vm3417_vm9  ;;  %v3850_v61 = vld [vmem:[#allocation6 + $0x128] sm:$0xff] }
 0x4d8   :  { %v3203_v34 = vsel %vm3202_vm3, %v5300_v33, %v3199_v20  ;;  %v3213_v48 = vmul.f32 %v6508_v14, %v3212_v22  ;;  %v3413_v54 = vsub.f32 1.0, %v3412_v58  ;;  %3680 = vmatpush.msrb.mxu0 %v3449_v60  ;;  %v3854_v58 = vld [vmem:[#allocation6 + $0x148] sm:$0xff] }
 0x4d9   :  { %v3208_v50 = vsel %vm3205_vm4, %v3207_v24, %v3203_v34  ;;  %5307 = vpow2.f32 %v5109_v43  ;;  %3720 = vmatpush.msrb.mxu2 %v3450_v23  ;;  %v3868_v34 = vld [vmem:[#allocation6 + $0x1b8] sm:$0xff] }
 0x4da   :  { %v3226_v52 = vmul.f32 %v3208_v50, %v6412_v31  ;;  %v3214_v36 = vadd.f32 %v6508_v14, %v3213_v48  ;;  %v3221_v31 = vand.u32 2147483648, %v6496_v10  ;;  %v3414_v62 = vmul.f32 %v6528_v51, %v3413_v54  ;;  %v3862_v50 = vld [vmem:[#allocation6 + $0x188] sm:$0xff] }
 0x4db   :  { %v3357_v18 = vpop.f32.mrf.mxu2 }
 0x4dc   :  { %v6534_v33 = vadd.f32 %v3227_v41, %v3226_v52  ;;  %v3382_v8 = vadd.f32 %v3357_v18, %v266_v28  ;;  %v3218_v13 = vsel %vm3217_vm7, %v6508_v14, %v3214_v36  ;;  %v3222_v55 = vor.u32 1.1754944e-38, %v3221_v31  ;;  %v3860_v18 = vld [vmem:[#allocation6 + $0x178] sm:$0xff]  ;;  %v3871_v28 = vld [vmem:[#allocation6 + $0x1d0] sm:$0xff] }
 0x4dd   :  { %v307_v14 = vadd.f32 %v5902_v17, %v5942_v57  ;;  %v3415_v43 = vadd.f32 %v6528_v51, %v3414_v62  ;;  %v3866_v17 = vld [vmem:[#allocation6 + $0x1a8] sm:$0xff] }
 0x4de   :  { %5309 = vtanh.f32 %v6534_v33  ;;  %v5111_v56 = vmul.f32 -1.442695, %v3382_v8  ;;  %v3223_v9 = vsel %vm3220_vm8, %v3222_v55, %v3218_v13  ;;  %v3423_v8 = vor.u32 1.1754944e-38, %v3422_v59  ;;  %v3846_v13 = vld [vmem:[#allocation6 + $0x108] sm:$0xff]  ;;  %v3848_v55 = vld [vmem:[#allocation6 + $0x118] sm:$0xff] }
 0x4df   :  { %v5308_v7 = vpop.eup %5307  ;;  %v3383_v2 = vadd.f32 %v3377_v16, %v307_v14  ;;  %v3419_v41 = vsel %vm6566_vm11, %v6528_v51, %v3415_v43  ;;  %v3856_v51 = vld [vmem:[#allocation6 + $0x158] sm:$0xff]  ;;  %v3842_v62 = vld [vmem:[#allocation6 + $0xe8] sm:$0xff] }
 0x4e0   :  { %v6544_v19 = vadd.f32 1.0, %v5308_v7  ;;  %5311 = vpow2.f32 %v5111_v56  ;;  %v3424_v36 = vsel %vm3421_vm13, %v3423_v8, %v3419_v41  ;;  %v3852_v7 = vld [vmem:[#allocation6 + $0x138] sm:$0xff]  ;;  %v3830_v43 = vld [vmem:[#allocation6 + $0x88] sm:$0xff]  ;;  %v3861_v8 = vld [vmem:[#allocation6 + $0x180] sm:$0xff] }
 0x4e1   :  { %v3442_v23 = vmul.f32 %v3424_v36, %v6459_v37  ;;  %v3844_v16 = vld [vmem:[#allocation6 + $0xf8] sm:$0xff]  ;;  %v3859_v36 = vld [vmem:[#allocation6 + $0x170] sm:$0xff] }
 0x4e2   :  { %5313 = vrcp.f32 %v6544_v19  ;;  %v3407_v52 = vand.u32 2147483648, %v6544_v19  ;;  %v3405_v30 = vand.u32 2147483647, %v6544_v19  ;;  %vm3401_vm14 = vweird.f32 %v6544_v19  ;;  %v3840_v37 = vld [vmem:[#allocation6 + $0xd8] sm:$0xff] }
 0x4e3   :  { %v3824_v41 = vld [vmem:[#allocation6 + $0x58] sm:$0xff] }
 0x4e4   :  { %v5310_v10 = vpop.eup %5309  ;;  %v3408_v31 = vor.u32 1.1754944e-38, %v3407_v52  ;;  %vm3406_vm0 = vcmp.eq.f32.partialorder %v3405_v30, 8.507059e+37  ;;  %v3822_v52 = vld [vmem:[#allocation6 + $0x48] sm:$0xff]  ;;  %v3867_v30 = vld [vmem:[#allocation6 + $0x1b0] sm:$0xff] }
 0x4e5   :  { %v6551_v63 = vmul.f32 %v5310_v10, %v3223_v9 }
 0x4e6   :  { %v5312_v22 = vpop.eup %5311 }
 0x4e7   :  { %v6555_v20 = vadd.f32 1.0, %v5312_v22  ;;  %3621 = vmatmul.f32.vlgmr.msra.gmra.mxu1 %v6551_v63  ;;  %3661 = vmatmul.f32.vlgmr.msra.gmra.mxu3 %v6551_v63  ;;  %v3838_v22 = vld [vmem:[#allocation6 + $0xc8] sm:$0xff] }
 0x4e8   :  { %v5314_v24 = vpop.eup %5313  ;;  %3897 = vmatpush.msra.mxu1 %v3874_v1  ;;  %3937 = vmatpush.msra.mxu3 %v3876_v29 }
 0x4e9   :  { %v3397_v12 = vmul.f32 %v5314_v24, %v6544_v19  ;;  %5315 = vrcp.f32 %v6555_v20  ;;  %vm3402_vm12 = vweird.f32 %v5314_v24  ;;  %v3437_v29 = vand.u32 2147483648, %v6555_v20 }
 0x4ea   :  { %3898 = vmatpush.msra.mxu1 %v3870_v44  ;;  %3938 = vmatpush.msra.mxu3 %v3872_v4  ;;  %5317 = vtanh.f32 %v3383_v2  ;;  %vm3403_vm15 = vmor %vm3401_vm14, %vm3402_vm12  ;;  %vm3431_vm2 = vweird.f32 %v6555_v20  ;;  %v3435_v14 = vand.u32 2147483647, %v6555_v20  ;;  %v3834_v44 = vld [vmem:[#allocation6 + $0xa8] sm:$0xff]  ;;  %v3836_v4 = vld [vmem:[#allocation6 + $0xb8] sm:$0xff] }
 0x4eb   :  { %v3398_v48 = vsub.f32 1.0, %v3397_v12  ;;  %v3438_v2 = vor.u32 1.1754944e-38, %v3437_v29  ;;  %v3832_v12 = vld [vmem:[#allocation6 + $0x98] sm:$0xff]  ;;  %v3821_v29 = vld [vmem:[#allocation6 + $0x40] sm:$0xff] }
 0x4ec   :  { %3899 = vmatpush.msra.mxu1 %v3866_v17  ;;  %3939 = vmatpush.msra.mxu3 %v3868_v34  ;;  %vm3436_vm4 = vcmp.eq.f32.partialorder %v3435_v14, 8.507059e+37  ;;  %v3819_v14 = vld [vmem:[#allocation6 + $0x30] sm:$0xff] }
 0x4ed   :  { %v3399_v6 = vmul.f32 %v5314_v24, %v3398_v48  ;;  %v3826_v48 = vld [vmem:[#allocation6 + $0x68] sm:$0xff] }
 0x4ee   :  { %3900 = vmatpush.msra.mxu1 %v3862_v50  ;;  %3940 = vmatpush.msra.mxu3 %v3864_v32  ;;  %v3828_v50 = vld [vmem:[#allocation6 + $0x78] sm:$0xff]  ;;  %v3869_v32 = vld [vmem:[#allocation6 + $0x1c0] sm:$0xff] }
 0x4ef   :  { %v5316_v5 = vpop.eup %5315  ;;  %v3400_v47 = vadd.f32 %v5314_v24, %v3399_v6  ;;  %3701 = vmatmul.f32.vlgmr.msrb.gmra.mxu1 %v6551_v63  ;;  %3741 = vmatmul.f32.vlgmr.msrb.gmra.mxu3 %v6551_v63  ;;  %v3865_v6 = vld [vmem:[#allocation6 + $0x1a0] sm:$0xff] }
 0x4f0   :  { %v3427_v56 = vmul.f32 %v5316_v5, %v6555_v20  ;;  %3901 = vmatpush.msra.mxu1 %v3858_v38  ;;  %3941 = vmatpush.msra.mxu3 %v3860_v18  ;;  %v5318_v46 = vpop.eup %5317  ;;  %vm3432_vm1 = vweird.f32 %v5316_v5  ;;  %v3873_v20 = vld [vmem:[#allocation6 + $0x1e0] sm:$0xff]  ;;  %v3818_v38 = vld [vmem:[#allocation6 + $0x28] sm:$0xff]  ;;  %v3820_v18 = vld [vmem:[#allocation6 + $0x38] sm:$0xff] }
 0x4f1   :  { %v3404_v53 = vsel %vm3403_vm15, %v5314_v24, %v3400_v47  ;;  %vm3433_vm3 = vmor %vm3431_vm2, %vm3432_vm1  ;;  %v3814_v47 = vld [vmem:[#allocation6 + $0x8] sm:$0xff] }
 0x4f2   :  { %v3409_v60 = vsel %vm3406_vm0, %v3408_v31, %v3404_v53  ;;  %v3428_v19 = vsub.f32 1.0, %v3427_v56  ;;  %3902 = vmatpush.msra.mxu1 %v3854_v58  ;;  %3942 = vmatpush.msra.mxu3 %v3856_v51  ;;  %v3816_v58 = vld [vmem:[#allocation6 + $0x18] sm:$0xff]  ;;  %v3857_v51 = vld [vmem:[#allocation6 + $0x160] sm:$0xff]  ;;  %v3855_v56 = vld [vmem:[#allocation6 + $0x150] sm:$0xff] }
 0x4f3   :  { %v3443_v54 = vmul.f32 %v5318_v46, %v3409_v60  ;;  %v3853_v31 = vld [vmem:[#allocation6 + $0x140] sm:$0xff]  ;;  %v3847_v46 = vld [vmem:[#allocation6 + $0x110] sm:$0xff] }
 0x4f4   :  { %v3429_v10 = vmul.f32 %v5316_v5, %v3428_v19  ;;  %3903 = vmatpush.msra.mxu1 %v3850_v61  ;;  %3943 = vmatpush.msra.mxu3 %v3852_v7  ;;  %v3849_v53 = vld [vmem:[#allocation6 + $0x120] sm:$0xff]  ;;  %v3851_v61 = vld [vmem:[#allocation6 + $0x130] sm:$0xff] }
 0x4f5   :  { %v6581_v9 = vadd.f32 %v3443_v54, %v3442_v23  ;;  %v3845_v7 = vld [vmem:[#allocation6 + $0x100] sm:$0xff]  ;;  %v3843_v19 = vld [vmem:[#allocation6 + $0xf0] sm:$0xff] }
 0x4f6   :  { %v3430_v1 = vadd.f32 %v5316_v5, %v3429_v10  ;;  %3904 = vmatpush.msra.mxu1 %v3846_v13  ;;  %3944 = vmatpush.msra.mxu3 %v3848_v55  ;;  %v3841_v60 = vld [vmem:[#allocation6 + $0xe0] sm:$0xff]  ;;  %v3839_v54 = vld [vmem:[#allocation6 + $0xd0] sm:$0xff] }
 0x4f7   :  { %5319 = vtanh.f32 %v6581_v9  ;;  %v3837_v23 = vld [vmem:[#allocation6 + $0xc0] sm:$0xff]  ;;  %v3835_v55 = vld [vmem:[#allocation6 + $0xb0] sm:$0xff] }
 0x4f8   :  { %3905 = vmatpush.msra.mxu1 %v3842_v62  ;;  %3945 = vmatpush.msra.mxu3 %v3844_v16  ;;  %v3434_v24 = vsel %vm3433_vm3, %v5316_v5, %v3430_v1  ;;  %v3863_v5 = vld [vmem:[#allocation6 + $0x190] sm:$0xff]  ;;  %v3833_v13 = vld [vmem:[#allocation6 + $0xa0] sm:$0xff] }
 0x4f9   :  { %v3439_v34 = vsel %vm3436_vm4, %v3438_v2, %v3434_v24  ;;  %v3829_v10 = vld [vmem:[#allocation6 + $0x80] sm:$0xff]  ;;  %v3831_v62 = vld [vmem:[#allocation6 + $0x90] sm:$0xff]  ;;  %v4149_v2 = vld [vmem:[#allocation8 + $0x3e8] sm:$0xff] }
 0x4fa   :  { %3906 = vmatpush.msra.mxu1 %v3838_v22  ;;  %3946 = vmatpush.msra.mxu3 %v3840_v37  ;;  %v3825_v16 = vld [vmem:[#allocation6 + $0x60] sm:$0xff]  ;;  %v3827_v1 = vld [vmem:[#allocation6 + $0x70] sm:$0xff] }
 0x4fb   :  { %v3823_v22 = vld [vmem:[#allocation6 + $0x50] sm:$0xff]  ;;  %v3817_v37 = vld [vmem:[#allocation6 + $0x20] sm:$0xff] }
 0x4fc   :  { %3907 = vmatpush.msra.mxu1 %v3834_v44  ;;  %3947 = vmatpush.msra.mxu3 %v3836_v4  ;;  %v3813_v44 = vld [vmem:[#allocation6] sm:$0xff]  ;;  %v3815_v4 = vld [vmem:[#allocation6 + $0x10] sm:$0xff] }
 0x4fd   :  { %v5320_v17 = vpop.eup %5319  ;;  %v4148_v24 = vld [vmem:[#allocation8 + $0x3e0] sm:$0xff] }
 0x4fe   :  { %v6587_v59 = vmul.f32 %v5320_v17, %v3439_v34  ;;  %3908 = vmatpush.msra.mxu1 %v3830_v43  ;;  %3948 = vmatpush.msra.mxu3 %v3832_v12  ;;  %v4144_v43 = vld [vmem:[#allocation8 + $0x3c0] sm:$0xff]  ;;  %v4145_v12 = vld [vmem:[#allocation8 + $0x3c8] sm:$0xff] }
 0x4ff   :  { %v4140_v17 = vld [vmem:[#allocation8 + $0x3a0] sm:$0xff]  ;;  %v4141_v34 = vld [vmem:[#allocation8 + $0x3a8] sm:$0xff] }
 0x500   :  { %3601 = vmatmul.f32.vlgmr.msra.gmra.mxu0 %v6587_v59  ;;  %3641 = vmatmul.f32.vlgmr.msra.gmra.mxu2 %v6587_v59 }
 0x501   :  { %3877 = vmatpush.msra.mxu0 %v3873_v20  ;;  %3917 = vmatpush.msra.mxu2 %v3875_v21  ;;  %v4136_v20 = vld [vmem:[#allocation8 + $0x380] sm:$0xff]  ;;  %v4137_v21 = vld [vmem:[#allocation8 + $0x388] sm:$0xff] }
 0x502   :  { %3909 = vmatpush.msra.mxu1 %v3826_v48  ;;  %3949 = vmatpush.msra.mxu3 %v3828_v50  ;;  %v4132_v48 = vld [vmem:[#allocation8 + $0x360] sm:$0xff]  ;;  %v4133_v50 = vld [vmem:[#allocation8 + $0x368] sm:$0xff] }
 0x503   :  { %3878 = vmatpush.msra.mxu0 %v3869_v32  ;;  %3918 = vmatpush.msra.mxu2 %v3871_v28  ;;  %v4129_v32 = vld [vmem:[#allocation8 + $0x348] sm:$0xff]  ;;  %v4124_v28 = vld [vmem:[#allocation8 + $0x320] sm:$0xff] }
 0x504   :  { %3910 = vmatpush.msra.mxu1 %v3822_v52  ;;  %3950 = vmatpush.msra.mxu3 %v3824_v41  ;;  %v4125_v52 = vld [vmem:[#allocation8 + $0x328] sm:$0xff]  ;;  %v4120_v41 = vld [vmem:[#allocation8 + $0x300] sm:$0xff] }
 0x505   :  { %3879 = vmatpush.msra.mxu0 %v3865_v6  ;;  %3919 = vmatpush.msra.mxu2 %v3867_v30  ;;  %v4121_v6 = vld [vmem:[#allocation8 + $0x308] sm:$0xff]  ;;  %v4116_v30 = vld [vmem:[#allocation8 + $0x2e0] sm:$0xff] }
 0x506   :  { %3911 = vmatpush.msra.mxu1 %v3818_v38  ;;  %3951 = vmatpush.msra.mxu3 %v3820_v18  ;;  %v4117_v38 = vld [vmem:[#allocation8 + $0x2e8] sm:$0xff]  ;;  %v4112_v18 = vld [vmem:[#allocation8 + $0x2c0] sm:$0xff] }
 0x507   :  { %3880 = vmatpush.msra.mxu0 %v3861_v8  ;;  %3920 = vmatpush.msra.mxu2 %v3863_v5  ;;  %v4113_v8 = vld [vmem:[#allocation8 + $0x2c8] sm:$0xff]  ;;  %v4108_v5 = vld [vmem:[#allocation8 + $0x2a0] sm:$0xff] }
 0x508   :  { %3912 = vmatpush.msra.mxu1 %v3814_v47  ;;  %3952 = vmatpush.msra.mxu3 %v3816_v58  ;;  %v4109_v47 = vld [vmem:[#allocation8 + $0x2a8] sm:$0xff]  ;;  %v4104_v58 = vld [vmem:[#allocation8 + $0x280] sm:$0xff] }
 0x509   :  { %3681 = vmatmul.f32.vlgmr.msrb.gmra.mxu0 %v6587_v59  ;;  %3721 = vmatmul.f32.vlgmr.msrb.gmra.mxu2 %v6587_v59 }
 0x50a   :  { %3881 = vmatpush.msra.mxu0 %v3857_v51  ;;  %3913 = vmatmul.f32.vlgmr.msra.gmra.mxu1 %v6587_v59  ;;  %v4105_v51 = vld [vmem:[#allocation8 + $0x288] sm:$0xff] }
 0x50b   :  { %3921 = vmatpush.msra.mxu2 %v3859_v36  ;;  %3953 = vmatmul.f32.vlgmr.msra.gmra.mxu3 %v6587_v59  ;;  %v4084_v36 = vld [vmem:[#allocation8 + $0x1e0] sm:$0xff] }
 0x50c   :  { %3882 = vmatpush.msra.mxu0 %v3853_v31  ;;  %4182 = vmatpush.msrb.mxu1 %v4148_v24  ;;  %v4085_v31 = vld [vmem:[#allocation8 + $0x1e8] sm:$0xff] }
 0x50d   :  { %3922 = vmatpush.msra.mxu2 %v3855_v56  ;;  %4222 = vmatpush.msrb.mxu3 %v4149_v2  ;;  %v4100_v56 = vld [vmem:[#allocation8 + $0x260] sm:$0xff]  ;;  %v4065_v24 = vld [vmem:[#allocation8 + $0x148] sm:$0xff]  ;;  %v4146_v2 = vld [vmem:[#allocation8 + $0x3d0] sm:$0xff] }
 0x50e   :  { %3883 = vmatpush.msra.mxu0 %v3849_v53  ;;  %4183 = vmatpush.msrb.mxu1 %v4144_v43  ;;  %v4101_v53 = vld [vmem:[#allocation8 + $0x268] sm:$0xff]  ;;  %v4147_v43 = vld [vmem:[#allocation8 + $0x3d8] sm:$0xff] }
 0x50f   :  { %3923 = vmatpush.msra.mxu2 %v3851_v61  ;;  %4223 = vmatpush.msrb.mxu3 %v4145_v12  ;;  %v4080_v61 = vld [vmem:[#allocation8 + $0x1c0] sm:$0xff] }
 0x510   :  { %3884 = vmatpush.msra.mxu0 %v3845_v7  ;;  %4184 = vmatpush.msrb.mxu1 %v4140_v17  ;;  %v4081_v7 = vld [vmem:[#allocation8 + $0x1c8] sm:$0xff]  ;;  %v4060_v12 = vld [vmem:[#allocation8 + $0x120] sm:$0xff] }
 0x511   :  { %3924 = vmatpush.msra.mxu2 %v3847_v46  ;;  %4224 = vmatpush.msrb.mxu3 %v4141_v34  ;;  %v4096_v46 = vld [vmem:[#allocation8 + $0x240] sm:$0xff]  ;;  %v4061_v17 = vld [vmem:[#allocation8 + $0x128] sm:$0xff]  ;;  %v4142_v34 = vld [vmem:[#allocation8 + $0x3b0] sm:$0xff] }
 0x512   :  { %3885 = vmatpush.msra.mxu0 %v3841_v60  ;;  %4185 = vmatpush.msrb.mxu1 %v4136_v20  ;;  %v4097_v60 = vld [vmem:[#allocation8 + $0x248] sm:$0xff] }
 0x513   :  { %3925 = vmatpush.msra.mxu2 %v3843_v19  ;;  %4225 = vmatpush.msrb.mxu3 %v4137_v21  ;;  %v4076_v19 = vld [vmem:[#allocation8 + $0x1a0] sm:$0xff]  ;;  %v4143_v21 = vld [vmem:[#allocation8 + $0x3b8] sm:$0xff] }
 0x514   :  { %3886 = vmatpush.msra.mxu0 %v3837_v23  ;;  %4186 = vmatpush.msrb.mxu1 %v4132_v48  ;;  %v4077_v23 = vld [vmem:[#allocation8 + $0x1a8] sm:$0xff]  ;;  %v4056_v48 = vld [vmem:[#allocation8 + $0x100] sm:$0xff] }
 0x515   :  { %3926 = vmatpush.msra.mxu2 %v3839_v54  ;;  %4226 = vmatpush.msrb.mxu3 %v4133_v50  ;;  %v4092_v54 = vld [vmem:[#allocation8 + $0x220] sm:$0xff]  ;;  %v4057_v50 = vld [vmem:[#allocation8 + $0x108] sm:$0xff] }
 0x516   :  { %3887 = vmatpush.msra.mxu0 %v3833_v13  ;;  %v4093_v13 = vld [vmem:[#allocation8 + $0x228] sm:$0xff] }
 0x517   :  { %3927 = vmatpush.msra.mxu2 %v3835_v55  ;;  %4227 = vmatpush.msrb.mxu3 %v4129_v32  ;;  %v4072_v55 = vld [vmem:[#allocation8 + $0x180] sm:$0xff]  ;;  %v4139_v32 = vld [vmem:[#allocation8 + $0x398] sm:$0xff] }
 0x518   :  { %3888 = vmatpush.msra.mxu0 %v3829_v10  ;;  %v4073_v10 = vld [vmem:[#allocation8 + $0x188] sm:$0xff] }
 0x519   :  { %3928 = vmatpush.msra.mxu2 %v3831_v62  ;;  %4228 = vmatpush.msrb.mxu3 %v4125_v52  ;;  %v4088_v62 = vld [vmem:[#allocation8 + $0x200] sm:$0xff] }
 0x51a   :  { %3889 = vmatpush.msra.mxu0 %v3825_v16  ;;  %v4089_v16 = vld [vmem:[#allocation8 + $0x208] sm:$0xff]  ;;  %v4052_v52 = vld [vmem:[#allocation8 + $0xe0] sm:$0xff] }
 0x51b   :  { %3929 = vmatpush.msra.mxu2 %v3827_v1  ;;  %4229 = vmatpush.msrb.mxu3 %v4121_v6  ;;  %v4134_v6 = vld [vmem:[#allocation8 + $0x370] sm:$0xff] }
 0x51c   :  { %3890 = vmatpush.msra.mxu0 %v3821_v29  ;;  %v4068_v29 = vld [vmem:[#allocation8 + $0x160] sm:$0xff] }
 0x51d   :  { %3930 = vmatpush.msra.mxu2 %v3823_v22  ;;  %4230 = vmatpush.msrb.mxu3 %v4117_v38  ;;  %v4069_v22 = vld [vmem:[#allocation8 + $0x168] sm:$0xff]  ;;  %v4135_v38 = vld [vmem:[#allocation8 + $0x378] sm:$0xff] }
 0x51e   :  { %3891 = vmatpush.msra.mxu0 %v3817_v37  ;;  %v4150_v37 = vld [vmem:[#allocation8 + $0x3f0] sm:$0xff] }
 0x51f   :  { %3931 = vmatpush.msra.mxu2 %v3819_v14  ;;  %4231 = vmatpush.msrb.mxu3 %v4113_v8  ;;  %v6600_v14 = vld [vmem:[%s6891_s5] sm:$0xf] }
 0x520   :  { %3892 = vmatpush.msra.mxu0 %v3813_v44  ;;  %v4151_v44 = vld [vmem:[#allocation8 + $0x3f8] sm:$0xff]  ;;  %v3577_v20 = vperm.slane %v6600_v14, 0  ;;  %v4048_v8 = vld [vmem:[#allocation8 + $0xc0] sm:$0xff] }
 0x521   :  { %3932 = vmatpush.msra.mxu2 %v3815_v4  ;;  %3893 = vmatmul.f32.vlgmr.msra.gmra.mxu0 %v6587_v59  ;;  %v4064_v4 = vld [vmem:[#allocation8 + $0x140] sm:$0xff] }
 0x522   :  { %3933 = vmatmul.f32.vlgmr.msra.gmra.mxu2 %v6587_v59  ;;  %v4128_v59 = vld [vmem:[#allocation8 + $0x340] sm:$0xff]  ;;  %4232 = vmatpush.msrb.mxu3 %v4109_v47  ;;  %v4130_v47 = vld [vmem:[#allocation8 + $0x350] sm:$0xff] }
 0x523   :  { %4187 = vmatpush.msrb.mxu1 %v4128_v59  ;;  %4162 = vmatpush.msrb.mxu0 %v4084_v36  ;;  %v4138_v59 = vld [vmem:[#allocation8 + $0x390] sm:$0xff]  ;;  %v4131_v36 = vld [vmem:[#allocation8 + $0x358] sm:$0xff] }
 0x524   :  { %4233 = vmatpush.msrb.mxu3 %v4105_v51  ;;  %4202 = vmatpush.msrb.mxu2 %v4085_v31  ;;  %v3578_v51 = vperm.slane %v6600_v14, 1  ;;  %v4044_v31 = vld [vmem:[#allocation8 + $0xa0] sm:$0xff] }
 0x525   :  { %4188 = vmatpush.msrb.mxu1 %v4124_v28  ;;  %4163 = vmatpush.msrb.mxu0 %v4080_v61 }
 0x526   :  { %4234 = vmatpush.msrb.mxu3 %v4101_v53  ;;  %4203 = vmatpush.msrb.mxu2 %v4081_v7  ;;  %v4126_v53 = vld [vmem:[#allocation8 + $0x330] sm:$0xff]  ;;  %v4127_v7 = vld [vmem:[#allocation8 + $0x338] sm:$0xff] }
 0x527   :  { %4189 = vmatpush.msrb.mxu1 %v4120_v41  ;;  %4164 = vmatpush.msrb.mxu0 %v4076_v19  ;;  %v4053_v41 = vld [vmem:[#allocation8 + $0xe8] sm:$0xff]  ;;  %v4040_v19 = vld [vmem:[#allocation8 + $0x80] sm:$0xff] }
 0x528   :  { %4235 = vmatpush.msrb.mxu3 %v4097_v60  ;;  %4204 = vmatpush.msrb.mxu2 %v4077_v23  ;;  %v3579_v60 = vperm.slane %v6600_v14, 2  ;;  %v4041_v23 = vld [vmem:[#allocation8 + $0x88] sm:$0xff] }
 0x529   :  { %4190 = vmatpush.msrb.mxu1 %v4116_v30  ;;  %4165 = vmatpush.msrb.mxu0 %v4072_v55  ;;  %v4123_v55 = vld [vmem:[#allocation8 + $0x318] sm:$0xff] }
 0x52a   :  { %4236 = vmatpush.msrb.mxu3 %v4093_v13  ;;  %4205 = vmatpush.msrb.mxu2 %v4073_v10 }
 0x52b   :  { %4191 = vmatpush.msrb.mxu1 %v4112_v18  ;;  %4166 = vmatpush.msrb.mxu0 %v4068_v29  ;;  %v228_v29 = vadd.f32 %v5870_v0, %v5895_v15  ;;  %v4028_v0 = vld [vmem:[#allocation8 + $0x20] sm:$0xff] }
 0x52c   :  { %4237 = vmatpush.msrb.mxu3 %v4089_v16  ;;  %4206 = vmatpush.msrb.mxu2 %v4069_v22  ;;  %v4037_v16 = vld [vmem:[#allocation8 + $0x68] sm:$0xff] }
 0x52d   :  { %4192 = vmatpush.msrb.mxu1 %v4108_v5  ;;  %4167 = vmatpush.msrb.mxu0 %v4064_v4  ;;  %v4049_v5 = vld [vmem:[#allocation8 + $0xc8] sm:$0xff] }
 0x52e   :  { %4302 = vmatpush.msra.mxu3 %v4151_v44  ;;  %4207 = vmatpush.msrb.mxu2 %v4065_v24  ;;  %v4119_v44 = vld [vmem:[#allocation8 + $0x2f8] sm:$0xff] }
 0x52f   :  { %4193 = vmatpush.msrb.mxu1 %v4104_v58  ;;  %4168 = vmatpush.msrb.mxu0 %v4060_v12  ;;  %v4114_v12 = vld [vmem:[#allocation8 + $0x2d0] sm:$0xff] }
 0x530   :  { %4303 = vmatpush.msra.mxu3 %v4147_v43  ;;  %4208 = vmatpush.msrb.mxu2 %v4061_v17  ;;  %v4033_v43 = vld [vmem:[#allocation8 + $0x48] sm:$0xff] }
 0x531   :  { %4194 = vmatpush.msrb.mxu1 %v4100_v56  ;;  %4169 = vmatpush.msrb.mxu0 %v4056_v48  ;;  %v4045_v56 = vld [vmem:[#allocation8 + $0xa8] sm:$0xff] }
 0x532   :  { %4304 = vmatpush.msra.mxu3 %v4143_v21  ;;  %4209 = vmatpush.msrb.mxu2 %v4057_v50  ;;  %v4029_v48 = vld [vmem:[#allocation8 + $0x28] sm:$0xff]  ;;  %v4110_v50 = vld [vmem:[#allocation8 + $0x2b0] sm:$0xff] }
 0x533   :  { %4195 = vmatpush.msrb.mxu1 %v4096_v46  ;;  %4170 = vmatpush.msrb.mxu0 %v4052_v52 }
 0x534   :  { %4305 = vmatpush.msra.mxu3 %v4139_v32  ;;  %4210 = vmatpush.msrb.mxu2 %v4053_v41  ;;  %v4111_v32 = vld [vmem:[#allocation8 + $0x2b8] sm:$0xff]  ;;  %v4024_v41 = vld [vmem:[#allocation8] sm:$0xff] }
 0x535   :  { %4196 = vmatpush.msrb.mxu1 %v4092_v54  ;;  %4171 = vmatpush.msrb.mxu0 %v4048_v8  ;;  %v4122_v54 = vld [vmem:[#allocation8 + $0x310] sm:$0xff] }
 0x536   :  { %4306 = vmatpush.msra.mxu3 %v4135_v38  ;;  %4211 = vmatpush.msrb.mxu2 %v4049_v5  ;;  %v4086_v8 = vld [vmem:[#allocation8 + $0x1f0] sm:$0xff]  ;;  %v4087_v5 = vld [vmem:[#allocation8 + $0x1f8] sm:$0xff] }
 0x537   :  { %4197 = vmatpush.msrb.mxu1 %v4088_v62  ;;  %4172 = vmatpush.msrb.mxu0 %v4044_v31  ;;  %v4036_v62 = vld [vmem:[#allocation8 + $0x60] sm:$0xff]  ;;  %v4098_v31 = vld [vmem:[#allocation8 + $0x250] sm:$0xff] }
 0x538   :  { %4307 = vmatpush.msra.mxu3 %v4131_v36  ;;  %4212 = vmatpush.msrb.mxu2 %v4045_v56  ;;  %v4083_v36 = vld [vmem:[#allocation8 + $0x1d8] sm:$0xff] }
 0x539   :  { %4262 = vmatpush.msra.mxu1 %v4150_v37  ;;  %4173 = vmatpush.msrb.mxu0 %v4040_v19  ;;  %v4099_v56 = vld [vmem:[#allocation8 + $0x258] sm:$0xff] }
 0x53a   :  { %4308 = vmatpush.msra.mxu3 %v4127_v7  ;;  %4213 = vmatpush.msrb.mxu2 %v4041_v23  ;;  %v4078_v7 = vld [vmem:[#allocation8 + $0x1b0] sm:$0xff] }
 0x53b   :  { %4263 = vmatpush.msra.mxu1 %v4146_v2  ;;  %4174 = vmatpush.msrb.mxu0 %v4036_v62  ;;  %v4032_v2 = vld [vmem:[#allocation8 + $0x40] sm:$0xff]  ;;  %v4094_v23 = vld [vmem:[#allocation8 + $0x230] sm:$0xff]  ;;  %v4091_v62 = vld [vmem:[#allocation8 + $0x218] sm:$0xff] }
 0x53c   :  { %4309 = vmatpush.msra.mxu3 %v4123_v55  ;;  %4214 = vmatpush.msrb.mxu2 %v4037_v16  ;;  %v4075_v55 = vld [vmem:[#allocation8 + $0x198] sm:$0xff] }
 0x53d   :  { %4264 = vmatpush.msra.mxu1 %v4142_v34  ;;  %4175 = vmatpush.msrb.mxu0 %v4032_v2  ;;  %v4066_v2 = vld [vmem:[#allocation8 + $0x150] sm:$0xff] }
 0x53e   :  { %4310 = vmatpush.msra.mxu3 %v4119_v44  ;;  %4215 = vmatpush.msrb.mxu2 %v4033_v43 }
 0x53f   :  { %4265 = vmatpush.msra.mxu1 %v4138_v59  ;;  %4176 = vmatpush.msrb.mxu0 %v4028_v0 }
 0x540   :  { %4216 = vmatpush.msrb.mxu2 %v4029_v48 }
 0x541   :  { %4266 = vmatpush.msra.mxu1 %v4134_v6  ;;  %v4025_v6 = vld [vmem:[#allocation8 + $0x8] sm:$0xff]  ;;  %4177 = vmatpush.msrb.mxu0 %v4024_v41 }
 0x542   :  { %4217 = vmatpush.msrb.mxu2 %v4025_v6 }
 0x543   :  { %4267 = vmatpush.msra.mxu1 %v4130_v47  ;;  %v4102_v47 = vld [vmem:[#allocation8 + $0x270] sm:$0xff]  ;;  %4242 = vmatpush.msra.mxu0 %v4086_v8 }
 0x544   :  { %4282 = vmatpush.msra.mxu2 %v4087_v5  ;;  %v6938_v5 = vld [vmem:[#allocation16_spill] sm:$0xff] }
 0x545   :  { %4268 = vmatpush.msra.mxu1 %v4126_v53 }
 0x546   :  { %4283 = vmatpush.msra.mxu2 %v4083_v36 }
 0x547   :  { %4269 = vmatpush.msra.mxu1 %v4122_v54  ;;  %v4095_v54 = vld [vmem:[#allocation8 + $0x238] sm:$0xff] }
 0x564   :  { %v3622_v1 = vpop.f32.mrf.mxu1 }
 0x56a   :  { %v3662_v10 = vpop.f32.mrf.mxu3 }
 0x56c   :  { %v3702_v18 = vpop.f32.mrf.mxu1 }
 0x572   :  { %v3742_v43 = vpop.f32.mrf.mxu3 }
 0x57d   :  { %v3602_v28 = vpop.f32.mrf.mxu0 }
 0x57e   :  { %v3603_v30 = vadd.f32 %v3602_v28, %v3577_v20  ;;  %v4115_v20 = vld [vmem:[#allocation8 + $0x2d8] sm:$0xff] }
 0x57f   :  { %4311 = vmatpush.msra.mxu3 %v4115_v20  ;;  %v4062_v20 = vld [vmem:[#allocation8 + $0x130] sm:$0xff] }
 0x580   :  { %v3623_v58 = vadd.f32 %v3622_v1, %v3603_v30  ;;  %v4118_v1 = vld [vmem:[#allocation8 + $0x2f0] sm:$0xff] }
 0x581   :  { %4270 = vmatpush.msra.mxu1 %v4118_v1  ;;  %4312 = vmatpush.msra.mxu3 %v4111_v32  ;;  %v4106_v30 = vld [vmem:[#allocation8 + $0x290] sm:$0xff] }
 0x582   :  { %v5112_v61 = vmul.f32 -1.442695, %v3623_v58  ;;  %v4103_v58 = vld [vmem:[#allocation8 + $0x278] sm:$0xff]  ;;  %v4058_v32 = vld [vmem:[#allocation8 + $0x110] sm:$0xff] }
 0x583   :  { %v3642_v46 = vpop.f32.mrf.mxu2  ;;  %4271 = vmatpush.msra.mxu1 %v4114_v12  ;;  %v4067_v12 = vld [vmem:[#allocation8 + $0x158] sm:$0xff] }
 0x584   :  { %5321 = vpow2.f32 %v5112_v61  ;;  %v3643_v13 = vadd.f32 %v3642_v46, %v3578_v51  ;;  %v4082_v51 = vld [vmem:[#allocation8 + $0x1d0] sm:$0xff]  ;;  %v3580_v61 = vperm.slane %v6600_v14, 3  ;;  %v4079_v46 = vld [vmem:[#allocation8 + $0x1b8] sm:$0xff] }
 0x585   :  { %4272 = vmatpush.msra.mxu1 %v4110_v50  ;;  %4243 = vmatpush.msra.mxu0 %v4082_v51  ;;  %v4090_v14 = vld [vmem:[#allocation8 + $0x210] sm:$0xff] }
 0x586   :  { %v3663_v22 = vadd.f32 %v3662_v10, %v3643_v13  ;;  %v3682_v37 = vpop.f32.mrf.mxu0  ;;  %4284 = vmatpush.msra.mxu2 %v4079_v46  ;;  %v4074_v13 = vld [vmem:[#allocation8 + $0x190] sm:$0xff] }
 0x587   :  { %v3683_v4 = vadd.f32 %v3682_v37, %v3579_v60  ;;  %v3914_v24 = vpop.f32.mrf.mxu1  ;;  %4273 = vmatpush.msra.mxu1 %v4106_v30  ;;  %4244 = vmatpush.msra.mxu0 %v4078_v7  ;;  %v4071_v37 = vld [vmem:[#allocation8 + $0x178] sm:$0xff] }
 0x588   :  { %v5113_v17 = vmul.f32 -1.442695, %v3663_v22  ;;  %v3958_v34 = vadd.f32 %v3914_v24, %v228_v29  ;;  %4285 = vmatpush.msra.mxu2 %v4075_v55  ;;  %v4070_v22 = vld [vmem:[#allocation8 + $0x170] sm:$0xff]  ;;  %v4051_v7 = vld [vmem:[#allocation8 + $0xd8] sm:$0xff] }
 0x589   :  { %v3703_v21 = vadd.f32 %v3702_v18, %v3683_v4  ;;  %v4107_v18 = vld [vmem:[#allocation8 + $0x298] sm:$0xff]  ;;  %4274 = vmatpush.msra.mxu1 %v4102_v47  ;;  %4245 = vmatpush.msra.mxu0 %v4074_v13  ;;  %v187_v47 = vadd.f32 %v6938_v5, %v5892_v11  ;;  %v4046_v13 = vld [vmem:[#allocation8 + $0xb0] sm:$0xff] }
 0x58a   :  { %v5322_v59 = vpop.eup %5321  ;;  %5323 = vpow2.f32 %v5113_v17  ;;  %v5116_v38 = vmul.f32 -1.442695, %v3958_v34  ;;  %4313 = vmatpush.msra.mxu3 %v4107_v18  ;;  %4286 = vmatpush.msra.mxu2 %v4071_v37  ;;  %v4055_v18 = vld [vmem:[#allocation8 + $0xf8] sm:$0xff] }
 0x58b   :  { %v6607_v28 = vadd.f32 1.0, %v5322_v59  ;;  %v5114_v52 = vmul.f32 -1.442695, %v3703_v21  ;;  %4275 = vmatpush.msra.mxu1 %v4098_v31  ;;  %4246 = vmatpush.msra.mxu0 %v4070_v22  ;;  %v4063_v21 = vld [vmem:[#allocation8 + $0x138] sm:$0xff] }
 0x58c   :  { %4314 = vmatpush.msra.mxu3 %v4103_v58  ;;  %v3722_v19 = vpop.f32.mrf.mxu2  ;;  %4287 = vmatpush.msra.mxu2 %v4067_v12  ;;  %v4047_v55 = vld [vmem:[#allocation8 + $0xb8] sm:$0xff]  ;;  %v4038_v12 = vld [vmem:[#allocation8 + $0x70] sm:$0xff] }
 0x58d   :  { %5325 = vrcp.f32 %v6607_v28  ;;  %4276 = vmatpush.msra.mxu1 %v4094_v23  ;;  %v3723_v29 = vadd.f32 %v3722_v19, %v3580_v61  ;;  %4247 = vmatpush.msra.mxu0 %v4066_v2  ;;  %v3768_v41 = vand.u32 2147483648, %v6607_v28  ;;  %vm3762_vm6 = vweird.f32 %v6607_v28  ;;  %v4050_v61 = vld [vmem:[#allocation8 + $0xd0] sm:$0xff]  ;;  %v4043_v22 = vld [vmem:[#allocation8 + $0x98] sm:$0xff] }
 0x58e   :  { %5327 = vpow2.f32 %v5114_v52  ;;  %4315 = vmatpush.msra.mxu3 %v4099_v56  ;;  %4288 = vmatpush.msra.mxu2 %v4063_v21  ;;  %v4059_v52 = vld [vmem:[#allocation8 + $0x118] sm:$0xff]  ;;  %v3766_v30 = vand.u32 2147483647, %v6607_v28 }
 0x58f   :  { %5329 = vpow2.f32 %v5116_v38  ;;  %4277 = vmatpush.msra.mxu1 %v4090_v14  ;;  %v3743_v17 = vadd.f32 %v3742_v43, %v3723_v29  ;;  %4248 = vmatpush.msra.mxu0 %v4062_v20  ;;  %v4054_v38 = vld [vmem:[#allocation8 + $0xf0] sm:$0xff]  ;;  %v3769_v46 = vor.u32 1.1754944e-38, %v3768_v41  ;;  %v4031_v41 = vld [vmem:[#allocation8 + $0x38] sm:$0xff] }
 0x590   :  { %v5324_v53 = vpop.eup %5323  ;;  %4316 = vmatpush.msra.mxu3 %v4095_v54  ;;  %4289 = vmatpush.msra.mxu2 %v4059_v52  ;;  %vm3767_vm10 = vcmp.eq.f32.partialorder %v3766_v30, 8.507059e+37  ;;  %v4042_v29 = vld [vmem:[#allocation8 + $0x90] sm:$0xff]  ;;  %v4027_v5 = vld [vmem:[#allocation8 + $0x18] sm:$0xff] }
 0x591   :  { %v6611_v60 = vadd.f32 1.0, %v5324_v53  ;;  %4249 = vmatpush.msra.mxu0 %v4058_v32  ;;  %v4030_v52 = vld [vmem:[#allocation8 + $0x30] sm:$0xff] }
 0x592   :  { %4317 = vmatpush.msra.mxu3 %v4091_v62  ;;  %4290 = vmatpush.msra.mxu2 %v4055_v18 }
 0x593   :  { %v6613_v10 = vpop.eup %5325  ;;  %5331 = vrcp.f32 %v6611_v60  ;;  %v3783_v58 = vand.u32 2147483648, %v6611_v60  ;;  %4250 = vmatpush.msra.mxu0 %v4054_v38  ;;  %vm3777_vm9 = vweird.f32 %v6611_v60  ;;  %v4026_v38 = vld [vmem:[#allocation8 + $0x10] sm:$0xff] }
 0x594   :  { %v5328_v16 = vpop.eup %5327  ;;  %v3758_v1 = vmul.f32 %v6613_v10, %v6607_v28  ;;  %vm3763_vm5 = vweird.f32 %v6613_v10  ;;  %v3781_v28 = vand.u32 2147483647, %v6611_v60  ;;  %4291 = vmatpush.msra.mxu2 %v4051_v7 }
 0x595   :  { %v6618_v44 = vadd.f32 1.0, %v5328_v16  ;;  %v5330_v4 = vpop.eup %5329  ;;  %vm6638_vm7 = vmor %vm3762_vm6, %vm3763_vm5  ;;  %4251 = vmatpush.msra.mxu0 %v4050_v61  ;;  %v3784_v14 = vor.u32 1.1754944e-38, %v3783_v58  ;;  %v4453_v61 = vld [vmem:[#allocation6 + $0x1f8] sm:$0xff] }
 0x596   :  { %v3759_v24 = vsub.f32 1.0, %v3758_v1  ;;  %v6622_v48 = vadd.f32 1.0, %v5330_v4  ;;  %vm3782_vm12 = vcmp.eq.f32.partialorder %v3781_v28, 8.507059e+37  ;;  %4292 = vmatpush.msra.mxu2 %v4047_v55 }
 0x597   :  { %5333 = vrcp.f32 %v6618_v44  ;;  %4252 = vmatpush.msra.mxu0 %v4046_v13  ;;  %vm3792_vm14 = vweird.f32 %v6618_v44  ;;  %v3796_v30 = vand.u32 2147483647, %v6618_v44 }
 0x598   :  { %v3760_v34 = vmul.f32 %v6613_v10, %v3759_v24  ;;  %5335 = vtanh.f32 %v3743_v17  ;;  %v269_v24 = vadd.f32 %v5868_v3, %v5911_v42  ;;  %4293 = vmatpush.msra.mxu2 %v4043_v22  ;;  %v4039_v17 = vld [vmem:[#allocation8 + $0x78] sm:$0xff]  ;;  %v3798_v3 = vand.u32 2147483648, %v6618_v44 }
 0x599   :  { %v5332_v0 = vpop.eup %5331  ;;  %5337 = vrcp.f32 %v6622_v48  ;;  %4253 = vmatpush.msra.mxu0 %v4042_v29  ;;  %vm3797_vm0 = vcmp.eq.f32.partialorder %v3796_v30, 8.507059e+37  ;;  %vm3993_vm2 = vweird.f32 %v6622_v48  ;;  %v4439_v29 = vld [vmem:[#allocation6 + $0x188] sm:$0xff]  ;;  %v4441_v22 = vld [vmem:[#allocation6 + $0x198] sm:$0xff] }
 0x59a   :  { %v3773_v50 = vmul.f32 %v5332_v0, %v6611_v60  ;;  %v3761_v59 = vadd.f32 %v6613_v10, %v3760_v34  ;;  %vm3778_vm8 = vweird.f32 %v5332_v0  ;;  %4294 = vmatpush.msra.mxu2 %v4039_v17  ;;  %v3799_v51 = vor.u32 1.1754944e-38, %v3798_v3 }
 0x59b   :  { %vm3779_vm11 = vmor %vm3777_vm9, %vm3778_vm8  ;;  %4254 = vmatpush.msra.mxu0 %v4038_v12  ;;  %v4437_v12 = vld [vmem:[#allocation6 + $0x178] sm:$0xff] }
 0x59c   :  { %v3774_v6 = vsub.f32 1.0, %v3773_v50  ;;  %v3765_v56 = vsel %vm6638_vm7, %v6613_v10, %v3761_v59  ;;  %v4035_v50 = vld [vmem:[#allocation8 + $0x58] sm:$0xff] }
 0x59d   :  { %v6630_v8 = vpop.eup %5333  ;;  %v3770_v10 = vsel %vm3767_vm10, %v3769_v46, %v3765_v56  ;;  %4295 = vmatpush.msra.mxu2 %v4035_v50 }
 0x59e   :  { %v3775_v36 = vmul.f32 %v5332_v0, %v3774_v6  ;;  %v3788_v31 = vmul.f32 %v6630_v8, %v6618_v44  ;;  %v3894_v53 = vpop.f32.mrf.mxu0  ;;  %v5336_v16 = vpop.eup %5335  ;;  %vm3793_vm13 = vweird.f32 %v6630_v8 }
 0x59f   :  { %v3957_v19 = vadd.f32 %v3894_v53, %v187_v47  ;;  %v6650_v60 = vpop.eup %5337  ;;  %v3804_v43 = vmul.f32 %v5336_v16, %v3770_v10  ;;  %vm3794_vm15 = vmor %vm3792_vm14, %vm3793_vm13  ;;  %4296 = vmatpush.msra.mxu2 %v4031_v41  ;;  %v4451_v53 = vld [vmem:[#allocation6 + $0x1e8] sm:$0xff]  ;;  %v4445_v10 = vld [vmem:[#allocation6 + $0x1b8] sm:$0xff]  ;;  %v3997_v16 = vand.u32 2147483647, %v6622_v48 }
 0x5a0   :  { %v3789_v23 = vsub.f32 1.0, %v3788_v31  ;;  %v3776_v54 = vadd.f32 %v5332_v0, %v3775_v36  ;;  %v3989_v59 = vmul.f32 %v6650_v60, %v6622_v48  ;;  %v3954_v31 = vpop.f32.mrf.mxu3  ;;  %vm3994_vm1 = vweird.f32 %v6650_v60 }
 0x5a1   :  { %v5115_v62 = vmul.f32 -1.442695, %v3957_v19  ;;  %4297 = vmatpush.msra.mxu2 %v4027_v5  ;;  %v4447_v19 = vld [vmem:[#allocation6 + $0x1c8] sm:$0xff]  ;;  %vm6688_vm3 = vmor %vm3993_vm2, %vm3994_vm1  ;;  %vm3998_vm5 = vcmp.eq.f32.partialorder %v3997_v16, 8.507059e+37  ;;  %v4405_v16 = vld [vmem:[#allocation6 + $0x78] sm:$0xff] }
 0x5a2   :  { %v3780_v1 = vsel %vm3779_vm11, %v5332_v0, %v3776_v54  ;;  %v3790_v37 = vmul.f32 %v6630_v8, %v3789_v23  ;;  %v4034_v0 = vld [vmem:[#allocation8 + $0x50] sm:$0xff]  ;;  %v3990_v47 = vsub.f32 1.0, %v3989_v59  ;;  %v4449_v23 = vld [vmem:[#allocation6 + $0x1d8] sm:$0xff]  ;;  %v4423_v5 = vld [vmem:[#allocation6 + $0x108] sm:$0xff] }
 0x5a3   :  { %v3785_v4 = vsel %vm3782_vm12, %v3784_v14, %v3780_v1  ;;  %5339 = vpow2.f32 %v5115_v62  ;;  %4255 = vmatpush.msra.mxu0 %v4034_v0  ;;  %v3999_v62 = vand.u32 2147483648, %v6622_v48  ;;  %v4431_v0 = vld [vmem:[#allocation6 + $0x148] sm:$0xff] }
 0x5a4   :  { %v3803_v2 = vmul.f32 %v3785_v4, %v6534_v33  ;;  %v3791_v32 = vadd.f32 %v6630_v8, %v3790_v37  ;;  %v3991_v36 = vmul.f32 %v6650_v60, %v3990_v47  ;;  %v4425_v47 = vld [vmem:[#allocation6 + $0x118] sm:$0xff] }
 0x5a5   :  { %v3934_v34 = vpop.f32.mrf.mxu2  ;;  %4256 = vmatpush.msra.mxu0 %v4030_v52  ;;  %v4000_v17 = vor.u32 1.1754944e-38, %v3999_v62  ;;  %v4429_v52 = vld [vmem:[#allocation6 + $0x138] sm:$0xff]  ;;  %v4403_v62 = vld [vmem:[#allocation6 + $0x68] sm:$0xff] }
 0x5a6   :  { %v6656_v20 = vadd.f32 %v3804_v43, %v3803_v2  ;;  %v3959_v21 = vadd.f32 %v3934_v34, %v269_v24  ;;  %v3795_v58 = vsel %vm3794_vm15, %v6630_v8, %v3791_v32  ;;  %v310_v8 = vadd.f32 %v5917_v45, %v5942_v57  ;;  %v4443_v45 = vld [vmem:[#allocation6 + $0x1a8] sm:$0xff]  ;;  %v4401_v37 = vld [vmem:[#allocation6 + $0x58] sm:$0xff] }
 0x5a7   :  { %4257 = vmatpush.msra.mxu0 %v4026_v38  ;;  %v3800_v28 = vsel %vm3797_vm0, %v3799_v51, %v3795_v58  ;;  %v3992_v55 = vadd.f32 %v6650_v60, %v3991_v36  ;;  %v4435_v43 = vld [vmem:[#allocation6 + $0x168] sm:$0xff] }
 0x5a8   :  { %5341 = vtanh.f32 %v6656_v20  ;;  %v5117_v33 = vmul.f32 -1.442695, %v3959_v21  ;;  %v3960_v13 = vadd.f32 %v3954_v31, %v310_v8  ;;  %v4413_v8 = vld [vmem:[#allocation6 + $0xb8] sm:$0xff] }
 0x5a9   :  { %v5340_v6 = vpop.eup %5339  ;;  %v3996_v24 = vsel %vm6688_vm3, %v6650_v60, %v3992_v55  ;;  %v4433_v60 = vld [vmem:[#allocation6 + $0x158] sm:$0xff] }
 0x5aa   :  { %v6666_v18 = vadd.f32 1.0, %v5340_v6  ;;  %5343 = vpow2.f32 %v5117_v33  ;;  %v4001_v50 = vsel %vm3998_vm5, %v4000_v17, %v3996_v24  ;;  %v4427_v33 = vld [vmem:[#allocation6 + $0x128] sm:$0xff]  ;;  %v4444_v24 = vld [vmem:[#allocation6 + $0x1b0] sm:$0xff] }
 0x5ab   :  { %v4019_v38 = vmul.f32 %v4001_v50, %v6581_v9  ;;  %v4417_v9 = vld [vmem:[#allocation6 + $0xd8] sm:$0xff]  ;;  %v4391_v17 = vld [vmem:[#allocation6 + $0x8] sm:$0xff]  ;;  %v4432_v50 = vld [vmem:[#allocation6 + $0x150] sm:$0xff] }
 0x5ac   :  { %5345 = vrcp.f32 %v6666_v18  ;;  %v3984_v4 = vand.u32 2147483648, %v6666_v18  ;;  %v3982_v48 = vand.u32 2147483647, %v6666_v18  ;;  %vm3978_vm6 = vweird.f32 %v6666_v18 }
 0x5ae   :  { %v5342_v44 = vpop.eup %5341  ;;  %v3985_v59 = vor.u32 1.1754944e-38, %v3984_v4  ;;  %vm3983_vm8 = vcmp.eq.f32.partialorder %v3982_v48, 8.507059e+37  ;;  %v4442_v4 = vld [vmem:[#allocation6 + $0x1a0] sm:$0xff]  ;;  %v4397_v48 = vld [vmem:[#allocation6 + $0x38] sm:$0xff] }
 0x5af   :  { %v6673_v56 = vmul.f32 %v5342_v44, %v3800_v28  ;;  %v4419_v44 = vld [vmem:[#allocation6 + $0xe8] sm:$0xff]  ;;  %v4421_v28 = vld [vmem:[#allocation6 + $0xf8] sm:$0xff] }
 0x5b0   :  { %v5344_v7 = vpop.eup %5343 }
 0x5b1   :  { %v6677_v46 = vadd.f32 1.0, %v5344_v7  ;;  %4198 = vmatmul.f32.vlgmr.msrb.gmra.mxu1 %v6673_v56  ;;  %4238 = vmatmul.f32.vlgmr.msrb.gmra.mxu3 %v6673_v56  ;;  %v4411_v7 = vld [vmem:[#allocation6 + $0xa8] sm:$0xff] }
 0x5b2   :  { %v5346_v54 = vpop.eup %5345  ;;  %4474 = vmatpush.msrb.mxu1 %v4451_v53  ;;  %4514 = vmatpush.msrb.mxu3 %v4453_v61  ;;  %v4415_v53 = vld [vmem:[#allocation6 + $0xc8] sm:$0xff] }
 0x5b3   :  { %v3974_v14 = vmul.f32 %v5346_v54, %v6666_v18  ;;  %5347 = vrcp.f32 %v6677_v46  ;;  %vm3979_vm4 = vweird.f32 %v5346_v54  ;;  %v4014_v31 = vand.u32 2147483648, %v6677_v46 }
 0x5b4   :  { %4475 = vmatpush.msrb.mxu1 %v4447_v19  ;;  %4515 = vmatpush.msrb.mxu3 %v4449_v23  ;;  %5349 = vtanh.f32 %v3960_v13  ;;  %vm3980_vm7 = vmor %vm3978_vm6, %vm3979_vm4  ;;  %vm4008_vm10 = vweird.f32 %v6677_v46  ;;  %v4012_v61 = vand.u32 2147483647, %v6677_v46  ;;  %v4409_v13 = vld [vmem:[#allocation6 + $0x98] sm:$0xff] }
 0x5b5   :  { %v3975_v1 = vsub.f32 1.0, %v3974_v14  ;;  %v4015_v23 = vor.u32 1.1754944e-38, %v4014_v31  ;;  %v4394_v31 = vld [vmem:[#allocation6 + $0x20] sm:$0xff] }
 0x5b6   :  { %4476 = vmatpush.msrb.mxu1 %v4443_v45  ;;  %4516 = vmatpush.msrb.mxu3 %v4445_v10  ;;  %vm4013_vm12 = vcmp.eq.f32.partialorder %v4012_v61, 8.507059e+37  ;;  %v4452_v10 = vld [vmem:[#allocation6 + $0x1f0] sm:$0xff] }
 0x5b7   :  { %v3976_v2 = vmul.f32 %v5346_v54, %v3975_v1  ;;  %v4446_v1 = vld [vmem:[#allocation6 + $0x1c0] sm:$0xff]  ;;  %v4392_v61 = vld [vmem:[#allocation6 + $0x10] sm:$0xff] }
 0x5b8   :  { %4477 = vmatpush.msrb.mxu1 %v4439_v29  ;;  %4517 = vmatpush.msrb.mxu3 %v4441_v22  ;;  %v4448_v29 = vld [vmem:[#allocation6 + $0x1d0] sm:$0xff]  ;;  %v4399_v22 = vld [vmem:[#allocation6 + $0x48] sm:$0xff] }
 0x5b9   :  { %v5348_v34 = vpop.eup %5347  ;;  %v3977_v21 = vadd.f32 %v5346_v54, %v3976_v2  ;;  %4278 = vmatmul.f32.vlgmr.msra.gmra.mxu1 %v6673_v56  ;;  %4318 = vmatmul.f32.vlgmr.msra.gmra.mxu3 %v6673_v56  ;;  %v4395_v2 = vld [vmem:[#allocation6 + $0x28] sm:$0xff] }
 0x5ba   :  { %v4004_v32 = vmul.f32 %v5348_v34, %v6677_v46  ;;  %4478 = vmatpush.msrb.mxu1 %v4435_v43  ;;  %4518 = vmatpush.msrb.mxu3 %v4437_v12  ;;  %v5350_v41 = vpop.eup %5349  ;;  %vm4009_vm9 = vweird.f32 %v5348_v34  ;;  %v4450_v46 = vld [vmem:[#allocation6 + $0x1e0] sm:$0xff]  ;;  %v4440_v12 = vld [vmem:[#allocation6 + $0x190] sm:$0xff] }
 0x5bb   :  { %v3981_v3 = vsel %vm3980_vm7, %v5346_v54, %v3977_v21  ;;  %vm4010_vm11 = vmor %vm4008_vm10, %vm4009_vm9  ;;  %v4407_v54 = vld [vmem:[#allocation6 + $0x88] sm:$0xff]  ;;  %v4438_v43 = vld [vmem:[#allocation6 + $0x180] sm:$0xff] }
 0x5bc   :  { %v3986_v6 = vsel %vm3983_vm8, %v3985_v59, %v3981_v3  ;;  %v4005_v30 = vsub.f32 1.0, %v4004_v32  ;;  %4479 = vmatpush.msrb.mxu1 %v4431_v0  ;;  %4519 = vmatpush.msrb.mxu3 %v4433_v60  ;;  %v4434_v21 = vld [vmem:[#allocation6 + $0x160] sm:$0xff]  ;;  %v4436_v0 = vld [vmem:[#allocation6 + $0x170] sm:$0xff] }
 0x5bd   :  { %v4020_v18 = vmul.f32 %v5350_v41, %v3986_v6  ;;  %v4430_v60 = vld [vmem:[#allocation6 + $0x140] sm:$0xff]  ;;  %v4428_v32 = vld [vmem:[#allocation6 + $0x130] sm:$0xff] }
 0x5be   :  { %v4006_v58 = vmul.f32 %v5348_v34, %v4005_v30  ;;  %4480 = vmatpush.msrb.mxu1 %v4427_v33  ;;  %4520 = vmatpush.msrb.mxu3 %v4429_v52  ;;  %v4426_v59 = vld [vmem:[#allocation6 + $0x120] sm:$0xff]  ;;  %v4424_v33 = vld [vmem:[#allocation6 + $0x110] sm:$0xff] }
 0x5bf   :  { %v6703_v51 = vadd.f32 %v4020_v18, %v4019_v38  ;;  %v4422_v3 = vld [vmem:[#allocation6 + $0x100] sm:$0xff]  ;;  %v4420_v41 = vld [vmem:[#allocation6 + $0xf0] sm:$0xff] }
 0x5c0   :  { %v4007_v36 = vadd.f32 %v5348_v34, %v4006_v58  ;;  %4481 = vmatpush.msrb.mxu1 %v4423_v5  ;;  %4521 = vmatpush.msrb.mxu3 %v4425_v47  ;;  %v4418_v52 = vld [vmem:[#allocation6 + $0xe0] sm:$0xff]  ;;  %v4416_v30 = vld [vmem:[#allocation6 + $0xd0] sm:$0xff] }
 0x5c1   :  { %5351 = vtanh.f32 %v6703_v51  ;;  %v4414_v6 = vld [vmem:[#allocation6 + $0xc0] sm:$0xff]  ;;  %v4412_v18 = vld [vmem:[#allocation6 + $0xb0] sm:$0xff] }
 0x5c2   :  { %4482 = vmatpush.msrb.mxu1 %v4419_v44  ;;  %4522 = vmatpush.msrb.mxu3 %v4421_v28  ;;  %v4011_v19 = vsel %vm4010_vm11, %v5348_v34, %v4007_v36  ;;  %v4393_v34 = vld [vmem:[#allocation6 + $0x18] sm:$0xff]  ;;  %v4410_v38 = vld [vmem:[#allocation6 + $0xa0] sm:$0xff]  ;;  %v4408_v47 = vld [vmem:[#allocation6 + $0x90] sm:$0xff] }
 0x5c3   :  { %v4016_v14 = vsel %vm4013_vm12, %v4015_v23, %v4011_v19  ;;  %v4406_v5 = vld [vmem:[#allocation6 + $0x80] sm:$0xff]  ;;  %v4404_v44 = vld [vmem:[#allocation6 + $0x70] sm:$0xff]  ;;  %v4722_v23 = vld [vmem:[#allocation8 + $0x3c8] sm:$0xff] }
 0x5c4   :  { %4483 = vmatpush.msrb.mxu1 %v4415_v53  ;;  %4523 = vmatpush.msrb.mxu3 %v4417_v9  ;;  %v4402_v58 = vld [vmem:[#allocation6 + $0x60] sm:$0xff]  ;;  %v4400_v36 = vld [vmem:[#allocation6 + $0x50] sm:$0xff] }
 0x5c5   :  { %v4398_v28 = vld [vmem:[#allocation6 + $0x40] sm:$0xff]  ;;  %v4396_v53 = vld [vmem:[#allocation6 + $0x30] sm:$0xff] }
 0x5c6   :  { %4484 = vmatpush.msrb.mxu1 %v4411_v7  ;;  %4524 = vmatpush.msrb.mxu3 %v4413_v8  ;;  %v4390_v9 = vld [vmem:[#allocation6] sm:$0xff]  ;;  %v4726_v8 = vld [vmem:[#allocation8 + $0x3e8] sm:$0xff] }
 0x5c7   :  { %v5352_v55 = vpop.eup %5351  ;;  %v4725_v7 = vld [vmem:[#allocation8 + $0x3e0] sm:$0xff] }
 0x5c8   :  { %v6709_v45 = vmul.f32 %v5352_v55, %v4016_v14  ;;  %4485 = vmatpush.msrb.mxu1 %v4407_v54  ;;  %4525 = vmatpush.msrb.mxu3 %v4409_v13  ;;  %v4721_v19 = vld [vmem:[#allocation8 + $0x3c0] sm:$0xff]  ;;  %v4718_v13 = vld [vmem:[#allocation8 + $0x3a8] sm:$0xff] }
 0x5c9   :  { %v4717_v54 = vld [vmem:[#allocation8 + $0x3a0] sm:$0xff]  ;;  %v4714_v14 = vld [vmem:[#allocation8 + $0x388] sm:$0xff] }
 0x5ca   :  { %4178 = vmatmul.f32.vlgmr.msrb.gmra.mxu0 %v6709_v45  ;;  %4218 = vmatmul.f32.vlgmr.msrb.gmra.mxu2 %v6709_v45  ;;  %v4713_v55 = vld [vmem:[#allocation8 + $0x380] sm:$0xff] }
 0x5cb   :  { %4454 = vmatpush.msrb.mxu0 %v4450_v46  ;;  %4494 = vmatpush.msrb.mxu2 %v4452_v10  ;;  %v4709_v46 = vld [vmem:[#allocation8 + $0x360] sm:$0xff]  ;;  %v4710_v10 = vld [vmem:[#allocation8 + $0x368] sm:$0xff] }
 0x5cc   :  { %4486 = vmatpush.msrb.mxu1 %v4403_v62  ;;  %4526 = vmatpush.msrb.mxu3 %v4405_v16  ;;  %v4706_v62 = vld [vmem:[#allocation8 + $0x348] sm:$0xff]  ;;  %v4701_v16 = vld [vmem:[#allocation8 + $0x320] sm:$0xff] }
 0x5cd   :  { %4455 = vmatpush.msrb.mxu0 %v4446_v1  ;;  %4495 = vmatpush.msrb.mxu2 %v4448_v29  ;;  %v4702_v1 = vld [vmem:[#allocation8 + $0x328] sm:$0xff]  ;;  %v4697_v29 = vld [vmem:[#allocation8 + $0x300] sm:$0xff] }
 0x5ce   :  { %4487 = vmatpush.msrb.mxu1 %v4399_v22  ;;  %4527 = vmatpush.msrb.mxu3 %v4401_v37  ;;  %v4698_v22 = vld [vmem:[#allocation8 + $0x308] sm:$0xff]  ;;  %v4661_v37 = vld [vmem:[#allocation8 + $0x1e0] sm:$0xff] }
 0x5cf   :  { %4456 = vmatpush.msrb.mxu0 %v4442_v4  ;;  %4496 = vmatpush.msrb.mxu2 %v4444_v24  ;;  %v4693_v4 = vld [vmem:[#allocation8 + $0x2e0] sm:$0xff]  ;;  %v4694_v24 = vld [vmem:[#allocation8 + $0x2e8] sm:$0xff] }
 0x5d0   :  { %4488 = vmatpush.msrb.mxu1 %v4395_v2  ;;  %4528 = vmatpush.msrb.mxu3 %v4397_v48  ;;  %v4657_v2 = vld [vmem:[#allocation8 + $0x1c0] sm:$0xff] }
 0x5d1   :  { %4457 = vmatpush.msrb.mxu0 %v4438_v43  ;;  %4497 = vmatpush.msrb.mxu2 %v4440_v12  ;;  %v4689_v48 = vld [vmem:[#allocation8 + $0x2c0] sm:$0xff]  ;;  %v4690_v43 = vld [vmem:[#allocation8 + $0x2c8] sm:$0xff] }
 0x5d2   :  { %4489 = vmatpush.msrb.mxu1 %v4391_v17  ;;  %4529 = vmatpush.msrb.mxu3 %v4393_v34  ;;  %v4653_v12 = vld [vmem:[#allocation8 + $0x1a0] sm:$0xff]  ;;  %v4686_v34 = vld [vmem:[#allocation8 + $0x2a8] sm:$0xff] }
 0x5d3   :  { %4258 = vmatmul.f32.vlgmr.msra.gmra.mxu0 %v6709_v45  ;;  %4298 = vmatmul.f32.vlgmr.msra.gmra.mxu2 %v6709_v45  ;;  %v4685_v17 = vld [vmem:[#allocation8 + $0x2a0] sm:$0xff] }
 0x5d4   :  { %4458 = vmatpush.msrb.mxu0 %v4434_v21  ;;  %4490 = vmatmul.f32.vlgmr.msrb.gmra.mxu1 %v6709_v45  ;;  %v4649_v21 = vld [vmem:[#allocation8 + $0x180] sm:$0xff] }
 0x5d5   :  { %4498 = vmatpush.msrb.mxu2 %v4436_v0  ;;  %4530 = vmatmul.f32.vlgmr.msrb.gmra.mxu3 %v6709_v45  ;;  %v4681_v0 = vld [vmem:[#allocation8 + $0x280] sm:$0xff] }
 0x5d6   :  { %4459 = vmatpush.msrb.mxu0 %v4430_v60  ;;  %4759 = vmatpush.msra.mxu1 %v4725_v7  ;;  %v4682_v60 = vld [vmem:[#allocation8 + $0x288] sm:$0xff] }
 0x5d7   :  { %4499 = vmatpush.msrb.mxu2 %v4432_v50  ;;  %4799 = vmatpush.msra.mxu3 %v4726_v8  ;;  %v4646_v7 = vld [vmem:[#allocation8 + $0x168] sm:$0xff]  ;;  %v4727_v8 = vld [vmem:[#allocation8 + $0x3f0] sm:$0xff] }
 0x5d8   :  { %4460 = vmatpush.msrb.mxu0 %v4426_v59  ;;  %4760 = vmatpush.msra.mxu1 %v4721_v19  ;;  %v4645_v59 = vld [vmem:[#allocation8 + $0x160] sm:$0xff] }
 0x5d9   :  { %4500 = vmatpush.msrb.mxu2 %v4428_v32  ;;  %4800 = vmatpush.msra.mxu3 %v4722_v23  ;;  %v4662_v32 = vld [vmem:[#allocation8 + $0x1e8] sm:$0xff]  ;;  %v4728_v23 = vld [vmem:[#allocation8 + $0x3f8] sm:$0xff] }
 0x5da   :  { %4461 = vmatpush.msrb.mxu0 %v4422_v3  ;;  %4761 = vmatpush.msra.mxu1 %v4717_v54  ;;  %v4677_v3 = vld [vmem:[#allocation8 + $0x260] sm:$0xff] }
 0x5db   :  { %4501 = vmatpush.msrb.mxu2 %v4424_v33  ;;  %4801 = vmatpush.msra.mxu3 %v4718_v13  ;;  %v4678_v33 = vld [vmem:[#allocation8 + $0x268] sm:$0xff]  ;;  %v4625_v13 = vld [vmem:[#allocation8 + $0xc0] sm:$0xff] }
 0x5dc   :  { %4462 = vmatpush.msrb.mxu0 %v4418_v52  ;;  %4762 = vmatpush.msra.mxu1 %v4713_v55  ;;  %v6722_v52 = vld [vmem:[%s6891_s5] sm:$0xf]  ;;  %v4642_v55 = vld [vmem:[#allocation8 + $0x148] sm:$0xff] }
 0x5dd   :  { %4502 = vmatpush.msrb.mxu2 %v4420_v41  ;;  %4802 = vmatpush.msra.mxu3 %v4714_v14  ;;  %v4641_v41 = vld [vmem:[#allocation8 + $0x140] sm:$0xff]  ;;  %v4723_v14 = vld [vmem:[#allocation8 + $0x3d0] sm:$0xff] }
 0x5de   :  { %4463 = vmatpush.msrb.mxu0 %v4414_v6  ;;  %4763 = vmatpush.msra.mxu1 %v4709_v46  ;;  %v4658_v6 = vld [vmem:[#allocation8 + $0x1c8] sm:$0xff] }
 0x5df   :  { %4503 = vmatpush.msrb.mxu2 %v4416_v30  ;;  %4803 = vmatpush.msra.mxu3 %v4710_v10  ;;  %v4673_v30 = vld [vmem:[#allocation8 + $0x240] sm:$0xff]  ;;  %v4155_v10 = vperm.slane %v6722_v52, 1 }
 0x5e0   :  { %4464 = vmatpush.msrb.mxu0 %v4410_v38  ;;  %v4674_v38 = vld [vmem:[#allocation8 + $0x248] sm:$0xff] }
 0x5e1   :  { %4504 = vmatpush.msrb.mxu2 %v4412_v18  ;;  %4804 = vmatpush.msra.mxu3 %v4706_v62  ;;  %v4637_v18 = vld [vmem:[#allocation8 + $0x120] sm:$0xff] }
 0x5e2   :  { %4465 = vmatpush.msrb.mxu0 %v4406_v5  ;;  %v4654_v5 = vld [vmem:[#allocation8 + $0x1a8] sm:$0xff]  ;;  %v4621_v62 = vld [vmem:[#allocation8 + $0xa0] sm:$0xff] }
 0x5e3   :  { %4505 = vmatpush.msrb.mxu2 %v4408_v47  ;;  %4805 = vmatpush.msra.mxu3 %v4702_v1  ;;  %v4154_v47 = vperm.slane %v6722_v52, 0  ;;  %v4719_v1 = vld [vmem:[#allocation8 + $0x3b0] sm:$0xff] }
 0x5e4   :  { %4466 = vmatpush.msrb.mxu0 %v4402_v58  ;;  %v4669_v58 = vld [vmem:[#allocation8 + $0x220] sm:$0xff] }
 0x5e5   :  { %4506 = vmatpush.msrb.mxu2 %v4404_v44  ;;  %4806 = vmatpush.msra.mxu3 %v4698_v22  ;;  %v4670_v44 = vld [vmem:[#allocation8 + $0x228] sm:$0xff]  ;;  %v4720_v22 = vld [vmem:[#allocation8 + $0x3b8] sm:$0xff] }
 0x5e6   :  { %4467 = vmatpush.msrb.mxu0 %v4398_v28  ;;  %v4633_v28 = vld [vmem:[#allocation8 + $0x100] sm:$0xff] }
 0x5e7   :  { %4507 = vmatpush.msrb.mxu2 %v4400_v36  ;;  %4807 = vmatpush.msra.mxu3 %v4694_v24  ;;  %v4650_v36 = vld [vmem:[#allocation8 + $0x188] sm:$0xff]  ;;  %v4617_v24 = vld [vmem:[#allocation8 + $0x80] sm:$0xff] }
 0x5e8   :  { %4468 = vmatpush.msrb.mxu0 %v4394_v31  ;;  %v4665_v31 = vld [vmem:[#allocation8 + $0x200] sm:$0xff] }
 0x5e9   :  { %4508 = vmatpush.msrb.mxu2 %v4396_v53  ;;  %4808 = vmatpush.msra.mxu3 %v4690_v43  ;;  %v4666_v53 = vld [vmem:[#allocation8 + $0x208] sm:$0xff] }
 0x5ea   :  { %4469 = vmatpush.msrb.mxu0 %v4390_v9 }
 0x5eb   :  { %4509 = vmatpush.msrb.mxu2 %v4392_v61  ;;  %4470 = vmatmul.f32.vlgmr.msrb.gmra.mxu0 %v6709_v45  ;;  %v4629_v61 = vld [vmem:[#allocation8 + $0xe0] sm:$0xff] }
 0x5ec   :  { %4510 = vmatmul.f32.vlgmr.msrb.gmra.mxu2 %v6709_v45  ;;  %v4705_v45 = vld [vmem:[#allocation8 + $0x340] sm:$0xff]  ;;  %4739 = vmatpush.msra.mxu0 %v4661_v37 }
 0x5ed   :  { %4764 = vmatpush.msra.mxu1 %v4705_v45  ;;  %4809 = vmatpush.msra.mxu3 %v4686_v34  ;;  %v4724_v45 = vld [vmem:[#allocation8 + $0x3d8] sm:$0xff]  ;;  %v4630_v34 = vld [vmem:[#allocation8 + $0xe8] sm:$0xff] }
 0x5ee   :  { %4740 = vmatpush.msra.mxu0 %v4657_v2  ;;  %4779 = vmatpush.msra.mxu2 %v4662_v32  ;;  %v4634_v2 = vld [vmem:[#allocation8 + $0x108] sm:$0xff]  ;;  %v5401_v32 = vld [vmem:[#allocation8 + $0x60] sm:$0xff] }
 0x5ef   :  { %4765 = vmatpush.msra.mxu1 %v4701_v16  ;;  %4810 = vmatpush.msra.mxu3 %v4682_v60  ;;  %v4638_v16 = vld [vmem:[#allocation8 + $0x128] sm:$0xff]  ;;  %v231_v60 = vadd.f32 %v5887_v27, %v5895_v15  ;;  %v4703_v15 = vld [vmem:[#allocation8 + $0x330] sm:$0xff] }
 0x5f0   :  { %4741 = vmatpush.msra.mxu0 %v4653_v12  ;;  %4780 = vmatpush.msra.mxu2 %v4658_v6  ;;  %v4716_v12 = vld [vmem:[#allocation8 + $0x398] sm:$0xff]  ;;  %v4707_v6 = vld [vmem:[#allocation8 + $0x350] sm:$0xff]  ;;  %v4622_v27 = vld [vmem:[#allocation8 + $0xa8] sm:$0xff] }
 0x5f1   :  { %4766 = vmatpush.msra.mxu1 %v4697_v29  ;;  %4811 = vmatpush.msra.mxu3 %v4678_v33 }
 0x5f2   :  { %4742 = vmatpush.msra.mxu0 %v4649_v21  ;;  %4781 = vmatpush.msra.mxu2 %v4654_v5  ;;  %v4711_v21 = vld [vmem:[#allocation8 + $0x370] sm:$0xff]  ;;  %v5402_v5 = vld [vmem:[#allocation8 + $0x40] sm:$0xff] }
 0x5f3   :  { %4767 = vmatpush.msra.mxu1 %v4693_v4  ;;  %4812 = vmatpush.msra.mxu3 %v4674_v38  ;;  %v4156_v4 = vperm.slane %v6722_v52, 2 }
 0x5f4   :  { %4743 = vmatpush.msra.mxu0 %v4645_v59  ;;  %4782 = vmatpush.msra.mxu2 %v4650_v36 }
 0x5f5   :  { %4768 = vmatpush.msra.mxu1 %v4689_v48  ;;  %4813 = vmatpush.msra.mxu3 %v4670_v44  ;;  %v4715_v48 = vld [vmem:[#allocation8 + $0x390] sm:$0xff] }
 0x5f6   :  { %4744 = vmatpush.msra.mxu0 %v4641_v41  ;;  %4783 = vmatpush.msra.mxu2 %v4646_v7  ;;  %v4626_v41 = vld [vmem:[#allocation8 + $0xc8] sm:$0xff] }
 0x5f7   :  { %4769 = vmatpush.msra.mxu1 %v4685_v17  ;;  %4814 = vmatpush.msra.mxu3 %v4666_v53  ;;  %v4618_v53 = vld [vmem:[#allocation8 + $0x88] sm:$0xff] }
 0x5f8   :  { %4745 = vmatpush.msra.mxu0 %v4637_v18  ;;  %4784 = vmatpush.msra.mxu2 %v4642_v55  ;;  %v4610_v55 = vld [vmem:[#allocation8 + $0x48] sm:$0xff] }
 0x5f9   :  { %4770 = vmatpush.msra.mxu1 %v4681_v0  ;;  %4879 = vmatpush.msrb.mxu3 %v4728_v23  ;;  %v4712_v0 = vld [vmem:[#allocation8 + $0x378] sm:$0xff]  ;;  %v4695_v23 = vld [vmem:[#allocation8 + $0x2f0] sm:$0xff] }
 0x5fa   :  { %4746 = vmatpush.msra.mxu0 %v4633_v28  ;;  %4785 = vmatpush.msra.mxu2 %v4638_v16  ;;  %v5403_v28 = vld [vmem:[#allocation8 + $0x20] sm:$0xff] }
 0x5fb   :  { %4771 = vmatpush.msra.mxu1 %v4677_v3  ;;  %4880 = vmatpush.msrb.mxu3 %v4724_v45  ;;  %v4157_v45 = vperm.slane %v6722_v52, 3  ;;  %v4602_v52 = vld [vmem:[#allocation8 + $0x8] sm:$0xff] }
 0x5fc   :  { %4747 = vmatpush.msra.mxu0 %v4629_v61  ;;  %4786 = vmatpush.msra.mxu2 %v4634_v2  ;;  %v4700_v61 = vld [vmem:[#allocation8 + $0x318] sm:$0xff]  ;;  %v4683_v2 = vld [vmem:[#allocation8 + $0x290] sm:$0xff] }
 0x5fd   :  { %4772 = vmatpush.msra.mxu1 %v4673_v30  ;;  %4881 = vmatpush.msrb.mxu3 %v4720_v22  ;;  %v4708_v30 = vld [vmem:[#allocation8 + $0x358] sm:$0xff]  ;;  %v4687_v22 = vld [vmem:[#allocation8 + $0x2b0] sm:$0xff] }
 0x5fe   :  { %4748 = vmatpush.msra.mxu0 %v4625_v13  ;;  %4787 = vmatpush.msra.mxu2 %v4630_v34  ;;  %v5405_v13 = vld [vmem:[#allocation8 + $0x1f0] sm:$0xff] }
 0x5ff   :  { %4773 = vmatpush.msra.mxu1 %v4669_v58  ;;  %4882 = vmatpush.msrb.mxu3 %v4716_v12  ;;  %v4704_v58 = vld [vmem:[#allocation8 + $0x338] sm:$0xff]  ;;  %v5408_v34 = vld [vmem:[#allocation8 + $0x190] sm:$0xff] }
 0x600   :  { %4749 = vmatpush.msra.mxu0 %v4621_v62  ;;  %4788 = vmatpush.msra.mxu2 %v4626_v41  ;;  %v5406_v62 = vld [vmem:[#allocation8 + $0x1d0] sm:$0xff] }
 0x601   :  { %4774 = vmatpush.msra.mxu1 %v4665_v31  ;;  %4883 = vmatpush.msrb.mxu3 %v4712_v0 }
 0x602   :  { %4750 = vmatpush.msra.mxu0 %v4617_v24  ;;  %4789 = vmatpush.msra.mxu2 %v4622_v27 }
 0x603   :  { %4839 = vmatpush.msrb.mxu1 %v4727_v8  ;;  %4884 = vmatpush.msrb.mxu3 %v4708_v30  ;;  %v5404_v8 = vld [vmem:[#allocation8] sm:$0xff]  ;;  %v4676_v30 = vld [vmem:[#allocation8 + $0x258] sm:$0xff] }
 0x604   :  { %4751 = vmatpush.msra.mxu0 %v5401_v32  ;;  %4790 = vmatpush.msra.mxu2 %v4618_v53  ;;  %v5411_v53 = vld [vmem:[#allocation8 + $0x130] sm:$0xff] }
 0x605   :  { %4840 = vmatpush.msrb.mxu1 %v4723_v14  ;;  %4885 = vmatpush.msrb.mxu3 %v4704_v58  ;;  %v4691_v14 = vld [vmem:[#allocation8 + $0x2d0] sm:$0xff] }
 0x606   :  { %4752 = vmatpush.msra.mxu0 %v5402_v5  ;;  %v5410_v5 = vld [vmem:[#allocation8 + $0x150] sm:$0xff] }
 0x607   :  { %4841 = vmatpush.msrb.mxu1 %v4719_v1  ;;  %4886 = vmatpush.msrb.mxu3 %v4700_v61  ;;  %v4671_v58 = vld [vmem:[#allocation8 + $0x230] sm:$0xff] }
 0x608   :  { %4753 = vmatpush.msra.mxu0 %v5403_v28 }
 0x609   :  { %4842 = vmatpush.msrb.mxu1 %v4715_v48  ;;  %v4684_v48 = vld [vmem:[#allocation8 + $0x298] sm:$0xff] }
 0x60a   :  { %4754 = vmatpush.msra.mxu0 %v5404_v8  ;;  %v4668_v8 = vld [vmem:[#allocation8 + $0x218] sm:$0xff] }
 0x60b   :  { %4843 = vmatpush.msrb.mxu1 %v4711_v21  ;;  %v4664_v21 = vld [vmem:[#allocation8 + $0x1f8] sm:$0xff] }
 0x60c   :  { %4819 = vmatpush.msrb.mxu0 %v5405_v13  ;;  %v4648_v13 = vld [vmem:[#allocation8 + $0x178] sm:$0xff] }
 0x60d   :  { %4844 = vmatpush.msrb.mxu1 %v4707_v6  ;;  %v4675_v6 = vld [vmem:[#allocation8 + $0x250] sm:$0xff] }
 0x60e   :  { %4820 = vmatpush.msrb.mxu0 %v5406_v62 }
 0x60f   :  { %4845 = vmatpush.msrb.mxu1 %v4703_v15 }
 0x62e   :  { %v4199_v50 = vpop.f32.mrf.mxu1 }
 0x634   :  { %v4239_v17 = vpop.f32.mrf.mxu3 }
 0x636   :  { %v4279_v54 = vpop.f32.mrf.mxu1 }
 0x63c   :  { %v4319_v41 = vpop.f32.mrf.mxu3 }
 0x647   :  { %v4179_v9 = vpop.f32.mrf.mxu0 }
 0x648   :  { %v4180_v19 = vadd.f32 %v4179_v9, %v4154_v47  ;;  %v4699_v9 = vld [vmem:[#allocation8 + $0x310] sm:$0xff] }
 0x649   :  { %4846 = vmatpush.msrb.mxu1 %v4699_v9  ;;  %v4652_v9 = vld [vmem:[#allocation8 + $0x198] sm:$0xff] }
 0x64a   :  { %v4200_v46 = vadd.f32 %v4199_v50, %v4180_v19  ;;  %v4614_v19 = vld [vmem:[#allocation8 + $0x68] sm:$0xff] }
 0x64b   :  { %4791 = vmatpush.msra.mxu2 %v4614_v19  ;;  %4847 = vmatpush.msrb.mxu1 %v4695_v23 }
 0x64c   :  { %v5118_v29 = vmul.f32 -1.442695, %v4200_v46  ;;  %v4692_v46 = vld [vmem:[#allocation8 + $0x2d8] sm:$0xff] }
 0x64d   :  { %v4219_v37 = vpop.f32.mrf.mxu2  ;;  %4792 = vmatpush.msra.mxu2 %v4610_v55  ;;  %4848 = vmatpush.msrb.mxu1 %v4691_v14  ;;  %v6943_v14 = vld [vmem:[#allocation17_spill] sm:$0xff] }
 0x64e   :  { %5353 = vpow2.f32 %v5118_v29  ;;  %v4220_v43 = vadd.f32 %v4219_v37, %v4155_v10  ;;  %v4606_v29 = vld [vmem:[#allocation8 + $0x28] sm:$0xff]  ;;  %v4688_v37 = vld [vmem:[#allocation8 + $0x2b8] sm:$0xff] }
 0x64f   :  { %4793 = vmatpush.msra.mxu2 %v4606_v29  ;;  %4849 = vmatpush.msrb.mxu1 %v4687_v22  ;;  %v5413_v22 = vld [vmem:[#allocation8 + $0xf0] sm:$0xff] }
 0x650   :  { %v4240_v50 = vadd.f32 %v4239_v17, %v4220_v43  ;;  %v4259_v59 = vpop.f32.mrf.mxu0 }
 0x651   :  { %v4260_v3 = vadd.f32 %v4259_v59, %v4156_v4  ;;  %v4491_v33 = vpop.f32.mrf.mxu1  ;;  %v5407_v4 = vld [vmem:[#allocation8 + $0x1b0] sm:$0xff]  ;;  %4794 = vmatpush.msra.mxu2 %v4602_v52  ;;  %4850 = vmatpush.msrb.mxu1 %v4683_v2  ;;  %v4640_v2 = vld [vmem:[#allocation8 + $0x138] sm:$0xff] }
 0x652   :  { %v5119_v38 = vmul.f32 -1.442695, %v4240_v50  ;;  %v4535_v18 = vadd.f32 %v4491_v33, %v231_v60  ;;  %4821 = vmatpush.msrb.mxu0 %v5407_v4  ;;  %v4679_v60 = vld [vmem:[#allocation8 + $0x270] sm:$0xff]  ;;  %v4680_v50 = vld [vmem:[#allocation8 + $0x278] sm:$0xff] }
 0x653   :  { %v4280_v47 = vadd.f32 %v4279_v54, %v4260_v3  ;;  %v4696_v54 = vld [vmem:[#allocation8 + $0x2f8] sm:$0xff]  ;;  %v5409_v3 = vld [vmem:[#allocation8 + $0x170] sm:$0xff]  ;;  %4859 = vmatpush.msrb.mxu2 %v4664_v21  ;;  %4851 = vmatpush.msrb.mxu1 %v4679_v60 }
 0x654   :  { %v5354_v44 = vpop.eup %5353  ;;  %5355 = vpow2.f32 %v5119_v38  ;;  %v5122_v7 = vmul.f32 -1.442695, %v4535_v18  ;;  %4887 = vmatpush.msrb.mxu3 %v4696_v54  ;;  %4822 = vmatpush.msrb.mxu0 %v5408_v34  ;;  %v4660_v33 = vld [vmem:[#allocation8 + $0x1d8] sm:$0xff]  ;;  %v5412_v54 = vld [vmem:[#allocation8 + $0x110] sm:$0xff] }
 0x655   :  { %v6729_v36 = vadd.f32 1.0, %v5354_v44  ;;  %v5120_v31 = vmul.f32 -1.442695, %v4280_v47  ;;  %4860 = vmatpush.msrb.mxu2 %v4660_v33  ;;  %v4656_v47 = vld [vmem:[#allocation8 + $0x1b8] sm:$0xff]  ;;  %4852 = vmatpush.msrb.mxu1 %v4675_v6  ;;  %v272_v33 = vadd.f32 %v5885_v26, %v5911_v42 }
 0x656   :  { %v4299_v1 = vpop.f32.mrf.mxu2  ;;  %4888 = vmatpush.msrb.mxu3 %v4692_v46  ;;  %4823 = vmatpush.msrb.mxu0 %v5409_v3  ;;  %v4672_v44 = vld [vmem:[#allocation8 + $0x238] sm:$0xff]  ;;  %v190_v46 = vadd.f32 %v6943_v14, %v5892_v11 }
 0x657   :  { %5357 = vrcp.f32 %v6729_v36  ;;  %v4300_v17 = vadd.f32 %v4299_v1, %v4157_v45  ;;  %4861 = vmatpush.msrb.mxu2 %v4656_v47  ;;  %v4345_v61 = vand.u32 2147483648, %v6729_v36  ;;  %4853 = vmatpush.msrb.mxu1 %v4671_v58  ;;  %vm4339_vm14 = vweird.f32 %v6729_v36  ;;  %v4636_v21 = vld [vmem:[#allocation8 + $0x118] sm:$0xff] }
 0x658   :  { %5359 = vpow2.f32 %v5120_v31  ;;  %4889 = vmatpush.msrb.mxu3 %v4688_v37  ;;  %4824 = vmatpush.msrb.mxu0 %v5410_v5  ;;  %v4343_v23 = vand.u32 2147483647, %v6729_v36  ;;  %v4644_v37 = vld [vmem:[#allocation8 + $0x158] sm:$0xff] }
 0x659   :  { %5361 = vpow2.f32 %v5122_v7  ;;  %v4320_v38 = vadd.f32 %v4319_v41, %v4300_v17  ;;  %v4667_v7 = vld [vmem:[#allocation8 + $0x210] sm:$0xff]  ;;  %4862 = vmatpush.msrb.mxu2 %v4652_v9  ;;  %v4346_v4 = vor.u32 1.1754944e-38, %v4345_v61  ;;  %v4628_v58 = vld [vmem:[#allocation8 + $0xd8] sm:$0xff] }
 0x65a   :  { %v5356_v10 = vpop.eup %5355  ;;  %4890 = vmatpush.msrb.mxu3 %v4684_v48  ;;  %4825 = vmatpush.msrb.mxu0 %v5411_v53  ;;  %vm4344_vm2 = vcmp.eq.f32.partialorder %v4343_v23, 8.507059e+37  ;;  %v5421_v14 = vld [vmem:[#allocation8 + $0x98] sm:$0xff] }
 0x65b   :  { %v6733_v16 = vadd.f32 1.0, %v5356_v10  ;;  %4854 = vmatpush.msrb.mxu1 %v4667_v7  ;;  %4863 = vmatpush.msrb.mxu2 %v4648_v13  ;;  %v4616_v13 = vld [vmem:[#allocation8 + $0x78] sm:$0xff] }
 0x65c   :  { %4891 = vmatpush.msrb.mxu3 %v4680_v50  ;;  %4826 = vmatpush.msrb.mxu0 %v5412_v54  ;;  %v4982_v7 = vld [vmem:[#allocation9 + $0x58] sm:$0xff] }
 0x65d   :  { %v6735_v24 = vpop.eup %5357  ;;  %5363 = vrcp.f32 %v6733_v16  ;;  %v4360_v10 = vand.u32 2147483648, %v6733_v16  ;;  %vm4354_vm1 = vweird.f32 %v6733_v16  ;;  %4864 = vmatpush.msrb.mxu2 %v4644_v37 }
 0x65e   :  { %v5360_v43 = vpop.eup %5359  ;;  %v4335_v12 = vmul.f32 %v6735_v24, %v6729_v36  ;;  %4892 = vmatpush.msrb.mxu3 %v4676_v30  ;;  %vm4340_vm13 = vweird.f32 %v6735_v24  ;;  %v4358_v36 = vand.u32 2147483647, %v6733_v16  ;;  %4827 = vmatpush.msrb.mxu0 %v5413_v22  ;;  %v5416_v30 = vld [vmem:[#allocation8 + $0x90] sm:$0xff] }
 0x65f   :  { %v6740_v0 = vadd.f32 1.0, %v5360_v43  ;;  %v5362_v59 = vpop.eup %5361  ;;  %vm6763_vm15 = vmor %vm4339_vm14, %vm4340_vm13  ;;  %4865 = vmatpush.msrb.mxu2 %v4640_v2 }
 0x660   :  { %v4336_v32 = vsub.f32 1.0, %v4335_v12  ;;  %v6746_v15 = vadd.f32 1.0, %v5362_v59  ;;  %4893 = vmatpush.msrb.mxu3 %v4672_v44  ;;  %v5414_v12 = vld [vmem:[#allocation8 + $0xd0] sm:$0xff]  ;;  %vm4359_vm4 = vcmp.eq.f32.partialorder %v4358_v36, 8.507059e+37  ;;  %v4531_v36 = vpop.f32.mrf.mxu3 }
 0x661   :  { %5365 = vrcp.f32 %v6740_v0  ;;  %4828 = vmatpush.msrb.mxu0 %v5414_v12  ;;  %v5415_v59 = vld [vmem:[#allocation8 + $0xb0] sm:$0xff]  ;;  %4866 = vmatpush.msrb.mxu2 %v4636_v21  ;;  %v4375_v26 = vand.u32 2147483648, %v6740_v0  ;;  %vm4369_vm6 = vweird.f32 %v6740_v0  ;;  %v4373_v9 = vand.u32 2147483647, %v6740_v0 }
 0x662   :  { %v4337_v18 = vmul.f32 %v6735_v24, %v4336_v32  ;;  %5367 = vtanh.f32 %v4320_v38  ;;  %4894 = vmatpush.msrb.mxu3 %v4668_v8  ;;  %v4632_v38 = vld [vmem:[#allocation8 + $0xf8] sm:$0xff]  ;;  %v5419_v8 = vld [vmem:[#allocation8 + $0x30] sm:$0xff]  ;;  %v4576_v2 = vand.u32 2147483648, %v6746_v15  ;;  %vm4570_vm10 = vweird.f32 %v6746_v15 }
 0x663   :  { %v6744_v27 = vpop.eup %5363  ;;  %5369 = vrcp.f32 %v6746_v15  ;;  %4829 = vmatpush.msrb.mxu0 %v5415_v59  ;;  %4867 = vmatpush.msrb.mxu2 %v4632_v38  ;;  %v4376_v54 = vor.u32 1.1754944e-38, %v4375_v26  ;;  %vm4374_vm8 = vcmp.eq.f32.partialorder %v4373_v9, 8.507059e+37  ;;  %v4984_v9 = vld [vmem:[#allocation9 + $0x68] sm:$0xff] }
 0x664   :  { %v4350_v28 = vmul.f32 %v6744_v27, %v6733_v16  ;;  %v4338_v31 = vadd.f32 %v6735_v24, %v4337_v18  ;;  %vm4355_vm0 = vweird.f32 %v6744_v27 }
 0x665   :  { %vm4356_vm3 = vmor %vm4354_vm1, %vm4355_vm0  ;;  %4830 = vmatpush.msrb.mxu0 %v5416_v30  ;;  %4868 = vmatpush.msrb.mxu2 %v4628_v58 }
 0x666   :  { %v4351_v19 = vsub.f32 1.0, %v4350_v28  ;;  %v4342_v1 = vsel %vm6763_vm15, %v6735_v24, %v4338_v31  ;;  %v4361_v24 = vor.u32 1.1754944e-38, %v4360_v10  ;;  %v4624_v31 = vld [vmem:[#allocation8 + $0xb8] sm:$0xff] }
 0x667   :  { %v6755_v55 = vpop.eup %5365  ;;  %v4347_v17 = vsel %vm4344_vm2, %v4346_v4, %v4342_v1  ;;  %4869 = vmatpush.msrb.mxu2 %v4624_v31  ;;  %v313_v1 = vadd.f32 %v5934_v25, %v5942_v57  ;;  %v4574_v25 = vand.u32 2147483647, %v6746_v15 }
 0x668   :  { %v4352_v62 = vmul.f32 %v6744_v27, %v4351_v19  ;;  %v4365_v11 = vmul.f32 %v6755_v55, %v6740_v0  ;;  %v4471_v29 = vpop.f32.mrf.mxu0  ;;  %v5368_v60 = vpop.eup %5367  ;;  %vm4370_vm5 = vweird.f32 %v6755_v55  ;;  %v5420_v0 = vld [vmem:[#allocation8 + $0x10] sm:$0xff] }
 0x669   :  { %v4534_v52 = vadd.f32 %v4471_v29, %v190_v46  ;;  %v6780_v16 = vpop.eup %5369  ;;  %v4381_v6 = vmul.f32 %v5368_v60, %v4347_v17  ;;  %vm6798_vm7 = vmor %vm4369_vm6, %vm4370_vm5  ;;  %4870 = vmatpush.msrb.mxu2 %v5421_v14  ;;  %v4537_v37 = vadd.f32 %v4531_v36, %v313_v1  ;;  %v4577_v60 = vor.u32 1.1754944e-38, %v4576_v2  ;;  %v4975_v14 = vld [vmem:[#allocation9 + $0x20] sm:$0xff] }
 0x66a   :  { %v4366_v48 = vsub.f32 1.0, %v4365_v11  ;;  %v4353_v43 = vadd.f32 %v6744_v27, %v4352_v62  ;;  %v4566_v44 = vmul.f32 %v6780_v16, %v6746_v15  ;;  %v4612_v11 = vld [vmem:[#allocation8 + $0x58] sm:$0xff]  ;;  %vm4571_vm9 = vweird.f32 %v6780_v16  ;;  %v4971_v36 = vld [vmem:[#allocation9] sm:$0xff] }
 0x66b   :  { %v5121_v34 = vmul.f32 -1.442695, %v4534_v52  ;;  %4871 = vmatpush.msrb.mxu2 %v4616_v13  ;;  %vm6819_vm11 = vmor %vm4570_vm10, %vm4571_vm9  ;;  %vm4575_vm13 = vcmp.eq.f32.partialorder %v4574_v25, 8.507059e+37  ;;  %v4976_v13 = vld [vmem:[#allocation9 + $0x28] sm:$0xff] }
 0x66c   :  { %v4357_v50 = vsel %vm4356_vm3, %v6744_v27, %v4353_v43  ;;  %v4367_v32 = vmul.f32 %v6755_v55, %v4366_v48  ;;  %v5417_v27 = vld [vmem:[#allocation8 + $0x70] sm:$0xff]  ;;  %v4567_v19 = vsub.f32 1.0, %v4566_v44  ;;  %v5422_v48 = vld [vmem:[#allocation8 + $0x38] sm:$0xff] }
 0x66d   :  { %v4362_v3 = vsel %vm4359_vm4, %v4361_v24, %v4357_v50  ;;  %5371 = vpow2.f32 %v5121_v34  ;;  %4831 = vmatpush.msrb.mxu0 %v5417_v27  ;;  %4872 = vmatpush.msrb.mxu2 %v4612_v11  ;;  %v5423_v24 = vld [vmem:[#allocation8 + $0x18] sm:$0xff]  ;;  %v4729_v11 = vld [vmem:[%s6891_s5] sm:$0xf] }
 0x66e   :  { %v4380_v41 = vmul.f32 %v4362_v3, %v6656_v20  ;;  %v4368_v28 = vadd.f32 %v6755_v55, %v4367_v32  ;;  %v5418_v20 = vld [vmem:[#allocation8 + $0x50] sm:$0xff]  ;;  %v4568_v45 = vmul.f32 %v6780_v16, %v4567_v19  ;;  %v4980_v19 = vld [vmem:[#allocation9 + $0x48] sm:$0xff] }
 0x66f   :  { %v4511_v18 = vpop.f32.mrf.mxu2  ;;  %4832 = vmatpush.msrb.mxu0 %v5418_v20  ;;  %4873 = vmatpush.msrb.mxu2 %v5422_v48 }
 0x670   :  { %v6786_v5 = vadd.f32 %v4381_v6, %v4380_v41  ;;  %v4536_v47 = vadd.f32 %v4511_v18, %v272_v33  ;;  %v4372_v23 = vsel %vm6798_vm7, %v6755_v55, %v4368_v28  ;;  %v4569_v4 = vadd.f32 %v6780_v16, %v4568_v45  ;;  %v4972_v45 = vld [vmem:[#allocation9 + $0x8] sm:$0xff] }
 0x671   :  { %4833 = vmatpush.msrb.mxu0 %v5419_v8  ;;  %v4377_v10 = vsel %vm4374_vm8, %v4376_v54, %v4372_v23  ;;  %4874 = vmatpush.msrb.mxu2 %v5423_v24  ;;  %v4981_v8 = vld [vmem:[#allocation9 + $0x50] sm:$0xff]  ;;  %v4979_v23 = vld [vmem:[#allocation9 + $0x40] sm:$0xff]  ;;  %v4978_v54 = vld [vmem:[#allocation9 + $0x38] sm:$0xff] }
 0x672   :  { %5373 = vtanh.f32 %v6786_v5  ;;  %v5123_v42 = vmul.f32 -1.442695, %v4536_v47  ;;  %v4573_v17 = vsel %vm6819_vm11, %v6780_v16, %v4569_v4 }
 0x673   :  { %v5372_v53 = vpop.eup %5371  ;;  %4834 = vmatpush.msrb.mxu0 %v5420_v0  ;;  %v4578_v59 = vsel %vm4575_vm13, %v4577_v60, %v4573_v17  ;;  %v4977_v0 = vld [vmem:[#allocation9 + $0x30] sm:$0xff] }
 0x674   :  { %v6796_v61 = vadd.f32 1.0, %v5372_v53  ;;  %5375 = vpow2.f32 %v5123_v42  ;;  %v4596_v30 = vmul.f32 %v4578_v59, %v6703_v51  ;;  %v4986_v53 = vld [vmem:[#allocation9 + $0x78] sm:$0xff]  ;;  %v4985_v51 = vld [vmem:[#allocation9 + $0x70] sm:$0xff] }
 0x676   :  { %5377 = vrcp.f32 %v6796_v61  ;;  %v4561_v12 = vand.u32 2147483648, %v6796_v61  ;;  %v4559_v21 = vand.u32 2147483647, %v6796_v61  ;;  %vm4555_vm14 = vweird.f32 %v6796_v61 }
 0x678   :  { %v5374_v46 = vpop.eup %5373  ;;  %v4562_v32 = vor.u32 1.1754944e-38, %v4561_v12  ;;  %vm4560_vm0 = vcmp.eq.f32.partialorder %v4559_v21, 8.507059e+37 }
 0x679   :  { %v6807_v62 = vmul.f32 %v5374_v46, %v4377_v10  ;;  %v4974_v46 = vld [vmem:[#allocation9 + $0x18] sm:$0xff]  ;;  %v4973_v10 = vld [vmem:[#allocation9 + $0x10] sm:$0xff] }
 0x67a   :  { %v5376_v55 = vpop.eup %5375 }
 0x67b   :  { %v4549_v29 = vadd.f32 1.0, %v5376_v55  ;;  %4775 = vmatmul.f32.vlgmr.msra.gmra.mxu1 %v6807_v62  ;;  %4815 = vmatmul.f32.vlgmr.msra.gmra.mxu3 %v6807_v62  ;;  %v4731_v55 = vperm.slane %v4729_v11, 0 }
 0x67c   :  { %v5378_v22 = vpop.eup %5377 }
 0x67d   :  { %v4551_v52 = vmul.f32 %v5378_v22, %v6796_v61  ;;  %5379 = vrcp.f32 %v4549_v29  ;;  %vm4556_vm12 = vweird.f32 %v5378_v22  ;;  %v4591_v58 = vand.u32 2147483648, %v4549_v29  ;;  %v4983_v61 = vld [vmem:[#allocation9 + $0x60] sm:$0xff] }
 0x67e   :  { %5381 = vtanh.f32 %v4537_v37  ;;  %vm4557_vm15 = vmor %vm4555_vm14, %vm4556_vm12  ;;  %vm4585_vm2 = vweird.f32 %v4549_v29  ;;  %v4589_v44 = vand.u32 2147483647, %v4549_v29 }
 0x67f   :  { %v4552_v57 = vsub.f32 1.0, %v4551_v52  ;;  %v4592_v26 = vor.u32 1.1754944e-38, %v4591_v58 }
 0x680   :  { %vm4590_vm4 = vcmp.eq.f32.partialorder %v4589_v44, 8.507059e+37 }
 0x681   :  { %v4553_v34 = vmul.f32 %v5378_v22, %v4552_v57 }
 0x683   :  { %v5380_v15 = vpop.eup %5379  ;;  %v4554_v50 = vadd.f32 %v5378_v22, %v4553_v34  ;;  %4855 = vmatmul.f32.vlgmr.msrb.gmra.mxu1 %v6807_v62  ;;  %4895 = vmatmul.f32.vlgmr.msrb.gmra.mxu3 %v6807_v62  ;;  %v4734_v34 = vperm.slane %v4729_v11, 3 }
 0x684   :  { %v4581_v3 = vmul.f32 %v5380_v15, %v4549_v29  ;;  %v5382_v16 = vpop.eup %5381  ;;  %vm4586_vm1 = vweird.f32 %v5380_v15 }
 0x685   :  { %v4558_v33 = vsel %vm4557_vm15, %v5378_v22, %v4554_v50  ;;  %vm4587_vm3 = vmor %vm4585_vm2, %vm4586_vm1 }
 0x686   :  { %v4563_v41 = vsel %vm4560_vm0, %v4562_v32, %v4558_v33  ;;  %v4582_v6 = vsub.f32 1.0, %v4581_v3 }
 0x687   :  { %v4597_v38 = vmul.f32 %v5382_v16, %v4563_v41 }
 0x688   :  { %v4583_v18 = vmul.f32 %v5380_v15, %v4582_v6 }
 0x689   :  { %v4598_v47 = vadd.f32 %v4597_v38, %v4596_v30 }
 0x68a   :  { %v4584_v27 = vadd.f32 %v5380_v15, %v4583_v18  ;;  %v6845_v18 = vld [vmem:[%s6893_s7] ss:$0 sm:$0xff] }
 0x68b   :  { %5383 = vtanh.f32 %v4598_v47 }
 0x68c   :  { %v4588_v28 = vsel %vm4587_vm3, %v5380_v15, %v4584_v27 }
 0x68d   :  { %v4593_v20 = vsel %vm4590_vm4, %v4592_v26, %v4588_v28 }
 0x691   :  { %v5384_v42 = vpop.eup %5383 }
 0x692   :  { %v4600_v31 = vmul.f32 %v5384_v42, %v4593_v20 }
 0x694   :  { %4755 = vmatmul.f32.vlgmr.msra.gmra.mxu0 %v4600_v31  ;;  %4795 = vmatmul.f32.vlgmr.msra.gmra.mxu2 %v4600_v31 }
 0x695   :  { %4991 = vmatpush.msra.mxu0 %v4986_v53 }
 0x697   :  { %4992 = vmatpush.msra.mxu0 %v4985_v51 }
 0x699   :  { %4993 = vmatpush.msra.mxu0 %v4984_v9 }
 0x69b   :  { %4994 = vmatpush.msra.mxu0 %v4983_v61 }
 0x69c   :  { %4835 = vmatmul.f32.vlgmr.msrb.gmra.mxu0 %v4600_v31  ;;  %4875 = vmatmul.f32.vlgmr.msrb.gmra.mxu2 %v4600_v31 }
 0x69d   :  { %4995 = vmatpush.msra.mxu0 %v4982_v7 }
 0x69f   :  { %4996 = vmatpush.msra.mxu0 %v4981_v8 }
 0x6a1   :  { %4997 = vmatpush.msra.mxu0 %v4980_v19 }
 0x6a3   :  { %4998 = vmatpush.msra.mxu0 %v4979_v23 }
 0x6a5   :  { %4999 = vmatpush.msra.mxu0 %v4978_v54 }
 0x6a7   :  { %5000 = vmatpush.msra.mxu0 %v4977_v0 }
 0x6a9   :  { %5001 = vmatpush.msra.mxu0 %v4976_v13 }
 0x6ab   :  { %5002 = vmatpush.msra.mxu0 %v4975_v14 }
 0x6ad   :  { %5003 = vmatpush.msra.mxu0 %v4974_v46 }
 0x6af   :  { %5004 = vmatpush.msra.mxu0 %v4973_v10 }
 0x6b1   :  { %5005 = vmatpush.msra.mxu0 %v4972_v45 }
 0x6b3   :  { %5006 = vmatpush.msra.mxu0 %v4971_v36 }
 0x6b4   :  { %5007 = vmatmul.f32.vlgmr.msra.gmra.mxu0 %v6066_v49 }
 0x6bc   :  { %5010 = vmatmul.f32.gmra.mxu0 %v6185_v35  ;;  %v4732_v35 = vperm.slane %v4729_v11, 1 }
 0x6c4   :  { %5013 = vmatmul.f32.gmra.mxu0 %v6307_v39  ;;  %v4733_v39 = vperm.slane %v4729_v11, 2 }
 0x6cc   :  { %5016 = vmatmul.f32.gmra.mxu0 %v6429_v40 }
 0x6d4   :  { %5019 = vmatmul.f32.gmra.mxu0 %v6551_v63 }
 0x6dc   :  { %5022 = vmatmul.f32.gmra.mxu0 %v6673_v56 }
 0x6e4   :  { %5025 = vmatmul.f32.gmra.mxu0 %v6807_v62 }
 0x6f8   :  { %v4776_v1 = vpop.f32.mrf.mxu1 }
 0x6fe   :  { %v4816_v63 = vpop.f32.mrf.mxu3 }
 0x700   :  { %v4856_v62 = vpop.f32.mrf.mxu1 }
 0x706   :  { %v4896_v33 = vpop.f32.mrf.mxu3 }
 0x711   :  { %v4756_v29 = vpop.f32.mrf.mxu0 }
 0x712   :  { %v4757_v49 = vadd.f32 %v4756_v29, %v4731_v55 }
 0x714   :  { %v4777_v22 = vadd.f32 %v4776_v1, %v4757_v49 }
 0x716   :  { %v5124_v37 = vmul.f32 -1.442695, %v4777_v22 }
 0x717   :  { %v4796_v4 = vpop.f32.mrf.mxu2 }
 0x718   :  { %5385 = vpow2.f32 %v5124_v37  ;;  %v4797_v40 = vadd.f32 %v4796_v4, %v4732_v35 }
 0x719   :  { %v4836_v52 = vpop.f32.mrf.mxu0 }
 0x71a   :  { %v4817_v56 = vadd.f32 %v4816_v63, %v4797_v40  ;;  %v4837_v2 = vadd.f32 %v4836_v52, %v4733_v39 }
 0x71c   :  { %v5125_v48 = vmul.f32 -1.442695, %v4817_v56  ;;  %v4857_v25 = vadd.f32 %v4856_v62, %v4837_v2 }
 0x71e   :  { %v5386_v57 = vpop.eup %5385  ;;  %5387 = vpow2.f32 %v5125_v48  ;;  %v5126_v43 = vmul.f32 -1.442695, %v4857_v25 }
 0x71f   :  { %v4908_v12 = vadd.f32 1.0, %v5386_v57  ;;  %v4876_v60 = vpop.f32.mrf.mxu2 }
 0x720   :  { %5389 = vpow2.f32 %v5126_v43  ;;  %v4877_v32 = vadd.f32 %v4876_v60, %v4734_v34 }
 0x721   :  { %5391 = vrcp.f32 %v4908_v12  ;;  %v4922_v27 = vand.u32 2147483648, %v4908_v12  ;;  %vm4916_vm6 = vweird.f32 %v4908_v12  ;;  %v4920_v44 = vand.u32 2147483647, %v4908_v12 }
 0x722   :  { %v4897_v6 = vadd.f32 %v4896_v33, %v4877_v32 }
 0x723   :  { %v4923_v61 = vor.u32 1.1754944e-38, %v4922_v27  ;;  %vm4921_vm10 = vcmp.eq.f32.partialorder %v4920_v44, 8.507059e+37 }
 0x724   :  { %v5388_v24 = vpop.eup %5387 }
 0x725   :  { %v4909_v17 = vadd.f32 1.0, %v5388_v24 }
 0x726   :  { %v5390_v21 = vpop.eup %5389 }
 0x727   :  { %v5392_v15 = vpop.eup %5391  ;;  %5393 = vrcp.f32 %v4909_v17  ;;  %v4910_v50 = vadd.f32 1.0, %v5390_v21  ;;  %v4937_v26 = vand.u32 2147483648, %v4909_v17  ;;  %v4935_v31 = vand.u32 2147483647, %v4909_v17 }
 0x728   :  { %v4912_v59 = vmul.f32 %v5392_v15, %v4908_v12  ;;  %vm4917_vm5 = vweird.f32 %v5392_v15  ;;  %vm4931_vm9 = vweird.f32 %v4909_v17 }
 0x729   :  { %5395 = vrcp.f32 %v4910_v50  ;;  %vm6847_vm7 = vmor %vm4916_vm6, %vm4917_vm5  ;;  %v4938_v19 = vor.u32 1.1754944e-38, %v4937_v26  ;;  %vm4936_vm12 = vcmp.eq.f32.partialorder %v4935_v31, 8.507059e+37  ;;  %v4952_v1 = vand.u32 2147483648, %v4910_v50 }
 0x72a   :  { %v4913_v3 = vsub.f32 1.0, %v4912_v59  ;;  %5397 = vtanh.f32 %v4897_v6  ;;  %vm4946_vm14 = vweird.f32 %v4910_v50  ;;  %v4950_v29 = vand.u32 2147483647, %v4910_v50 }
 0x72b   :  { %v4953_v22 = vor.u32 1.1754944e-38, %v4952_v1 }
 0x72c   :  { %v4914_v16 = vmul.f32 %v5392_v15, %v4913_v3  ;;  %vm4951_vm0 = vcmp.eq.f32.partialorder %v4950_v29, 8.507059e+37 }
 0x72d   :  { %v5394_v41 = vpop.eup %5393 }
 0x72e   :  { %v4927_v30 = vmul.f32 %v5394_v41, %v4909_v17  ;;  %v4915_v38 = vadd.f32 %v5392_v15, %v4914_v16  ;;  %vm4932_vm8 = vweird.f32 %v5394_v41 }
 0x72f   :  { %v5396_v47 = vpop.eup %5395  ;;  %vm4933_vm11 = vmor %vm4931_vm9, %vm4932_vm8 }
 0x730   :  { %v4928_v58 = vsub.f32 1.0, %v4927_v30  ;;  %v4942_v28 = vmul.f32 %v5396_v47, %v4910_v50  ;;  %v4919_v51 = vsel %vm6847_vm7, %v5392_v15, %v4915_v38  ;;  %v5398_v0 = vpop.eup %5397  ;;  %vm4947_vm13 = vweird.f32 %v5396_v47 }
 0x731   :  { %v5008_v20 = vpop.f32.mrf.mxu0  ;;  %v4924_v23 = vsel %vm4921_vm10, %v4923_v61, %v4919_v51  ;;  %vm4948_vm15 = vmor %vm4946_vm14, %vm4947_vm13 }
 0x732   :  { %v4929_v53 = vmul.f32 %v5394_v41, %v4928_v58  ;;  %v5009_v9 = vadd.f32 %v6845_v18, %v5008_v20  ;;  %v4943_v7 = vsub.f32 1.0, %v4942_v28  ;;  %v4958_v46 = vmul.f32 %v5398_v0, %v4924_v23 }
 0x734   :  { %5032 = vst [vmem:[%s6894_s8] sm:$0xff] %v5009_v9  ;;  %v4930_v8 = vadd.f32 %v5394_v41, %v4929_v53  ;;  %v4944_v14 = vmul.f32 %v5396_v47, %v4943_v7 }
 0x736   :  { %v4934_v54 = vsel %vm4933_vm11, %v5394_v41, %v4930_v8  ;;  %v4945_v55 = vadd.f32 %v5396_v47, %v4944_v14 }
 0x737   :  { %v4939_v13 = vsel %vm4936_vm12, %v4938_v19, %v4934_v54 }
 0x738   :  { %v4957_v10 = vmul.f32 %v4939_v13, %v6786_v5  ;;  %v4949_v49 = vsel %vm4948_vm15, %v5396_v47, %v4945_v55 }
 0x739   :  { %v5011_v45 = vpop.f32.mrf.mxu0  ;;  %v4954_v39 = vsel %vm4951_vm0, %v4953_v22, %v4949_v49 }
 0x73a   :  { %v5012_v36 = vadd.f32 %v6845_v18, %v5011_v45  ;;  %v4959_v11 = vadd.f32 %v4958_v46, %v4957_v10 }
 0x73c   :  { %5033 = vst [vmem:[%s6894_s8 + $0x8] sm:$0xff] %v5012_v36  ;;  %5399 = vtanh.f32 %v4959_v11 }
 0x741   :  { %v5014_v35 = vpop.f32.mrf.mxu0 }
 0x742   :  { %v5400_v5 = vpop.eup %5399  ;;  %v5015_v37 = vadd.f32 %v6845_v18, %v5014_v35 }
 0x743   :  { %v4961_v4 = vmul.f32 %v5400_v5, %v4954_v39 }
 0x744   :  { %5034 = vst [vmem:[%s6894_s8 + $0x10] sm:$0xff] %v5015_v37 }
 0x745   :  { %5028 = vmatmul.f32.gmra.mxu0 %v4961_v4 }
 0x749   :  { %v5017_v40 = vpop.f32.mrf.mxu0 }
 0x74a   :  { %v5018_v63 = vadd.f32 %v6845_v18, %v5017_v40 }
 0x74c   :  { %5035 = vst [vmem:[%s6894_s8 + $0x18] sm:$0xff] %v5018_v63 }
 0x751   :  { %v5020_v52 = vpop.f32.mrf.mxu0 }
 0x752   :  { %v5021_v56 = vadd.f32 %v6845_v18, %v5020_v52 }
 0x754   :  { %5036 = vst [vmem:[%s6894_s8 + $0x20] sm:$0xff] %v5021_v56 }
 0x759   :  { %v5023_v2 = vpop.f32.mrf.mxu0 }
 0x75a   :  { %v5024_v62 = vadd.f32 %v6845_v18, %v5023_v2 }
 0x75c   :  { %5037 = vst [vmem:[%s6894_s8 + $0x28] sm:$0xff] %v5024_v62 }
 0x761   :  { %v5026_v48 = vpop.f32.mrf.mxu0 }
 0x762   :  { %v5027_v25 = vadd.f32 %v6845_v18, %v5026_v48 }
 0x764   :  { %5038 = vst [vmem:[%s6894_s8 + $0x30] sm:$0xff] %v5027_v25 }
 0x7c2   :  { %v5029_v57 = vpop.f32.mrf.mxu0 }
 0x7c3   :  { %v5030_v43 = vadd.f32 %v6845_v18, %v5029_v57 }
 0x7c5   :  { %5039 = vst [vmem:[%s6894_s8 + $0x38] sm:$0xff] %v5030_v43 }
 0x7c6   :  { %5044 = vsyncpa [#allocation5], 1 }
 0x7c7   :  { %5045 = vsyncpa [#allocation7], 1 }
 0x7c8   :  { %5046 = vsyncpa [#allocation10], 1 }

</bundles_post_ra>
